<compile_context>
chip_gen: v6e
topology: v6e:2x2x1
jax: 0.10.0
libtpu: 0.0.40
codegen_flags: <defaults>
</compile_context>

<pallas_src>
import jax
import jax.numpy as jnp
from jax.experimental import pallas as pl
from jax.experimental.pallas import tpu as pltpu


# ----------------------------------------------------------------------------
# Pallas kernels
# ----------------------------------------------------------------------------
def _matmul_bias_relu_kernel(x_ref, w_ref, b_ref, o_ref):
    # y = relu(x @ w + b), bf16 inputs, f32 accumulation.
    y = jnp.dot(x_ref[...], w_ref[...], preferred_element_type=jnp.float32)
    y = jnp.maximum(y + b_ref[...], 0.0)
    o_ref[...] = y.astype(o_ref.dtype)


def matmul_bias_relu(x, w, b, out_dtype=jnp.bfloat16):
    """x: (M, K) bf16, w: (K, N) bf16, b: (1, N) f32 -> (M, N) out_dtype."""
    M, K = x.shape
    K2, N = w.shape
    assert K == K2, (K, K2)
    return pl.pallas_call(
        _matmul_bias_relu_kernel,
        out_shape=jax.ShapeDtypeStruct((M, N), out_dtype),
        in_specs=[
            pl.BlockSpec(memory_space=pltpu.MemorySpace.VMEM),
            pl.BlockSpec(memory_space=pltpu.MemorySpace.VMEM),
            pl.BlockSpec(memory_space=pltpu.MemorySpace.VMEM),
        ],
        out_specs=pl.BlockSpec(memory_space=pltpu.MemorySpace.VMEM),
    )(x, w, b)


def _mlp_head_kernel(x_ref, w1_ref, b1_ref, w2_ref, b2_ref, o_ref):
    # Fused fc1 (ReLU) + fc2; the hidden activation stays in VMEM/registers.
    h = jnp.dot(x_ref[...], w1_ref[...], preferred_element_type=jnp.float32)
    h = jnp.maximum(h + b1_ref[...], 0.0).astype(jnp.bfloat16)
    y = jnp.dot(h, w2_ref[...], preferred_element_type=jnp.float32)
    o_ref[...] = (y + b2_ref[...]).astype(o_ref.dtype)


def mlp_head(x, w1, b1, w2, b2):
    """x: (M, 3840) bf16 -> (M, 2) f32; fc1+fc2 in one kernel launch."""
    M = x.shape[0]
    N = w2.shape[1]
    return pl.pallas_call(
        _mlp_head_kernel,
        out_shape=jax.ShapeDtypeStruct((M, N), jnp.float32),
        in_specs=[pl.BlockSpec(memory_space=pltpu.MemorySpace.VMEM)] * 5,
        out_specs=pl.BlockSpec(memory_space=pltpu.MemorySpace.VMEM),
    )(x, w1, b1, w2, b2)


# ----------------------------------------------------------------------------
# im2col glue (NHWC -> (N*OH*OW, KH*KW*IC)), plain JAX, stays in bf16
# ----------------------------------------------------------------------------
def _im2col(x, kh, kw, sh, sw):
    n, h, w, c = x.shape
    oh = (h - kh) // sh + 1
    ow = (w - kw) // sw + 1
    patches = []
    for i in range(kh):
        for j in range(kw):
            patches.append(x[:, i:i + sh * oh:sh, j:j + sw * ow:sw, :])
    cols = jnp.stack(patches, axis=3)               # (N, OH, OW, KH*KW, C)
    return cols.reshape(n * oh * ow, kh * kw * c), oh, ow


# ----------------------------------------------------------------------------
# Parameter init (PyTorch layouts) + one-time prepare step (kernel layouts)
# ----------------------------------------------------------------------------
def init_params(key):
    def uni(k, shape, fan_in):
        bound = 1.0 / jnp.sqrt(fan_in)
        return jax.random.uniform(k, shape, jnp.float32, -bound, bound)

    ks = jax.random.split(key, 10)
    return {
        "conv1_w": uni(ks[0], (32, 1, 8, 8), 1 * 8 * 8),
        "conv1_b": uni(ks[1], (32,), 1 * 8 * 8),
        "conv2_w": uni(ks[2], (64, 32, 4, 4), 32 * 4 * 4),
        "conv2_b": uni(ks[3], (64,), 32 * 4 * 4),
        "conv3_w": uni(ks[4], (64, 64, 3, 3), 64 * 3 * 3),
        "conv3_b": uni(ks[5], (64,), 64 * 3 * 3),
        "fc1_w": uni(ks[6], (512, 3840), 3840),   # torch (out, in)
        "fc1_b": uni(ks[7], (512,), 3840),
        "fc2_w": uni(ks[8], (2, 512), 512),
        "fc2_b": uni(ks[9], (2,), 512),
    }


def prepare_params(params):
    """One-time weight re-layout (runs outside the forward pass)."""
    def conv_w(w):
        # PyTorch (OC, IC, KH, KW) -> (KH*KW*IC, OC), matching _im2col K order.
        oc, ic, kh, kw = w.shape
        return jnp.transpose(w, (2, 3, 1, 0)).reshape(kh * kw * ic, oc).astype(
            jnp.bfloat16)

    def bias(b):
        return b.reshape(1, -1).astype(jnp.float32)

    # fc1: torch weight is (512, 3840) with input index c*60 + h*6 + w
    # (NCHW flatten of the (64, 10, 6) conv3 output).  Permute its input axis
    # to the NHWC flatten order (h*6 + w)*64 + c and transpose to (3840, 512)
    # so the forward pass needs neither a weight transpose nor an activation
    # permute.
    w1 = params["fc1_w"].reshape(512, 64, 10, 6)
    w1 = jnp.transpose(w1, (2, 3, 1, 0)).reshape(3840, 512).astype(jnp.bfloat16)

    return {
        "conv1_w": conv_w(params["conv1_w"]), "conv1_b": bias(params["conv1_b"]),
        "conv2_w": conv_w(params["conv2_w"]), "conv2_b": bias(params["conv2_b"]),
        "conv3_w": conv_w(params["conv3_w"]), "conv3_b": bias(params["conv3_b"]),
        "fc1_w": w1, "fc1_b": bias(params["fc1_b"]),
        "fc2_w": params["fc2_w"].T.astype(jnp.bfloat16),
        "fc2_b": bias(params["fc2_b"]),
    }


# ----------------------------------------------------------------------------
# Forward pass (mirrors DQN.forward)
# ----------------------------------------------------------------------------
@jax.jit
def dqn_forward(prep, state_nchw):
    n, ic, h, w = state_nchw.shape
    assert ic == 1
    # NCHW with C==1 -> NHWC is a pure reshape (no data movement).
    x = state_nchw.reshape(n, h, w, 1).astype(jnp.bfloat16)

    # conv1 (8x8, stride 4) + ReLU
    cols, oh, ow = _im2col(x, 8, 8, 4, 4)
    x = matmul_bias_relu(cols, prep["conv1_w"], prep["conv1_b"]).reshape(
        n, oh, ow, 32)

    # conv2 (4x4, stride 2) + ReLU
    cols, oh, ow = _im2col(x, 4, 4, 2, 2)
    x = matmul_bias_relu(cols, prep["conv2_w"], prep["conv2_b"]).reshape(
        n, oh, ow, 64)

    # conv3 (3x3, stride 1) + ReLU
    cols, oh, ow = _im2col(x, 3, 3, 1, 1)
    x = matmul_bias_relu(cols, prep["conv3_w"], prep["conv3_b"])

    # NHWC flatten; fc1's weight rows were pre-permuted to this order.
    x = x.reshape(n, oh * ow * 64)

    # Fused fc1 (ReLU) + fc2, single kernel launch, f32 output.
    return mlp_head(x, prep["fc1_w"], prep["fc1_b"],
                    prep["fc2_w"], prep["fc2_b"])


# ----------------------------------------------------------------------------
# Pure-JAX f32 reference (torch semantics) for a sanity check
# ----------------------------------------------------------------------------
def reference_forward(params, state):
    def conv(x, w, b, s):
        y = jax.lax.conv_general_dilated(
            x, w, window_strides=(s, s), padding="VALID",
            dimension_numbers=("NCHW", "OIHW", "NCHW"))
        return jax.nn.relu(y + b[None, :, None, None])

    x = conv(state, params["conv1_w"], params["conv1_b"], 4)
    x = conv(x, params["conv2_w"], params["conv2_b"], 2)
    x = conv(x, params["conv3_w"], params["conv3_b"], 1)
    x = x.reshape(x.shape[0], -1)                      # NCHW flatten -> 3840
    x = jax.nn.relu(x @ params["fc1_w"].T + params["fc1_b"])
    return x @ params["fc2_w"].T + params["fc2_b"]


if __name__ == "__main__":
    key = jax.random.PRNGKey(0)
    pkey, xkey = jax.random.split(key)
    params = init_params(pkey)
    prep = prepare_params(params)          # one-time weight re-layout

    # Input spatial size 108x76 is implied by fc1's 3840 = 64 * 10 * 6 after
    # the three strided convs.  Batch = 2, single channel (NCHW like PyTorch).
    state = jax.random.normal(xkey, (2, 1, 108, 76), dtype=jnp.float32)

    q_values = dqn_forward(prep, state)
    jax.block_until_ready(q_values)
    assert q_values.shape == (2, 2) and q_values.dtype == jnp.float32

    ref = reference_forward(params, state)
    max_err = float(jnp.max(jnp.abs(q_values - ref)))
    assert jnp.isfinite(q_values).all()
    assert max_err < 5e-2, f"mismatch vs reference: {max_err}"

    print("KERNEL_OK")
</pallas_src>

<mosaic_0001>
module attributes {stable_mosaic.version = 11 : i64} {
  func.func @_matmul_bias_relu_kernel(%arg0: memref<936x64xbf16, #tpu.memory_space<vmem>>, %arg1: memref<64x32xbf16, #tpu.memory_space<vmem>>, %arg2: memref<1x32xf32, #tpu.memory_space<vmem>>, %arg3: memref<936x32xbf16, #tpu.memory_space<vmem>>) attributes {dimension_semantics = [], scalar_prefetch = 0 : i64, scratch_operands = 0 : i64, tpu.core_type = #tpu.core_type<tc>} {
    %c0 = arith.constant 0 : index
    %c0_0 = arith.constant 0 : index
    %0 = vector.load %arg0[%c0, %c0_0] : memref<936x64xbf16, #tpu.memory_space<vmem>>, vector<936x64xbf16>
    %c0_1 = arith.constant 0 : index
    %c0_2 = arith.constant 0 : index
    %1 = vector.load %arg1[%c0_1, %c0_2] : memref<64x32xbf16, #tpu.memory_space<vmem>>, vector<64x32xbf16>
    %cst = arith.constant dense<0.000000e+00> : vector<936x32xf32>
    %2 = tpu.matmul %0, %1, %cst {dimension_numbers = #tpu.dot_dimension_numbers<[1], [0], [0], [1], [0, 0, 1, 1], [], []>} : vector<936x64xbf16>, vector<64x32xbf16>, vector<936x32xf32> -> vector<936x32xf32>
    %c0_3 = arith.constant 0 : index
    %c0_4 = arith.constant 0 : index
    %3 = vector.load %arg2[%c0_3, %c0_4] : memref<1x32xf32, #tpu.memory_space<vmem>>, vector<1x32xf32>
    %4 = vector.broadcast %3 : vector<1x32xf32> to vector<936x32xf32>
    %5 = arith.addf %2, %4 : vector<936x32xf32>
    %cst_5 = arith.constant 0.000000e+00 : f32
    %6 = vector.broadcast %cst_5 : f32 to vector<936x32xf32>
    %7 = arith.maximumf %5, %6 : vector<936x32xf32>
    %8 = arith.truncf %7 : vector<936x32xf32> to vector<936x32xbf16>
    %c0_6 = arith.constant 0 : index
    %c0_7 = arith.constant 0 : index
    %9 = vector.load %arg3[%c0_6, %c0_7] : memref<936x32xbf16, #tpu.memory_space<vmem>>, vector<936x32xbf16>
    tpu.vector_store %arg3[%c0_6, %c0_7], %8 {strides = array<i32>} : memref<936x32xbf16, #tpu.memory_space<vmem>>, vector<936x32xbf16>,
    return
  }
}

module attributes {stable_mosaic.version = 11 : i64} {
  func.func @_matmul_bias_relu_kernel(%arg0: memref<192x512xbf16, #tpu.memory_space<vmem>>, %arg1: memref<512x64xbf16, #tpu.memory_space<vmem>>, %arg2: memref<1x64xf32, #tpu.memory_space<vmem>>, %arg3: memref<192x64xbf16, #tpu.memory_space<vmem>>) attributes {dimension_semantics = [], scalar_prefetch = 0 : i64, scratch_operands = 0 : i64, tpu.core_type = #tpu.core_type<tc>} {
    %c0 = arith.constant 0 : index
    %c0_0 = arith.constant 0 : index
    %0 = vector.load %arg0[%c0, %c0_0] : memref<192x512xbf16, #tpu.memory_space<vmem>>, vector<192x512xbf16>
    %c0_1 = arith.constant 0 : index
    %c0_2 = arith.constant 0 : index
    %1 = vector.load %arg1[%c0_1, %c0_2] : memref<512x64xbf16, #tpu.memory_space<vmem>>, vector<512x64xbf16>
    %cst = arith.constant dense<0.000000e+00> : vector<192x64xf32>
    %2 = tpu.matmul %0, %1, %cst {dimension_numbers = #tpu.dot_dimension_numbers<[1], [0], [0], [1], [0, 0, 1, 1], [], []>} : vector<192x512xbf16>, vector<512x64xbf16>, vector<192x64xf32> -> vector<192x64xf32>
    %c0_3 = arith.constant 0 : index
    %c0_4 = arith.constant 0 : index
    %3 = vector.load %arg2[%c0_3, %c0_4] : memref<1x64xf32, #tpu.memory_space<vmem>>, vector<1x64xf32>
    %4 = vector.broadcast %3 : vector<1x64xf32> to vector<192x64xf32>
    %5 = arith.addf %2, %4 : vector<192x64xf32>
    %cst_5 = arith.constant 0.000000e+00 : f32
    %6 = vector.broadcast %cst_5 : f32 to vector<192x64xf32>
    %7 = arith.maximumf %5, %6 : vector<192x64xf32>
    %8 = arith.truncf %7 : vector<192x64xf32> to vector<192x64xbf16>
    %c0_6 = arith.constant 0 : index
    %c0_7 = arith.constant 0 : index
    %9 = vector.load %arg3[%c0_6, %c0_7] : memref<192x64xbf16, #tpu.memory_space<vmem>>, vector<192x64xbf16>
    tpu.vector_store %arg3[%c0_6, %c0_7], %8 {strides = array<i32>} : memref<192x64xbf16, #tpu.memory_space<vmem>>, vector<192x64xbf16>,
    return
  }
}

module attributes {stable_mosaic.version = 11 : i64} {
  func.func @_matmul_bias_relu_kernel(%arg0: memref<120x576xbf16, #tpu.memory_space<vmem>>, %arg1: memref<576x64xbf16, #tpu.memory_space<vmem>>, %arg2: memref<1x64xf32, #tpu.memory_space<vmem>>, %arg3: memref<120x64xbf16, #tpu.memory_space<vmem>>) attributes {dimension_semantics = [], scalar_prefetch = 0 : i64, scratch_operands = 0 : i64, tpu.core_type = #tpu.core_type<tc>} {
    %c0 = arith.constant 0 : index
    %c0_0 = arith.constant 0 : index
    %0 = vector.load %arg0[%c0, %c0_0] : memref<120x576xbf16, #tpu.memory_space<vmem>>, vector<120x576xbf16>
    %c0_1 = arith.constant 0 : index
    %c0_2 = arith.constant 0 : index
    %1 = vector.load %arg1[%c0_1, %c0_2] : memref<576x64xbf16, #tpu.memory_space<vmem>>, vector<576x64xbf16>
    %cst = arith.constant dense<0.000000e+00> : vector<120x64xf32>
    %2 = tpu.matmul %0, %1, %cst {dimension_numbers = #tpu.dot_dimension_numbers<[1], [0], [0], [1], [0, 0, 1, 1], [], []>} : vector<120x576xbf16>, vector<576x64xbf16>, vector<120x64xf32> -> vector<120x64xf32>
    %c0_3 = arith.constant 0 : index
    %c0_4 = arith.constant 0 : index
    %3 = vector.load %arg2[%c0_3, %c0_4] : memref<1x64xf32, #tpu.memory_space<vmem>>, vector<1x64xf32>
    %4 = vector.broadcast %3 : vector<1x64xf32> to vector<120x64xf32>
    %5 = arith.addf %2, %4 : vector<120x64xf32>
    %cst_5 = arith.constant 0.000000e+00 : f32
    %6 = vector.broadcast %cst_5 : f32 to vector<120x64xf32>
    %7 = arith.maximumf %5, %6 : vector<120x64xf32>
    %8 = arith.truncf %7 : vector<120x64xf32> to vector<120x64xbf16>
    %c0_6 = arith.constant 0 : index
    %c0_7 = arith.constant 0 : index
    %9 = vector.load %arg3[%c0_6, %c0_7] : memref<120x64xbf16, #tpu.memory_space<vmem>>, vector<120x64xbf16>
    tpu.vector_store %arg3[%c0_6, %c0_7], %8 {strides = array<i32>} : memref<120x64xbf16, #tpu.memory_space<vmem>>, vector<120x64xbf16>,
    return
  }
}

module attributes {stable_mosaic.version = 11 : i64} {
  func.func @_mlp_head_kernel(%arg0: memref<2x3840xbf16, #tpu.memory_space<vmem>>, %arg1: memref<3840x512xbf16, #tpu.memory_space<vmem>>, %arg2: memref<1x512xf32, #tpu.memory_space<vmem>>, %arg3: memref<512x2xbf16, #tpu.memory_space<vmem>>, %arg4: memref<1x2xf32, #tpu.memory_space<vmem>>, %arg5: memref<2x2xf32, #tpu.memory_space<vmem>>) attributes {dimension_semantics = [], scalar_prefetch = 0 : i64, scratch_operands = 0 : i64, tpu.core_type = #tpu.core_type<tc>} {
    %c0 = arith.constant 0 : index
    %c0_0 = arith.constant 0 : index
    %0 = vector.load %arg0[%c0, %c0_0] : memref<2x3840xbf16, #tpu.memory_space<vmem>>, vector<2x3840xbf16>
    %c0_1 = arith.constant 0 : index
    %c0_2 = arith.constant 0 : index
    %1 = vector.load %arg1[%c0_1, %c0_2] : memref<3840x512xbf16, #tpu.memory_space<vmem>>, vector<3840x512xbf16>
    %cst = arith.constant dense<0.000000e+00> : vector<2x512xf32>
    %2 = tpu.matmul %0, %1, %cst {dimension_numbers = #tpu.dot_dimension_numbers<[1], [0], [0], [1], [0, 0, 1, 1], [], []>} : vector<2x3840xbf16>, vector<3840x512xbf16>, vector<2x512xf32> -> vector<2x512xf32>
    %c0_3 = arith.constant 0 : index
    %c0_4 = arith.constant 0 : index
    %3 = vector.load %arg2[%c0_3, %c0_4] : memref<1x512xf32, #tpu.memory_space<vmem>>, vector<1x512xf32>
    %4 = vector.broadcast %3 : vector<1x512xf32> to vector<2x512xf32>
    %5 = arith.addf %2, %4 : vector<2x512xf32>
    %cst_5 = arith.constant 0.000000e+00 : f32
    %6 = vector.broadcast %cst_5 : f32 to vector<2x512xf32>
    %7 = arith.maximumf %5, %6 : vector<2x512xf32>
    %8 = arith.truncf %7 : vector<2x512xf32> to vector<2x512xbf16>
    %c0_6 = arith.constant 0 : index
    %c0_7 = arith.constant 0 : index
    %9 = vector.load %arg3[%c0_6, %c0_7] : memref<512x2xbf16, #tpu.memory_space<vmem>>, vector<512x2xbf16>
    %cst_8 = arith.constant dense<0.000000e+00> : vector<2x2xf32>
    %10 = tpu.matmul %8, %9, %cst_8 {dimension_numbers = #tpu.dot_dimension_numbers<[1], [0], [0], [1], [0, 0, 1, 1], [], []>} : vector<2x512xbf16>, vector<512x2xbf16>, vector<2x2xf32> -> vector<2x2xf32>
    %c0_9 = arith.constant 0 : index
    %c0_10 = arith.constant 0 : index
    %11 = vector.load %arg4[%c0_9, %c0_10] : memref<1x2xf32, #tpu.memory_space<vmem>>, vector<1x2xf32>
    %12 = vector.broadcast %11 : vector<1x2xf32> to vector<2x2xf32>
    %13 = arith.addf %10, %12 : vector<2x2xf32>
    %c0_11 = arith.constant 0 : index
    %c0_12 = arith.constant 0 : index
    %14 = vector.load %arg5[%c0_11, %c0_12] : memref<2x2xf32, #tpu.memory_space<vmem>>, vector<2x2xf32>
    tpu.vector_store %arg5[%c0_11, %c0_12], %13 {strides = array<i32>} : memref<2x2xf32, #tpu.memory_space<vmem>>, vector<2x2xf32>,
    return
  }
}

</mosaic_0001>

<bundles_post_ra>
// kernel: dqn_forward.4
= control target key start
LH: loop header
LB: loop body
LE: loop exit
PB: predicated region body
PF: predicated region fallthrough
CT: control target
= control target key end

     0   :  { %v2592_v0 = vmov 0.0   ;;  %vm2593_vm0 = vmmov 0   ;;  %vm464_vm1 = vcmask 523264   ;;  %vm1732_vm2 = vcmask 257024   ;;  %s3583_s1 = inlined_call_operand.vmem [shape: bf16[64,32], index: 1, kind: input, shape index: {}]   ;;  %s3584_s0 = inlined_call_operand.vmem [shape: bf16[936,64], index: 0, kind: input, shape index: {}]   ;;  %s3585_s2 = inlined_call_operand.vmem [shape: f32[1,32], index: 2, kind: input, shape index: {}]   ;;  %s3586_s3 = inlined_call_operand.vmem [shape: bf16[936,32], index: 3, kind: output, shape index: {}]  }
   0x1   :  { %2274 = vmatprep.subr.bf16.mxu0 %v2592_v0  ;;  %v2528_v1 = vld [vmem:[%s3583_s1 + $0x18] sm:$0xff]   ;;  %2518 = vmatprep.subr.bf16.mxu1 %v2592_v0  ;;  %v2529_v2 = vld [vmem:[%s3583_s1 + $0x10] sm:$0xff]   ;;  %v2530_v3 = vld [vmem:[%s3583_s1 + $0x8] sm:$0xff]  }
   0x2   :  { %2282 = vmatprep.mubr.msk.bf16.mxu0 %vm2593_vm0, %v2592_v0  ;;  %2402 = vmatprep.mubr.msk.bf16.mxu1 %vm2593_vm0, %v2592_v0  ;;  %v2531_v4 = vld [vmem:[%s3583_s1] sm:$0xff]   ;;  %v2533_v6 = vld [vmem:[%s3584_s0 + $0xf0] sm:$0xff]   ;;  %v2534_v7 = vld [vmem:[%s3584_s0 + $0x8] sm:$0xff]  }
   0x3   :  { %2275 = vmatpush3.bf16.msra.mxu0 %v2528_v1  ;;  %2522 = vmatpush3.bf16.msra.mxu1 %v2528_v1  ;;  %v2532_v5 = vld [vmem:[%s3584_s0] sm:$0xff]   ;;  %v2535_v8 = vld [vmem:[%s3584_s0 + $0xf8] sm:$0xff]   ;;  %v2536_v9 = vld [vmem:[%s3584_s0 + $0x10] sm:$0xff]  }
   0x4   :  { %2276 = vmatprep.subr.bf16.mxu0 %v2592_v0  ;;  %2519 = vmatprep.subr.bf16.mxu1 %v2592_v0  ;;  %v2537_v10 = vld [vmem:[%s3584_s0 + $0x100] sm:$0xff]   ;;  %v2538_v11 = vld [vmem:[%s3584_s0 + $0x18] sm:$0xff]   ;;  %v2539_v12 = vld [vmem:[%s3584_s0 + $0x108] sm:$0xff]  }
   0x5   :  { %v2540_v13 = vld [vmem:[%s3584_s0 + $0x20] sm:$0xff]   ;;  %v2541_v14 = vld [vmem:[%s3584_s0 + $0x110] sm:$0xff]   ;;  %v2542_v15 = vld [vmem:[%s3584_s0 + $0x28] sm:$0xff]  }
   0x6   :  { %v2543_v16 = vld [vmem:[%s3584_s0 + $0x118] sm:$0xff]   ;;  %v2544_v17 = vld [vmem:[%s3584_s0 + $0x30] sm:$0xff]   ;;  %v2545_v18 = vld [vmem:[%s3584_s0 + $0x120] sm:$0xff]  }
   0x7   :  { %2277 = vmatpush3.bf16.msra.mxu0 %v2529_v2  ;;  %2523 = vmatpush3.bf16.msra.mxu1 %v2529_v2  ;;  %v2546_v19 = vld [vmem:[%s3584_s0 + $0x38] sm:$0xff]   ;;  %v2547_v20 = vld [vmem:[%s3584_s0 + $0x128] sm:$0xff]   ;;  %v2548_v21 = vld [vmem:[%s3584_s0 + $0x40] sm:$0xff]  }
   0x8   :  { %2278 = vmatprep.subr.bf16.mxu0 %v2592_v0  ;;  %2520 = vmatprep.subr.bf16.mxu1 %v2592_v0  ;;  %v2549_v22 = vld [vmem:[%s3584_s0 + $0x130] sm:$0xff]   ;;  %v2550_v23 = vld [vmem:[%s3584_s0 + $0x48] sm:$0xff]   ;;  %v2551_v24 = vld [vmem:[%s3584_s0 + $0x138] sm:$0xff]  }
   0x9   :  { %v2552_v25 = vld [vmem:[%s3584_s0 + $0x50] sm:$0xff]   ;;  %v2553_v26 = vld [vmem:[%s3584_s0 + $0x140] sm:$0xff]   ;;  %v2554_v27 = vld [vmem:[%s3584_s0 + $0x58] sm:$0xff]  }
   0xa   :  { %v2555_v28 = vld [vmem:[%s3584_s0 + $0x148] sm:$0xff]   ;;  %v2556_v29 = vld [vmem:[%s3584_s0 + $0x60] sm:$0xff]   ;;  %v2557_v30 = vld [vmem:[%s3584_s0 + $0x150] sm:$0xff]  }
   0xb   :  { %2279 = vmatpush3.bf16.msra.mxu0 %v2530_v3  ;;  %2524 = vmatpush3.bf16.msra.mxu1 %v2530_v3  ;;  %v2558_v31 = vld [vmem:[%s3584_s0 + $0x68] sm:$0xff]   ;;  %v2559_v32 = vld [vmem:[%s3584_s0 + $0x158] sm:$0xff]   ;;  %v2560_v33 = vld [vmem:[%s3584_s0 + $0x70] sm:$0xff]  }
   0xc   :  { %2280 = vmatprep.subr.bf16.mxu0 %v2592_v0  ;;  %2521 = vmatprep.subr.bf16.mxu1 %v2592_v0  ;;  %v2561_v34 = vld [vmem:[%s3584_s0 + $0x160] sm:$0xff]   ;;  %v2562_v35 = vld [vmem:[%s3584_s0 + $0x78] sm:$0xff]   ;;  %v2563_v36 = vld [vmem:[%s3584_s0 + $0x168] sm:$0xff]  }
   0xd   :  { %v2564_v37 = vld [vmem:[%s3584_s0 + $0x80] sm:$0xff]   ;;  %v2565_v38 = vld [vmem:[%s3584_s0 + $0x170] sm:$0xff]   ;;  %v2566_v39 = vld [vmem:[%s3584_s0 + $0x88] sm:$0xff]  }
   0xe   :  { %v2567_v40 = vld [vmem:[%s3584_s0 + $0x178] sm:$0xff]   ;;  %v2568_v41 = vld [vmem:[%s3584_s0 + $0x90] sm:$0xff]   ;;  %v2569_v42 = vld [vmem:[%s3584_s0 + $0x180] sm:$0xff]  }
   0xf   :  { %2281 = vmatpush3.bf16.msra.mxu0 %v2531_v4  ;;  %2525 = vmatpush3.bf16.msra.mxu1 %v2531_v4  ;;  %v2570_v43 = vld [vmem:[%s3584_s0 + $0x98] sm:$0xff]   ;;  %v2571_v44 = vld [vmem:[%s3584_s0 + $0x188] sm:$0xff]   ;;  %v2572_v45 = vld [vmem:[%s3584_s0 + $0xa0] sm:$0xff]  }
  0x10   :  { %v2573_v46 = vld [vmem:[%s3584_s0 + $0x190] sm:$0xff]   ;;  %v2574_v47 = vld [vmem:[%s3584_s0 + $0xa8] sm:$0xff]   ;;  %v2575_v48 = vld [vmem:[%s3584_s0 + $0x198] sm:$0xff]  }
  0x11   :  { %v2576_v49 = vld [vmem:[%s3584_s0 + $0xb0] sm:$0xff]   ;;  %v2577_v50 = vld [vmem:[%s3584_s0 + $0x1a0] sm:$0xff]   ;;  %v2578_v51 = vld [vmem:[%s3584_s0 + $0xb8] sm:$0xff]  }
  0x12   :  { %2283 = vmatmul.mubr.msk.bf16.vlgmr.msra.gmra.mxu0 %vm464_vm1, %v2532_v5  ;;  %2403 = vmatmul.mubr.msk.bf16.vlgmr.msra.gmra.mxu1 %vm464_vm1, %v2533_v6  ;;  %v2579_v52 = vld [vmem:[%s3584_s0 + $0x1a8] sm:$0xff]   ;;  %v2580_v53 = vld [vmem:[%s3584_s0 + $0xc0] sm:$0xff]   ;;  %v2581_v54 = vld [vmem:[%s3584_s0 + $0x1b0] sm:$0xff]  }
  0x13   :  { %2286 = vmatprep.mubr.msk.bf16.mxu0 %vm2593_vm0, %v2592_v0  ;;  %2406 = vmatprep.mubr.msk.bf16.mxu1 %vm2593_vm0, %v2592_v0  ;;  %v2935_v55 = vld [vmem:[%s3585_s2] ss:$0 sm:$0xff]  ;;  %v2582_v2 = vld [vmem:[%s3584_s0 + $0xc8] sm:$0xff]   ;;  %v2583_v4 = vld [vmem:[%s3584_s0 + $0x1b8] sm:$0xff]  }
  0x1a   :  { %2287 = vmatmul.mubr.msk.bf16.gmra.mxu0 %vm464_vm1, %v2534_v7  ;;  %2407 = vmatmul.mubr.msk.bf16.gmra.mxu1 %vm464_vm1, %v2535_v8 }
  0x1b   :  { %2290 = vmatprep.mubr.msk.bf16.mxu0 %vm2593_vm0, %v2592_v0  ;;  %2410 = vmatprep.mubr.msk.bf16.mxu1 %vm2593_vm0, %v2592_v0 }
  0x22   :  { %2291 = vmatmul.mubr.msk.bf16.gmra.mxu0 %vm464_vm1, %v2536_v9  ;;  %2411 = vmatmul.mubr.msk.bf16.gmra.mxu1 %vm464_vm1, %v2537_v10 }
  0x23   :  { %2294 = vmatprep.mubr.msk.bf16.mxu0 %vm2593_vm0, %v2592_v0  ;;  %2414 = vmatprep.mubr.msk.bf16.mxu1 %vm2593_vm0, %v2592_v0 }
  0x2a   :  { %2295 = vmatmul.mubr.msk.bf16.gmra.mxu0 %vm464_vm1, %v2538_v11  ;;  %2415 = vmatmul.mubr.msk.bf16.gmra.mxu1 %vm464_vm1, %v2539_v12 }
  0x2b   :  { %2298 = vmatprep.mubr.msk.bf16.mxu0 %vm2593_vm0, %v2592_v0  ;;  %2418 = vmatprep.mubr.msk.bf16.mxu1 %vm2593_vm0, %v2592_v0 }
  0x32   :  { %2299 = vmatmul.mubr.msk.bf16.gmra.mxu0 %vm464_vm1, %v2540_v13  ;;  %2419 = vmatmul.mubr.msk.bf16.gmra.mxu1 %vm464_vm1, %v2541_v14 }
  0x33   :  { %2302 = vmatprep.mubr.msk.bf16.mxu0 %vm2593_vm0, %v2592_v0  ;;  %2422 = vmatprep.mubr.msk.bf16.mxu1 %vm2593_vm0, %v2592_v0 }
  0x3a   :  { %2303 = vmatmul.mubr.msk.bf16.gmra.mxu0 %vm464_vm1, %v2542_v15  ;;  %2423 = vmatmul.mubr.msk.bf16.gmra.mxu1 %vm464_vm1, %v2543_v16 }
  0x3b   :  { %2306 = vmatprep.mubr.msk.bf16.mxu0 %vm2593_vm0, %v2592_v0  ;;  %2426 = vmatprep.mubr.msk.bf16.mxu1 %vm2593_vm0, %v2592_v0 }
  0x42   :  { %2307 = vmatmul.mubr.msk.bf16.gmra.mxu0 %vm464_vm1, %v2544_v17  ;;  %2427 = vmatmul.mubr.msk.bf16.gmra.mxu1 %vm464_vm1, %v2545_v18 }
  0x43   :  { %2310 = vmatprep.mubr.msk.bf16.mxu0 %vm2593_vm0, %v2592_v0  ;;  %2430 = vmatprep.mubr.msk.bf16.mxu1 %vm2593_vm0, %v2592_v0 }
  0x4a   :  { %2311 = vmatmul.mubr.msk.bf16.gmra.mxu0 %vm464_vm1, %v2546_v19  ;;  %2431 = vmatmul.mubr.msk.bf16.gmra.mxu1 %vm464_vm1, %v2547_v20 }
  0x4b   :  { %2314 = vmatprep.mubr.msk.bf16.mxu0 %vm2593_vm0, %v2592_v0  ;;  %2434 = vmatprep.mubr.msk.bf16.mxu1 %vm2593_vm0, %v2592_v0 }
  0x52   :  { %2315 = vmatmul.mubr.msk.bf16.gmra.mxu0 %vm464_vm1, %v2548_v21  ;;  %2435 = vmatmul.mubr.msk.bf16.gmra.mxu1 %vm464_vm1, %v2549_v22 }
  0x53   :  { %2318 = vmatprep.mubr.msk.bf16.mxu0 %vm2593_vm0, %v2592_v0  ;;  %2438 = vmatprep.mubr.msk.bf16.mxu1 %vm2593_vm0, %v2592_v0 }
  0x5a   :  { %2319 = vmatmul.mubr.msk.bf16.gmra.mxu0 %vm464_vm1, %v2550_v23  ;;  %2439 = vmatmul.mubr.msk.bf16.gmra.mxu1 %vm464_vm1, %v2551_v24  ;;  %v2584_v24 = vld [vmem:[%s3584_s0 + $0xd0] sm:$0xff]  }
  0x5b   :  { %2322 = vmatprep.mubr.msk.bf16.mxu0 %vm2593_vm0, %v2592_v0  ;;  %2442 = vmatprep.mubr.msk.bf16.mxu1 %vm2593_vm0, %v2592_v0 }
  0x62   :  { %2323 = vmatmul.mubr.msk.bf16.gmra.mxu0 %vm464_vm1, %v2552_v25  ;;  %2443 = vmatmul.mubr.msk.bf16.gmra.mxu1 %vm464_vm1, %v2553_v26  ;;  %v2585_v26 = vld [vmem:[%s3584_s0 + $0x1c0] sm:$0xff]  }
  0x63   :  { %2326 = vmatprep.mubr.msk.bf16.mxu0 %vm2593_vm0, %v2592_v0  ;;  %2446 = vmatprep.mubr.msk.bf16.mxu1 %vm2593_vm0, %v2592_v0 }
  0x6a   :  { %2327 = vmatmul.mubr.msk.bf16.gmra.mxu0 %vm464_vm1, %v2554_v27  ;;  %2447 = vmatmul.mubr.msk.bf16.gmra.mxu1 %vm464_vm1, %v2555_v28 }
  0x6b   :  { %2330 = vmatprep.mubr.msk.bf16.mxu0 %vm2593_vm0, %v2592_v0  ;;  %2450 = vmatprep.mubr.msk.bf16.mxu1 %vm2593_vm0, %v2592_v0 }
  0x72   :  { %2331 = vmatmul.mubr.msk.bf16.gmra.mxu0 %vm464_vm1, %v2556_v29  ;;  %2451 = vmatmul.mubr.msk.bf16.gmra.mxu1 %vm464_vm1, %v2557_v30 }
  0x73   :  { %2334 = vmatprep.mubr.msk.bf16.mxu0 %vm2593_vm0, %v2592_v0  ;;  %2454 = vmatprep.mubr.msk.bf16.mxu1 %vm2593_vm0, %v2592_v0 }
  0x7a   :  { %2335 = vmatmul.mubr.msk.bf16.gmra.mxu0 %vm464_vm1, %v2558_v31  ;;  %2455 = vmatmul.mubr.msk.bf16.gmra.mxu1 %vm464_vm1, %v2559_v32 }
  0x7b   :  { %2338 = vmatprep.mubr.msk.bf16.mxu0 %vm2593_vm0, %v2592_v0  ;;  %2458 = vmatprep.mubr.msk.bf16.mxu1 %vm2593_vm0, %v2592_v0 }
  0x82   :  { %2339 = vmatmul.mubr.msk.bf16.gmra.mxu0 %vm464_vm1, %v2560_v33  ;;  %2459 = vmatmul.mubr.msk.bf16.gmra.mxu1 %vm464_vm1, %v2561_v34 }
  0x83   :  { %2342 = vmatprep.mubr.msk.bf16.mxu0 %vm2593_vm0, %v2592_v0  ;;  %2462 = vmatprep.mubr.msk.bf16.mxu1 %vm2593_vm0, %v2592_v0 }
  0x8a   :  { %2343 = vmatmul.mubr.msk.bf16.gmra.mxu0 %vm464_vm1, %v2562_v35  ;;  %2463 = vmatmul.mubr.msk.bf16.gmra.mxu1 %vm464_vm1, %v2563_v36 }
  0x8b   :  { %2346 = vmatprep.mubr.msk.bf16.mxu0 %vm2593_vm0, %v2592_v0  ;;  %2466 = vmatprep.mubr.msk.bf16.mxu1 %vm2593_vm0, %v2592_v0 }
  0x92   :  { %2347 = vmatmul.mubr.msk.bf16.gmra.mxu0 %vm464_vm1, %v2564_v37  ;;  %2467 = vmatmul.mubr.msk.bf16.gmra.mxu1 %vm464_vm1, %v2565_v38 }
  0x93   :  { %2350 = vmatprep.mubr.msk.bf16.mxu0 %vm2593_vm0, %v2592_v0  ;;  %2470 = vmatprep.mubr.msk.bf16.mxu1 %vm2593_vm0, %v2592_v0 }
  0x9a   :  { %2351 = vmatmul.mubr.msk.bf16.gmra.mxu0 %vm464_vm1, %v2566_v39  ;;  %2471 = vmatmul.mubr.msk.bf16.gmra.mxu1 %vm464_vm1, %v2567_v40 }
  0x9b   :  { %2354 = vmatprep.mubr.msk.bf16.mxu0 %vm2593_vm0, %v2592_v0  ;;  %2474 = vmatprep.mubr.msk.bf16.mxu1 %vm2593_vm0, %v2592_v0 }
  0xa2   :  { %2355 = vmatmul.mubr.msk.bf16.gmra.mxu0 %vm464_vm1, %v2568_v41  ;;  %2475 = vmatmul.mubr.msk.bf16.gmra.mxu1 %vm464_vm1, %v2569_v42 }
  0xa3   :  { %2358 = vmatprep.mubr.msk.bf16.mxu0 %vm2593_vm0, %v2592_v0  ;;  %2478 = vmatprep.mubr.msk.bf16.mxu1 %vm2593_vm0, %v2592_v0 }
  0xaa   :  { %2359 = vmatmul.mubr.msk.bf16.gmra.mxu0 %vm464_vm1, %v2570_v43  ;;  %2479 = vmatmul.mubr.msk.bf16.gmra.mxu1 %vm464_vm1, %v2571_v44 }
  0xab   :  { %2362 = vmatprep.mubr.msk.bf16.mxu0 %vm2593_vm0, %v2592_v0  ;;  %2482 = vmatprep.mubr.msk.bf16.mxu1 %vm2593_vm0, %v2592_v0 }
  0xb2   :  { %2363 = vmatmul.mubr.msk.bf16.gmra.mxu0 %vm464_vm1, %v2572_v45  ;;  %2483 = vmatmul.mubr.msk.bf16.gmra.mxu1 %vm464_vm1, %v2573_v46  ;;  %v2586_v46 = vld [vmem:[%s3584_s0 + $0xd8] sm:$0xff]  }
  0xb3   :  { %2366 = vmatprep.mubr.msk.bf16.mxu0 %vm2593_vm0, %v2592_v0  ;;  %2486 = vmatprep.mubr.msk.bf16.mxu1 %vm2593_vm0, %v2592_v0 }
  0xba   :  { %2367 = vmatmul.mubr.msk.bf16.gmra.mxu0 %vm464_vm1, %v2574_v47  ;;  %2487 = vmatmul.mubr.msk.bf16.gmra.mxu1 %vm464_vm1, %v2575_v48  ;;  %v2587_v48 = vld [vmem:[%s3584_s0 + $0x1c8] sm:$0xff]  }
  0xbb   :  { %2370 = vmatprep.mubr.msk.bf16.mxu0 %vm2593_vm0, %v2592_v0  ;;  %2490 = vmatprep.mubr.msk.bf16.mxu1 %vm2593_vm0, %v2592_v0 }
  0xc2   :  { %2371 = vmatmul.mubr.msk.bf16.gmra.mxu0 %vm464_vm1, %v2576_v49  ;;  %2491 = vmatmul.mubr.msk.bf16.gmra.mxu1 %vm464_vm1, %v2577_v50 }
  0xc3   :  { %2374 = vmatprep.mubr.msk.bf16.mxu0 %vm2593_vm0, %v2592_v0  ;;  %2494 = vmatprep.mubr.msk.bf16.mxu1 %vm2593_vm0, %v2592_v0 }
  0xca   :  { %2375 = vmatmul.mubr.msk.bf16.gmra.mxu0 %vm464_vm1, %v2578_v51  ;;  %2495 = vmatmul.mubr.msk.bf16.gmra.mxu1 %vm464_vm1, %v2579_v52 }
  0xcb   :  { %2378 = vmatprep.mubr.msk.bf16.mxu0 %vm2593_vm0, %v2592_v0  ;;  %2498 = vmatprep.mubr.msk.bf16.mxu1 %vm2593_vm0, %v2592_v0 }
  0xd2   :  { %v676_v56 = vpop.f32.mrf.mxu0  ;;  %2379 = vmatmul.mubr.msk.bf16.gmra.mxu0 %vm464_vm1, %v2580_v53  ;;  %v916_v57 = vpop.f32.mrf.mxu1  ;;  %2499 = vmatmul.mubr.msk.bf16.gmra.mxu1 %vm464_vm1, %v2581_v54 }
  0xd3   :  { %v677_v58 = vadd.f32 %v2935_v55, %v676_v56  ;;  %v917_v59 = vadd.f32 %v2935_v55, %v916_v57  ;;  %2382 = vmatprep.mubr.msk.bf16.mxu0 %vm2593_vm0, %v2592_v0  ;;  %2502 = vmatprep.mubr.msk.bf16.mxu1 %vm2593_vm0, %v2592_v0 }
  0xd4   :  { %v2284_v60 = vpop.f32.mrf.mxu0  ;;  %v2404_v61 = vpop.f32.mrf.mxu1 }
  0xd5   :  { %v1146_v62 = vmax.f32 %v677_v58, 0.0  ;;  %v1206_v63 = vmax.f32 %v917_v59, 0.0 }
  0xd6   :  { %v679_v1 = vpop.f32.mrf.mxu0  ;;  %v919_v3 = vpop.f32.mrf.mxu1 }
  0xd7   :  { %v2094_v5 = vpack.c.bf16 %v1146_v62, %v1146_v62  ;;  %v680_v6 = vadd.f32 %v2935_v55, %v679_v1  ;;  %v2154_v7 = vpack.c.bf16 %v1206_v63, %v1206_v63  ;;  %v920_v8 = vadd.f32 %v2935_v55, %v919_v3 }
  0xd8   :  { %v2285_v9 = vpop.f32.mrf.mxu0  ;;  %v2405_v10 = vpop.f32.mrf.mxu1 }
  0xd9   :  { %1733 = vst.msk [vmem:[%s3586_s3] sm:$0xf] %vm1732_vm2, %v2094_v5  ;;  %v1147_v11 = vmax.f32 %v680_v6, 0.0  ;;  %1793 = vst.msk [vmem:[%s3586_s3 + $0xf0] sm:$0xf] %vm1732_vm2, %v2154_v7  ;;  %v1207_v12 = vmax.f32 %v920_v8, 0.0 }
  0xda   :  { %v684_v13 = vpop.f32.mrf.mxu0  ;;  %2383 = vmatmul.mubr.msk.bf16.gmra.mxu0 %vm464_vm1, %v2582_v2  ;;  %v924_v14 = vpop.f32.mrf.mxu1  ;;  %2503 = vmatmul.mubr.msk.bf16.gmra.mxu1 %vm464_vm1, %v2583_v4  ;;  %v2588_v6 = vld [vmem:[%s3584_s0 + $0xe0] sm:$0xff]   ;;  %v2589_v8 = vld [vmem:[%s3584_s0 + $0x1d0] ss:$0 sps:$4 sm:$0xff]  }
  0xdb   :  { %v2095_v15 = vpack.c.bf16 %v1147_v11, %v1147_v11  ;;  %v685_v16 = vadd.f32 %v2935_v55, %v684_v13  ;;  %v2155_v17 = vpack.c.bf16 %v1207_v12, %v1207_v12  ;;  %v925_v18 = vadd.f32 %v2935_v55, %v924_v14  ;;  %2386 = vmatprep.mubr.msk.bf16.mxu0 %vm2593_vm0, %v2592_v0 }
  0xdc   :  { %v2288_v19 = vpop.f32.mrf.mxu0  ;;  %v2408_v20 = vpop.f32.mrf.mxu1  ;;  %2506 = vmatprep.mubr.msk.bf16.mxu1 %vm2593_vm0, %v2592_v0 }
  0xdd   :  { %1734 = vst.msk [vmem:[%s3586_s3 + $0x4] sm:$0xf] %vm1732_vm2, %v2095_v15  ;;  %v1148_v21 = vmax.f32 %v685_v16, 0.0  ;;  %1794 = vst.msk [vmem:[%s3586_s3 + $0xf4] sm:$0xf] %vm1732_vm2, %v2155_v17  ;;  %v1208_v22 = vmax.f32 %v925_v18, 0.0 }
  0xde   :  { %v687_v23 = vpop.f32.mrf.mxu0  ;;  %v927_v25 = vpop.f32.mrf.mxu1 }
  0xdf   :  { %v2096_v27 = vpack.c.bf16 %v1148_v21, %v1148_v21  ;;  %v688_v28 = vadd.f32 %v2935_v55, %v687_v23  ;;  %v2156_v29 = vpack.c.bf16 %v1208_v22, %v1208_v22  ;;  %v928_v30 = vadd.f32 %v2935_v55, %v927_v25 }
  0xe0   :  { %v2289_v31 = vpop.f32.mrf.mxu0  ;;  %v2409_v32 = vpop.f32.mrf.mxu1 }
  0xe1   :  { %1735 = vst.msk [vmem:[%s3586_s3 + $0x8] sm:$0xf] %vm1732_vm2, %v2096_v27  ;;  %v1149_v33 = vmax.f32 %v688_v28, 0.0  ;;  %1795 = vst.msk [vmem:[%s3586_s3 + $0xf8] sm:$0xf] %vm1732_vm2, %v2156_v29  ;;  %v1209_v34 = vmax.f32 %v928_v30, 0.0 }
  0xe2   :  { %v692_v35 = vpop.f32.mrf.mxu0  ;;  %2387 = vmatmul.mubr.msk.bf16.gmra.mxu0 %vm464_vm1, %v2584_v24  ;;  %v932_v36 = vpop.f32.mrf.mxu1  ;;  %2507 = vmatmul.mubr.msk.bf16.gmra.mxu1 %vm464_vm1, %v2585_v26  ;;  %v2590_v28 = vld [vmem:[%s3584_s0 + $0xe8] sm:$0xff]  }
  0xe3   :  { %v2097_v37 = vpack.c.bf16 %v1149_v33, %v1149_v33  ;;  %v693_v38 = vadd.f32 %v2935_v55, %v692_v35  ;;  %v2157_v39 = vpack.c.bf16 %v1209_v34, %v1209_v34  ;;  %v933_v40 = vadd.f32 %v2935_v55, %v932_v36  ;;  %2390 = vmatprep.mubr.msk.bf16.mxu0 %vm2593_vm0, %v2592_v0 }
  0xe4   :  { %v2292_v41 = vpop.f32.mrf.mxu0  ;;  %v2412_v42 = vpop.f32.mrf.mxu1  ;;  %2510 = vmatprep.mubr.msk.bf16.mxu1 %vm2593_vm0, %v2592_v0 }
  0xe5   :  { %1736 = vst.msk [vmem:[%s3586_s3 + $0xc] sm:$0xf] %vm1732_vm2, %v2097_v37  ;;  %v1150_v43 = vmax.f32 %v693_v38, 0.0  ;;  %1796 = vst.msk [vmem:[%s3586_s3 + $0xfc] sm:$0xf] %vm1732_vm2, %v2157_v39  ;;  %v1210_v44 = vmax.f32 %v933_v40, 0.0 }
  0xe6   :  { %v695_v45 = vpop.f32.mrf.mxu0  ;;  %v935_v47 = vpop.f32.mrf.mxu1 }
  0xe7   :  { %v2098_v49 = vpack.c.bf16 %v1150_v43, %v1150_v43  ;;  %v696_v50 = vadd.f32 %v2935_v55, %v695_v45  ;;  %v2158_v51 = vpack.c.bf16 %v1210_v44, %v1210_v44  ;;  %v936_v52 = vadd.f32 %v2935_v55, %v935_v47 }
  0xe8   :  { %v2293_v53 = vpop.f32.mrf.mxu0  ;;  %v2413_v54 = vpop.f32.mrf.mxu1 }
  0xe9   :  { %1737 = vst.msk [vmem:[%s3586_s3 + $0x10] sm:$0xf] %vm1732_vm2, %v2098_v49  ;;  %v1151_v56 = vmax.f32 %v696_v50, 0.0  ;;  %1797 = vst.msk [vmem:[%s3586_s3 + $0x100] sm:$0xf] %vm1732_vm2, %v2158_v51  ;;  %v1211_v57 = vmax.f32 %v936_v52, 0.0 }
  0xea   :  { %v700_v58 = vpop.f32.mrf.mxu0  ;;  %2391 = vmatmul.mubr.msk.bf16.gmra.mxu0 %vm464_vm1, %v2586_v46  ;;  %v940_v59 = vpop.f32.mrf.mxu1  ;;  %2511 = vmatmul.mubr.msk.bf16.gmra.mxu1 %vm464_vm1, %v2587_v48 }
  0xeb   :  { %v2099_v60 = vpack.c.bf16 %v1151_v56, %v1151_v56  ;;  %v701_v61 = vadd.f32 %v2935_v55, %v700_v58  ;;  %v2159_v62 = vpack.c.bf16 %v1211_v57, %v1211_v57  ;;  %v941_v63 = vadd.f32 %v2935_v55, %v940_v59  ;;  %2394 = vmatprep.mubr.msk.bf16.mxu0 %vm2593_vm0, %v2592_v0 }
  0xec   :  { %v2296_v1 = vpop.f32.mrf.mxu0  ;;  %v2416_v2 = vpop.f32.mrf.mxu1  ;;  %2514 = vmatprep.mubr.msk.bf16.mxu1 %vm2593_vm0, %v2592_v0 }
  0xed   :  { %1738 = vst.msk [vmem:[%s3586_s3 + $0x14] sm:$0xf] %vm1732_vm2, %v2099_v60  ;;  %v1152_v3 = vmax.f32 %v701_v61, 0.0  ;;  %1798 = vst.msk [vmem:[%s3586_s3 + $0x104] sm:$0xf] %vm1732_vm2, %v2159_v62  ;;  %v1212_v4 = vmax.f32 %v941_v63, 0.0 }
  0xee   :  { %v703_v5 = vpop.f32.mrf.mxu0  ;;  %v943_v7 = vpop.f32.mrf.mxu1 }
  0xef   :  { %v2100_v9 = vpack.c.bf16 %v1152_v3, %v1152_v3  ;;  %v704_v10 = vadd.f32 %v2935_v55, %v703_v5  ;;  %v2160_v11 = vpack.c.bf16 %v1212_v4, %v1212_v4  ;;  %v944_v12 = vadd.f32 %v2935_v55, %v943_v7 }
  0xf0   :  { %v2297_v13 = vpop.f32.mrf.mxu0  ;;  %v2417_v14 = vpop.f32.mrf.mxu1 }
  0xf1   :  { %1739 = vst.msk [vmem:[%s3586_s3 + $0x18] sm:$0xf] %vm1732_vm2, %v2100_v9  ;;  %v1153_v15 = vmax.f32 %v704_v10, 0.0  ;;  %1799 = vst.msk [vmem:[%s3586_s3 + $0x108] sm:$0xf] %vm1732_vm2, %v2160_v11  ;;  %v1213_v16 = vmax.f32 %v944_v12, 0.0 }
  0xf2   :  { %v708_v17 = vpop.f32.mrf.mxu0  ;;  %2395 = vmatmul.mubr.msk.bf16.gmra.mxu0 %vm464_vm1, %v2588_v6  ;;  %v948_v18 = vpop.f32.mrf.mxu1  ;;  %2515 = vmatmul.mubr.msk.bf16.gmra.mxu1 %vm464_vm1, %v2589_v8 }
  0xf3   :  { %v2101_v19 = vpack.c.bf16 %v1153_v15, %v1153_v15  ;;  %v709_v20 = vadd.f32 %v2935_v55, %v708_v17  ;;  %v2161_v21 = vpack.c.bf16 %v1213_v16, %v1213_v16  ;;  %v949_v22 = vadd.f32 %v2935_v55, %v948_v18  ;;  %2398 = vmatprep.mubr.msk.bf16.mxu0 %vm2593_vm0, %v2592_v0 }
  0xf4   :  { %v2300_v23 = vpop.f32.mrf.mxu0  ;;  %v2420_v24 = vpop.f32.mrf.mxu1 }
  0xf5   :  { %1740 = vst.msk [vmem:[%s3586_s3 + $0x1c] sm:$0xf] %vm1732_vm2, %v2101_v19  ;;  %v1154_v25 = vmax.f32 %v709_v20, 0.0  ;;  %1800 = vst.msk [vmem:[%s3586_s3 + $0x10c] sm:$0xf] %vm1732_vm2, %v2161_v21  ;;  %v1214_v26 = vmax.f32 %v949_v22, 0.0 }
  0xf6   :  { %v711_v27 = vpop.f32.mrf.mxu0  ;;  %v951_v0 = vpop.f32.mrf.mxu1 }
  0xf7   :  { %v2102_v29 = vpack.c.bf16 %v1154_v25, %v1154_v25  ;;  %v712_v30 = vadd.f32 %v2935_v55, %v711_v27  ;;  %v2162_v31 = vpack.c.bf16 %v1214_v26, %v1214_v26  ;;  %v952_v32 = vadd.f32 %v2935_v55, %v951_v0 }
  0xf8   :  { %v2301_v33 = vpop.f32.mrf.mxu0  ;;  %v2421_v34 = vpop.f32.mrf.mxu1 }
  0xf9   :  { %1741 = vst.msk [vmem:[%s3586_s3 + $0x20] sm:$0xf] %vm1732_vm2, %v2102_v29  ;;  %v1155_v35 = vmax.f32 %v712_v30, 0.0  ;;  %1801 = vst.msk [vmem:[%s3586_s3 + $0x110] sm:$0xf] %vm1732_vm2, %v2162_v31  ;;  %v1215_v36 = vmax.f32 %v952_v32, 0.0 }
  0xfa   :  { %v716_v37 = vpop.f32.mrf.mxu0  ;;  %2399 = vmatmul.mubr.msk.bf16.gmra.mxu0 %vm464_vm1, %v2590_v28  ;;  %v956_v38 = vpop.f32.mrf.mxu1 }
  0xfb   :  { %v2103_v39 = vpack.c.bf16 %v1155_v35, %v1155_v35  ;;  %v717_v40 = vadd.f32 %v2935_v55, %v716_v37  ;;  %v2163_v41 = vpack.c.bf16 %v1215_v36, %v1215_v36  ;;  %v957_v42 = vadd.f32 %v2935_v55, %v956_v38 }
  0xfc   :  { %v2304_v43 = vpop.f32.mrf.mxu0  ;;  %v2424_v44 = vpop.f32.mrf.mxu1 }
  0xfd   :  { %1742 = vst.msk [vmem:[%s3586_s3 + $0x24] sm:$0xf] %vm1732_vm2, %v2103_v39  ;;  %v1156_v45 = vmax.f32 %v717_v40, 0.0  ;;  %1802 = vst.msk [vmem:[%s3586_s3 + $0x114] sm:$0xf] %vm1732_vm2, %v2163_v41  ;;  %v1216_v46 = vmax.f32 %v957_v42, 0.0 }
  0xfe   :  { %v719_v47 = vpop.f32.mrf.mxu0  ;;  %v959_v48 = vpop.f32.mrf.mxu1 }
  0xff   :  { %v2104_v49 = vpack.c.bf16 %v1156_v45, %v1156_v45  ;;  %v720_v50 = vadd.f32 %v2935_v55, %v719_v47  ;;  %v2164_v51 = vpack.c.bf16 %v1216_v46, %v1216_v46  ;;  %v960_v52 = vadd.f32 %v2935_v55, %v959_v48 }
 0x100   :  { %v2305_v53 = vpop.f32.mrf.mxu0  ;;  %v2425_v54 = vpop.f32.mrf.mxu1 }
 0x101   :  { %1743 = vst.msk [vmem:[%s3586_s3 + $0x28] sm:$0xf] %vm1732_vm2, %v2104_v49  ;;  %v1157_v56 = vmax.f32 %v720_v50, 0.0  ;;  %1803 = vst.msk [vmem:[%s3586_s3 + $0x118] sm:$0xf] %vm1732_vm2, %v2164_v51  ;;  %v1217_v57 = vmax.f32 %v960_v52, 0.0 }
 0x102   :  { %v724_v58 = vpop.f32.mrf.mxu0  ;;  %v964_v59 = vpop.f32.mrf.mxu1 }
 0x103   :  { %v2105_v60 = vpack.c.bf16 %v1157_v56, %v1157_v56  ;;  %v725_v61 = vadd.f32 %v2935_v55, %v724_v58  ;;  %v2165_v62 = vpack.c.bf16 %v1217_v57, %v1217_v57  ;;  %v965_v63 = vadd.f32 %v2935_v55, %v964_v59 }
 0x104   :  { %v2308_v1 = vpop.f32.mrf.mxu0  ;;  %v2428_v2 = vpop.f32.mrf.mxu1 }
 0x105   :  { %1744 = vst.msk [vmem:[%s3586_s3 + $0x2c] sm:$0xf] %vm1732_vm2, %v2105_v60  ;;  %v1158_v3 = vmax.f32 %v725_v61, 0.0  ;;  %1804 = vst.msk [vmem:[%s3586_s3 + $0x11c] sm:$0xf] %vm1732_vm2, %v2165_v62  ;;  %v1218_v4 = vmax.f32 %v965_v63, 0.0 }
 0x106   :  { %v727_v5 = vpop.f32.mrf.mxu0  ;;  %v967_v6 = vpop.f32.mrf.mxu1 }
 0x107   :  { %v2106_v7 = vpack.c.bf16 %v1158_v3, %v1158_v3  ;;  %v728_v8 = vadd.f32 %v2935_v55, %v727_v5  ;;  %v2166_v9 = vpack.c.bf16 %v1218_v4, %v1218_v4  ;;  %v968_v10 = vadd.f32 %v2935_v55, %v967_v6 }
 0x108   :  { %v2309_v11 = vpop.f32.mrf.mxu0  ;;  %v2429_v12 = vpop.f32.mrf.mxu1 }
 0x109   :  { %1745 = vst.msk [vmem:[%s3586_s3 + $0x30] sm:$0xf] %vm1732_vm2, %v2106_v7  ;;  %v1159_v13 = vmax.f32 %v728_v8, 0.0  ;;  %1805 = vst.msk [vmem:[%s3586_s3 + $0x120] sm:$0xf] %vm1732_vm2, %v2166_v9  ;;  %v1219_v14 = vmax.f32 %v968_v10, 0.0 }
 0x10a   :  { %v732_v15 = vpop.f32.mrf.mxu0  ;;  %v972_v16 = vpop.f32.mrf.mxu1 }
 0x10b   :  { %v2107_v17 = vpack.c.bf16 %v1159_v13, %v1159_v13  ;;  %v733_v18 = vadd.f32 %v2935_v55, %v732_v15  ;;  %v2167_v19 = vpack.c.bf16 %v1219_v14, %v1219_v14  ;;  %v973_v20 = vadd.f32 %v2935_v55, %v972_v16 }
 0x10c   :  { %v2312_v21 = vpop.f32.mrf.mxu0  ;;  %v2432_v22 = vpop.f32.mrf.mxu1 }
 0x10d   :  { %1746 = vst.msk [vmem:[%s3586_s3 + $0x34] sm:$0xf] %vm1732_vm2, %v2107_v17  ;;  %v1160_v23 = vmax.f32 %v733_v18, 0.0  ;;  %1806 = vst.msk [vmem:[%s3586_s3 + $0x124] sm:$0xf] %vm1732_vm2, %v2167_v19  ;;  %v1220_v24 = vmax.f32 %v973_v20, 0.0 }
 0x10e   :  { %v735_v25 = vpop.f32.mrf.mxu0  ;;  %v975_v26 = vpop.f32.mrf.mxu1 }
 0x10f   :  { %v2108_v27 = vpack.c.bf16 %v1160_v23, %v1160_v23  ;;  %v736_v28 = vadd.f32 %v2935_v55, %v735_v25  ;;  %v2168_v0 = vpack.c.bf16 %v1220_v24, %v1220_v24  ;;  %v976_v29 = vadd.f32 %v2935_v55, %v975_v26 }
 0x110   :  { %v2313_v30 = vpop.f32.mrf.mxu0  ;;  %v2433_v31 = vpop.f32.mrf.mxu1 }
 0x111   :  { %1747 = vst.msk [vmem:[%s3586_s3 + $0x38] sm:$0xf] %vm1732_vm2, %v2108_v27  ;;  %v1161_v32 = vmax.f32 %v736_v28, 0.0  ;;  %1807 = vst.msk [vmem:[%s3586_s3 + $0x128] sm:$0xf] %vm1732_vm2, %v2168_v0  ;;  %v1221_v33 = vmax.f32 %v976_v29, 0.0 }
 0x112   :  { %v740_v34 = vpop.f32.mrf.mxu0  ;;  %v980_v35 = vpop.f32.mrf.mxu1 }
 0x113   :  { %v2109_v36 = vpack.c.bf16 %v1161_v32, %v1161_v32  ;;  %v741_v37 = vadd.f32 %v2935_v55, %v740_v34  ;;  %v2169_v38 = vpack.c.bf16 %v1221_v33, %v1221_v33  ;;  %v981_v39 = vadd.f32 %v2935_v55, %v980_v35 }
 0x114   :  { %v2316_v40 = vpop.f32.mrf.mxu0  ;;  %v2436_v41 = vpop.f32.mrf.mxu1 }
 0x115   :  { %1748 = vst.msk [vmem:[%s3586_s3 + $0x3c] sm:$0xf] %vm1732_vm2, %v2109_v36  ;;  %v1162_v42 = vmax.f32 %v741_v37, 0.0  ;;  %1808 = vst.msk [vmem:[%s3586_s3 + $0x12c] sm:$0xf] %vm1732_vm2, %v2169_v38  ;;  %v1222_v43 = vmax.f32 %v981_v39, 0.0 }
 0x116   :  { %v743_v44 = vpop.f32.mrf.mxu0  ;;  %v983_v45 = vpop.f32.mrf.mxu1 }
 0x117   :  { %v2110_v46 = vpack.c.bf16 %v1162_v42, %v1162_v42  ;;  %v744_v47 = vadd.f32 %v2935_v55, %v743_v44  ;;  %v2170_v48 = vpack.c.bf16 %v1222_v43, %v1222_v43  ;;  %v984_v49 = vadd.f32 %v2935_v55, %v983_v45 }
 0x118   :  { %v2317_v50 = vpop.f32.mrf.mxu0  ;;  %v2437_v51 = vpop.f32.mrf.mxu1 }
 0x119   :  { %1749 = vst.msk [vmem:[%s3586_s3 + $0x40] sm:$0xf] %vm1732_vm2, %v2110_v46  ;;  %v1163_v52 = vmax.f32 %v744_v47, 0.0  ;;  %1809 = vst.msk [vmem:[%s3586_s3 + $0x130] sm:$0xf] %vm1732_vm2, %v2170_v48  ;;  %v1223_v53 = vmax.f32 %v984_v49, 0.0 }
 0x11a   :  { %v748_v54 = vpop.f32.mrf.mxu0  ;;  %v988_v56 = vpop.f32.mrf.mxu1 }
 0x11b   :  { %v2111_v57 = vpack.c.bf16 %v1163_v52, %v1163_v52  ;;  %v749_v58 = vadd.f32 %v2935_v55, %v748_v54  ;;  %v2171_v59 = vpack.c.bf16 %v1223_v53, %v1223_v53  ;;  %v989_v60 = vadd.f32 %v2935_v55, %v988_v56 }
 0x11c   :  { %v2320_v61 = vpop.f32.mrf.mxu0  ;;  %v2440_v62 = vpop.f32.mrf.mxu1 }
 0x11d   :  { %1750 = vst.msk [vmem:[%s3586_s3 + $0x44] sm:$0xf] %vm1732_vm2, %v2111_v57  ;;  %v1164_v63 = vmax.f32 %v749_v58, 0.0  ;;  %1810 = vst.msk [vmem:[%s3586_s3 + $0x134] sm:$0xf] %vm1732_vm2, %v2171_v59  ;;  %v1224_v1 = vmax.f32 %v989_v60, 0.0 }
 0x11e   :  { %v751_v2 = vpop.f32.mrf.mxu0  ;;  %v991_v3 = vpop.f32.mrf.mxu1 }
 0x11f   :  { %v2112_v4 = vpack.c.bf16 %v1164_v63, %v1164_v63  ;;  %v752_v5 = vadd.f32 %v2935_v55, %v751_v2  ;;  %v2172_v6 = vpack.c.bf16 %v1224_v1, %v1224_v1  ;;  %v992_v7 = vadd.f32 %v2935_v55, %v991_v3 }
 0x120   :  { %v2321_v8 = vpop.f32.mrf.mxu0  ;;  %v2441_v9 = vpop.f32.mrf.mxu1 }
 0x121   :  { %1751 = vst.msk [vmem:[%s3586_s3 + $0x48] sm:$0xf] %vm1732_vm2, %v2112_v4  ;;  %v1165_v10 = vmax.f32 %v752_v5, 0.0  ;;  %1811 = vst.msk [vmem:[%s3586_s3 + $0x138] sm:$0xf] %vm1732_vm2, %v2172_v6  ;;  %v1225_v11 = vmax.f32 %v992_v7, 0.0 }
 0x122   :  { %v756_v12 = vpop.f32.mrf.mxu0  ;;  %v996_v13 = vpop.f32.mrf.mxu1 }
 0x123   :  { %v2113_v14 = vpack.c.bf16 %v1165_v10, %v1165_v10  ;;  %v757_v15 = vadd.f32 %v2935_v55, %v756_v12  ;;  %v2173_v16 = vpack.c.bf16 %v1225_v11, %v1225_v11  ;;  %v997_v17 = vadd.f32 %v2935_v55, %v996_v13 }
 0x124   :  { %v2324_v18 = vpop.f32.mrf.mxu0  ;;  %v2444_v19 = vpop.f32.mrf.mxu1 }
 0x125   :  { %1752 = vst.msk [vmem:[%s3586_s3 + $0x4c] sm:$0xf] %vm1732_vm2, %v2113_v14  ;;  %v1166_v20 = vmax.f32 %v757_v15, 0.0  ;;  %1812 = vst.msk [vmem:[%s3586_s3 + $0x13c] sm:$0xf] %vm1732_vm2, %v2173_v16  ;;  %v1226_v21 = vmax.f32 %v997_v17, 0.0 }
 0x126   :  { %v759_v22 = vpop.f32.mrf.mxu0  ;;  %v999_v23 = vpop.f32.mrf.mxu1 }
 0x127   :  { %v2114_v24 = vpack.c.bf16 %v1166_v20, %v1166_v20  ;;  %v760_v25 = vadd.f32 %v2935_v55, %v759_v22  ;;  %v2174_v26 = vpack.c.bf16 %v1226_v21, %v1226_v21  ;;  %v1000_v27 = vadd.f32 %v2935_v55, %v999_v23 }
 0x128   :  { %v2325_v28 = vpop.f32.mrf.mxu0  ;;  %v2445_v0 = vpop.f32.mrf.mxu1 }
 0x129   :  { %1753 = vst.msk [vmem:[%s3586_s3 + $0x50] sm:$0xf] %vm1732_vm2, %v2114_v24  ;;  %v1167_v29 = vmax.f32 %v760_v25, 0.0  ;;  %1813 = vst.msk [vmem:[%s3586_s3 + $0x140] sm:$0xf] %vm1732_vm2, %v2174_v26  ;;  %v1227_v30 = vmax.f32 %v1000_v27, 0.0 }
 0x12a   :  { %v764_v31 = vpop.f32.mrf.mxu0  ;;  %v1004_v32 = vpop.f32.mrf.mxu1 }
 0x12b   :  { %v2115_v33 = vpack.c.bf16 %v1167_v29, %v1167_v29  ;;  %v765_v34 = vadd.f32 %v2935_v55, %v764_v31  ;;  %v2175_v35 = vpack.c.bf16 %v1227_v30, %v1227_v30  ;;  %v1005_v36 = vadd.f32 %v2935_v55, %v1004_v32 }
 0x12c   :  { %v2328_v37 = vpop.f32.mrf.mxu0  ;;  %v2448_v38 = vpop.f32.mrf.mxu1 }
 0x12d   :  { %1754 = vst.msk [vmem:[%s3586_s3 + $0x54] sm:$0xf] %vm1732_vm2, %v2115_v33  ;;  %v1168_v39 = vmax.f32 %v765_v34, 0.0  ;;  %1814 = vst.msk [vmem:[%s3586_s3 + $0x144] sm:$0xf] %vm1732_vm2, %v2175_v35  ;;  %v1228_v40 = vmax.f32 %v1005_v36, 0.0 }
 0x12e   :  { %v767_v41 = vpop.f32.mrf.mxu0  ;;  %v1007_v42 = vpop.f32.mrf.mxu1 }
 0x12f   :  { %v2116_v43 = vpack.c.bf16 %v1168_v39, %v1168_v39  ;;  %v768_v44 = vadd.f32 %v2935_v55, %v767_v41  ;;  %v2176_v45 = vpack.c.bf16 %v1228_v40, %v1228_v40  ;;  %v1008_v46 = vadd.f32 %v2935_v55, %v1007_v42 }
 0x130   :  { %v2329_v47 = vpop.f32.mrf.mxu0  ;;  %v2449_v48 = vpop.f32.mrf.mxu1 }
 0x131   :  { %1755 = vst.msk [vmem:[%s3586_s3 + $0x58] sm:$0xf] %vm1732_vm2, %v2116_v43  ;;  %v1169_v49 = vmax.f32 %v768_v44, 0.0  ;;  %1815 = vst.msk [vmem:[%s3586_s3 + $0x148] sm:$0xf] %vm1732_vm2, %v2176_v45  ;;  %v1229_v50 = vmax.f32 %v1008_v46, 0.0 }
 0x132   :  { %v772_v51 = vpop.f32.mrf.mxu0  ;;  %v1012_v52 = vpop.f32.mrf.mxu1 }
 0x133   :  { %v2117_v53 = vpack.c.bf16 %v1169_v49, %v1169_v49  ;;  %v773_v54 = vadd.f32 %v2935_v55, %v772_v51  ;;  %v2177_v56 = vpack.c.bf16 %v1229_v50, %v1229_v50  ;;  %v1013_v57 = vadd.f32 %v2935_v55, %v1012_v52 }
 0x134   :  { %v2332_v58 = vpop.f32.mrf.mxu0  ;;  %v2452_v59 = vpop.f32.mrf.mxu1 }
 0x135   :  { %1756 = vst.msk [vmem:[%s3586_s3 + $0x5c] sm:$0xf] %vm1732_vm2, %v2117_v53  ;;  %v1170_v60 = vmax.f32 %v773_v54, 0.0  ;;  %1816 = vst.msk [vmem:[%s3586_s3 + $0x14c] sm:$0xf] %vm1732_vm2, %v2177_v56  ;;  %v1230_v61 = vmax.f32 %v1013_v57, 0.0 }
 0x136   :  { %v775_v62 = vpop.f32.mrf.mxu0  ;;  %v1015_v63 = vpop.f32.mrf.mxu1 }
 0x137   :  { %v2118_v1 = vpack.c.bf16 %v1170_v60, %v1170_v60  ;;  %v776_v2 = vadd.f32 %v2935_v55, %v775_v62  ;;  %v2178_v3 = vpack.c.bf16 %v1230_v61, %v1230_v61  ;;  %v1016_v4 = vadd.f32 %v2935_v55, %v1015_v63 }
 0x138   :  { %v2333_v5 = vpop.f32.mrf.mxu0  ;;  %v2453_v6 = vpop.f32.mrf.mxu1 }
 0x139   :  { %1757 = vst.msk [vmem:[%s3586_s3 + $0x60] sm:$0xf] %vm1732_vm2, %v2118_v1  ;;  %v1171_v7 = vmax.f32 %v776_v2, 0.0  ;;  %1817 = vst.msk [vmem:[%s3586_s3 + $0x150] sm:$0xf] %vm1732_vm2, %v2178_v3  ;;  %v1231_v8 = vmax.f32 %v1016_v4, 0.0 }
 0x13a   :  { %v780_v9 = vpop.f32.mrf.mxu0  ;;  %v1020_v10 = vpop.f32.mrf.mxu1 }
 0x13b   :  { %v2119_v11 = vpack.c.bf16 %v1171_v7, %v1171_v7  ;;  %v781_v12 = vadd.f32 %v2935_v55, %v780_v9  ;;  %v2179_v13 = vpack.c.bf16 %v1231_v8, %v1231_v8  ;;  %v1021_v14 = vadd.f32 %v2935_v55, %v1020_v10 }
 0x13c   :  { %v2336_v15 = vpop.f32.mrf.mxu0  ;;  %v2456_v16 = vpop.f32.mrf.mxu1 }
 0x13d   :  { %1758 = vst.msk [vmem:[%s3586_s3 + $0x64] sm:$0xf] %vm1732_vm2, %v2119_v11  ;;  %v1172_v17 = vmax.f32 %v781_v12, 0.0  ;;  %1818 = vst.msk [vmem:[%s3586_s3 + $0x154] sm:$0xf] %vm1732_vm2, %v2179_v13  ;;  %v1232_v18 = vmax.f32 %v1021_v14, 0.0 }
 0x13e   :  { %v783_v19 = vpop.f32.mrf.mxu0  ;;  %v1023_v20 = vpop.f32.mrf.mxu1 }
 0x13f   :  { %v2120_v21 = vpack.c.bf16 %v1172_v17, %v1172_v17  ;;  %v784_v22 = vadd.f32 %v2935_v55, %v783_v19  ;;  %v2180_v23 = vpack.c.bf16 %v1232_v18, %v1232_v18  ;;  %v1024_v24 = vadd.f32 %v2935_v55, %v1023_v20 }
 0x140   :  { %v2337_v25 = vpop.f32.mrf.mxu0  ;;  %v2457_v26 = vpop.f32.mrf.mxu1 }
 0x141   :  { %1759 = vst.msk [vmem:[%s3586_s3 + $0x68] sm:$0xf] %vm1732_vm2, %v2120_v21  ;;  %v1173_v27 = vmax.f32 %v784_v22, 0.0  ;;  %1819 = vst.msk [vmem:[%s3586_s3 + $0x158] sm:$0xf] %vm1732_vm2, %v2180_v23  ;;  %v1233_v28 = vmax.f32 %v1024_v24, 0.0 }
 0x142   :  { %v788_v0 = vpop.f32.mrf.mxu0  ;;  %v1028_v29 = vpop.f32.mrf.mxu1 }
 0x143   :  { %v2121_v30 = vpack.c.bf16 %v1173_v27, %v1173_v27  ;;  %v789_v31 = vadd.f32 %v2935_v55, %v788_v0  ;;  %v2181_v32 = vpack.c.bf16 %v1233_v28, %v1233_v28  ;;  %v1029_v33 = vadd.f32 %v2935_v55, %v1028_v29 }
 0x144   :  { %v2340_v34 = vpop.f32.mrf.mxu0  ;;  %v2460_v35 = vpop.f32.mrf.mxu1 }
 0x145   :  { %1760 = vst.msk [vmem:[%s3586_s3 + $0x6c] sm:$0xf] %vm1732_vm2, %v2121_v30  ;;  %v1174_v36 = vmax.f32 %v789_v31, 0.0  ;;  %1820 = vst.msk [vmem:[%s3586_s3 + $0x15c] sm:$0xf] %vm1732_vm2, %v2181_v32  ;;  %v1234_v37 = vmax.f32 %v1029_v33, 0.0 }
 0x146   :  { %v791_v38 = vpop.f32.mrf.mxu0  ;;  %v1031_v39 = vpop.f32.mrf.mxu1 }
 0x147   :  { %v2122_v40 = vpack.c.bf16 %v1174_v36, %v1174_v36  ;;  %v792_v41 = vadd.f32 %v2935_v55, %v791_v38  ;;  %v2182_v42 = vpack.c.bf16 %v1234_v37, %v1234_v37  ;;  %v1032_v43 = vadd.f32 %v2935_v55, %v1031_v39 }
 0x148   :  { %v2341_v44 = vpop.f32.mrf.mxu0  ;;  %v2461_v45 = vpop.f32.mrf.mxu1 }
 0x149   :  { %1761 = vst.msk [vmem:[%s3586_s3 + $0x70] sm:$0xf] %vm1732_vm2, %v2122_v40  ;;  %v1175_v46 = vmax.f32 %v792_v41, 0.0  ;;  %1821 = vst.msk [vmem:[%s3586_s3 + $0x160] sm:$0xf] %vm1732_vm2, %v2182_v42  ;;  %v1235_v47 = vmax.f32 %v1032_v43, 0.0 }
 0x14a   :  { %v796_v48 = vpop.f32.mrf.mxu0  ;;  %v1036_v49 = vpop.f32.mrf.mxu1 }
 0x14b   :  { %v2123_v50 = vpack.c.bf16 %v1175_v46, %v1175_v46  ;;  %v797_v51 = vadd.f32 %v2935_v55, %v796_v48  ;;  %v2183_v52 = vpack.c.bf16 %v1235_v47, %v1235_v47  ;;  %v1037_v53 = vadd.f32 %v2935_v55, %v1036_v49 }
 0x14c   :  { %v2344_v54 = vpop.f32.mrf.mxu0  ;;  %v2464_v56 = vpop.f32.mrf.mxu1 }
 0x14d   :  { %1762 = vst.msk [vmem:[%s3586_s3 + $0x74] sm:$0xf] %vm1732_vm2, %v2123_v50  ;;  %v1176_v57 = vmax.f32 %v797_v51, 0.0  ;;  %1822 = vst.msk [vmem:[%s3586_s3 + $0x164] sm:$0xf] %vm1732_vm2, %v2183_v52  ;;  %v1236_v58 = vmax.f32 %v1037_v53, 0.0 }
 0x14e   :  { %v799_v59 = vpop.f32.mrf.mxu0  ;;  %v1039_v60 = vpop.f32.mrf.mxu1 }
 0x14f   :  { %v2124_v61 = vpack.c.bf16 %v1176_v57, %v1176_v57  ;;  %v800_v62 = vadd.f32 %v2935_v55, %v799_v59  ;;  %v2184_v63 = vpack.c.bf16 %v1236_v58, %v1236_v58  ;;  %v1040_v1 = vadd.f32 %v2935_v55, %v1039_v60 }
 0x150   :  { %v2345_v2 = vpop.f32.mrf.mxu0  ;;  %v2465_v3 = vpop.f32.mrf.mxu1 }
 0x151   :  { %1763 = vst.msk [vmem:[%s3586_s3 + $0x78] sm:$0xf] %vm1732_vm2, %v2124_v61  ;;  %v1177_v4 = vmax.f32 %v800_v62, 0.0  ;;  %1823 = vst.msk [vmem:[%s3586_s3 + $0x168] sm:$0xf] %vm1732_vm2, %v2184_v63  ;;  %v1237_v5 = vmax.f32 %v1040_v1, 0.0 }
 0x152   :  { %v804_v6 = vpop.f32.mrf.mxu0  ;;  %v1044_v7 = vpop.f32.mrf.mxu1 }
 0x153   :  { %v2125_v8 = vpack.c.bf16 %v1177_v4, %v1177_v4  ;;  %v805_v9 = vadd.f32 %v2935_v55, %v804_v6  ;;  %v2185_v10 = vpack.c.bf16 %v1237_v5, %v1237_v5  ;;  %v1045_v11 = vadd.f32 %v2935_v55, %v1044_v7 }
 0x154   :  { %v2348_v12 = vpop.f32.mrf.mxu0  ;;  %v2468_v13 = vpop.f32.mrf.mxu1 }
 0x155   :  { %1764 = vst.msk [vmem:[%s3586_s3 + $0x7c] sm:$0xf] %vm1732_vm2, %v2125_v8  ;;  %v1178_v14 = vmax.f32 %v805_v9, 0.0  ;;  %1824 = vst.msk [vmem:[%s3586_s3 + $0x16c] sm:$0xf] %vm1732_vm2, %v2185_v10  ;;  %v1238_v15 = vmax.f32 %v1045_v11, 0.0 }
 0x156   :  { %v807_v16 = vpop.f32.mrf.mxu0  ;;  %v1047_v17 = vpop.f32.mrf.mxu1 }
 0x157   :  { %v2126_v18 = vpack.c.bf16 %v1178_v14, %v1178_v14  ;;  %v808_v19 = vadd.f32 %v2935_v55, %v807_v16  ;;  %v2186_v20 = vpack.c.bf16 %v1238_v15, %v1238_v15  ;;  %v1048_v21 = vadd.f32 %v2935_v55, %v1047_v17 }
 0x158   :  { %v2349_v22 = vpop.f32.mrf.mxu0  ;;  %v2469_v23 = vpop.f32.mrf.mxu1 }
 0x159   :  { %1765 = vst.msk [vmem:[%s3586_s3 + $0x80] sm:$0xf] %vm1732_vm2, %v2126_v18  ;;  %v1179_v24 = vmax.f32 %v808_v19, 0.0  ;;  %1825 = vst.msk [vmem:[%s3586_s3 + $0x170] sm:$0xf] %vm1732_vm2, %v2186_v20  ;;  %v1239_v25 = vmax.f32 %v1048_v21, 0.0 }
 0x15a   :  { %v812_v26 = vpop.f32.mrf.mxu0  ;;  %v1052_v27 = vpop.f32.mrf.mxu1 }
 0x15b   :  { %v2127_v28 = vpack.c.bf16 %v1179_v24, %v1179_v24  ;;  %v813_v0 = vadd.f32 %v2935_v55, %v812_v26  ;;  %v2187_v29 = vpack.c.bf16 %v1239_v25, %v1239_v25  ;;  %v1053_v30 = vadd.f32 %v2935_v55, %v1052_v27 }
 0x15c   :  { %v2352_v31 = vpop.f32.mrf.mxu0  ;;  %v2472_v32 = vpop.f32.mrf.mxu1 }
 0x15d   :  { %1766 = vst.msk [vmem:[%s3586_s3 + $0x84] sm:$0xf] %vm1732_vm2, %v2127_v28  ;;  %v1180_v33 = vmax.f32 %v813_v0, 0.0  ;;  %1826 = vst.msk [vmem:[%s3586_s3 + $0x174] sm:$0xf] %vm1732_vm2, %v2187_v29  ;;  %v1240_v34 = vmax.f32 %v1053_v30, 0.0 }
 0x15e   :  { %v815_v35 = vpop.f32.mrf.mxu0  ;;  %v1055_v36 = vpop.f32.mrf.mxu1  ;;  %v3389_v28 = vld [vmem:[%s3585_s2] ss:$0 sm:$0xff] }
 0x15f   :  { %v2128_v37 = vpack.c.bf16 %v1180_v33, %v1180_v33  ;;  %v816_v38 = vadd.f32 %v2935_v55, %v815_v35  ;;  %v2188_v39 = vpack.c.bf16 %v1240_v34, %v1240_v34  ;;  %v1056_v40 = vadd.f32 %v2935_v55, %v1055_v36 }
 0x160   :  { %v2353_v41 = vpop.f32.mrf.mxu0  ;;  %v2473_v42 = vpop.f32.mrf.mxu1 }
 0x161   :  { %1767 = vst.msk [vmem:[%s3586_s3 + $0x88] sm:$0xf] %vm1732_vm2, %v2128_v37  ;;  %v1181_v43 = vmax.f32 %v816_v38, 0.0  ;;  %1827 = vst.msk [vmem:[%s3586_s3 + $0x178] sm:$0xf] %vm1732_vm2, %v2188_v39  ;;  %v1241_v44 = vmax.f32 %v1056_v40, 0.0 }
 0x162   :  { %v820_v45 = vpop.f32.mrf.mxu0  ;;  %v1060_v46 = vpop.f32.mrf.mxu1 }
 0x163   :  { %v2129_v47 = vpack.c.bf16 %v1181_v43, %v1181_v43  ;;  %v821_v48 = vadd.f32 %v2935_v55, %v820_v45  ;;  %v2189_v49 = vpack.c.bf16 %v1241_v44, %v1241_v44  ;;  %v1061_v50 = vadd.f32 %v2935_v55, %v1060_v46 }
 0x164   :  { %v2356_v51 = vpop.f32.mrf.mxu0  ;;  %v2476_v52 = vpop.f32.mrf.mxu1 }
 0x165   :  { %1768 = vst.msk [vmem:[%s3586_s3 + $0x8c] sm:$0xf] %vm1732_vm2, %v2129_v47  ;;  %v1182_v53 = vmax.f32 %v821_v48, 0.0  ;;  %1828 = vst.msk [vmem:[%s3586_s3 + $0x17c] sm:$0xf] %vm1732_vm2, %v2189_v49  ;;  %v1242_v54 = vmax.f32 %v1061_v50, 0.0 }
 0x166   :  { %v823_v56 = vpop.f32.mrf.mxu0  ;;  %v1063_v57 = vpop.f32.mrf.mxu1 }
 0x167   :  { %v2130_v58 = vpack.c.bf16 %v1182_v53, %v1182_v53  ;;  %v824_v59 = vadd.f32 %v2935_v55, %v823_v56  ;;  %v2190_v60 = vpack.c.bf16 %v1242_v54, %v1242_v54  ;;  %v1064_v61 = vadd.f32 %v2935_v55, %v1063_v57 }
 0x168   :  { %v2357_v62 = vpop.f32.mrf.mxu0  ;;  %v2477_v63 = vpop.f32.mrf.mxu1 }
 0x169   :  { %1769 = vst.msk [vmem:[%s3586_s3 + $0x90] sm:$0xf] %vm1732_vm2, %v2130_v58  ;;  %v1183_v1 = vmax.f32 %v824_v59, 0.0  ;;  %1829 = vst.msk [vmem:[%s3586_s3 + $0x180] sm:$0xf] %vm1732_vm2, %v2190_v60  ;;  %v1243_v2 = vmax.f32 %v1064_v61, 0.0 }
 0x16a   :  { %v828_v3 = vpop.f32.mrf.mxu0  ;;  %v1068_v4 = vpop.f32.mrf.mxu1 }
 0x16b   :  { %v2131_v5 = vpack.c.bf16 %v1183_v1, %v1183_v1  ;;  %v829_v6 = vadd.f32 %v2935_v55, %v828_v3  ;;  %v2191_v7 = vpack.c.bf16 %v1243_v2, %v1243_v2  ;;  %v1069_v8 = vadd.f32 %v2935_v55, %v1068_v4 }
 0x16c   :  { %v2360_v9 = vpop.f32.mrf.mxu0  ;;  %v2480_v10 = vpop.f32.mrf.mxu1 }
 0x16d   :  { %1770 = vst.msk [vmem:[%s3586_s3 + $0x94] sm:$0xf] %vm1732_vm2, %v2131_v5  ;;  %v1184_v11 = vmax.f32 %v829_v6, 0.0  ;;  %1830 = vst.msk [vmem:[%s3586_s3 + $0x184] sm:$0xf] %vm1732_vm2, %v2191_v7  ;;  %v1244_v12 = vmax.f32 %v1069_v8, 0.0 }
 0x16e   :  { %v831_v13 = vpop.f32.mrf.mxu0  ;;  %v1071_v14 = vpop.f32.mrf.mxu1 }
 0x16f   :  { %v2132_v15 = vpack.c.bf16 %v1184_v11, %v1184_v11  ;;  %v832_v16 = vadd.f32 %v2935_v55, %v831_v13  ;;  %v2192_v17 = vpack.c.bf16 %v1244_v12, %v1244_v12  ;;  %v1072_v18 = vadd.f32 %v2935_v55, %v1071_v14 }
 0x170   :  { %v2361_v19 = vpop.f32.mrf.mxu0  ;;  %v2481_v20 = vpop.f32.mrf.mxu1 }
 0x171   :  { %1771 = vst.msk [vmem:[%s3586_s3 + $0x98] sm:$0xf] %vm1732_vm2, %v2132_v15  ;;  %v1185_v21 = vmax.f32 %v832_v16, 0.0  ;;  %1831 = vst.msk [vmem:[%s3586_s3 + $0x188] sm:$0xf] %vm1732_vm2, %v2192_v17  ;;  %v1245_v22 = vmax.f32 %v1072_v18, 0.0 }
 0x172   :  { %v836_v23 = vpop.f32.mrf.mxu0  ;;  %v1076_v24 = vpop.f32.mrf.mxu1 }
 0x173   :  { %v2133_v25 = vpack.c.bf16 %v1185_v21, %v1185_v21  ;;  %v837_v26 = vadd.f32 %v2935_v55, %v836_v23  ;;  %v2193_v27 = vpack.c.bf16 %v1245_v22, %v1245_v22  ;;  %v1077_v0 = vadd.f32 %v3389_v28, %v1076_v24 }
 0x174   :  { %v2364_v29 = vpop.f32.mrf.mxu0  ;;  %v2484_v30 = vpop.f32.mrf.mxu1 }
 0x175   :  { %1772 = vst.msk [vmem:[%s3586_s3 + $0x9c] sm:$0xf] %vm1732_vm2, %v2133_v25  ;;  %v1186_v31 = vmax.f32 %v837_v26, 0.0  ;;  %1832 = vst.msk [vmem:[%s3586_s3 + $0x18c] sm:$0xf] %vm1732_vm2, %v2193_v27  ;;  %v1246_v55 = vmax.f32 %v1077_v0, 0.0 }
 0x176   :  { %v839_v32 = vpop.f32.mrf.mxu0  ;;  %v1079_v33 = vpop.f32.mrf.mxu1 }
 0x177   :  { %v2134_v34 = vpack.c.bf16 %v1186_v31, %v1186_v31  ;;  %v840_v35 = vadd.f32 %v3389_v28, %v839_v32  ;;  %v2194_v36 = vpack.c.bf16 %v1246_v55, %v1246_v55  ;;  %v1080_v37 = vadd.f32 %v3389_v28, %v1079_v33 }
 0x178   :  { %v2365_v38 = vpop.f32.mrf.mxu0  ;;  %v2485_v39 = vpop.f32.mrf.mxu1 }
 0x179   :  { %1773 = vst.msk [vmem:[%s3586_s3 + $0xa0] sm:$0xf] %vm1732_vm2, %v2134_v34  ;;  %v1187_v40 = vmax.f32 %v840_v35, 0.0  ;;  %1833 = vst.msk [vmem:[%s3586_s3 + $0x190] sm:$0xf] %vm1732_vm2, %v2194_v36  ;;  %v1247_v41 = vmax.f32 %v1080_v37, 0.0 }
 0x17a   :  { %v844_v42 = vpop.f32.mrf.mxu0  ;;  %v1084_v43 = vpop.f32.mrf.mxu1 }
 0x17b   :  { %v2135_v44 = vpack.c.bf16 %v1187_v40, %v1187_v40  ;;  %v845_v45 = vadd.f32 %v3389_v28, %v844_v42  ;;  %v2195_v46 = vpack.c.bf16 %v1247_v41, %v1247_v41  ;;  %v1085_v47 = vadd.f32 %v3389_v28, %v1084_v43 }
 0x17c   :  { %v2368_v48 = vpop.f32.mrf.mxu0  ;;  %v2488_v49 = vpop.f32.mrf.mxu1 }
 0x17d   :  { %1774 = vst.msk [vmem:[%s3586_s3 + $0xa4] sm:$0xf] %vm1732_vm2, %v2135_v44  ;;  %v1188_v50 = vmax.f32 %v845_v45, 0.0  ;;  %1834 = vst.msk [vmem:[%s3586_s3 + $0x194] sm:$0xf] %vm1732_vm2, %v2195_v46  ;;  %v1248_v51 = vmax.f32 %v1085_v47, 0.0 }
 0x17e   :  { %v847_v52 = vpop.f32.mrf.mxu0  ;;  %v1087_v53 = vpop.f32.mrf.mxu1 }
 0x17f   :  { %v2136_v54 = vpack.c.bf16 %v1188_v50, %v1188_v50  ;;  %v848_v56 = vadd.f32 %v3389_v28, %v847_v52  ;;  %v2196_v57 = vpack.c.bf16 %v1248_v51, %v1248_v51  ;;  %v1088_v58 = vadd.f32 %v3389_v28, %v1087_v53 }
 0x180   :  { %v2369_v59 = vpop.f32.mrf.mxu0  ;;  %v2489_v60 = vpop.f32.mrf.mxu1 }
 0x181   :  { %1775 = vst.msk [vmem:[%s3586_s3 + $0xa8] sm:$0xf] %vm1732_vm2, %v2136_v54  ;;  %v1189_v61 = vmax.f32 %v848_v56, 0.0  ;;  %1835 = vst.msk [vmem:[%s3586_s3 + $0x198] sm:$0xf] %vm1732_vm2, %v2196_v57  ;;  %v1249_v62 = vmax.f32 %v1088_v58, 0.0 }
 0x182   :  { %v852_v63 = vpop.f32.mrf.mxu0  ;;  %v1092_v1 = vpop.f32.mrf.mxu1 }
 0x183   :  { %v2137_v2 = vpack.c.bf16 %v1189_v61, %v1189_v61  ;;  %v853_v3 = vadd.f32 %v3389_v28, %v852_v63  ;;  %v2197_v4 = vpack.c.bf16 %v1249_v62, %v1249_v62  ;;  %v1093_v5 = vadd.f32 %v3389_v28, %v1092_v1 }
 0x184   :  { %v2372_v6 = vpop.f32.mrf.mxu0  ;;  %v2492_v7 = vpop.f32.mrf.mxu1 }
 0x185   :  { %1776 = vst.msk [vmem:[%s3586_s3 + $0xac] sm:$0xf] %vm1732_vm2, %v2137_v2  ;;  %v1190_v8 = vmax.f32 %v853_v3, 0.0  ;;  %1836 = vst.msk [vmem:[%s3586_s3 + $0x19c] sm:$0xf] %vm1732_vm2, %v2197_v4  ;;  %v1250_v9 = vmax.f32 %v1093_v5, 0.0 }
 0x186   :  { %v855_v10 = vpop.f32.mrf.mxu0  ;;  %v1095_v11 = vpop.f32.mrf.mxu1 }
 0x187   :  { %v2138_v12 = vpack.c.bf16 %v1190_v8, %v1190_v8  ;;  %v856_v13 = vadd.f32 %v3389_v28, %v855_v10  ;;  %v2198_v14 = vpack.c.bf16 %v1250_v9, %v1250_v9  ;;  %v1096_v15 = vadd.f32 %v3389_v28, %v1095_v11 }
 0x188   :  { %v2373_v16 = vpop.f32.mrf.mxu0  ;;  %v2493_v17 = vpop.f32.mrf.mxu1 }
 0x189   :  { %1777 = vst.msk [vmem:[%s3586_s3 + $0xb0] sm:$0xf] %vm1732_vm2, %v2138_v12  ;;  %v1191_v18 = vmax.f32 %v856_v13, 0.0  ;;  %1837 = vst.msk [vmem:[%s3586_s3 + $0x1a0] sm:$0xf] %vm1732_vm2, %v2198_v14  ;;  %v1251_v19 = vmax.f32 %v1096_v15, 0.0 }
 0x18a   :  { %v860_v20 = vpop.f32.mrf.mxu0  ;;  %v1100_v21 = vpop.f32.mrf.mxu1 }
 0x18b   :  { %v2139_v22 = vpack.c.bf16 %v1191_v18, %v1191_v18  ;;  %v861_v23 = vadd.f32 %v3389_v28, %v860_v20  ;;  %v2199_v24 = vpack.c.bf16 %v1251_v19, %v1251_v19  ;;  %v1101_v25 = vadd.f32 %v3389_v28, %v1100_v21 }
 0x18c   :  { %v2376_v26 = vpop.f32.mrf.mxu0  ;;  %v2496_v27 = vpop.f32.mrf.mxu1 }
 0x18d   :  { %1778 = vst.msk [vmem:[%s3586_s3 + $0xb4] sm:$0xf] %vm1732_vm2, %v2139_v22  ;;  %v1192_v0 = vmax.f32 %v861_v23, 0.0  ;;  %1838 = vst.msk [vmem:[%s3586_s3 + $0x1a4] sm:$0xf] %vm1732_vm2, %v2199_v24  ;;  %v1252_v29 = vmax.f32 %v1101_v25, 0.0 }
 0x18e   :  { %v863_v30 = vpop.f32.mrf.mxu0  ;;  %v1103_v31 = vpop.f32.mrf.mxu1 }
 0x18f   :  { %v2140_v55 = vpack.c.bf16 %v1192_v0, %v1192_v0  ;;  %v864_v32 = vadd.f32 %v3389_v28, %v863_v30  ;;  %v2200_v33 = vpack.c.bf16 %v1252_v29, %v1252_v29  ;;  %v1104_v34 = vadd.f32 %v3389_v28, %v1103_v31 }
 0x190   :  { %v2377_v35 = vpop.f32.mrf.mxu0  ;;  %v2497_v36 = vpop.f32.mrf.mxu1 }
 0x191   :  { %1779 = vst.msk [vmem:[%s3586_s3 + $0xb8] sm:$0xf] %vm1732_vm2, %v2140_v55  ;;  %v1193_v37 = vmax.f32 %v864_v32, 0.0  ;;  %1839 = vst.msk [vmem:[%s3586_s3 + $0x1a8] sm:$0xf] %vm1732_vm2, %v2200_v33  ;;  %v1253_v38 = vmax.f32 %v1104_v34, 0.0 }
 0x192   :  { %v868_v39 = vpop.f32.mrf.mxu0  ;;  %v1108_v40 = vpop.f32.mrf.mxu1 }
 0x193   :  { %v2141_v41 = vpack.c.bf16 %v1193_v37, %v1193_v37  ;;  %v869_v42 = vadd.f32 %v3389_v28, %v868_v39  ;;  %v2201_v43 = vpack.c.bf16 %v1253_v38, %v1253_v38  ;;  %v1109_v44 = vadd.f32 %v3389_v28, %v1108_v40 }
 0x194   :  { %v2380_v45 = vpop.f32.mrf.mxu0  ;;  %v2500_v46 = vpop.f32.mrf.mxu1 }
 0x195   :  { %1780 = vst.msk [vmem:[%s3586_s3 + $0xbc] sm:$0xf] %vm1732_vm2, %v2141_v41  ;;  %v1194_v47 = vmax.f32 %v869_v42, 0.0  ;;  %1840 = vst.msk [vmem:[%s3586_s3 + $0x1ac] sm:$0xf] %vm1732_vm2, %v2201_v43  ;;  %v1254_v48 = vmax.f32 %v1109_v44, 0.0 }
 0x196   :  { %v871_v49 = vpop.f32.mrf.mxu0  ;;  %v1111_v50 = vpop.f32.mrf.mxu1 }
 0x197   :  { %v2142_v51 = vpack.c.bf16 %v1194_v47, %v1194_v47  ;;  %v872_v52 = vadd.f32 %v3389_v28, %v871_v49  ;;  %v2202_v53 = vpack.c.bf16 %v1254_v48, %v1254_v48  ;;  %v1112_v54 = vadd.f32 %v3389_v28, %v1111_v50 }
 0x198   :  { %v2381_v56 = vpop.f32.mrf.mxu0  ;;  %v2501_v57 = vpop.f32.mrf.mxu1 }
 0x199   :  { %1781 = vst.msk [vmem:[%s3586_s3 + $0xc0] sm:$0xf] %vm1732_vm2, %v2142_v51  ;;  %v1195_v58 = vmax.f32 %v872_v52, 0.0  ;;  %1841 = vst.msk [vmem:[%s3586_s3 + $0x1b0] sm:$0xf] %vm1732_vm2, %v2202_v53  ;;  %v1255_v59 = vmax.f32 %v1112_v54, 0.0 }
 0x19a   :  { %v876_v60 = vpop.f32.mrf.mxu0  ;;  %v1116_v61 = vpop.f32.mrf.mxu1 }
 0x19b   :  { %v2143_v62 = vpack.c.bf16 %v1195_v58, %v1195_v58  ;;  %v877_v63 = vadd.f32 %v3389_v28, %v876_v60  ;;  %v2203_v1 = vpack.c.bf16 %v1255_v59, %v1255_v59  ;;  %v1117_v2 = vadd.f32 %v3389_v28, %v1116_v61 }
 0x19c   :  { %v2384_v3 = vpop.f32.mrf.mxu0  ;;  %v2504_v4 = vpop.f32.mrf.mxu1 }
 0x19d   :  { %1782 = vst.msk [vmem:[%s3586_s3 + $0xc4] sm:$0xf] %vm1732_vm2, %v2143_v62  ;;  %v1196_v5 = vmax.f32 %v877_v63, 0.0  ;;  %1842 = vst.msk [vmem:[%s3586_s3 + $0x1b4] sm:$0xf] %vm1732_vm2, %v2203_v1  ;;  %v1256_v6 = vmax.f32 %v1117_v2, 0.0 }
 0x19e   :  { %v879_v7 = vpop.f32.mrf.mxu0  ;;  %v1119_v8 = vpop.f32.mrf.mxu1 }
 0x19f   :  { %v2144_v9 = vpack.c.bf16 %v1196_v5, %v1196_v5  ;;  %v880_v10 = vadd.f32 %v3389_v28, %v879_v7  ;;  %v2204_v11 = vpack.c.bf16 %v1256_v6, %v1256_v6  ;;  %v1120_v12 = vadd.f32 %v3389_v28, %v1119_v8 }
 0x1a0   :  { %v2385_v13 = vpop.f32.mrf.mxu0  ;;  %v2505_v14 = vpop.f32.mrf.mxu1 }
 0x1a1   :  { %1783 = vst.msk [vmem:[%s3586_s3 + $0xc8] sm:$0xf] %vm1732_vm2, %v2144_v9  ;;  %v1197_v15 = vmax.f32 %v880_v10, 0.0  ;;  %1843 = vst.msk [vmem:[%s3586_s3 + $0x1b8] sm:$0xf] %vm1732_vm2, %v2204_v11  ;;  %v1257_v16 = vmax.f32 %v1120_v12, 0.0 }
 0x1a2   :  { %v884_v17 = vpop.f32.mrf.mxu0  ;;  %v1124_v18 = vpop.f32.mrf.mxu1 }
 0x1a3   :  { %v2145_v19 = vpack.c.bf16 %v1197_v15, %v1197_v15  ;;  %v885_v20 = vadd.f32 %v3389_v28, %v884_v17  ;;  %v2205_v21 = vpack.c.bf16 %v1257_v16, %v1257_v16  ;;  %v1125_v22 = vadd.f32 %v3389_v28, %v1124_v18 }
 0x1a4   :  { %v2388_v23 = vpop.f32.mrf.mxu0  ;;  %v2508_v24 = vpop.f32.mrf.mxu1 }
 0x1a5   :  { %1784 = vst.msk [vmem:[%s3586_s3 + $0xcc] sm:$0xf] %vm1732_vm2, %v2145_v19  ;;  %v1198_v25 = vmax.f32 %v885_v20, 0.0  ;;  %1844 = vst.msk [vmem:[%s3586_s3 + $0x1bc] sm:$0xf] %vm1732_vm2, %v2205_v21  ;;  %v1258_v26 = vmax.f32 %v1125_v22, 0.0 }
 0x1a6   :  { %v887_v27 = vpop.f32.mrf.mxu0  ;;  %v1127_v0 = vpop.f32.mrf.mxu1 }
 0x1a7   :  { %v2146_v29 = vpack.c.bf16 %v1198_v25, %v1198_v25  ;;  %v888_v30 = vadd.f32 %v3389_v28, %v887_v27  ;;  %v2206_v31 = vpack.c.bf16 %v1258_v26, %v1258_v26  ;;  %v1128_v55 = vadd.f32 %v3389_v28, %v1127_v0 }
 0x1a8   :  { %v2389_v32 = vpop.f32.mrf.mxu0  ;;  %v2509_v33 = vpop.f32.mrf.mxu1 }
 0x1a9   :  { %1785 = vst.msk [vmem:[%s3586_s3 + $0xd0] sm:$0xf] %vm1732_vm2, %v2146_v29  ;;  %v1199_v34 = vmax.f32 %v888_v30, 0.0  ;;  %1845 = vst.msk [vmem:[%s3586_s3 + $0x1c0] sm:$0xf] %vm1732_vm2, %v2206_v31  ;;  %v1259_v35 = vmax.f32 %v1128_v55, 0.0 }
 0x1aa   :  { %v892_v36 = vpop.f32.mrf.mxu0  ;;  %v1132_v37 = vpop.f32.mrf.mxu1 }
 0x1ab   :  { %v2147_v38 = vpack.c.bf16 %v1199_v34, %v1199_v34  ;;  %v893_v39 = vadd.f32 %v3389_v28, %v892_v36  ;;  %v2207_v40 = vpack.c.bf16 %v1259_v35, %v1259_v35  ;;  %v1133_v41 = vadd.f32 %v3389_v28, %v1132_v37 }
 0x1ac   :  { %v2392_v42 = vpop.f32.mrf.mxu0  ;;  %v2512_v43 = vpop.f32.mrf.mxu1 }
 0x1ad   :  { %1786 = vst.msk [vmem:[%s3586_s3 + $0xd4] sm:$0xf] %vm1732_vm2, %v2147_v38  ;;  %v1200_v44 = vmax.f32 %v893_v39, 0.0  ;;  %1846 = vst.msk [vmem:[%s3586_s3 + $0x1c4] sm:$0xf] %vm1732_vm2, %v2207_v40  ;;  %v1260_v45 = vmax.f32 %v1133_v41, 0.0 }
 0x1ae   :  { %v895_v46 = vpop.f32.mrf.mxu0  ;;  %v1135_v47 = vpop.f32.mrf.mxu1 }
 0x1af   :  { %v2148_v48 = vpack.c.bf16 %v1200_v44, %v1200_v44  ;;  %v896_v49 = vadd.f32 %v3389_v28, %v895_v46  ;;  %v2208_v50 = vpack.c.bf16 %v1260_v45, %v1260_v45  ;;  %v1136_v51 = vadd.f32 %v3389_v28, %v1135_v47 }
 0x1b0   :  { %v2393_v52 = vpop.f32.mrf.mxu0  ;;  %v2513_v53 = vpop.f32.mrf.mxu1 }
 0x1b1   :  { %1787 = vst.msk [vmem:[%s3586_s3 + $0xd8] sm:$0xf] %vm1732_vm2, %v2148_v48  ;;  %v1201_v54 = vmax.f32 %v896_v49, 0.0  ;;  %1847 = vst.msk [vmem:[%s3586_s3 + $0x1c8] sm:$0xf] %vm1732_vm2, %v2208_v50  ;;  %v1261_v56 = vmax.f32 %v1136_v51, 0.0 }
 0x1b2   :  { %v900_v57 = vpop.f32.mrf.mxu0  ;;  %v1140_v58 = vpop.f32.mrf.mxu1 }
 0x1b3   :  { %v2149_v59 = vpack.c.bf16 %v1201_v54, %v1201_v54  ;;  %v901_v60 = vadd.f32 %v3389_v28, %v900_v57  ;;  %v2209_v61 = vpack.c.bf16 %v1261_v56, %v1261_v56  ;;  %v1141_v62 = vadd.f32 %v3389_v28, %v1140_v58 }
 0x1b4   :  { %v2396_v63 = vpop.f32.mrf.mxu0  ;;  %v2516_v1 = vpop.f32.mrf.mxu1 }
 0x1b5   :  { %1788 = vst.msk [vmem:[%s3586_s3 + $0xdc] sm:$0xf] %vm1732_vm2, %v2149_v59  ;;  %v1202_v2 = vmax.f32 %v901_v60, 0.0  ;;  %1848 = vst.msk [vmem:[%s3586_s3 + $0x1cc] sm:$0xf] %vm1732_vm2, %v2209_v61  ;;  %v1262_v3 = vmax.f32 %v1141_v62, 0.0 }
 0x1b6   :  { %v903_v4 = vpop.f32.mrf.mxu0  ;;  %v1143_v5 = vpop.f32.mrf.mxu1 }
 0x1b7   :  { %v2150_v6 = vpack.c.bf16 %v1202_v2, %v1202_v2  ;;  %v904_v7 = vadd.f32 %v3389_v28, %v903_v4  ;;  %v2210_v8 = vpack.c.bf16 %v1262_v3, %v1262_v3 }
 0x1b8   :  { %v2397_v9 = vpop.f32.mrf.mxu0  ;;  %v2517_v10 = vpop.f32.mrf.mxu1 }
 0x1b9   :  { %1789 = vst.msk [vmem:[%s3586_s3 + $0xe0] sm:$0xf] %vm1732_vm2, %v2150_v6  ;;  %v1203_v11 = vmax.f32 %v904_v7, 0.0  ;;  %1849 = vst.msk [vmem:[%s3586_s3 + $0x1d0] sm:$0xf] %vm1732_vm2, %v2210_v8 }
 0x1ba   :  { %v908_v12 = vpop.f32.mrf.mxu0 }
 0x1bb   :  { %v2151_v13 = vpack.c.bf16 %v1203_v11, %v1203_v11  ;;  %v909_v14 = vadd.f32 %v3389_v28, %v908_v12 }
 0x1bc   :  { %v2400_v15 = vpop.f32.mrf.mxu0 }
 0x1bd   :  { %1790 = vst.msk [vmem:[%s3586_s3 + $0xe4] sm:$0xf] %vm1732_vm2, %v2151_v13  ;;  %v1204_v16 = vmax.f32 %v909_v14, 0.0 }
 0x1be   :  { %v911_v17 = vpop.f32.mrf.mxu0 }
 0x1bf   :  { %v2152_v18 = vpack.c.bf16 %v1204_v16, %v1204_v16  ;;  %v912_v19 = vadd.f32 %v3389_v28, %v911_v17 }
 0x1c0   :  { %v2401_v20 = vpop.f32.mrf.mxu0 }
 0x1c1   :  { %1791 = vst.msk [vmem:[%s3586_s3 + $0xe8] sm:$0xf] %vm1732_vm2, %v2152_v18  ;;  %v1205_v21 = vmax.f32 %v912_v19, 0.0 }
 0x1c3   :  { %v2153_v22 = vpack.c.bf16 %v1205_v21, %v1205_v21 }
 0x1c5   :  { %1792 = vst.msk [vmem:[%s3586_s3 + $0xec] sm:$0xf] %vm1732_vm2, %v2153_v22 }

// kernel: dqn_forward.5
= control target key start
LH: loop header
LB: loop body
LE: loop exit
PB: predicated region body
PF: predicated region fallthrough
CT: control target
= control target key end

     0   :  { %vm944_vm0 = vcmask 519168   ;;  %s1767_s1 = inlined_call_operand.vmem [shape: bf16[512,64], index: 1, kind: input, shape index: {}]   ;;  %s1768_s0 = inlined_call_operand.vmem [shape: bf16[192,512], index: 0, kind: input, shape index: {}]   ;;  %s1769_s2 = inlined_call_operand.vmem [shape: f32[1,64], index: 2, kind: input, shape index: {}]   ;;  %s1770_s3 = inlined_call_operand.vmem [shape: bf16[192,64], index: 3, kind: output, shape index: {}]  }
   0x1   :  { %v1278_v0 = vld [vmem:[%s1767_s1 + $0x78] sm:$0xff]   ;;  %v1282_v4 = vld [vmem:[%s1767_s1 + $0x70] sm:$0xff]   ;;  %v1286_v8 = vld [vmem:[%s1767_s1 + $0x68] sm:$0xff]  }
   0x2   :  { %v1279_v1 = vld [vmem:[%s1767_s1 + $0xf8] sm:$0xff]   ;;  %1102 = vmatprep.subr.bf16.mxu0 %v1278_v0  ;;  %v1283_v5 = vld [vmem:[%s1767_s1 + $0xf0] sm:$0xff]   ;;  %v1287_v9 = vld [vmem:[%s1767_s1 + $0xe8] sm:$0xff]  }
   0x3   :  { %v1280_v2 = vld [vmem:[%s1767_s1 + $0x38] sm:$0xff]   ;;  %1190 = vmatprep.subr.bf16.mxu1 %v1279_v1  ;;  %v1284_v6 = vld [vmem:[%s1767_s1 + $0x30] sm:$0xff]   ;;  %v1288_v10 = vld [vmem:[%s1767_s1 + $0x28] sm:$0xff]  }
   0x4   :  { %v1281_v3 = vld [vmem:[%s1767_s1 + $0xb8] sm:$0xff]   ;;  %1103 = vmatpush3.bf16.msra.mxu0 %v1280_v2  ;;  %v1285_v7 = vld [vmem:[%s1767_s1 + $0xb0] sm:$0xff]   ;;  %v1289_v11 = vld [vmem:[%s1767_s1 + $0xa8] sm:$0xff]  }
   0x5   :  { %1191 = vmatpush3.bf16.msra.mxu1 %v1281_v3  ;;  %1104 = vmatprep.subr.bf16.mxu0 %v1282_v4  ;;  %v1290_v12 = vld [vmem:[%s1767_s1 + $0x60] sm:$0xff]   ;;  %v1294_v16 = vld [vmem:[%s1767_s1 + $0x58] sm:$0xff]   ;;  %v1298_v20 = vld [vmem:[%s1767_s1 + $0x50] sm:$0xff]  }
   0x6   :  { %1192 = vmatprep.subr.bf16.mxu1 %v1283_v5  ;;  %v1291_v13 = vld [vmem:[%s1767_s1 + $0xe0] sm:$0xff]   ;;  %v1295_v17 = vld [vmem:[%s1767_s1 + $0xd8] sm:$0xff]   ;;  %v1299_v21 = vld [vmem:[%s1767_s1 + $0xd0] sm:$0xff]  }
   0x7   :  { %v1292_v14 = vld [vmem:[%s1767_s1 + $0x20] sm:$0xff]   ;;  %v1296_v18 = vld [vmem:[%s1767_s1 + $0x18] sm:$0xff]   ;;  %v1300_v22 = vld [vmem:[%s1767_s1 + $0x10] sm:$0xff]  }
   0x8   :  { %1105 = vmatpush3.bf16.msra.mxu0 %v1284_v6  ;;  %v1293_v15 = vld [vmem:[%s1767_s1 + $0xa0] sm:$0xff]   ;;  %v1297_v19 = vld [vmem:[%s1767_s1 + $0x98] sm:$0xff]   ;;  %v1301_v23 = vld [vmem:[%s1767_s1 + $0x90] sm:$0xff]  }
   0x9   :  { %1193 = vmatpush3.bf16.msra.mxu1 %v1285_v7  ;;  %1106 = vmatprep.subr.bf16.mxu0 %v1286_v8  ;;  %v1302_v24 = vld [vmem:[%s1767_s1 + $0x48] sm:$0xff]   ;;  %v1306_v28 = vld [vmem:[%s1767_s1 + $0x40] sm:$0xff]  }
   0xa   :  { %1194 = vmatprep.subr.bf16.mxu1 %v1287_v9  ;;  %v1303_v25 = vld [vmem:[%s1767_s1 + $0xc8] sm:$0xff]   ;;  %v1307_v29 = vld [vmem:[%s1767_s1 + $0xc0] sm:$0xff]  }
   0xb   :  { %v1304_v26 = vld [vmem:[%s1767_s1 + $0x8] sm:$0xff]   ;;  %v1308_v30 = vld [vmem:[%s1767_s1] sm:$0xff]  }
   0xc   :  { %1107 = vmatpush3.bf16.msra.mxu0 %v1288_v10  ;;  %v1305_v27 = vld [vmem:[%s1767_s1 + $0x88] sm:$0xff]   ;;  %v1309_v31 = vld [vmem:[%s1767_s1 + $0x80] sm:$0xff]  }
   0xd   :  { %1195 = vmatpush3.bf16.msra.mxu1 %v1289_v11  ;;  %1108 = vmatprep.subr.bf16.mxu0 %v1290_v12  ;;  %v1310_v32 = vld [vmem:[%s1768_s0] ss:$16 sps:$4 sm:$0xff]   ;;  %v1312_v33 = vld [vmem:[%s1768_s0 + $0x4] ss:$16 sps:$4 sm:$0xff]   ;;  %v1313_v34 = vld [vmem:[%s1768_s0 + $0x8] ss:$16 sps:$4 sm:$0xff]  }
   0xe   :  { %1196 = vmatprep.subr.bf16.mxu1 %v1291_v13  ;;  %v1315_v35 = vld [vmem:[%s1768_s0 + $0xc] ss:$16 sps:$4 sm:$0xff]   ;;  %598 = vmatprep.mubr.bf16.mxu0 %v1312_v33  ;;  %v1316_v36 = vld [vmem:[%s1768_s0 + $0x24] ss:$16 sps:$4 sm:$0xff]   ;;  %v1320_v38 = vld [vmem:[%s1768_s0 + $0x20] ss:$16 sps:$4 sm:$0xff]  }
   0xf   :  { %727 = vmatprep.mubr.bf16.mxu1 %v1315_v35  ;;  %v1318_v37 = vld [vmem:[%s1768_s0 + $0x2c] ss:$16 sps:$4 sm:$0xff]   ;;  %v1321_v39 = vld [vmem:[%s1768_s0 + $0x28] ss:$16 sps:$4 sm:$0xff]   ;;  %v1322_v40 = vld [vmem:[%s1768_s0 + $0x44] ss:$16 sps:$4 sm:$0xff]  }
  0x10   :  { %1109 = vmatpush3.bf16.msra.mxu0 %v1292_v14  ;;  %v1324_v41 = vld [vmem:[%s1768_s0 + $0x4c] ss:$16 sps:$4 sm:$0xff]   ;;  %v1326_v42 = vld [vmem:[%s1768_s0 + $0x40] ss:$16 sps:$4 sm:$0xff]   ;;  %v1327_v43 = vld [vmem:[%s1768_s0 + $0x48] ss:$16 sps:$4 sm:$0xff]  }
  0x11   :  { %1197 = vmatpush3.bf16.msra.mxu1 %v1293_v15  ;;  %1110 = vmatprep.subr.bf16.mxu0 %v1294_v16  ;;  %v1328_v44 = vld [vmem:[%s1768_s0 + $0x64] ss:$16 sps:$4 sm:$0xff]   ;;  %v1330_v45 = vld [vmem:[%s1768_s0 + $0x6c] ss:$16 sps:$4 sm:$0xff]   ;;  %v1332_v46 = vld [vmem:[%s1768_s0 + $0x60] ss:$16 sps:$4 sm:$0xff]  }
  0x12   :  { %1198 = vmatprep.subr.bf16.mxu1 %v1295_v17  ;;  %v1333_v47 = vld [vmem:[%s1768_s0 + $0x68] ss:$16 sps:$4 sm:$0xff]   ;;  %v1334_v48 = vld [vmem:[%s1768_s0 + $0x84] ss:$16 sps:$4 sm:$0xff]   ;;  %v1336_v49 = vld [vmem:[%s1768_s0 + $0x8c] ss:$16 sps:$4 sm:$0xff]  }
  0x13   :  { %v1338_v50 = vld [vmem:[%s1768_s0 + $0x80] ss:$16 sps:$4 sm:$0xff]   ;;  %v1339_v51 = vld [vmem:[%s1768_s0 + $0x88] ss:$16 sps:$4 sm:$0xff]   ;;  %v1340_v52 = vld [vmem:[%s1768_s0 + $0xa4] ss:$16 sps:$4 sm:$0xff]  }
  0x14   :  { %1111 = vmatpush3.bf16.msra.mxu0 %v1296_v18  ;;  %v1342_v53 = vld [vmem:[%s1768_s0 + $0xac] ss:$16 sps:$4 sm:$0xff]   ;;  %v1344_v54 = vld [vmem:[%s1768_s0 + $0xa0] ss:$16 sps:$4 sm:$0xff]   ;;  %v1345_v55 = vld [vmem:[%s1768_s0 + $0xa8] ss:$16 sps:$4 sm:$0xff]  }
  0x15   :  { %1199 = vmatpush3.bf16.msra.mxu1 %v1297_v19  ;;  %1112 = vmatprep.subr.bf16.mxu0 %v1298_v20  ;;  %v1346_v56 = vld [vmem:[%s1768_s0 + $0xc4] ss:$16 sps:$4 sm:$0xff]   ;;  %v1348_v57 = vld [vmem:[%s1768_s0 + $0xcc] ss:$16 sps:$4 sm:$0xff]   ;;  %v1350_v58 = vld [vmem:[%s1768_s0 + $0xc0] ss:$16 sps:$4 sm:$0xff]  }
  0x16   :  { %1200 = vmatprep.subr.bf16.mxu1 %v1299_v21  ;;  %v1351_v59 = vld [vmem:[%s1768_s0 + $0xc8] ss:$16 sps:$4 sm:$0xff]   ;;  %v1352_v60 = vld [vmem:[%s1768_s0 + $0xe4] ss:$16 sps:$4 sm:$0xff]   ;;  %v1354_v61 = vld [vmem:[%s1768_s0 + $0xec] ss:$16 sps:$4 sm:$0xff]  }
  0x17   :  { %v1356_v62 = vld [vmem:[%s1768_s0 + $0xe0] ss:$16 sps:$4 sm:$0xff]   ;;  %v1357_v63 = vld [vmem:[%s1768_s0 + $0xe8] ss:$16 sps:$4 sm:$0xff]   ;;  %v1358_v0 = vld [vmem:[%s1768_s0 + $0x104] ss:$16 sps:$4 sm:$0xff]  }
  0x18   :  { %1113 = vmatpush3.bf16.msra.mxu0 %v1300_v22  ;;  %v1360_v1 = vld [vmem:[%s1768_s0 + $0x10c] ss:$16 sps:$4 sm:$0xff]   ;;  %v1362_v2 = vld [vmem:[%s1768_s0 + $0x100] ss:$16 sps:$4 sm:$0xff]   ;;  %v1363_v3 = vld [vmem:[%s1768_s0 + $0x108] ss:$16 sps:$4 sm:$0xff]  }
  0x19   :  { %1201 = vmatpush3.bf16.msra.mxu1 %v1301_v23  ;;  %1114 = vmatprep.subr.bf16.mxu0 %v1302_v24  ;;  %v1364_v4 = vld [vmem:[%s1768_s0 + $0x124] ss:$16 sps:$4 sm:$0xff]   ;;  %v1366_v5 = vld [vmem:[%s1768_s0 + $0x12c] ss:$16 sps:$4 sm:$0xff]   ;;  %v1368_v6 = vld [vmem:[%s1768_s0 + $0x120] ss:$16 sps:$4 sm:$0xff]  }
  0x1a   :  { %1202 = vmatprep.subr.bf16.mxu1 %v1303_v25  ;;  %v1369_v7 = vld [vmem:[%s1768_s0 + $0x128] ss:$16 sps:$4 sm:$0xff]   ;;  %v1370_v8 = vld [vmem:[%s1768_s0 + $0x144] ss:$16 sps:$4 sm:$0xff]   ;;  %v1372_v9 = vld [vmem:[%s1768_s0 + $0x14c] ss:$16 sps:$4 sm:$0xff]  }
  0x1b   :  { %v1374_v10 = vld [vmem:[%s1768_s0 + $0x140] ss:$16 sps:$4 sm:$0xff]   ;;  %v1375_v11 = vld [vmem:[%s1768_s0 + $0x148] ss:$16 sps:$4 sm:$0xff]   ;;  %v1376_v12 = vld [vmem:[%s1768_s0 + $0x164] ss:$16 sps:$4 sm:$0xff]  }
  0x1c   :  { %1115 = vmatpush3.bf16.msra.mxu0 %v1304_v26  ;;  %v1378_v13 = vld [vmem:[%s1768_s0 + $0x16c] ss:$16 sps:$4 sm:$0xff]   ;;  %v1380_v14 = vld [vmem:[%s1768_s0 + $0x160] ss:$16 sps:$4 sm:$0xff]   ;;  %v1381_v15 = vld [vmem:[%s1768_s0 + $0x168] ss:$16 sps:$4 sm:$0xff]  }
  0x1d   :  { %1203 = vmatpush3.bf16.msra.mxu1 %v1305_v27  ;;  %1116 = vmatprep.subr.bf16.mxu0 %v1306_v28  ;;  %v1645_v18 = vld [vmem:[%s1769_s2] ss:$0 sm:$0xff] }
  0x1e   :  { %1204 = vmatprep.subr.bf16.mxu1 %v1307_v29 }
  0x20   :  { %1117 = vmatpush3.bf16.msra.mxu0 %v1308_v30 }
  0x21   :  { %1205 = vmatpush3.bf16.msra.mxu1 %v1309_v31 }
  0x23   :  { %599 = vmatmul.mubr.bf16.vlgmr.msra.gmra.mxu0 %v1310_v32 }
  0x24   :  { %728 = vmatmul.mubr.bf16.vlgmr.msra.gmra.mxu1 %v1313_v34  ;;  %606 = vmatprep.mubr.bf16.mxu0 %v1316_v36 }
  0x25   :  { %735 = vmatprep.mubr.bf16.mxu1 %v1318_v37 }
  0x2b   :  { %607 = vmatmul.mubr.bf16.gmra.mxu0 %v1320_v38 }
  0x2c   :  { %736 = vmatmul.mubr.bf16.gmra.mxu1 %v1321_v39  ;;  %614 = vmatprep.mubr.bf16.mxu0 %v1322_v40 }
  0x2d   :  { %743 = vmatprep.mubr.bf16.mxu1 %v1324_v41 }
  0x33   :  { %615 = vmatmul.mubr.bf16.gmra.mxu0 %v1326_v42 }
  0x34   :  { %744 = vmatmul.mubr.bf16.gmra.mxu1 %v1327_v43  ;;  %622 = vmatprep.mubr.bf16.mxu0 %v1328_v44 }
  0x35   :  { %751 = vmatprep.mubr.bf16.mxu1 %v1330_v45 }
  0x3b   :  { %623 = vmatmul.mubr.bf16.gmra.mxu0 %v1332_v46 }
  0x3c   :  { %752 = vmatmul.mubr.bf16.gmra.mxu1 %v1333_v47  ;;  %630 = vmatprep.mubr.bf16.mxu0 %v1334_v48 }
  0x3d   :  { %759 = vmatprep.mubr.bf16.mxu1 %v1336_v49 }
  0x43   :  { %631 = vmatmul.mubr.bf16.gmra.mxu0 %v1338_v50 }
  0x44   :  { %760 = vmatmul.mubr.bf16.gmra.mxu1 %v1339_v51  ;;  %638 = vmatprep.mubr.bf16.mxu0 %v1340_v52 }
  0x45   :  { %767 = vmatprep.mubr.bf16.mxu1 %v1342_v53 }
  0x4b   :  { %639 = vmatmul.mubr.bf16.gmra.mxu0 %v1344_v54 }
  0x4c   :  { %768 = vmatmul.mubr.bf16.gmra.mxu1 %v1345_v55  ;;  %646 = vmatprep.mubr.bf16.mxu0 %v1346_v56 }
  0x4d   :  { %775 = vmatprep.mubr.bf16.mxu1 %v1348_v57 }
  0x53   :  { %647 = vmatmul.mubr.bf16.gmra.mxu0 %v1350_v58 }
  0x54   :  { %776 = vmatmul.mubr.bf16.gmra.mxu1 %v1351_v59  ;;  %654 = vmatprep.mubr.bf16.mxu0 %v1352_v60 }
  0x55   :  { %783 = vmatprep.mubr.bf16.mxu1 %v1354_v61 }
  0x5b   :  { %655 = vmatmul.mubr.bf16.gmra.mxu0 %v1356_v62 }
  0x5c   :  { %784 = vmatmul.mubr.bf16.gmra.mxu1 %v1357_v63  ;;  %662 = vmatprep.mubr.bf16.mxu0 %v1358_v0 }
  0x5d   :  { %791 = vmatprep.mubr.bf16.mxu1 %v1360_v1 }
  0x63   :  { %663 = vmatmul.mubr.bf16.gmra.mxu0 %v1362_v2 }
  0x64   :  { %792 = vmatmul.mubr.bf16.gmra.mxu1 %v1363_v3  ;;  %670 = vmatprep.mubr.bf16.mxu0 %v1364_v4 }
  0x65   :  { %799 = vmatprep.mubr.bf16.mxu1 %v1366_v5 }
  0x6b   :  { %671 = vmatmul.mubr.bf16.gmra.mxu0 %v1368_v6 }
  0x6c   :  { %800 = vmatmul.mubr.bf16.gmra.mxu1 %v1369_v7  ;;  %678 = vmatprep.mubr.bf16.mxu0 %v1370_v8 }
  0x6d   :  { %807 = vmatprep.mubr.bf16.mxu1 %v1372_v9 }
  0x73   :  { %679 = vmatmul.mubr.bf16.gmra.mxu0 %v1374_v10 }
  0x74   :  { %808 = vmatmul.mubr.bf16.gmra.mxu1 %v1375_v11  ;;  %686 = vmatprep.mubr.bf16.mxu0 %v1376_v12 }
  0x75   :  { %815 = vmatprep.mubr.bf16.mxu1 %v1378_v13 }
  0x7b   :  { %687 = vmatmul.mubr.bf16.gmra.mxu0 %v1380_v14 }
  0x7c   :  { %816 = vmatmul.mubr.bf16.gmra.mxu1 %v1381_v15 }
  0xe3   :  { %v1118_v16 = vpop.f32.mrf.mxu0 }
  0xe4   :  { %v1206_v17 = vpop.f32.mrf.mxu1 }
  0xe5   :  { %v1119_v19 = vpop.f32.mrf.mxu0 }
  0xe6   :  { %v1120_v20 = vadd.f32 %v1119_v19, %v1118_v16  ;;  %v1207_v21 = vpop.f32.mrf.mxu1 }
  0xe7   :  { %v1121_v22 = vpop.f32.mrf.mxu0  ;;  %v1208_v24 = vadd.f32 %v1207_v21, %v1206_v17 }
  0xe8   :  { %v601_v23 = vadd.f32 %v1120_v20, %v1645_v18  ;;  %v1209_v25 = vpop.f32.mrf.mxu1 }
  0xe9   :  { %v1122_v26 = vpop.f32.mrf.mxu0 }
  0xea   :  { %v730_v27 = vadd.f32 %v1208_v24, %v601_v23  ;;  %v1123_v28 = vadd.f32 %v1122_v26, %v1121_v22  ;;  %v1210_v29 = vpop.f32.mrf.mxu1 }
  0xeb   :  { %v1124_v30 = vpop.f32.mrf.mxu0  ;;  %v1211_v33 = vadd.f32 %v1210_v29, %v1209_v25 }
  0xec   :  { %v824_v31 = vmax.f32 %v730_v27, 0.0  ;;  %v604_v32 = vadd.f32 %v1123_v28, %v1645_v18  ;;  %v1212_v34 = vpop.f32.mrf.mxu1 }
  0xed   :  { %v1125_v35 = vpop.f32.mrf.mxu0 }
  0xee   :  { %v1078_v36 = vpack.c.bf16 %v824_v31, %v824_v31  ;;  %v733_v37 = vadd.f32 %v1211_v33, %v604_v32  ;;  %v1126_v38 = vadd.f32 %v1125_v35, %v1124_v30  ;;  %v1213_v39 = vpop.f32.mrf.mxu1 }
  0xef   :  { %v1127_v40 = vpop.f32.mrf.mxu0  ;;  %v1214_v43 = vadd.f32 %v1213_v39, %v1212_v34 }
  0xf0   :  { %945 = vst.msk [vmem:[%s1770_s3] sm:$0xf] %vm944_vm0, %v1078_v36  ;;  %v825_v41 = vmax.f32 %v733_v37, 0.0  ;;  %v609_v42 = vadd.f32 %v1126_v38, %v1645_v18  ;;  %v1215_v44 = vpop.f32.mrf.mxu1 }
  0xf1   :  { %v1128_v45 = vpop.f32.mrf.mxu0 }
  0xf2   :  { %v1079_v46 = vpack.c.bf16 %v825_v41, %v825_v41  ;;  %v738_v47 = vadd.f32 %v1214_v43, %v609_v42  ;;  %v1129_v48 = vadd.f32 %v1128_v45, %v1127_v40  ;;  %v1216_v49 = vpop.f32.mrf.mxu1 }
  0xf3   :  { %v1130_v50 = vpop.f32.mrf.mxu0  ;;  %v1217_v53 = vadd.f32 %v1216_v49, %v1215_v44 }
  0xf4   :  { %946 = vst.msk [vmem:[%s1770_s3 + $0x4] sm:$0xf] %vm944_vm0, %v1079_v46  ;;  %v826_v51 = vmax.f32 %v738_v47, 0.0  ;;  %v612_v52 = vadd.f32 %v1129_v48, %v1645_v18  ;;  %v1218_v54 = vpop.f32.mrf.mxu1 }
  0xf5   :  { %v1131_v55 = vpop.f32.mrf.mxu0 }
  0xf6   :  { %v1080_v56 = vpack.c.bf16 %v826_v51, %v826_v51  ;;  %v741_v57 = vadd.f32 %v1217_v53, %v612_v52  ;;  %v1132_v58 = vadd.f32 %v1131_v55, %v1130_v50  ;;  %v1219_v59 = vpop.f32.mrf.mxu1 }
  0xf7   :  { %v1133_v60 = vpop.f32.mrf.mxu0  ;;  %v1220_v63 = vadd.f32 %v1219_v59, %v1218_v54 }
  0xf8   :  { %947 = vst.msk [vmem:[%s1770_s3 + $0x8] sm:$0xf] %vm944_vm0, %v1080_v56  ;;  %v827_v61 = vmax.f32 %v741_v57, 0.0  ;;  %v617_v62 = vadd.f32 %v1132_v58, %v1645_v18  ;;  %v1221_v0 = vpop.f32.mrf.mxu1 }
  0xf9   :  { %v1134_v1 = vpop.f32.mrf.mxu0 }
  0xfa   :  { %v1081_v2 = vpack.c.bf16 %v827_v61, %v827_v61  ;;  %v746_v3 = vadd.f32 %v1220_v63, %v617_v62  ;;  %v1135_v4 = vadd.f32 %v1134_v1, %v1133_v60  ;;  %v1222_v5 = vpop.f32.mrf.mxu1 }
  0xfb   :  { %v1136_v6 = vpop.f32.mrf.mxu0  ;;  %v1223_v9 = vadd.f32 %v1222_v5, %v1221_v0 }
  0xfc   :  { %948 = vst.msk [vmem:[%s1770_s3 + $0xc] sm:$0xf] %vm944_vm0, %v1081_v2  ;;  %v828_v7 = vmax.f32 %v746_v3, 0.0  ;;  %v620_v8 = vadd.f32 %v1135_v4, %v1645_v18  ;;  %v1224_v10 = vpop.f32.mrf.mxu1 }
  0xfd   :  { %v1137_v11 = vpop.f32.mrf.mxu0 }
  0xfe   :  { %v1082_v12 = vpack.c.bf16 %v828_v7, %v828_v7  ;;  %v749_v13 = vadd.f32 %v1223_v9, %v620_v8  ;;  %v1138_v14 = vadd.f32 %v1137_v11, %v1136_v6  ;;  %v1225_v15 = vpop.f32.mrf.mxu1 }
  0xff   :  { %v1139_v16 = vpop.f32.mrf.mxu0  ;;  %v1226_v20 = vadd.f32 %v1225_v15, %v1224_v10 }
 0x100   :  { %949 = vst.msk [vmem:[%s1770_s3 + $0x10] sm:$0xf] %vm944_vm0, %v1082_v12  ;;  %v829_v17 = vmax.f32 %v749_v13, 0.0  ;;  %v625_v19 = vadd.f32 %v1138_v14, %v1645_v18  ;;  %v1227_v21 = vpop.f32.mrf.mxu1 }
 0x101   :  { %v1140_v22 = vpop.f32.mrf.mxu0 }
 0x102   :  { %v1083_v23 = vpack.c.bf16 %v829_v17, %v829_v17  ;;  %v754_v24 = vadd.f32 %v1226_v20, %v625_v19  ;;  %v1141_v25 = vadd.f32 %v1140_v22, %v1139_v16  ;;  %v1228_v26 = vpop.f32.mrf.mxu1 }
 0x103   :  { %v1142_v27 = vpop.f32.mrf.mxu0  ;;  %v1229_v30 = vadd.f32 %v1228_v26, %v1227_v21 }
 0x104   :  { %950 = vst.msk [vmem:[%s1770_s3 + $0x14] sm:$0xf] %vm944_vm0, %v1083_v23  ;;  %v830_v28 = vmax.f32 %v754_v24, 0.0  ;;  %v628_v29 = vadd.f32 %v1141_v25, %v1645_v18  ;;  %v1230_v31 = vpop.f32.mrf.mxu1 }
 0x105   :  { %v1143_v32 = vpop.f32.mrf.mxu0 }
 0x106   :  { %v1084_v33 = vpack.c.bf16 %v830_v28, %v830_v28  ;;  %v757_v34 = vadd.f32 %v1229_v30, %v628_v29  ;;  %v1144_v35 = vadd.f32 %v1143_v32, %v1142_v27  ;;  %v1231_v36 = vpop.f32.mrf.mxu1 }
 0x107   :  { %v1145_v37 = vpop.f32.mrf.mxu0  ;;  %v1232_v40 = vadd.f32 %v1231_v36, %v1230_v31 }
 0x108   :  { %951 = vst.msk [vmem:[%s1770_s3 + $0x18] sm:$0xf] %vm944_vm0, %v1084_v33  ;;  %v831_v38 = vmax.f32 %v757_v34, 0.0  ;;  %v633_v39 = vadd.f32 %v1144_v35, %v1645_v18  ;;  %v1233_v41 = vpop.f32.mrf.mxu1 }
 0x109   :  { %v1146_v42 = vpop.f32.mrf.mxu0 }
 0x10a   :  { %v1085_v43 = vpack.c.bf16 %v831_v38, %v831_v38  ;;  %v762_v44 = vadd.f32 %v1232_v40, %v633_v39  ;;  %v1147_v45 = vadd.f32 %v1146_v42, %v1145_v37  ;;  %v1234_v46 = vpop.f32.mrf.mxu1 }
 0x10b   :  { %v1148_v47 = vpop.f32.mrf.mxu0  ;;  %v1235_v50 = vadd.f32 %v1234_v46, %v1233_v41 }
 0x10c   :  { %952 = vst.msk [vmem:[%s1770_s3 + $0x1c] sm:$0xf] %vm944_vm0, %v1085_v43  ;;  %v832_v48 = vmax.f32 %v762_v44, 0.0  ;;  %v636_v49 = vadd.f32 %v1147_v45, %v1645_v18  ;;  %v1236_v51 = vpop.f32.mrf.mxu1 }
 0x10d   :  { %v1149_v52 = vpop.f32.mrf.mxu0 }
 0x10e   :  { %v1086_v53 = vpack.c.bf16 %v832_v48, %v832_v48  ;;  %v765_v54 = vadd.f32 %v1235_v50, %v636_v49  ;;  %v1150_v55 = vadd.f32 %v1149_v52, %v1148_v47  ;;  %v1237_v56 = vpop.f32.mrf.mxu1 }
 0x10f   :  { %v1151_v57 = vpop.f32.mrf.mxu0  ;;  %v1238_v60 = vadd.f32 %v1237_v56, %v1236_v51 }
 0x110   :  { %953 = vst.msk [vmem:[%s1770_s3 + $0x20] sm:$0xf] %vm944_vm0, %v1086_v53  ;;  %v833_v58 = vmax.f32 %v765_v54, 0.0  ;;  %v641_v59 = vadd.f32 %v1150_v55, %v1645_v18  ;;  %v1239_v61 = vpop.f32.mrf.mxu1 }
 0x111   :  { %v1152_v62 = vpop.f32.mrf.mxu0 }
 0x112   :  { %v1087_v63 = vpack.c.bf16 %v833_v58, %v833_v58  ;;  %v770_v0 = vadd.f32 %v1238_v60, %v641_v59  ;;  %v1153_v1 = vadd.f32 %v1152_v62, %v1151_v57  ;;  %v1240_v2 = vpop.f32.mrf.mxu1 }
 0x113   :  { %v1154_v3 = vpop.f32.mrf.mxu0  ;;  %v1241_v6 = vadd.f32 %v1240_v2, %v1239_v61 }
 0x114   :  { %954 = vst.msk [vmem:[%s1770_s3 + $0x24] sm:$0xf] %vm944_vm0, %v1087_v63  ;;  %v834_v4 = vmax.f32 %v770_v0, 0.0  ;;  %v644_v5 = vadd.f32 %v1153_v1, %v1645_v18  ;;  %v1242_v7 = vpop.f32.mrf.mxu1 }
 0x115   :  { %v1155_v8 = vpop.f32.mrf.mxu0 }
 0x116   :  { %v1088_v9 = vpack.c.bf16 %v834_v4, %v834_v4  ;;  %v773_v10 = vadd.f32 %v1241_v6, %v644_v5  ;;  %v1156_v11 = vadd.f32 %v1155_v8, %v1154_v3  ;;  %v1243_v12 = vpop.f32.mrf.mxu1 }
 0x117   :  { %v1157_v13 = vpop.f32.mrf.mxu0  ;;  %v1244_v16 = vadd.f32 %v1243_v12, %v1242_v7 }
 0x118   :  { %955 = vst.msk [vmem:[%s1770_s3 + $0x28] sm:$0xf] %vm944_vm0, %v1088_v9  ;;  %v835_v14 = vmax.f32 %v773_v10, 0.0  ;;  %v649_v15 = vadd.f32 %v1156_v11, %v1645_v18  ;;  %v1245_v17 = vpop.f32.mrf.mxu1 }
 0x119   :  { %v1158_v19 = vpop.f32.mrf.mxu0 }
 0x11a   :  { %v1089_v20 = vpack.c.bf16 %v835_v14, %v835_v14  ;;  %v778_v21 = vadd.f32 %v1244_v16, %v649_v15  ;;  %v1159_v22 = vadd.f32 %v1158_v19, %v1157_v13  ;;  %v1246_v23 = vpop.f32.mrf.mxu1 }
 0x11b   :  { %v1160_v24 = vpop.f32.mrf.mxu0  ;;  %v1247_v27 = vadd.f32 %v1246_v23, %v1245_v17 }
 0x11c   :  { %956 = vst.msk [vmem:[%s1770_s3 + $0x2c] sm:$0xf] %vm944_vm0, %v1089_v20  ;;  %v836_v25 = vmax.f32 %v778_v21, 0.0  ;;  %v652_v26 = vadd.f32 %v1159_v22, %v1645_v18  ;;  %v1248_v28 = vpop.f32.mrf.mxu1 }
 0x11d   :  { %v1161_v29 = vpop.f32.mrf.mxu0 }
 0x11e   :  { %v1090_v30 = vpack.c.bf16 %v836_v25, %v836_v25  ;;  %v781_v31 = vadd.f32 %v1247_v27, %v652_v26  ;;  %v1162_v32 = vadd.f32 %v1161_v29, %v1160_v24  ;;  %v1249_v33 = vpop.f32.mrf.mxu1 }
 0x11f   :  { %v1163_v34 = vpop.f32.mrf.mxu0  ;;  %v1250_v37 = vadd.f32 %v1249_v33, %v1248_v28 }
 0x120   :  { %957 = vst.msk [vmem:[%s1770_s3 + $0x30] sm:$0xf] %vm944_vm0, %v1090_v30  ;;  %v837_v35 = vmax.f32 %v781_v31, 0.0  ;;  %v657_v36 = vadd.f32 %v1162_v32, %v1645_v18  ;;  %v1251_v38 = vpop.f32.mrf.mxu1 }
 0x121   :  { %v1164_v39 = vpop.f32.mrf.mxu0 }
 0x122   :  { %v1091_v40 = vpack.c.bf16 %v837_v35, %v837_v35  ;;  %v786_v41 = vadd.f32 %v1250_v37, %v657_v36  ;;  %v1165_v42 = vadd.f32 %v1164_v39, %v1163_v34  ;;  %v1252_v43 = vpop.f32.mrf.mxu1 }
 0x123   :  { %v1166_v44 = vpop.f32.mrf.mxu0  ;;  %v1253_v47 = vadd.f32 %v1252_v43, %v1251_v38 }
 0x124   :  { %958 = vst.msk [vmem:[%s1770_s3 + $0x34] sm:$0xf] %vm944_vm0, %v1091_v40  ;;  %v838_v45 = vmax.f32 %v786_v41, 0.0  ;;  %v660_v46 = vadd.f32 %v1165_v42, %v1645_v18  ;;  %v1254_v48 = vpop.f32.mrf.mxu1 }
 0x125   :  { %v1167_v49 = vpop.f32.mrf.mxu0 }
 0x126   :  { %v1092_v50 = vpack.c.bf16 %v838_v45, %v838_v45  ;;  %v789_v51 = vadd.f32 %v1253_v47, %v660_v46  ;;  %v1168_v52 = vadd.f32 %v1167_v49, %v1166_v44  ;;  %v1255_v53 = vpop.f32.mrf.mxu1 }
 0x127   :  { %v1169_v54 = vpop.f32.mrf.mxu0  ;;  %v1256_v57 = vadd.f32 %v1255_v53, %v1254_v48 }
 0x128   :  { %959 = vst.msk [vmem:[%s1770_s3 + $0x38] sm:$0xf] %vm944_vm0, %v1092_v50  ;;  %v839_v55 = vmax.f32 %v789_v51, 0.0  ;;  %v665_v56 = vadd.f32 %v1168_v52, %v1645_v18  ;;  %v1257_v58 = vpop.f32.mrf.mxu1 }
 0x129   :  { %v1170_v59 = vpop.f32.mrf.mxu0 }
 0x12a   :  { %v1093_v60 = vpack.c.bf16 %v839_v55, %v839_v55  ;;  %v794_v61 = vadd.f32 %v1256_v57, %v665_v56  ;;  %v1171_v62 = vadd.f32 %v1170_v59, %v1169_v54  ;;  %v1258_v63 = vpop.f32.mrf.mxu1 }
 0x12b   :  { %v1172_v0 = vpop.f32.mrf.mxu0  ;;  %v1259_v3 = vadd.f32 %v1258_v63, %v1257_v58 }
 0x12c   :  { %960 = vst.msk [vmem:[%s1770_s3 + $0x3c] sm:$0xf] %vm944_vm0, %v1093_v60  ;;  %v840_v1 = vmax.f32 %v794_v61, 0.0  ;;  %v668_v2 = vadd.f32 %v1171_v62, %v1645_v18  ;;  %v1260_v4 = vpop.f32.mrf.mxu1 }
 0x12d   :  { %v1173_v5 = vpop.f32.mrf.mxu0 }
 0x12e   :  { %v1094_v6 = vpack.c.bf16 %v840_v1, %v840_v1  ;;  %v797_v7 = vadd.f32 %v1259_v3, %v668_v2  ;;  %v1174_v8 = vadd.f32 %v1173_v5, %v1172_v0  ;;  %v1261_v9 = vpop.f32.mrf.mxu1 }
 0x12f   :  { %v1175_v10 = vpop.f32.mrf.mxu0  ;;  %v1262_v13 = vadd.f32 %v1261_v9, %v1260_v4 }
 0x130   :  { %961 = vst.msk [vmem:[%s1770_s3 + $0x40] sm:$0xf] %vm944_vm0, %v1094_v6  ;;  %v841_v11 = vmax.f32 %v797_v7, 0.0  ;;  %v673_v12 = vadd.f32 %v1174_v8, %v1645_v18  ;;  %v1263_v14 = vpop.f32.mrf.mxu1 }
 0x131   :  { %v1176_v15 = vpop.f32.mrf.mxu0 }
 0x132   :  { %v1095_v16 = vpack.c.bf16 %v841_v11, %v841_v11  ;;  %v802_v17 = vadd.f32 %v1262_v13, %v673_v12  ;;  %v1177_v19 = vadd.f32 %v1176_v15, %v1175_v10  ;;  %v1264_v20 = vpop.f32.mrf.mxu1 }
 0x133   :  { %v1178_v21 = vpop.f32.mrf.mxu0  ;;  %v1265_v24 = vadd.f32 %v1264_v20, %v1263_v14 }
 0x134   :  { %962 = vst.msk [vmem:[%s1770_s3 + $0x44] sm:$0xf] %vm944_vm0, %v1095_v16  ;;  %v842_v22 = vmax.f32 %v802_v17, 0.0  ;;  %v676_v23 = vadd.f32 %v1177_v19, %v1645_v18  ;;  %v1266_v25 = vpop.f32.mrf.mxu1 }
 0x135   :  { %v1179_v26 = vpop.f32.mrf.mxu0 }
 0x136   :  { %v1096_v27 = vpack.c.bf16 %v842_v22, %v842_v22  ;;  %v805_v28 = vadd.f32 %v1265_v24, %v676_v23  ;;  %v1180_v29 = vadd.f32 %v1179_v26, %v1178_v21  ;;  %v1267_v30 = vpop.f32.mrf.mxu1 }
 0x137   :  { %v1181_v31 = vpop.f32.mrf.mxu0  ;;  %v1268_v34 = vadd.f32 %v1267_v30, %v1266_v25 }
 0x138   :  { %963 = vst.msk [vmem:[%s1770_s3 + $0x48] sm:$0xf] %vm944_vm0, %v1096_v27  ;;  %v843_v32 = vmax.f32 %v805_v28, 0.0  ;;  %v681_v33 = vadd.f32 %v1180_v29, %v1645_v18  ;;  %v1269_v35 = vpop.f32.mrf.mxu1 }
 0x139   :  { %v1182_v36 = vpop.f32.mrf.mxu0 }
 0x13a   :  { %v1097_v37 = vpack.c.bf16 %v843_v32, %v843_v32  ;;  %v810_v38 = vadd.f32 %v1268_v34, %v681_v33  ;;  %v1183_v39 = vadd.f32 %v1182_v36, %v1181_v31  ;;  %v1270_v40 = vpop.f32.mrf.mxu1 }
 0x13b   :  { %v1184_v41 = vpop.f32.mrf.mxu0  ;;  %v1271_v44 = vadd.f32 %v1270_v40, %v1269_v35 }
 0x13c   :  { %964 = vst.msk [vmem:[%s1770_s3 + $0x4c] sm:$0xf] %vm944_vm0, %v1097_v37  ;;  %v844_v42 = vmax.f32 %v810_v38, 0.0  ;;  %v684_v43 = vadd.f32 %v1183_v39, %v1645_v18  ;;  %v1272_v45 = vpop.f32.mrf.mxu1 }
 0x13d   :  { %v1185_v46 = vpop.f32.mrf.mxu0 }
 0x13e   :  { %v1098_v47 = vpack.c.bf16 %v844_v42, %v844_v42  ;;  %v813_v48 = vadd.f32 %v1271_v44, %v684_v43  ;;  %v1186_v49 = vadd.f32 %v1185_v46, %v1184_v41  ;;  %v1273_v50 = vpop.f32.mrf.mxu1 }
 0x13f   :  { %v1187_v51 = vpop.f32.mrf.mxu0  ;;  %v1274_v54 = vadd.f32 %v1273_v50, %v1272_v45 }
 0x140   :  { %965 = vst.msk [vmem:[%s1770_s3 + $0x50] sm:$0xf] %vm944_vm0, %v1098_v47  ;;  %v845_v52 = vmax.f32 %v813_v48, 0.0  ;;  %v689_v53 = vadd.f32 %v1186_v49, %v1645_v18  ;;  %v1275_v55 = vpop.f32.mrf.mxu1 }
 0x141   :  { %v1188_v56 = vpop.f32.mrf.mxu0 }
 0x142   :  { %v1099_v57 = vpack.c.bf16 %v845_v52, %v845_v52  ;;  %v818_v58 = vadd.f32 %v1274_v54, %v689_v53  ;;  %v1189_v59 = vadd.f32 %v1188_v56, %v1187_v51  ;;  %v1276_v60 = vpop.f32.mrf.mxu1 }
 0x143   :  { %v1277_v63 = vadd.f32 %v1276_v60, %v1275_v55 }
 0x144   :  { %966 = vst.msk [vmem:[%s1770_s3 + $0x54] sm:$0xf] %vm944_vm0, %v1099_v57  ;;  %v846_v61 = vmax.f32 %v818_v58, 0.0  ;;  %v692_v62 = vadd.f32 %v1189_v59, %v1645_v18 }
 0x146   :  { %v1100_v0 = vpack.c.bf16 %v846_v61, %v846_v61  ;;  %v821_v1 = vadd.f32 %v1277_v63, %v692_v62 }
 0x148   :  { %967 = vst.msk [vmem:[%s1770_s3 + $0x58] sm:$0xf] %vm944_vm0, %v1100_v0  ;;  %v847_v2 = vmax.f32 %v821_v1, 0.0 }
 0x14a   :  { %v1101_v3 = vpack.c.bf16 %v847_v2, %v847_v2 }
 0x14c   :  { %968 = vst.msk [vmem:[%s1770_s3 + $0x5c] sm:$0xf] %vm944_vm0, %v1101_v3 }

// kernel: dqn_forward.6
= control target key start
LH: loop header
LB: loop body
LE: loop exit
PB: predicated region body
PF: predicated region fallthrough
CT: control target
= control target key end

     0   :  { %vm547_vm0 = vcmask 523264   ;;  %vm936_vm1 = vcmask 519168   ;;  %s1744_s1 = inlined_call_operand.vmem [shape: bf16[576,64], index: 1, kind: input, shape index: {}]   ;;  %s1745_s0 = inlined_call_operand.vmem [shape: bf16[120,576], index: 0, kind: input, shape index: {}]   ;;  %s1746_s2 = inlined_call_operand.vmem [shape: f32[1,64], index: 2, kind: input, shape index: {}]   ;;  %s1747_s3 = inlined_call_operand.vmem [shape: bf16[120,64], index: 3, kind: output, shape index: {}]  }
   0x1   :  { %v1243_v0 = vld [vmem:[%s1744_s1 + $0x78] sm:$0xff]   ;;  %v1247_v4 = vld [vmem:[%s1744_s1 + $0x70] sm:$0xff]   ;;  %v1251_v8 = vld [vmem:[%s1744_s1 + $0x68] sm:$0xff]  }
   0x2   :  { %v1244_v1 = vld [vmem:[%s1744_s1 + $0xf8] sm:$0xff]   ;;  %1071 = vmatprep.subr.bf16.mxu0 %v1243_v0  ;;  %v1248_v5 = vld [vmem:[%s1744_s1 + $0xf0] sm:$0xff]   ;;  %v1252_v9 = vld [vmem:[%s1744_s1 + $0xe8] sm:$0xff]  }
   0x3   :  { %v1245_v2 = vld [vmem:[%s1744_s1 + $0x38] sm:$0xff]   ;;  %1135 = vmatprep.subr.bf16.mxu1 %v1244_v1  ;;  %v1249_v6 = vld [vmem:[%s1744_s1 + $0x30] sm:$0xff]   ;;  %v1253_v10 = vld [vmem:[%s1744_s1 + $0x28] sm:$0xff]  }
   0x4   :  { %v1246_v3 = vld [vmem:[%s1744_s1 + $0xb8] sm:$0xff]   ;;  %1072 = vmatpush3.bf16.msra.mxu0 %v1245_v2  ;;  %v1250_v7 = vld [vmem:[%s1744_s1 + $0xb0] sm:$0xff]   ;;  %v1254_v11 = vld [vmem:[%s1744_s1 + $0xa8] sm:$0xff]  }
   0x5   :  { %1136 = vmatpush3.bf16.msra.mxu1 %v1246_v3  ;;  %1073 = vmatprep.subr.bf16.mxu0 %v1247_v4  ;;  %v1255_v12 = vld [vmem:[%s1744_s1 + $0x60] sm:$0xff]   ;;  %v1259_v16 = vld [vmem:[%s1744_s1 + $0x58] sm:$0xff]   ;;  %v1263_v20 = vld [vmem:[%s1744_s1 + $0x50] sm:$0xff]  }
   0x6   :  { %1137 = vmatprep.subr.bf16.mxu1 %v1248_v5  ;;  %v1256_v13 = vld [vmem:[%s1744_s1 + $0xe0] sm:$0xff]   ;;  %v1260_v17 = vld [vmem:[%s1744_s1 + $0xd8] sm:$0xff]   ;;  %v1264_v21 = vld [vmem:[%s1744_s1 + $0xd0] sm:$0xff]  }
   0x7   :  { %v1257_v14 = vld [vmem:[%s1744_s1 + $0x20] sm:$0xff]   ;;  %v1261_v18 = vld [vmem:[%s1744_s1 + $0x18] sm:$0xff]   ;;  %v1265_v22 = vld [vmem:[%s1744_s1 + $0x10] sm:$0xff]  }
   0x8   :  { %1074 = vmatpush3.bf16.msra.mxu0 %v1249_v6  ;;  %v1258_v15 = vld [vmem:[%s1744_s1 + $0xa0] sm:$0xff]   ;;  %v1262_v19 = vld [vmem:[%s1744_s1 + $0x98] sm:$0xff]   ;;  %v1266_v23 = vld [vmem:[%s1744_s1 + $0x90] sm:$0xff]  }
   0x9   :  { %1138 = vmatpush3.bf16.msra.mxu1 %v1250_v7  ;;  %1075 = vmatprep.subr.bf16.mxu0 %v1251_v8  ;;  %v1267_v24 = vld [vmem:[%s1744_s1 + $0x48] sm:$0xff]   ;;  %v1271_v28 = vld [vmem:[%s1744_s1 + $0x40] sm:$0xff]   ;;  %v1281_v36 = vld [vmem:[%s1744_s1 + $0x118] sm:$0xff]  }
   0xa   :  { %1139 = vmatprep.subr.bf16.mxu1 %v1252_v9  ;;  %v1268_v25 = vld [vmem:[%s1744_s1 + $0xc8] sm:$0xff]   ;;  %v1272_v29 = vld [vmem:[%s1744_s1 + $0xc0] sm:$0xff]   ;;  %v1294_v42 = vld [vmem:[%s1744_s1 + $0x110] sm:$0xff]  }
   0xb   :  { %v1269_v26 = vld [vmem:[%s1744_s1 + $0x8] sm:$0xff]   ;;  %v1273_v30 = vld [vmem:[%s1744_s1] sm:$0xff]   ;;  %v1290_v43 = vld [vmem:[%s1745_s0 + $0x5c] ss:$20 sps:$4 sm:$0xff]  }
   0xc   :  { %1076 = vmatpush3.bf16.msra.mxu0 %v1253_v10  ;;  %v1270_v27 = vld [vmem:[%s1744_s1 + $0x88] sm:$0xff]   ;;  %v1274_v31 = vld [vmem:[%s1744_s1 + $0x80] sm:$0xff]   ;;  %v1295_v47 = vld [vmem:[%s1745_s0 + $0x7c] ss:$20 sps:$4 sm:$0xff]  }
   0xd   :  { %1140 = vmatpush3.bf16.msra.mxu1 %v1254_v11  ;;  %1077 = vmatprep.subr.bf16.mxu0 %v1255_v12  ;;  %v1275_v32 = vld [vmem:[%s1745_s0] ss:$20 sps:$4 sm:$0xff]   ;;  %v1277_v33 = vld [vmem:[%s1745_s0 + $0x4] ss:$20 sps:$4 sm:$0xff]   ;;  %v1278_v34 = vld [vmem:[%s1745_s0 + $0x8] ss:$20 sps:$4 sm:$0xff]  }
   0xe   :  { %1141 = vmatprep.subr.bf16.mxu1 %v1256_v13  ;;  %v1280_v35 = vld [vmem:[%s1745_s0 + $0xc] ss:$20 sps:$4 sm:$0xff]   ;;  %604 = vmatprep.mubr.bf16.mxu0 %v1277_v33  ;;  %v1284_v38 = vld [vmem:[%s1745_s0 + $0x34] ss:$20 sps:$4 sm:$0xff]   ;;  %v1287_v40 = vld [vmem:[%s1745_s0 + $0x30] ss:$20 sps:$4 sm:$0xff]  }
   0xf   :  { %700 = vmatprep.mubr.bf16.mxu1 %v1280_v35  ;;  %v1282_v37 = vld [vmem:[%s1745_s0 + $0x2c] ss:$20 sps:$4 sm:$0xff]   ;;  %v1286_v39 = vld [vmem:[%s1745_s0 + $0x28] ss:$20 sps:$4 sm:$0xff]   ;;  %v1292_v44 = vld [vmem:[%s1745_s0 + $0x50] ss:$20 sps:$4 sm:$0xff]  }
  0x10   :  { %1078 = vmatpush3.bf16.msra.mxu0 %v1257_v14  ;;  %v1288_v41 = vld [vmem:[%s1745_s0 + $0x54] ss:$20 sps:$4 sm:$0xff]   ;;  %v1293_v45 = vld [vmem:[%s1745_s0 + $0x58] ss:$20 sps:$4 sm:$0xff]   ;;  %v1320_v49 = vld [vmem:[%s1744_s1 + $0x100] sm:$0xff]  }
  0x11   :  { %1142 = vmatpush3.bf16.msra.mxu1 %v1258_v15  ;;  %1079 = vmatprep.subr.bf16.mxu0 %v1259_v16  ;;  %v1307_v46 = vld [vmem:[%s1744_s1 + $0x108] sm:$0xff]   ;;  %v1297_v48 = vld [vmem:[%s1745_s0 + $0x84] ss:$20 sps:$4 sm:$0xff]   ;;  %v1300_v51 = vld [vmem:[%s1745_s0 + $0x80] ss:$20 sps:$4 sm:$0xff]  }
  0x12   :  { %1143 = vmatprep.subr.bf16.mxu1 %v1260_v17  ;;  %v1299_v50 = vld [vmem:[%s1745_s0 + $0x78] ss:$20 sps:$4 sm:$0xff]   ;;  %v1305_v54 = vld [vmem:[%s1745_s0 + $0xa0] ss:$20 sps:$4 sm:$0xff]   ;;  %v1306_v55 = vld [vmem:[%s1745_s0 + $0xa8] ss:$20 sps:$4 sm:$0xff]  }
  0x13   :  { %v1301_v52 = vld [vmem:[%s1745_s0 + $0xa4] ss:$20 sps:$4 sm:$0xff]   ;;  %v1303_v53 = vld [vmem:[%s1745_s0 + $0xac] ss:$20 sps:$4 sm:$0xff]   ;;  %v1310_v57 = vld [vmem:[%s1745_s0 + $0xd4] ss:$20 sps:$4 sm:$0xff]  }
  0x14   :  { %1080 = vmatpush3.bf16.msra.mxu0 %v1261_v18  ;;  %v1308_v56 = vld [vmem:[%s1745_s0 + $0xcc] ss:$20 sps:$4 sm:$0xff]   ;;  %v1312_v58 = vld [vmem:[%s1745_s0 + $0xc8] ss:$20 sps:$4 sm:$0xff]   ;;  %v1313_v59 = vld [vmem:[%s1745_s0 + $0xd0] ss:$20 sps:$4 sm:$0xff]  }
  0x15   :  { %1144 = vmatpush3.bf16.msra.mxu1 %v1262_v19  ;;  %1081 = vmatprep.subr.bf16.mxu0 %v1263_v20  ;;  %v1314_v60 = vld [vmem:[%s1745_s0 + $0xf4] ss:$20 sps:$4 sm:$0xff]   ;;  %v1316_v61 = vld [vmem:[%s1745_s0 + $0xfc] ss:$20 sps:$4 sm:$0xff]   ;;  %v58_v63 = vld [vmem:[%s1745_s0 + $0x120] sm:$0xff] }
  0x16   :  { %1145 = vmatprep.subr.bf16.mxu1 %v1264_v21  ;;  %v57_v62 = vld [vmem:[%s1745_s0 + $0x118] sm:$0xff]  ;;  %v1318_v0 = vld [vmem:[%s1745_s0 + $0xf0] ss:$20 sps:$4 sm:$0xff]   ;;  %v995_v3 = vcombine.high %v58_v63, %v58_v63  ;;  %v994_v5 = vcombine.low %v58_v63, %v58_v63  ;;  %v1329_v10 = vld [vmem:[%s1745_s0 + $0x60] ss:$20 sps:$4 sm:$0xff]  }
  0x17   :  { %v1319_v1 = vld [vmem:[%s1745_s0 + $0xf8] ss:$20 sps:$4 sm:$0xff]   ;;  %v993_v2 = vcombine.high %v57_v62, %v57_v62  ;;  %v992_v4 = vcombine.low %v57_v62, %v57_v62  ;;  %v1325_v6 = vld [vmem:[%s1745_s0 + $0x10] ss:$20 sps:$4 sm:$0xff]   ;;  %v1330_v11 = vld [vmem:[%s1745_s0 + $0x100] ss:$20 sps:$4 sm:$0xff]  }
  0x18   :  { %1082 = vmatpush3.bf16.msra.mxu0 %v1265_v22  ;;  %v1326_v7 = vld [vmem:[%s1745_s0 + $0xb0] ss:$20 sps:$4 sm:$0xff]   ;;  %v1327_v8 = vld [vmem:[%s1745_s0 + $0x38] ss:$20 sps:$4 sm:$0xff]   ;;  %v1331_v12 = vld [vmem:[%s1745_s0 + $0x88] ss:$20 sps:$4 sm:$0xff]  }
  0x19   :  { %1146 = vmatpush3.bf16.msra.mxu1 %v1266_v23  ;;  %1083 = vmatprep.subr.bf16.mxu0 %v1267_v24  ;;  %v1328_v9 = vld [vmem:[%s1745_s0 + $0xd8] ss:$20 sps:$4 sm:$0xff]   ;;  %v1332_v13 = vld [vmem:[%s1745_s0 + $0x128] ss:$0 sps:$4 sm:$0xff]  }
  0x1a   :  { %1147 = vmatprep.subr.bf16.mxu1 %v1268_v25 }
  0x1c   :  { %1084 = vmatpush3.bf16.msra.mxu0 %v1269_v26 }
  0x1d   :  { %1148 = vmatpush3.bf16.msra.mxu1 %v1270_v27  ;;  %1085 = vmatprep.subr.bf16.mxu0 %v1271_v28 }
  0x1e   :  { %1149 = vmatprep.subr.bf16.mxu1 %v1272_v29 }
  0x20   :  { %1086 = vmatpush3.bf16.msra.mxu0 %v1273_v30 }
  0x21   :  { %1150 = vmatpush3.bf16.msra.mxu1 %v1274_v31  ;;  %1211 = vmatprep.subr.bf16.mxu0 %v1281_v36 }
  0x22   :  { %1235 = vmatprep.subr.bf16.mxu1 %v1281_v36 }
  0x23   :  { %605 = vmatmul.mubr.bf16.vlgmr.msra.gmra.mxu0 %v1275_v32 }
  0x24   :  { %701 = vmatmul.mubr.bf16.vlgmr.msra.gmra.mxu1 %v1278_v34  ;;  %1212 = vmatpush3.bf16.msra.mxu0 %v1281_v36 }
  0x25   :  { %1239 = vmatpush3.bf16.msra.mxu1 %v1281_v36  ;;  %612 = vmatprep.mubr.bf16.mxu0 %v1282_v37 }
  0x26   :  { %708 = vmatprep.mubr.bf16.mxu1 %v1284_v38  ;;  %1213 = vmatprep.subr.bf16.mxu0 %v1294_v42 }
  0x27   :  { %1236 = vmatprep.subr.bf16.mxu1 %v1294_v42 }
  0x28   :  { %1214 = vmatpush3.bf16.msra.mxu0 %v1294_v42 }
  0x29   :  { %1240 = vmatpush3.bf16.msra.mxu1 %v1294_v42  ;;  %1215 = vmatprep.subr.bf16.mxu0 %v1307_v46 }
  0x2a   :  { %1237 = vmatprep.subr.bf16.mxu1 %v1307_v46 }
  0x2b   :  { %613 = vmatmul.mubr.bf16.gmra.mxu0 %v1286_v39 }
  0x2c   :  { %709 = vmatmul.mubr.bf16.gmra.mxu1 %v1287_v40  ;;  %620 = vmatprep.mubr.bf16.mxu0 %v1288_v41 }
  0x2d   :  { %716 = vmatprep.mubr.bf16.mxu1 %v1290_v43  ;;  %1216 = vmatpush3.bf16.msra.mxu0 %v1307_v46 }
  0x2e   :  { %1241 = vmatpush3.bf16.msra.mxu1 %v1307_v46  ;;  %1217 = vmatprep.subr.bf16.mxu0 %v1320_v49 }
  0x2f   :  { %1238 = vmatprep.subr.bf16.mxu1 %v1320_v49 }
  0x31   :  { %1218 = vmatpush3.bf16.msra.mxu0 %v1320_v49 }
  0x32   :  { %1242 = vmatpush3.bf16.msra.mxu1 %v1320_v49 }
  0x33   :  { %621 = vmatmul.mubr.bf16.gmra.mxu0 %v1292_v44 }
  0x34   :  { %717 = vmatmul.mubr.bf16.gmra.mxu1 %v1293_v45  ;;  %628 = vmatprep.mubr.bf16.mxu0 %v1295_v47 }
  0x35   :  { %724 = vmatprep.mubr.bf16.mxu1 %v1297_v48 }
  0x3b   :  { %629 = vmatmul.mubr.bf16.gmra.mxu0 %v1299_v50 }
  0x3c   :  { %725 = vmatmul.mubr.bf16.gmra.mxu1 %v1300_v51  ;;  %636 = vmatprep.mubr.bf16.mxu0 %v1301_v52 }
  0x3d   :  { %732 = vmatprep.mubr.bf16.mxu1 %v1303_v53 }
  0x43   :  { %637 = vmatmul.mubr.bf16.gmra.mxu0 %v1305_v54 }
  0x44   :  { %733 = vmatmul.mubr.bf16.gmra.mxu1 %v1306_v55  ;;  %644 = vmatprep.mubr.bf16.mxu0 %v1308_v56 }
  0x45   :  { %740 = vmatprep.mubr.bf16.mxu1 %v1310_v57 }
  0x4b   :  { %645 = vmatmul.mubr.bf16.gmra.mxu0 %v1312_v58 }
  0x4c   :  { %741 = vmatmul.mubr.bf16.gmra.mxu1 %v1313_v59  ;;  %652 = vmatprep.mubr.bf16.mxu0 %v1314_v60 }
  0x4d   :  { %748 = vmatprep.mubr.bf16.mxu1 %v1316_v61 }
  0x53   :  { %653 = vmatmul.mubr.bf16.gmra.mxu0 %v1318_v0 }
  0x54   :  { %749 = vmatmul.mubr.bf16.gmra.mxu1 %v1319_v1  ;;  %660 = vmatprep.mubr.bf16.mxu0 %v993_v2 }
  0x55   :  { %756 = vmatprep.mubr.bf16.mxu1 %v995_v3 }
  0x5b   :  { %661 = vmatmul.mubr.bf16.gmra.mxu0 %v992_v4 }
  0x5c   :  { %757 = vmatmul.mubr.bf16.gmra.mxu1 %v994_v5  ;;  %1219 = vmatprep.mubr.msk.bf16.mxu0 %vm547_vm0, %v1325_v6  ;;  %v1628_v5 = vld [vmem:[%s1746_s2] ss:$0 sm:$0xff] }
  0x5d   :  { %1227 = vmatprep.mubr.msk.bf16.mxu1 %vm547_vm0, %v1326_v7 }
  0x63   :  { %1220 = vmatmul.mubr.msk.bf16.vlgmr.msra.gmra.mxu0 %vm547_vm0, %v1327_v8 }
  0x64   :  { %1228 = vmatmul.mubr.msk.bf16.vlgmr.msra.gmra.mxu1 %vm547_vm0, %v1328_v9  ;;  %1223 = vmatprep.mubr.msk.bf16.mxu0 %vm547_vm0, %v1329_v10 }
  0x65   :  { %1231 = vmatprep.mubr.msk.bf16.mxu1 %vm547_vm0, %v1330_v11 }
  0x6b   :  { %1224 = vmatmul.mubr.msk.bf16.gmra.mxu0 %vm547_vm0, %v1331_v12 }
  0x6c   :  { %1232 = vmatmul.mubr.msk.bf16.gmra.mxu1 %vm547_vm0, %v1332_v13 }
  0xe3   :  { %v1087_v14 = vpop.f32.mrf.mxu0 }
  0xe4   :  { %v1583_v15 = vpop.f32.mrf.mxu1 }
  0xe5   :  { %v1088_v16 = vpop.f32.mrf.mxu0 }
  0xe6   :  { %v1152_v17 = vpop.f32.mrf.mxu1  ;;  %v1089_v2 = vadd.f32 %v1088_v16, %v1087_v14 }
  0xe7   :  { %v1090_v18 = vpop.f32.mrf.mxu0  ;;  %v1153_v13 = vadd.f32 %v1152_v17, %v1583_v15 }
  0xe8   :  { %v1585_v19 = vpop.f32.mrf.mxu1  ;;  %v607_v12 = vadd.f32 %v1089_v2, %v1628_v5 }
  0xe9   :  { %v1091_v20 = vpop.f32.mrf.mxu0 }
  0xea   :  { %v1587_v21 = vpop.f32.mrf.mxu1  ;;  %v1092_v3 = vadd.f32 %v1091_v20, %v1090_v18 }
  0xeb   :  { %v1093_v22 = vpop.f32.mrf.mxu0 }
  0xec   :  { %v1589_v23 = vpop.f32.mrf.mxu1  ;;  %v610_v14 = vadd.f32 %v1092_v3, %v1628_v5 }
  0xed   :  { %v1094_v24 = vpop.f32.mrf.mxu0 }
  0xee   :  { %v1591_v25 = vpop.f32.mrf.mxu1  ;;  %v1095_v6 = vadd.f32 %v1094_v24, %v1093_v22 }
  0xef   :  { %v1096_v26 = vpop.f32.mrf.mxu0 }
  0xf0   :  { %v1160_v27 = vpop.f32.mrf.mxu1  ;;  %v615_v20 = vadd.f32 %v1095_v6, %v1628_v5 }
  0xf1   :  { %v1097_v28 = vpop.f32.mrf.mxu0 }
  0xf2   :  { %v1161_v29 = vpop.f32.mrf.mxu1  ;;  %v1098_v7 = vadd.f32 %v1097_v28, %v1096_v26 }
  0xf3   :  { %v1099_v30 = vpop.f32.mrf.mxu0  ;;  %v1162_v2 = vadd.f32 %v1161_v29, %v1160_v27 }
  0xf4   :  { %v1163_v31 = vpop.f32.mrf.mxu1  ;;  %v618_v22 = vadd.f32 %v1098_v7, %v1628_v5 }
  0xf5   :  { %v1100_v32 = vpop.f32.mrf.mxu0 }
  0xf6   :  { %v1164_v33 = vpop.f32.mrf.mxu1  ;;  %v1101_v8 = vadd.f32 %v1100_v32, %v1099_v30  ;;  %v1156_v30 = vadd.f32 %v1587_v21, %v1585_v19  ;;  %v1159_v32 = vadd.f32 %v1591_v25, %v1589_v23 }
  0xf7   :  { %v1102_v34 = vpop.f32.mrf.mxu0  ;;  %v1165_v3 = vadd.f32 %v1164_v33, %v1163_v31 }
  0xf8   :  { %v1593_v35 = vpop.f32.mrf.mxu1  ;;  %v623_v24 = vadd.f32 %v1101_v8, %v1628_v5  ;;  %v711_v21 = vadd.f32 %v1159_v32, %v615_v20 }
  0xf9   :  { %v1103_v36 = vpop.f32.mrf.mxu0 }
  0xfa   :  { %v1595_v37 = vpop.f32.mrf.mxu1  ;;  %v1648_v23 = vadd.f32 %v1165_v3, %v623_v24 }
  0xfb   :  { %v1105_v38 = vpop.f32.mrf.mxu0  ;;  %v1652_v25 = vadd.f32 %v1595_v37, %v1593_v35 }
  0xfc   :  { %v1597_v39 = vpop.f32.mrf.mxu1 }
  0xfd   :  { %v1106_v40 = vpop.f32.mrf.mxu0 }
  0xfe   :  { %v1599_v41 = vpop.f32.mrf.mxu1  ;;  %v1107_v26 = vadd.f32 %v1106_v40, %v1105_v38  ;;  %v703_v38 = vadd.f32 %v1153_v13, %v607_v12  ;;  %v706_v40 = vadd.f32 %v1156_v30, %v610_v14 }
  0xff   :  { %v1601_v42 = vpop.f32.mrf.mxu0 }
 0x100   :  { %v1603_v43 = vpop.f32.mrf.mxu1  ;;  %v631_v8 = vadd.f32 %v1107_v26, %v1628_v5 }
 0x101   :  { %v1605_v44 = vpop.f32.mrf.mxu0 }
 0x102   :  { %v1607_v45 = vpop.f32.mrf.mxu1  ;;  %v1110_v27 = vadd.f32 %v1605_v44, %v1601_v42 }
 0x103   :  { %v1111_v46 = vpop.f32.mrf.mxu0 }
 0x104   :  { %v1609_v47 = vpop.f32.mrf.mxu1 }
 0x105   :  { %v1112_v48 = vpop.f32.mrf.mxu0 }
 0x106   :  { %v1611_v49 = vpop.f32.mrf.mxu1  ;;  %v1113_v15 = vadd.f32 %v1112_v48, %v1111_v46 }
 0x107   :  { %v1114_v50 = vpop.f32.mrf.mxu0  ;;  %v1177_v35 = vadd.f32 %v1611_v49, %v1609_v47 }
 0x108   :  { %v1613_v51 = vpop.f32.mrf.mxu1  ;;  %v639_v29 = vadd.f32 %v1113_v15, %v1628_v5 }
 0x109   :  { %v1115_v52 = vpop.f32.mrf.mxu0 }
 0x10a   :  { %v1615_v53 = vpop.f32.mrf.mxu1  ;;  %v735_v47 = vadd.f32 %v1177_v35, %v639_v29 }
 0x10b   :  { %v1117_v54 = vpop.f32.mrf.mxu0 }
 0x10c   :  { %v1181_v55 = vpop.f32.mrf.mxu1 }
 0x10d   :  { %v1118_v56 = vpop.f32.mrf.mxu0 }
 0x10e   :  { %v1182_v57 = vpop.f32.mrf.mxu1  ;;  %v1119_v16 = vadd.f32 %v1118_v56, %v1117_v54  ;;  %v1104_v54 = vadd.f32 %v1103_v36, %v1102_v34  ;;  %v1116_v56 = vadd.f32 %v1115_v52, %v1114_v50  ;;  %v1171_v36 = vadd.f32 %v1599_v41, %v1597_v39 }
 0x10f   :  { %v1120_v58 = vpop.f32.mrf.mxu0  ;;  %v1183_v31 = vadd.f32 %v1182_v57, %v1181_v55  ;;  %v1180_v55 = vadd.f32 %v1615_v53, %v1613_v51  ;;  %v634_v41 = vadd.f32 %v1110_v27, %v1628_v5 }
 0x110   :  { %v1617_v59 = vpop.f32.mrf.mxu1  ;;  %v647_v7 = vadd.f32 %v1119_v16, %v1628_v5  ;;  %v1658_v34 = vadd.f32 %v1104_v54, %v1628_v5  ;;  %v642_v46 = vadd.f32 %v1116_v56, %v1628_v5  ;;  %v727_v39 = vadd.f32 %v1171_v36, %v631_v8 }
 0x111   :  { %v1121_v60 = vpop.f32.mrf.mxu0 }
 0x112   :  { %v1185_v61 = vpop.f32.mrf.mxu1  ;;  %v743_v52 = vadd.f32 %v1183_v31, %v647_v7  ;;  %v738_v14 = vadd.f32 %v1180_v55, %v642_v46 }
 0x113   :  { %v1123_v62 = vpop.f32.mrf.mxu0  ;;  %v1186_v57 = vadd.f32 %v1185_v61, %v1617_v59 }
 0x114   :  { %v1619_v63 = vpop.f32.mrf.mxu1 }
 0x115   :  { %v1124_v0 = vpop.f32.mrf.mxu0 }
 0x116   :  { %v1621_v1 = vpop.f32.mrf.mxu1  ;;  %v1125_v37 = vadd.f32 %v1124_v0, %v1123_v62 }
 0x117   :  { %1748 = vst [vmem:[#allocation2_spill] sm:$0xff] %v1621_v1  ;;  %v1623_v4 = vpop.f32.mrf.mxu0  ;;  %v714_v1 = vadd.f32 %v1162_v2, %v618_v22 }
 0x118   :  { %v1630_v9 = vpop.f32.mrf.mxu1  ;;  %v655_v51 = vadd.f32 %v1125_v37, %v1628_v5 }
 0x119   :  { %1749 = vst [vmem:[#allocation3_spill] sm:$0xff] %v1630_v9  ;;  %v1632_v10 = vpop.f32.mrf.mxu0 }
 0x11a   :  { %v1634_v11 = vpop.f32.mrf.mxu1 }
 0x11b   :  { %1750 = vst [vmem:[#allocation4_spill] sm:$0xff] %v1634_v11  ;;  %v1129_v18 = vpop.f32.mrf.mxu0  ;;  %v1122_v11 = vadd.f32 %v1121_v60, %v1120_v58 }
 0x11c   :  { %v1193_v28 = vpop.f32.mrf.mxu1 }
 0x11d   :  { %v1130_v17 = vpop.f32.mrf.mxu0  ;;  %v650_v48 = vadd.f32 %v1122_v11, %v1628_v5 }
 0x11e   :  { %v1194_v6 = vpop.f32.mrf.mxu1  ;;  %v1131_v42 = vadd.f32 %v1130_v17, %v1129_v18  ;;  %v1128_v18 = vadd.f32 %v1632_v10, %v1623_v4  ;;  %v1751_v15 = vld [vmem:[#allocation2_spill] sm:$0xff] }
 0x11f   :  { %v1132_v9 = vpop.f32.mrf.mxu0  ;;  %v746_v13 = vadd.f32 %v1186_v57, %v650_v48  ;;  %v1195_v24 = vadd.f32 %v1194_v6, %v1193_v28  ;;  %v1189_v17 = vadd.f32 %v1751_v15, %v1619_v63 }
 0x120   :  { %v1196_v19 = vpop.f32.mrf.mxu1  ;;  %v1174_v9 = vadd.f32 %v1607_v45, %v1603_v43  ;;  %v663_v53 = vadd.f32 %v1131_v42, %v1628_v5  ;;  %v1752_v35 = vld [vmem:[#allocation3_spill] sm:$0xff] }
 0x121   :  { %v1133_v33 = vpop.f32.mrf.mxu0  ;;  %v751_v19 = vadd.f32 %v1189_v17, %v655_v51 }
 0x122   :  { %v1197_v50 = vpop.f32.mrf.mxu1  ;;  %v759_v7 = vadd.f32 %v1195_v24, %v663_v53  ;;  %v1753_v37 = vld [vmem:[#allocation4_spill] sm:$0xff] }
 0x123   :  { %v1221_v44 = vpop.f32.mrf.mxu0  ;;  %v1192_v42 = vadd.f32 %v1753_v37, %v1752_v35 }
 0x124   :  { %v807_v58 = vadd.f32 %v1221_v44, %v711_v21  ;;  %v1229_v60 = vpop.f32.mrf.mxu1  ;;  %v658_v21 = vadd.f32 %v1128_v18, %v1628_v5  ;;  %v730_v5 = vadd.f32 %v1174_v9, %v634_v41  ;;  %v722_v41 = vadd.f32 %v1652_v25, %v1658_v34 }
 0x125   :  { %v839_v11 = vadd.f32 %v1229_v60, %v743_v52  ;;  %v798_v12 = vpop.f32.mrf.mxu0 }
 0x126   :  { %v862_v49 = vmax.f32 %v807_v58, 0.0  ;;  %v799_v62 = vadd.f32 %v798_v12, %v703_v38  ;;  %v830_v0 = vpop.f32.mrf.mxu1 }
 0x127   :  { %v870_v59 = vmax.f32 %v839_v11, 0.0  ;;  %v831_v61 = vadd.f32 %v830_v0, %v735_v47  ;;  %v1222_v16 = vpop.f32.mrf.mxu0  ;;  %v754_v47 = vadd.f32 %v1192_v42, %v658_v21 }
 0x128   :  { %v1058_v20 = vpack.c.bf16 %v862_v49, %v862_v49  ;;  %v860_v43 = vmax.f32 %v799_v62, 0.0  ;;  %v810_v45 = vadd.f32 %v1222_v16, %v714_v1  ;;  %v1230_v22 = vpop.f32.mrf.mxu1 }
 0x129   :  { %v1066_v26 = vpack.c.bf16 %v870_v59, %v870_v59  ;;  %v868_v30 = vmax.f32 %v831_v61, 0.0  ;;  %v842_v32 = vadd.f32 %v1230_v22, %v746_v13  ;;  %v801_v2 = vpop.f32.mrf.mxu0 }
 0x12a   :  { %939 = vst.msk [vmem:[%s1747_s3 + $0x8] sm:$0xf] %vm936_vm1, %v1058_v20  ;;  %v1056_v3 = vpack.c.bf16 %v860_v43, %v860_v43  ;;  %v863_v54 = vmax.f32 %v810_v45, 0.0  ;;  %v802_v4 = vadd.f32 %v801_v2, %v706_v40  ;;  %v833_v10 = vpop.f32.mrf.mxu1 }
 0x12b   :  { %947 = vst.msk [vmem:[%s1747_s3 + $0x28] sm:$0xf] %vm936_vm1, %v1066_v26  ;;  %v1064_v1 = vpack.c.bf16 %v868_v30, %v868_v30  ;;  %v871_v28 = vmax.f32 %v842_v32, 0.0  ;;  %v834_v56 = vadd.f32 %v833_v10, %v738_v14  ;;  %v1225_v6 = vpop.f32.mrf.mxu0 }
 0x12c   :  { %937 = vst.msk [vmem:[%s1747_s3] sm:$0xf] %vm936_vm1, %v1056_v3  ;;  %v1059_v63 = vpack.c.bf16 %v863_v54, %v863_v54  ;;  %v861_v38 = vmax.f32 %v802_v4, 0.0  ;;  %v823_v8 = vadd.f32 %v1225_v6, %v727_v39  ;;  %v1233_v40 = vpop.f32.mrf.mxu1 }
 0x12d   :  { %945 = vst.msk [vmem:[%s1747_s3 + $0x20] sm:$0xf] %vm936_vm1, %v1064_v1  ;;  %v1067_v27 = vpack.c.bf16 %v871_v28, %v871_v28  ;;  %v869_v29 = vmax.f32 %v834_v56, 0.0  ;;  %v855_v31 = vadd.f32 %v1233_v40, %v759_v7  ;;  %v814_v33 = vpop.f32.mrf.mxu0 }
 0x12e   :  { %940 = vst.msk [vmem:[%s1747_s3 + $0xc] sm:$0xf] %vm936_vm1, %v1059_v63  ;;  %v1057_v36 = vpack.c.bf16 %v861_v38, %v861_v38  ;;  %v866_v46 = vmax.f32 %v823_v8, 0.0  ;;  %v815_v48 = vadd.f32 %v814_v33, %v1648_v23  ;;  %v846_v50 = vpop.f32.mrf.mxu1 }
 0x12f   :  { %948 = vst.msk [vmem:[%s1747_s3 + $0x2c] sm:$0xf] %vm936_vm1, %v1067_v27  ;;  %v1065_v44 = vpack.c.bf16 %v869_v29, %v869_v29  ;;  %v874_v52 = vmax.f32 %v855_v31, 0.0  ;;  %v847_v55 = vadd.f32 %v846_v50, %v751_v19  ;;  %v1226_v57 = vpop.f32.mrf.mxu0 }
 0x130   :  { %938 = vst.msk [vmem:[%s1747_s3 + $0x4] sm:$0xf] %vm936_vm1, %v1057_v36  ;;  %v1062_v23 = vpack.c.bf16 %v866_v46, %v866_v46  ;;  %v864_v58 = vmax.f32 %v815_v48, 0.0  ;;  %v826_v60 = vadd.f32 %v1226_v57, %v730_v5  ;;  %v1234_v39 = vpop.f32.mrf.mxu1 }
 0x131   :  { %946 = vst.msk [vmem:[%s1747_s3 + $0x24] sm:$0xf] %vm936_vm1, %v1065_v44  ;;  %v1070_v9 = vpack.c.bf16 %v874_v52, %v874_v52  ;;  %v872_v11 = vmax.f32 %v847_v55, 0.0  ;;  %v817_v12 = vpop.f32.mrf.mxu0 }
 0x132   :  { %943 = vst.msk [vmem:[%s1747_s3 + $0x18] sm:$0xf] %vm936_vm1, %v1062_v23  ;;  %v1060_v49 = vpack.c.bf16 %v864_v58, %v864_v58  ;;  %v867_v62 = vmax.f32 %v826_v60, 0.0  ;;  %v818_v0 = vadd.f32 %v817_v12, %v722_v41  ;;  %v849_v13 = vpop.f32.mrf.mxu1 }
 0x133   :  { %951 = vst.msk [vmem:[%s1747_s3 + $0x38] sm:$0xf] %vm936_vm1, %v1070_v9  ;;  %v1068_v25 = vpack.c.bf16 %v872_v11, %v872_v11  ;;  %v850_v34 = vadd.f32 %v849_v13, %v754_v47 }
 0x134   :  { %941 = vst.msk [vmem:[%s1747_s3 + $0x10] sm:$0xf] %vm936_vm1, %v1060_v49  ;;  %v1063_v14 = vpack.c.bf16 %v867_v62, %v867_v62  ;;  %v865_v51 = vmax.f32 %v818_v0, 0.0 }
 0x135   :  { %949 = vst.msk [vmem:[%s1747_s3 + $0x30] sm:$0xf] %vm936_vm1, %v1068_v25  ;;  %v873_v53 = vmax.f32 %v850_v34, 0.0 }
 0x136   :  { %944 = vst.msk [vmem:[%s1747_s3 + $0x1c] sm:$0xf] %vm936_vm1, %v1063_v14  ;;  %v1061_v59 = vpack.c.bf16 %v865_v51, %v865_v51 }
 0x137   :  { %v1069_v61 = vpack.c.bf16 %v873_v53, %v873_v53 }
 0x138   :  { %942 = vst.msk [vmem:[%s1747_s3 + $0x14] sm:$0xf] %vm936_vm1, %v1061_v59 }
 0x139   :  { %950 = vst.msk [vmem:[%s1747_s3 + $0x34] sm:$0xf] %vm936_vm1, %v1069_v61 }

// kernel: dqn_forward.7
= control target key start
LH: loop header
LB: loop body
LE: loop exit
PB: predicated region body
PF: predicated region fallthrough
CT: control target
= control target key end

     0   :  { %v988_v36 = vlaneseq  ;;  %v10171_v37 = vmov 1966171168   ;;  %s13506_s0 = inlined_call_operand.vmem [shape: bf16[2,3840], index: 0, kind: input, shape index: {}]   ;;  %s13507_s1 = inlined_call_operand.vmem [shape: bf16[3840,512], index: 1, kind: input, shape index: {}]   ;;  %s13508_s2 = inlined_call_operand.vmem [shape: f32[1,512], index: 2, kind: input, shape index: {}]   ;;  %s13509_s3 = inlined_call_operand.vmem [shape: bf16[512,2], index: 3, kind: input, shape index: {}]   ;;  %s13510_s4 = inlined_call_operand.vmem [shape: f32[1,2], index: 4, kind: input, shape index: {}]   ;;  %s13511_s5 = inlined_call_operand.hbm [shape: f32[2,2], index: 5, kind: output, shape index: {}]  }
   0x1   :  { %v8672_v0 = vld [vmem:[%s13507_s1 + $0xe4] ss:$16 sps:$4 sm:$0xff]   ;;  %v8676_v2 = vld [vmem:[%s13507_s1 + $0xe0] ss:$16 sps:$4 sm:$0xff]   ;;  %v1014_v38 = vunpack.c.l.s4 %v10171_v37 }
   0x2   :  { %v8674_v1 = vld [vmem:[%s13507_s1 + $0x2e4] ss:$16 sps:$4 sm:$0xff]   ;;  %6036 = vmatprep.subr.bf16.mxu0 %v8672_v0  ;;  %v8677_v3 = vld [vmem:[%s13507_s1 + $0x2e0] ss:$16 sps:$4 sm:$0xff]   ;;  %v10320_v42 = vshrl.u32 %v988_v36, 7 }
   0x3   :  { %6077 = vmatprep.subr.bf16.mxu1 %v8674_v1  ;;  %v8678_v4 = vld [vmem:[%s13507_s1 + $0xc4] ss:$16 sps:$4 sm:$0xff]   ;;  %6037 = vmatpush1.bf16.msra.mxu0 %v8676_v2  ;;  %v8682_v6 = vld [vmem:[%s13507_s1 + $0xc0] ss:$16 sps:$4 sm:$0xff]   ;;  %v1015_v43 = vunpack.c.0.s8 %v1014_v38 }
   0x4   :  { %6078 = vmatpush1.bf16.msra.mxu1 %v8677_v3  ;;  %v8680_v5 = vld [vmem:[%s13507_s1 + $0x2c4] ss:$16 sps:$4 sm:$0xff]   ;;  %6038 = vmatprep.subr.bf16.mxu0 %v8678_v4  ;;  %v8683_v7 = vld [vmem:[%s13507_s1 + $0x2c0] ss:$16 sps:$4 sm:$0xff]  }
   0x5   :  { %6079 = vmatprep.subr.bf16.mxu1 %v8680_v5  ;;  %v8684_v8 = vld [vmem:[%s13507_s1 + $0xa4] ss:$16 sps:$4 sm:$0xff]   ;;  %v8688_v10 = vld [vmem:[%s13507_s1 + $0xa0] ss:$16 sps:$4 sm:$0xff]   ;;  %v10338_v49 = vsub.s32 %v1015_v43, %v10320_v42 }
   0x6   :  { %v8686_v9 = vld [vmem:[%s13507_s1 + $0x2a4] ss:$16 sps:$4 sm:$0xff]   ;;  %v8689_v11 = vld [vmem:[%s13507_s1 + $0x2a0] ss:$16 sps:$4 sm:$0xff]  }
   0x7   :  { %6039 = vmatpush1.bf16.msra.mxu0 %v8682_v6  ;;  %v8690_v12 = vld [vmem:[%s13507_s1 + $0x84] ss:$16 sps:$4 sm:$0xff]   ;;  %v8694_v14 = vld [vmem:[%s13507_s1 + $0x80] ss:$16 sps:$4 sm:$0xff]  }
   0x8   :  { %6080 = vmatpush1.bf16.msra.mxu1 %v8683_v7  ;;  %6040 = vmatprep.subr.bf16.mxu0 %v8684_v8  ;;  %v8692_v13 = vld [vmem:[%s13507_s1 + $0x284] ss:$16 sps:$4 sm:$0xff]   ;;  %v8695_v15 = vld [vmem:[%s13507_s1 + $0x280] ss:$16 sps:$4 sm:$0xff]  }
   0x9   :  { %6081 = vmatprep.subr.bf16.mxu1 %v8686_v9  ;;  %v8696_v16 = vld [vmem:[%s13507_s1 + $0x64] ss:$16 sps:$4 sm:$0xff]   ;;  %v8700_v18 = vld [vmem:[%s13507_s1 + $0x60] ss:$16 sps:$4 sm:$0xff]  }
   0xa   :  { %v8698_v17 = vld [vmem:[%s13507_s1 + $0x264] ss:$16 sps:$4 sm:$0xff]   ;;  %v8701_v19 = vld [vmem:[%s13507_s1 + $0x260] ss:$16 sps:$4 sm:$0xff]  }
   0xb   :  { %6041 = vmatpush1.bf16.msra.mxu0 %v8688_v10  ;;  %v8702_v20 = vld [vmem:[%s13507_s1 + $0x44] ss:$16 sps:$4 sm:$0xff]   ;;  %v8706_v22 = vld [vmem:[%s13507_s1 + $0x40] ss:$16 sps:$4 sm:$0xff]  }
   0xc   :  { %6082 = vmatpush1.bf16.msra.mxu1 %v8689_v11  ;;  %6042 = vmatprep.subr.bf16.mxu0 %v8690_v12  ;;  %v8704_v21 = vld [vmem:[%s13507_s1 + $0x244] ss:$16 sps:$4 sm:$0xff]   ;;  %v8707_v23 = vld [vmem:[%s13507_s1 + $0x240] ss:$16 sps:$4 sm:$0xff]  }
   0xd   :  { %6083 = vmatprep.subr.bf16.mxu1 %v8692_v13  ;;  %v8708_v24 = vld [vmem:[%s13507_s1 + $0x24] ss:$16 sps:$4 sm:$0xff]   ;;  %v8712_v26 = vld [vmem:[%s13507_s1 + $0x20] ss:$16 sps:$4 sm:$0xff]  }
   0xe   :  { %v8710_v25 = vld [vmem:[%s13507_s1 + $0x224] ss:$16 sps:$4 sm:$0xff]   ;;  %v8713_v27 = vld [vmem:[%s13507_s1 + $0x220] ss:$16 sps:$4 sm:$0xff]  }
   0xf   :  { %6043 = vmatpush1.bf16.msra.mxu0 %v8694_v14  ;;  %v8714_v28 = vld [vmem:[%s13507_s1 + $0x4] ss:$16 sps:$4 sm:$0xff]   ;;  %v8718_v30 = vld [vmem:[%s13507_s1] ss:$16 sps:$4 sm:$0xff]  }
  0x10   :  { %6084 = vmatpush1.bf16.msra.mxu1 %v8695_v15  ;;  %6044 = vmatprep.subr.bf16.mxu0 %v8696_v16  ;;  %v8716_v29 = vld [vmem:[%s13507_s1 + $0x204] ss:$16 sps:$4 sm:$0xff]   ;;  %v8719_v31 = vld [vmem:[%s13507_s1 + $0x200] ss:$16 sps:$4 sm:$0xff]  }
  0x11   :  { %6085 = vmatprep.subr.bf16.mxu1 %v8698_v17  ;;  %v8720_v32 = vld [vmem:[%s13507_s1 + $0x1e4] ss:$16 sps:$4 sm:$0xff]   ;;  %v8724_v34 = vld [vmem:[%s13507_s1 + $0x1e0] ss:$16 sps:$4 sm:$0xff]  }
  0x12   :  { %v8722_v33 = vld [vmem:[%s13507_s1 + $0x3e4] ss:$16 sps:$4 sm:$0xff]   ;;  %v8725_v35 = vld [vmem:[%s13507_s1 + $0x3e0] ss:$16 sps:$4 sm:$0xff]  }
  0x13   :  { %6045 = vmatpush1.bf16.msra.mxu0 %v8700_v18  ;;  %v8726_v39 = vld [vmem:[%s13507_s1 + $0x1c4] ss:$16 sps:$4 sm:$0xff]   ;;  %v8730_v41 = vld [vmem:[%s13507_s1 + $0x1c0] ss:$16 sps:$4 sm:$0xff]  }
  0x14   :  { %6086 = vmatpush1.bf16.msra.mxu1 %v8701_v19  ;;  %6046 = vmatprep.subr.bf16.mxu0 %v8702_v20  ;;  %v8728_v40 = vld [vmem:[%s13507_s1 + $0x3c4] ss:$16 sps:$4 sm:$0xff]   ;;  %v8731_v44 = vld [vmem:[%s13507_s1 + $0x3c0] ss:$16 sps:$4 sm:$0xff]  }
  0x15   :  { %6087 = vmatprep.subr.bf16.mxu1 %v8704_v21  ;;  %v8732_v45 = vld [vmem:[%s13507_s1 + $0x1a4] ss:$16 sps:$4 sm:$0xff]   ;;  %v8736_v47 = vld [vmem:[%s13507_s1 + $0x1a0] ss:$16 sps:$4 sm:$0xff]  }
  0x16   :  { %v8734_v46 = vld [vmem:[%s13507_s1 + $0x3a4] ss:$16 sps:$4 sm:$0xff]   ;;  %v8737_v48 = vld [vmem:[%s13507_s1 + $0x3a0] ss:$16 sps:$4 sm:$0xff]  }
  0x17   :  { %6047 = vmatpush1.bf16.msra.mxu0 %v8706_v22  ;;  %v8738_v50 = vld [vmem:[%s13507_s1 + $0x184] ss:$16 sps:$4 sm:$0xff]   ;;  %v8742_v53 = vld [vmem:[%s13507_s1 + $0x180] ss:$16 sps:$4 sm:$0xff]  }
  0x18   :  { %6088 = vmatpush1.bf16.msra.mxu1 %v8707_v23  ;;  %6048 = vmatprep.subr.bf16.mxu0 %v8708_v24  ;;  %v8740_v51 = vld [vmem:[%s13507_s1 + $0x384] ss:$16 sps:$4 sm:$0xff]   ;;  %v8743_v55 = vld [vmem:[%s13507_s1 + $0x380] ss:$16 sps:$4 sm:$0xff]  }
  0x19   :  { %6089 = vmatprep.subr.bf16.mxu1 %v8710_v25  ;;  %v22_v52 = vld [vmem:[%s13506_s0] sm:$0xff] }
  0x1a   :  { %v1019_v54 = vrot.slane %v22_v52, %v10338_v49  ;;  %v8744_v56 = vld [vmem:[%s13507_s1 + $0x164] ss:$16 sps:$4 sm:$0xff]   ;;  %v8748_v59 = vld [vmem:[%s13507_s1 + $0x160] ss:$16 sps:$4 sm:$0xff]   ;;  %v1012_v1 = vcombine.high %v22_v52, %v22_v52 }
  0x1b   :  { %6049 = vmatpush1.bf16.msra.mxu0 %v8712_v26  ;;  %v8746_v57 = vld [vmem:[%s13507_s1 + $0x364] ss:$16 sps:$4 sm:$0xff]   ;;  %v8749_v61 = vld [vmem:[%s13507_s1 + $0x360] ss:$16 sps:$4 sm:$0xff]  }
  0x1c   :  { %6090 = vmatpush1.bf16.msra.mxu1 %v8713_v27  ;;  %6050 = vmatprep.subr.bf16.mxu0 %v8714_v28  ;;  %v1027_v58 = vcombine.high %v1019_v54, %v1019_v54  ;;  %v8750_v62 = vld [vmem:[%s13507_s1 + $0x144] ss:$16 sps:$4 sm:$0xff]   ;;  %v8754_v2 = vld [vmem:[%s13507_s1 + $0x140] ss:$16 sps:$4 sm:$0xff]   ;;  %v10396_v6 = vrot.slane %v1012_v1, %v10338_v49  ;;  %v10416_v13 = vrot.slane %v1019_v54, %v10338_v49 }
  0x1d   :  { %6091 = vmatprep.subr.bf16.mxu1 %v8716_v29  ;;  %v8752_v63 = vld [vmem:[%s13507_s1 + $0x344] ss:$16 sps:$4 sm:$0xff]   ;;  %v8755_v3 = vld [vmem:[%s13507_s1 + $0x340] ss:$16 sps:$4 sm:$0xff]  }
  0x1e   :  { %v10366_v60 = vrot.slane %v1027_v58, %v10338_v49  ;;  %v8756_v4 = vld [vmem:[%s13507_s1 + $0x124] ss:$16 sps:$4 sm:$0xff]   ;;  %v8760_v7 = vld [vmem:[%s13507_s1 + $0x120] ss:$16 sps:$4 sm:$0xff]   ;;  %v1028_v11 = vcombine.high %v10396_v6, %v10396_v6  ;;  %v10432_v18 = vcombine.high %v10416_v13, %v10416_v13 }
  0x1f   :  { %6051 = vmatpush1.bf16.msra.mxu0 %v8718_v30  ;;  %v8758_v5 = vld [vmem:[%s13507_s1 + $0x324] ss:$16 sps:$4 sm:$0xff]   ;;  %v8761_v8 = vld [vmem:[%s13507_s1 + $0x320] ss:$16 sps:$4 sm:$0xff]  }
  0x20   :  { %6092 = vmatpush1.bf16.msra.mxu1 %v8719_v31  ;;  %6052 = vmatprep.subr.bf16.mxu0 %v8720_v32  ;;  %v10379_v0 = vcombine.high %v10366_v60, %v10366_v60  ;;  %v8762_v9 = vld [vmem:[%s13507_s1 + $0x104] ss:$16 sps:$4 sm:$0xff]   ;;  %v8766_v12 = vld [vmem:[%s13507_s1 + $0x100] ss:$16 sps:$4 sm:$0xff]   ;;  %v10428_v17 = vrot.slane %v1028_v11, %v10338_v49 }
  0x21   :  { %6093 = vmatprep.subr.bf16.mxu1 %v8722_v33  ;;  %6068 = vmatprep.mubr.bf16.mxu0 %v10366_v60  ;;  %v8764_v10 = vld [vmem:[%s13507_s1 + $0x304] ss:$16 sps:$4 sm:$0xff]   ;;  %v8767_v14 = vld [vmem:[%s13507_s1 + $0x300] ss:$16 sps:$4 sm:$0xff]  }
  0x22   :  { %6109 = vmatprep.mubr.bf16.mxu1 %v10379_v0  ;;  %v8770_v15 = vld [vmem:[%s13507_s1 + $0x4e4] ss:$16 sps:$4 sm:$0xff]   ;;  %v8768_v19 = vld [vmem:[%s13507_s1 + $0x4e0] ss:$16 sps:$4 sm:$0xff]   ;;  %v10448_v23 = vcombine.high %v10428_v17, %v10428_v17 }
  0x23   :  { %6053 = vmatpush2.bf16.msra.mxu0 %v8724_v34  ;;  %v8773_v16 = vld [vmem:[%s13507_s1 + $0x6e4] ss:$16 sps:$4 sm:$0xff]   ;;  %v8771_v20 = vld [vmem:[%s13507_s1 + $0x6e0] ss:$16 sps:$4 sm:$0xff]  }
  0x24   :  { %6094 = vmatpush2.bf16.msra.mxu1 %v8725_v35  ;;  %6054 = vmatprep.subr.bf16.mxu0 %v8726_v39  ;;  %v8776_v21 = vld [vmem:[%s13507_s1 + $0x4c4] ss:$16 sps:$4 sm:$0xff]   ;;  %v8774_v24 = vld [vmem:[%s13507_s1 + $0x4c0] ss:$16 sps:$4 sm:$0xff]  }
  0x25   :  { %6095 = vmatprep.subr.bf16.mxu1 %v8728_v40  ;;  %v8779_v22 = vld [vmem:[%s13507_s1 + $0x6c4] ss:$16 sps:$4 sm:$0xff]   ;;  %v8777_v25 = vld [vmem:[%s13507_s1 + $0x6c0] ss:$16 sps:$4 sm:$0xff]  }
  0x26   :  { %v8782_v26 = vld [vmem:[%s13507_s1 + $0x4a4] ss:$16 sps:$4 sm:$0xff]   ;;  %v8780_v28 = vld [vmem:[%s13507_s1 + $0x4a0] ss:$16 sps:$4 sm:$0xff]  }
  0x27   :  { %6055 = vmatpush2.bf16.msra.mxu0 %v8730_v41  ;;  %v8785_v27 = vld [vmem:[%s13507_s1 + $0x6a4] ss:$16 sps:$4 sm:$0xff]   ;;  %v8783_v29 = vld [vmem:[%s13507_s1 + $0x6a0] ss:$16 sps:$4 sm:$0xff]  }
  0x28   :  { %6096 = vmatpush2.bf16.msra.mxu1 %v8731_v44  ;;  %6056 = vmatprep.subr.bf16.mxu0 %v8732_v45  ;;  %v8788_v30 = vld [vmem:[%s13507_s1 + $0x484] ss:$16 sps:$4 sm:$0xff]   ;;  %v8786_v32 = vld [vmem:[%s13507_s1 + $0x480] ss:$16 sps:$4 sm:$0xff]  }
  0x29   :  { %6097 = vmatprep.subr.bf16.mxu1 %v8734_v46  ;;  %v8791_v31 = vld [vmem:[%s13507_s1 + $0x684] ss:$16 sps:$4 sm:$0xff]   ;;  %v8789_v33 = vld [vmem:[%s13507_s1 + $0x680] ss:$16 sps:$4 sm:$0xff]  }
  0x2a   :  { %v8794_v34 = vld [vmem:[%s13507_s1 + $0x464] ss:$16 sps:$4 sm:$0xff]   ;;  %v8792_v36 = vld [vmem:[%s13507_s1 + $0x460] ss:$16 sps:$4 sm:$0xff]  }
  0x2b   :  { %6057 = vmatpush2.bf16.msra.mxu0 %v8736_v47  ;;  %v8797_v35 = vld [vmem:[%s13507_s1 + $0x664] ss:$16 sps:$4 sm:$0xff]   ;;  %v8795_v37 = vld [vmem:[%s13507_s1 + $0x660] ss:$16 sps:$4 sm:$0xff]  }
  0x2c   :  { %6098 = vmatpush2.bf16.msra.mxu1 %v8737_v48  ;;  %6058 = vmatprep.subr.bf16.mxu0 %v8738_v50  ;;  %v8800_v38 = vld [vmem:[%s13507_s1 + $0x444] ss:$16 sps:$4 sm:$0xff]   ;;  %v8798_v40 = vld [vmem:[%s13507_s1 + $0x440] ss:$16 sps:$4 sm:$0xff]  }
  0x2d   :  { %6099 = vmatprep.subr.bf16.mxu1 %v8740_v51  ;;  %v8803_v39 = vld [vmem:[%s13507_s1 + $0x644] ss:$16 sps:$4 sm:$0xff]   ;;  %v8801_v41 = vld [vmem:[%s13507_s1 + $0x640] ss:$16 sps:$4 sm:$0xff]  }
  0x2e   :  { %v8806_v43 = vld [vmem:[%s13507_s1 + $0x424] ss:$16 sps:$4 sm:$0xff]   ;;  %v8804_v45 = vld [vmem:[%s13507_s1 + $0x420] ss:$16 sps:$4 sm:$0xff]  }
  0x2f   :  { %6059 = vmatpush2.bf16.msra.mxu0 %v8742_v53  ;;  %v8809_v44 = vld [vmem:[%s13507_s1 + $0x624] ss:$16 sps:$4 sm:$0xff]   ;;  %v8807_v46 = vld [vmem:[%s13507_s1 + $0x620] ss:$16 sps:$4 sm:$0xff]  }
  0x30   :  { %6100 = vmatpush2.bf16.msra.mxu1 %v8743_v55  ;;  %6060 = vmatprep.subr.bf16.mxu0 %v8744_v56  ;;  %v8812_v47 = vld [vmem:[%s13507_s1 + $0x404] ss:$16 sps:$4 sm:$0xff]   ;;  %v8810_v50 = vld [vmem:[%s13507_s1 + $0x400] ss:$16 sps:$4 sm:$0xff]  }
  0x31   :  { %6101 = vmatprep.subr.bf16.mxu1 %v8746_v57  ;;  %v8815_v48 = vld [vmem:[%s13507_s1 + $0x604] ss:$16 sps:$4 sm:$0xff]   ;;  %v8813_v51 = vld [vmem:[%s13507_s1 + $0x600] ss:$16 sps:$4 sm:$0xff]  }
  0x32   :  { %v8818_v52 = vld [vmem:[%s13507_s1 + $0x5e4] ss:$16 sps:$4 sm:$0xff]   ;;  %v8816_v54 = vld [vmem:[%s13507_s1 + $0x5e0] ss:$16 sps:$4 sm:$0xff]  }
  0x33   :  { %6061 = vmatpush2.bf16.msra.mxu0 %v8748_v59  ;;  %v8821_v53 = vld [vmem:[%s13507_s1 + $0x7e4] ss:$16 sps:$4 sm:$0xff]   ;;  %v8819_v55 = vld [vmem:[%s13507_s1 + $0x7e0] ss:$16 sps:$4 sm:$0xff]  }
  0x34   :  { %6102 = vmatpush2.bf16.msra.mxu1 %v8749_v61  ;;  %6062 = vmatprep.subr.bf16.mxu0 %v8750_v62  ;;  %v8824_v56 = vld [vmem:[%s13507_s1 + $0x5c4] ss:$16 sps:$4 sm:$0xff]   ;;  %v8822_v58 = vld [vmem:[%s13507_s1 + $0x5c0] ss:$16 sps:$4 sm:$0xff]  }
  0x35   :  { %6103 = vmatprep.subr.bf16.mxu1 %v8752_v63  ;;  %v8827_v57 = vld [vmem:[%s13507_s1 + $0x7c4] ss:$16 sps:$4 sm:$0xff]   ;;  %v8825_v59 = vld [vmem:[%s13507_s1 + $0x7c0] ss:$16 sps:$4 sm:$0xff]  }
  0x36   :  { %v8830_v61 = vld [vmem:[%s13507_s1 + $0x5a4] ss:$16 sps:$4 sm:$0xff]   ;;  %v8828_v63 = vld [vmem:[%s13507_s1 + $0x5a0] ss:$16 sps:$4 sm:$0xff]  }
  0x37   :  { %6063 = vmatpush2.bf16.msra.mxu0 %v8754_v2  ;;  %v8833_v62 = vld [vmem:[%s13507_s1 + $0x7a4] ss:$16 sps:$4 sm:$0xff]   ;;  %v8831_v1 = vld [vmem:[%s13507_s1 + $0x7a0] ss:$16 sps:$4 sm:$0xff]  }
  0x38   :  { %6104 = vmatpush2.bf16.msra.mxu1 %v8755_v3  ;;  %6064 = vmatprep.subr.bf16.mxu0 %v8756_v4  ;;  %v8836_v2 = vld [vmem:[%s13507_s1 + $0x584] ss:$16 sps:$4 sm:$0xff]   ;;  %v8834_v4 = vld [vmem:[%s13507_s1 + $0x580] ss:$16 sps:$4 sm:$0xff]  }
  0x39   :  { %6105 = vmatprep.subr.bf16.mxu1 %v8758_v5  ;;  %v8839_v3 = vld [vmem:[%s13507_s1 + $0x784] ss:$16 sps:$4 sm:$0xff]   ;;  %v8837_v5 = vld [vmem:[%s13507_s1 + $0x780] ss:$16 sps:$4 sm:$0xff]  }
  0x3a   :  { %v8848_v11 = vld [vmem:[%s13507_s1 + $0x544] ss:$16 sps:$4 sm:$0xff]  }
  0x3b   :  { %6065 = vmatpush2.bf16.msra.mxu0 %v8760_v7  ;;  %v8842_v7 = vld [vmem:[%s13507_s1 + $0x564] ss:$16 sps:$4 sm:$0xff]  }
  0x3c   :  { %6106 = vmatpush2.bf16.msra.mxu1 %v8761_v8  ;;  %6066 = vmatprep.subr.bf16.mxu0 %v8762_v9  ;;  %v8845_v8 = vld [vmem:[%s13507_s1 + $0x764] ss:$16 sps:$4 sm:$0xff]   ;;  %v8840_v9 = vld [vmem:[%s13507_s1 + $0x560] ss:$16 sps:$4 sm:$0xff]  }
  0x3d   :  { %6107 = vmatprep.subr.bf16.mxu1 %v8764_v10  ;;  %v8843_v10 = vld [vmem:[%s13507_s1 + $0x760] ss:$16 sps:$4 sm:$0xff]  }
  0x3f   :  { %6067 = vmatpush2.bf16.msra.mxu0 %v8766_v12  ;;  %v8851_v12 = vld [vmem:[%s13507_s1 + $0x744] ss:$16 sps:$4 sm:$0xff]  }
  0x40   :  { %6108 = vmatpush2.bf16.msra.mxu1 %v8767_v14  ;;  %6118 = vmatprep.subr.bf16.mxu0 %v8770_v15  ;;  %v8846_v14 = vld [vmem:[%s13507_s1 + $0x540] ss:$16 sps:$4 sm:$0xff]  }
  0x41   :  { %6159 = vmatprep.subr.bf16.mxu1 %v8773_v16  ;;  %v8849_v15 = vld [vmem:[%s13507_s1 + $0x740] ss:$16 sps:$4 sm:$0xff]   ;;  %v8854_v16 = vld [vmem:[%s13507_s1 + $0x524] ss:$16 sps:$4 sm:$0xff]  }
  0x42   :  { %6069 = vmatmul.mubr.bf16.vlgmr.msra.gmra.mxu0 %v10416_v13 }
  0x43   :  { %6110 = vmatmul.mubr.bf16.vlgmr.msra.gmra.mxu1 %v10432_v18  ;;  %6119 = vmatpush1.bf16.msra.mxu0 %v8768_v19  ;;  %v8857_v19 = vld [vmem:[%s13507_s1 + $0x724] ss:$16 sps:$4 sm:$0xff]  }
  0x44   :  { %6160 = vmatpush1.bf16.msra.mxu1 %v8771_v20  ;;  %6120 = vmatprep.subr.bf16.mxu0 %v8776_v21  ;;  %v8852_v20 = vld [vmem:[%s13507_s1 + $0x520] ss:$16 sps:$4 sm:$0xff]  }
  0x45   :  { %6161 = vmatprep.subr.bf16.mxu1 %v8779_v22  ;;  %6150 = vmatprep.mubr.bf16.mxu0 %v10428_v17  ;;  %v8855_v21 = vld [vmem:[%s13507_s1 + $0x720] ss:$16 sps:$4 sm:$0xff]   ;;  %v8860_v22 = vld [vmem:[%s13507_s1 + $0x504] ss:$16 sps:$4 sm:$0xff]  }
  0x46   :  { %6191 = vmatprep.mubr.bf16.mxu1 %v10448_v23 }
  0x47   :  { %6121 = vmatpush1.bf16.msra.mxu0 %v8774_v24  ;;  %v8863_v24 = vld [vmem:[%s13507_s1 + $0x704] ss:$16 sps:$4 sm:$0xff]  }
  0x48   :  { %6162 = vmatpush1.bf16.msra.mxu1 %v8777_v25  ;;  %6122 = vmatprep.subr.bf16.mxu0 %v8782_v26  ;;  %v8858_v25 = vld [vmem:[%s13507_s1 + $0x500] ss:$16 sps:$4 sm:$0xff]   ;;  %v10627_v26 = vrot.slane %v10396_v6, %v10338_v49 }
  0x49   :  { %6163 = vmatprep.subr.bf16.mxu1 %v8785_v27  ;;  %v8861_v27 = vld [vmem:[%s13507_s1 + $0x700] ss:$16 sps:$4 sm:$0xff]  }
  0x4a   :  { %v10640_v6 = vcombine.high %v10627_v26, %v10627_v26 }
  0x4b   :  { %6123 = vmatpush1.bf16.msra.mxu0 %v8780_v28  ;;  %v8867_v28 = vld [vmem:[%s13507_s1 + $0x8e4] ss:$16 sps:$4 sm:$0xff]  }
  0x4c   :  { %6164 = vmatpush1.bf16.msra.mxu1 %v8783_v29  ;;  %6124 = vmatprep.subr.bf16.mxu0 %v8788_v30  ;;  %v8870_v29 = vld [vmem:[%s13507_s1 + $0xae4] ss:$16 sps:$4 sm:$0xff]   ;;  %v8865_v30 = vld [vmem:[%s13507_s1 + $0x8e0] ss:$16 sps:$4 sm:$0xff]  }
  0x4d   :  { %6165 = vmatprep.subr.bf16.mxu1 %v8791_v31  ;;  %v8868_v31 = vld [vmem:[%s13507_s1 + $0xae0] ss:$16 sps:$4 sm:$0xff]  }
  0x4f   :  { %6125 = vmatpush1.bf16.msra.mxu0 %v8786_v32  ;;  %v10651_v32 = vld [vmem:[%s13506_s0 + $0x8] sm:$0xff] }
  0x50   :  { %6166 = vmatpush1.bf16.msra.mxu1 %v8789_v33  ;;  %6126 = vmatprep.subr.bf16.mxu0 %v8794_v34  ;;  %v8873_v33 = vld [vmem:[%s13507_s1 + $0x8c4] ss:$16 sps:$4 sm:$0xff]  }
  0x51   :  { %6167 = vmatprep.subr.bf16.mxu1 %v8797_v35  ;;  %v8876_v34 = vld [vmem:[%s13507_s1 + $0xac4] ss:$16 sps:$4 sm:$0xff]   ;;  %v10661_v35 = vrot.slane %v10651_v32, %v10338_v49 }
  0x53   :  { %6127 = vmatpush1.bf16.msra.mxu0 %v8792_v36  ;;  %v1076_v36 = vcombine.high %v10661_v35, %v10661_v35 }
  0x54   :  { %6168 = vmatpush1.bf16.msra.mxu1 %v8795_v37  ;;  %6128 = vmatprep.subr.bf16.mxu0 %v8800_v38  ;;  %v8871_v37 = vld [vmem:[%s13507_s1 + $0x8c0] ss:$16 sps:$4 sm:$0xff]  }
  0x55   :  { %6169 = vmatprep.subr.bf16.mxu1 %v8803_v39  ;;  %v8874_v38 = vld [vmem:[%s13507_s1 + $0xac0] ss:$16 sps:$4 sm:$0xff]   ;;  %v8879_v39 = vld [vmem:[%s13507_s1 + $0x8a4] ss:$16 sps:$4 sm:$0xff]  }
  0x57   :  { %6129 = vmatpush1.bf16.msra.mxu0 %v8798_v40  ;;  %v8882_v40 = vld [vmem:[%s13507_s1 + $0xaa4] ss:$16 sps:$4 sm:$0xff]  }
  0x58   :  { %6170 = vmatpush1.bf16.msra.mxu1 %v8801_v41  ;;  %6130 = vmatprep.subr.bf16.mxu0 %v8806_v43  ;;  %v10680_v41 = vrot.slane %v1076_v36, %v10338_v49  ;;  %v8943_v36 = vld [vmem:[%s13507_s1 + $0x940] ss:$16 sps:$4 sm:$0xff]  }
  0x59   :  { %6171 = vmatprep.subr.bf16.mxu1 %v8809_v44  ;;  %v8877_v44 = vld [vmem:[%s13507_s1 + $0x8a0] ss:$16 sps:$4 sm:$0xff]  }
  0x5a   :  { %v10685_v43 = vcombine.high %v10680_v41, %v10680_v41 }
  0x5b   :  { %6131 = vmatpush1.bf16.msra.mxu0 %v8804_v45  ;;  %v8880_v45 = vld [vmem:[%s13507_s1 + $0xaa0] ss:$16 sps:$4 sm:$0xff]  }
  0x5c   :  { %6172 = vmatpush1.bf16.msra.mxu1 %v8807_v46  ;;  %6132 = vmatprep.subr.bf16.mxu0 %v8812_v47  ;;  %v8885_v46 = vld [vmem:[%s13507_s1 + $0x884] ss:$16 sps:$4 sm:$0xff]  }
  0x5d   :  { %6173 = vmatprep.subr.bf16.mxu1 %v8815_v48  ;;  %v8888_v47 = vld [vmem:[%s13507_s1 + $0xa84] ss:$16 sps:$4 sm:$0xff]   ;;  %v8883_v48 = vld [vmem:[%s13507_s1 + $0x880] ss:$16 sps:$4 sm:$0xff]  }
  0x5f   :  { %6133 = vmatpush1.bf16.msra.mxu0 %v8810_v50  ;;  %v8886_v50 = vld [vmem:[%s13507_s1 + $0xa80] ss:$16 sps:$4 sm:$0xff]  }
  0x60   :  { %6174 = vmatpush1.bf16.msra.mxu1 %v8813_v51  ;;  %6134 = vmatprep.subr.bf16.mxu0 %v8818_v52  ;;  %v8891_v51 = vld [vmem:[%s13507_s1 + $0x864] ss:$16 sps:$4 sm:$0xff]  }
  0x61   :  { %6175 = vmatprep.subr.bf16.mxu1 %v8821_v53  ;;  %v8894_v52 = vld [vmem:[%s13507_s1 + $0xa64] ss:$16 sps:$4 sm:$0xff]   ;;  %v8889_v53 = vld [vmem:[%s13507_s1 + $0x860] ss:$16 sps:$4 sm:$0xff]  }
  0x63   :  { %6135 = vmatpush2.bf16.msra.mxu0 %v8816_v54  ;;  %v8892_v54 = vld [vmem:[%s13507_s1 + $0xa60] ss:$16 sps:$4 sm:$0xff]  }
  0x64   :  { %6176 = vmatpush2.bf16.msra.mxu1 %v8819_v55  ;;  %6136 = vmatprep.subr.bf16.mxu0 %v8824_v56  ;;  %v8897_v55 = vld [vmem:[%s13507_s1 + $0x844] ss:$16 sps:$4 sm:$0xff]  }
  0x65   :  { %6177 = vmatprep.subr.bf16.mxu1 %v8827_v57  ;;  %v8900_v56 = vld [vmem:[%s13507_s1 + $0xa44] ss:$16 sps:$4 sm:$0xff]   ;;  %v8895_v57 = vld [vmem:[%s13507_s1 + $0x840] ss:$16 sps:$4 sm:$0xff]  }
  0x67   :  { %6137 = vmatpush2.bf16.msra.mxu0 %v8822_v58  ;;  %v8898_v58 = vld [vmem:[%s13507_s1 + $0xa40] ss:$16 sps:$4 sm:$0xff]  }
  0x68   :  { %6178 = vmatpush2.bf16.msra.mxu1 %v8825_v59  ;;  %6138 = vmatprep.subr.bf16.mxu0 %v8830_v61  ;;  %v8903_v59 = vld [vmem:[%s13507_s1 + $0x824] ss:$16 sps:$4 sm:$0xff]  }
  0x69   :  { %6179 = vmatprep.subr.bf16.mxu1 %v8833_v62  ;;  %v8906_v61 = vld [vmem:[%s13507_s1 + $0xa24] ss:$16 sps:$4 sm:$0xff]   ;;  %v8901_v62 = vld [vmem:[%s13507_s1 + $0x820] ss:$16 sps:$4 sm:$0xff]  }
  0x6b   :  { %6139 = vmatpush2.bf16.msra.mxu0 %v8828_v63  ;;  %v8904_v63 = vld [vmem:[%s13507_s1 + $0xa20] ss:$16 sps:$4 sm:$0xff]  }
  0x6c   :  { %6180 = vmatpush2.bf16.msra.mxu1 %v8831_v1  ;;  %6140 = vmatprep.subr.bf16.mxu0 %v8836_v2  ;;  %v8909_v1 = vld [vmem:[%s13507_s1 + $0x804] ss:$16 sps:$4 sm:$0xff]  }
  0x6d   :  { %6181 = vmatprep.subr.bf16.mxu1 %v8839_v3  ;;  %v8912_v2 = vld [vmem:[%s13507_s1 + $0xa04] ss:$16 sps:$4 sm:$0xff]   ;;  %v8907_v3 = vld [vmem:[%s13507_s1 + $0x800] ss:$16 sps:$4 sm:$0xff]  }
  0x6f   :  { %6141 = vmatpush2.bf16.msra.mxu0 %v8834_v4  ;;  %v8910_v4 = vld [vmem:[%s13507_s1 + $0xa00] ss:$16 sps:$4 sm:$0xff]  }
  0x70   :  { %6182 = vmatpush2.bf16.msra.mxu1 %v8837_v5  ;;  %6142 = vmatprep.subr.bf16.mxu0 %v8842_v7  ;;  %v8915_v5 = vld [vmem:[%s13507_s1 + $0x9e4] ss:$16 sps:$4 sm:$0xff]  }
  0x71   :  { %6183 = vmatprep.subr.bf16.mxu1 %v8845_v8  ;;  %v8918_v7 = vld [vmem:[%s13507_s1 + $0xbe4] ss:$16 sps:$4 sm:$0xff]   ;;  %v8913_v8 = vld [vmem:[%s13507_s1 + $0x9e0] ss:$16 sps:$4 sm:$0xff]  }
  0x73   :  { %6143 = vmatpush2.bf16.msra.mxu0 %v8840_v9  ;;  %v8916_v9 = vld [vmem:[%s13507_s1 + $0xbe0] ss:$16 sps:$4 sm:$0xff]  }
  0x74   :  { %6184 = vmatpush2.bf16.msra.mxu1 %v8843_v10  ;;  %6144 = vmatprep.subr.bf16.mxu0 %v8848_v11  ;;  %v8921_v10 = vld [vmem:[%s13507_s1 + $0x9c4] ss:$16 sps:$4 sm:$0xff]  }
  0x75   :  { %6185 = vmatprep.subr.bf16.mxu1 %v8851_v12  ;;  %v8924_v11 = vld [vmem:[%s13507_s1 + $0xbc4] ss:$16 sps:$4 sm:$0xff]   ;;  %v8919_v12 = vld [vmem:[%s13507_s1 + $0x9c0] ss:$16 sps:$4 sm:$0xff]  }
  0x77   :  { %6145 = vmatpush2.bf16.msra.mxu0 %v8846_v14  ;;  %v8922_v14 = vld [vmem:[%s13507_s1 + $0xbc0] ss:$16 sps:$4 sm:$0xff]  }
  0x78   :  { %6186 = vmatpush2.bf16.msra.mxu1 %v8849_v15  ;;  %6146 = vmatprep.subr.bf16.mxu0 %v8854_v16  ;;  %v8927_v15 = vld [vmem:[%s13507_s1 + $0x9a4] ss:$16 sps:$4 sm:$0xff]  }
  0x79   :  { %6187 = vmatprep.subr.bf16.mxu1 %v8857_v19  ;;  %v8930_v16 = vld [vmem:[%s13507_s1 + $0xba4] ss:$16 sps:$4 sm:$0xff]   ;;  %v8925_v19 = vld [vmem:[%s13507_s1 + $0x9a0] ss:$16 sps:$4 sm:$0xff]  }
  0x7b   :  { %6147 = vmatpush2.bf16.msra.mxu0 %v8852_v20  ;;  %v8928_v20 = vld [vmem:[%s13507_s1 + $0xba0] ss:$16 sps:$4 sm:$0xff]  }
  0x7c   :  { %6188 = vmatpush2.bf16.msra.mxu1 %v8855_v21  ;;  %6148 = vmatprep.subr.bf16.mxu0 %v8860_v22  ;;  %v8933_v21 = vld [vmem:[%s13507_s1 + $0x984] ss:$16 sps:$4 sm:$0xff]  }
  0x7d   :  { %6189 = vmatprep.subr.bf16.mxu1 %v8863_v24  ;;  %v8936_v22 = vld [vmem:[%s13507_s1 + $0xb84] ss:$16 sps:$4 sm:$0xff]   ;;  %v8931_v24 = vld [vmem:[%s13507_s1 + $0x980] ss:$16 sps:$4 sm:$0xff]  }
  0x7f   :  { %6149 = vmatpush2.bf16.msra.mxu0 %v8858_v25  ;;  %v8934_v25 = vld [vmem:[%s13507_s1 + $0xb80] ss:$16 sps:$4 sm:$0xff]  }
  0x80   :  { %6190 = vmatpush2.bf16.msra.mxu1 %v8861_v27  ;;  %6200 = vmatprep.subr.bf16.mxu0 %v8867_v28  ;;  %v8939_v27 = vld [vmem:[%s13507_s1 + $0x964] ss:$16 sps:$4 sm:$0xff]  }
  0x81   :  { %6241 = vmatprep.subr.bf16.mxu1 %v8870_v29  ;;  %v8942_v28 = vld [vmem:[%s13507_s1 + $0xb64] ss:$16 sps:$4 sm:$0xff]   ;;  %v8937_v29 = vld [vmem:[%s13507_s1 + $0x960] ss:$16 sps:$4 sm:$0xff]  }
  0x82   :  { %6151 = vmatmul.mubr.bf16.vlgmr.msra.gmra.mxu0 %v10627_v26 }
  0x83   :  { %6192 = vmatmul.mubr.bf16.vlgmr.msra.gmra.mxu1 %v10640_v6  ;;  %6201 = vmatpush1.bf16.msra.mxu0 %v8865_v30  ;;  %v8940_v30 = vld [vmem:[%s13507_s1 + $0xb60] ss:$16 sps:$4 sm:$0xff]  }
  0x84   :  { %6242 = vmatpush1.bf16.msra.mxu1 %v8868_v31  ;;  %6202 = vmatprep.subr.bf16.mxu0 %v8873_v33  ;;  %v8945_v31 = vld [vmem:[%s13507_s1 + $0x944] ss:$16 sps:$4 sm:$0xff]  }
  0x85   :  { %6243 = vmatprep.subr.bf16.mxu1 %v8876_v34  ;;  %6232 = vmatprep.mubr.bf16.mxu0 %v10680_v41  ;;  %v8948_v33 = vld [vmem:[%s13507_s1 + $0xb44] ss:$16 sps:$4 sm:$0xff]   ;;  %v1061_v34 = vcombine.high %v10651_v32, %v10651_v32 }
  0x86   :  { %6273 = vmatprep.mubr.bf16.mxu1 %v10685_v43  ;;  %v8954_v32 = vld [vmem:[%s13507_s1 + $0xb24] ss:$16 sps:$4 sm:$0xff]  }
  0x87   :  { %6203 = vmatpush1.bf16.msra.mxu0 %v8871_v37  ;;  %v8946_v37 = vld [vmem:[%s13507_s1 + $0xb40] ss:$16 sps:$4 sm:$0xff]  }
  0x88   :  { %6244 = vmatpush1.bf16.msra.mxu1 %v8874_v38  ;;  %6204 = vmatprep.subr.bf16.mxu0 %v8879_v39  ;;  %v8951_v38 = vld [vmem:[%s13507_s1 + $0x924] ss:$16 sps:$4 sm:$0xff]   ;;  %v10835_v39 = vrot.slane %v1061_v34, %v10338_v49  ;;  %v9012_v34 = vld [vmem:[%s13507_s1 + $0xfe0] ss:$16 sps:$4 sm:$0xff]  }
  0x89   :  { %6245 = vmatprep.subr.bf16.mxu1 %v8882_v40  ;;  %v8949_v40 = vld [vmem:[%s13507_s1 + $0x920] ss:$16 sps:$4 sm:$0xff]  }
  0x8b   :  { %6205 = vmatpush1.bf16.msra.mxu0 %v8877_v44  ;;  %v8952_v44 = vld [vmem:[%s13507_s1 + $0xb20] ss:$16 sps:$4 sm:$0xff]  }
  0x8c   :  { %6246 = vmatpush1.bf16.msra.mxu1 %v8880_v45  ;;  %6206 = vmatprep.subr.bf16.mxu0 %v8885_v46  ;;  %v8957_v45 = vld [vmem:[%s13507_s1 + $0x904] ss:$16 sps:$4 sm:$0xff]  }
  0x8d   :  { %6247 = vmatprep.subr.bf16.mxu1 %v8888_v47  ;;  %v8960_v46 = vld [vmem:[%s13507_s1 + $0xb04] ss:$16 sps:$4 sm:$0xff]   ;;  %v1077_v47 = vcombine.high %v10835_v39, %v10835_v39 }
  0x8f   :  { %6207 = vmatpush1.bf16.msra.mxu0 %v8883_v48  ;;  %v8955_v48 = vld [vmem:[%s13507_s1 + $0x900] ss:$16 sps:$4 sm:$0xff]  }
  0x90   :  { %6248 = vmatpush1.bf16.msra.mxu1 %v8886_v50  ;;  %6208 = vmatprep.subr.bf16.mxu0 %v8891_v51  ;;  %v10856_v50 = vrot.slane %v10661_v35, %v10338_v49  ;;  %v8958_v51 = vld [vmem:[%s13507_s1 + $0xb00] ss:$16 sps:$4 sm:$0xff]  }
  0x91   :  { %6249 = vmatprep.subr.bf16.mxu1 %v8894_v52  ;;  %v8963_v52 = vld [vmem:[%s13507_s1 + $0xce4] ss:$16 sps:$4 sm:$0xff]  }
  0x92   :  { %v10872_v35 = vcombine.high %v10856_v50, %v10856_v50 }
  0x93   :  { %6209 = vmatpush1.bf16.msra.mxu0 %v8889_v53  ;;  %v8966_v53 = vld [vmem:[%s13507_s1 + $0xee4] ss:$16 sps:$4 sm:$0xff]  }
  0x94   :  { %6250 = vmatpush1.bf16.msra.mxu1 %v8892_v54  ;;  %6210 = vmatprep.subr.bf16.mxu0 %v8897_v55  ;;  %v10868_v54 = vrot.slane %v1077_v47, %v10338_v49  ;;  %v8961_v55 = vld [vmem:[%s13507_s1 + $0xce0] ss:$16 sps:$4 sm:$0xff]   ;;  %v9029_v47 = vld [vmem:[%s13507_s1 + $0xd84] ss:$16 sps:$4 sm:$0xff]  }
  0x95   :  { %6251 = vmatprep.subr.bf16.mxu1 %v8900_v56  ;;  %v8964_v56 = vld [vmem:[%s13507_s1 + $0xee0] ss:$16 sps:$4 sm:$0xff]  }
  0x97   :  { %6211 = vmatpush1.bf16.msra.mxu0 %v8895_v57  ;;  %v8969_v57 = vld [vmem:[%s13507_s1 + $0xcc4] ss:$16 sps:$4 sm:$0xff]  }
  0x98   :  { %6252 = vmatpush1.bf16.msra.mxu1 %v8898_v58  ;;  %6212 = vmatprep.subr.bf16.mxu0 %v8903_v59  ;;  %v8972_v58 = vld [vmem:[%s13507_s1 + $0xec4] ss:$16 sps:$4 sm:$0xff]   ;;  %v10888_v59 = vcombine.high %v10868_v54, %v10868_v54 }
  0x99   :  { %6253 = vmatprep.subr.bf16.mxu1 %v8906_v61  ;;  %v8967_v61 = vld [vmem:[%s13507_s1 + $0xcc0] ss:$16 sps:$4 sm:$0xff]  }
  0x9b   :  { %6213 = vmatpush1.bf16.msra.mxu0 %v8901_v62  ;;  %v8970_v62 = vld [vmem:[%s13507_s1 + $0xec0] ss:$16 sps:$4 sm:$0xff]  }
  0x9c   :  { %6254 = vmatpush1.bf16.msra.mxu1 %v8904_v63  ;;  %6214 = vmatprep.subr.bf16.mxu0 %v8909_v1  ;;  %v8975_v63 = vld [vmem:[%s13507_s1 + $0xca4] ss:$16 sps:$4 sm:$0xff]  }
  0x9d   :  { %6255 = vmatprep.subr.bf16.mxu1 %v8912_v2  ;;  %v8978_v1 = vld [vmem:[%s13507_s1 + $0xea4] ss:$16 sps:$4 sm:$0xff]   ;;  %v8973_v2 = vld [vmem:[%s13507_s1 + $0xca0] ss:$16 sps:$4 sm:$0xff]  }
  0x9f   :  { %6215 = vmatpush1.bf16.msra.mxu0 %v8907_v3  ;;  %v8976_v3 = vld [vmem:[%s13507_s1 + $0xea0] ss:$16 sps:$4 sm:$0xff]  }
  0xa0   :  { %6256 = vmatpush1.bf16.msra.mxu1 %v8910_v4  ;;  %6216 = vmatprep.subr.bf16.mxu0 %v8915_v5  ;;  %v8981_v4 = vld [vmem:[%s13507_s1 + $0xc84] ss:$16 sps:$4 sm:$0xff]  }
  0xa1   :  { %6257 = vmatprep.subr.bf16.mxu1 %v8918_v7  ;;  %v8984_v5 = vld [vmem:[%s13507_s1 + $0xe84] ss:$16 sps:$4 sm:$0xff]   ;;  %v8979_v7 = vld [vmem:[%s13507_s1 + $0xc80] ss:$16 sps:$4 sm:$0xff]  }
  0xa3   :  { %6217 = vmatpush2.bf16.msra.mxu0 %v8913_v8  ;;  %v8982_v8 = vld [vmem:[%s13507_s1 + $0xe80] ss:$16 sps:$4 sm:$0xff]  }
  0xa4   :  { %6258 = vmatpush2.bf16.msra.mxu1 %v8916_v9  ;;  %6218 = vmatprep.subr.bf16.mxu0 %v8921_v10  ;;  %v8987_v9 = vld [vmem:[%s13507_s1 + $0xc64] ss:$16 sps:$4 sm:$0xff]  }
  0xa5   :  { %6259 = vmatprep.subr.bf16.mxu1 %v8924_v11  ;;  %v8990_v10 = vld [vmem:[%s13507_s1 + $0xe64] ss:$16 sps:$4 sm:$0xff]   ;;  %v8985_v11 = vld [vmem:[%s13507_s1 + $0xc60] ss:$16 sps:$4 sm:$0xff]  }
  0xa7   :  { %6219 = vmatpush2.bf16.msra.mxu0 %v8919_v12  ;;  %v8988_v12 = vld [vmem:[%s13507_s1 + $0xe60] ss:$16 sps:$4 sm:$0xff]  }
  0xa8   :  { %6260 = vmatpush2.bf16.msra.mxu1 %v8922_v14  ;;  %6220 = vmatprep.subr.bf16.mxu0 %v8927_v15  ;;  %v8993_v14 = vld [vmem:[%s13507_s1 + $0xc44] ss:$16 sps:$4 sm:$0xff]  }
  0xa9   :  { %6261 = vmatprep.subr.bf16.mxu1 %v8930_v16  ;;  %v8996_v15 = vld [vmem:[%s13507_s1 + $0xe44] ss:$16 sps:$4 sm:$0xff]   ;;  %v8991_v16 = vld [vmem:[%s13507_s1 + $0xc40] ss:$16 sps:$4 sm:$0xff]  }
  0xab   :  { %6221 = vmatpush2.bf16.msra.mxu0 %v8925_v19  ;;  %v8994_v19 = vld [vmem:[%s13507_s1 + $0xe40] ss:$16 sps:$4 sm:$0xff]  }
  0xac   :  { %6262 = vmatpush2.bf16.msra.mxu1 %v8928_v20  ;;  %6222 = vmatprep.subr.bf16.mxu0 %v8933_v21  ;;  %v8999_v20 = vld [vmem:[%s13507_s1 + $0xc24] ss:$16 sps:$4 sm:$0xff]  }
  0xad   :  { %6263 = vmatprep.subr.bf16.mxu1 %v8936_v22  ;;  %v9002_v21 = vld [vmem:[%s13507_s1 + $0xe24] ss:$16 sps:$4 sm:$0xff]   ;;  %v8997_v22 = vld [vmem:[%s13507_s1 + $0xc20] ss:$16 sps:$4 sm:$0xff]  }
  0xaf   :  { %6223 = vmatpush2.bf16.msra.mxu0 %v8931_v24  ;;  %v9000_v24 = vld [vmem:[%s13507_s1 + $0xe20] ss:$16 sps:$4 sm:$0xff]  }
  0xb0   :  { %6264 = vmatpush2.bf16.msra.mxu1 %v8934_v25  ;;  %6224 = vmatprep.subr.bf16.mxu0 %v8939_v27  ;;  %v9005_v25 = vld [vmem:[%s13507_s1 + $0xc04] ss:$16 sps:$4 sm:$0xff]  }
  0xb1   :  { %6265 = vmatprep.subr.bf16.mxu1 %v8942_v28  ;;  %v9008_v27 = vld [vmem:[%s13507_s1 + $0xe04] ss:$16 sps:$4 sm:$0xff]   ;;  %v9003_v28 = vld [vmem:[%s13507_s1 + $0xc00] ss:$16 sps:$4 sm:$0xff]  }
  0xb3   :  { %6225 = vmatpush2.bf16.msra.mxu0 %v8937_v29  ;;  %v9006_v29 = vld [vmem:[%s13507_s1 + $0xe00] ss:$16 sps:$4 sm:$0xff]  }
  0xb4   :  { %6266 = vmatpush2.bf16.msra.mxu1 %v8940_v30  ;;  %6226 = vmatprep.subr.bf16.mxu0 %v8945_v31  ;;  %v9011_v30 = vld [vmem:[%s13507_s1 + $0xde4] ss:$16 sps:$4 sm:$0xff]  }
  0xb5   :  { %6267 = vmatprep.subr.bf16.mxu1 %v8948_v33  ;;  %v9014_v31 = vld [vmem:[%s13507_s1 + $0xfe4] ss:$16 sps:$4 sm:$0xff]   ;;  %v9009_v33 = vld [vmem:[%s13507_s1 + $0xde0] ss:$16 sps:$4 sm:$0xff]  }
  0xb7   :  { %6227 = vmatpush2.bf16.msra.mxu0 %v8943_v36  ;;  %v9017_v36 = vld [vmem:[%s13507_s1 + $0xdc4] ss:$16 sps:$4 sm:$0xff]  }
  0xb8   :  { %6268 = vmatpush2.bf16.msra.mxu1 %v8946_v37  ;;  %6228 = vmatprep.subr.bf16.mxu0 %v8951_v38  ;;  %v9020_v37 = vld [vmem:[%s13507_s1 + $0xfc4] ss:$16 sps:$4 sm:$0xff]   ;;  %v9015_v38 = vld [vmem:[%s13507_s1 + $0xdc0] ss:$16 sps:$4 sm:$0xff]  }
  0xb9   :  { %6269 = vmatprep.subr.bf16.mxu1 %v8954_v32  ;;  %v9018_v32 = vld [vmem:[%s13507_s1 + $0xfc0] ss:$16 sps:$4 sm:$0xff]  }
  0xbb   :  { %6229 = vmatpush2.bf16.msra.mxu0 %v8949_v40  ;;  %v9023_v40 = vld [vmem:[%s13507_s1 + $0xda4] ss:$16 sps:$4 sm:$0xff]  }
  0xbc   :  { %6270 = vmatpush2.bf16.msra.mxu1 %v8952_v44  ;;  %6230 = vmatprep.subr.bf16.mxu0 %v8957_v45  ;;  %v9026_v44 = vld [vmem:[%s13507_s1 + $0xfa4] ss:$16 sps:$4 sm:$0xff]   ;;  %v9021_v45 = vld [vmem:[%s13507_s1 + $0xda0] ss:$16 sps:$4 sm:$0xff]  }
  0xbd   :  { %6271 = vmatprep.subr.bf16.mxu1 %v8960_v46  ;;  %v9024_v46 = vld [vmem:[%s13507_s1 + $0xfa0] ss:$16 sps:$4 sm:$0xff]  }
  0xbf   :  { %6231 = vmatpush2.bf16.msra.mxu0 %v8955_v48  ;;  %v9032_v48 = vld [vmem:[%s13507_s1 + $0xf84] ss:$16 sps:$4 sm:$0xff]  }
  0xc0   :  { %6272 = vmatpush2.bf16.msra.mxu1 %v8958_v51  ;;  %6282 = vmatprep.subr.bf16.mxu0 %v8963_v52  ;;  %v9027_v51 = vld [vmem:[%s13507_s1 + $0xd80] ss:$16 sps:$4 sm:$0xff]  }
  0xc1   :  { %6323 = vmatprep.subr.bf16.mxu1 %v8966_v53  ;;  %v9030_v52 = vld [vmem:[%s13507_s1 + $0xf80] ss:$16 sps:$4 sm:$0xff]   ;;  %v9035_v53 = vld [vmem:[%s13507_s1 + $0xd64] ss:$16 sps:$4 sm:$0xff]  }
  0xc2   :  { %6233 = vmatmul.mubr.bf16.vlgmr.msra.gmra.mxu0 %v10856_v50 }
  0xc3   :  { %6274 = vmatmul.mubr.bf16.vlgmr.msra.gmra.mxu1 %v10872_v35  ;;  %6283 = vmatpush1.bf16.msra.mxu0 %v8961_v55  ;;  %v9038_v55 = vld [vmem:[%s13507_s1 + $0xf64] ss:$16 sps:$4 sm:$0xff]  }
  0xc4   :  { %6324 = vmatpush1.bf16.msra.mxu1 %v8964_v56  ;;  %6284 = vmatprep.subr.bf16.mxu0 %v8969_v57  ;;  %v9033_v56 = vld [vmem:[%s13507_s1 + $0xd60] ss:$16 sps:$4 sm:$0xff]  }
  0xc5   :  { %6325 = vmatprep.subr.bf16.mxu1 %v8972_v58  ;;  %6314 = vmatprep.mubr.bf16.mxu0 %v10868_v54  ;;  %v9036_v57 = vld [vmem:[%s13507_s1 + $0xf60] ss:$16 sps:$4 sm:$0xff]   ;;  %v9041_v58 = vld [vmem:[%s13507_s1 + $0xd44] ss:$16 sps:$4 sm:$0xff]  }
  0xc6   :  { %6355 = vmatprep.mubr.bf16.mxu1 %v10888_v59 }
  0xc7   :  { %6285 = vmatpush1.bf16.msra.mxu0 %v8967_v61  ;;  %v9044_v61 = vld [vmem:[%s13507_s1 + $0xf44] ss:$16 sps:$4 sm:$0xff]  }
  0xc8   :  { %6326 = vmatpush1.bf16.msra.mxu1 %v8970_v62  ;;  %6286 = vmatprep.subr.bf16.mxu0 %v8975_v63  ;;  %v9039_v62 = vld [vmem:[%s13507_s1 + $0xd40] ss:$16 sps:$4 sm:$0xff]  }
  0xc9   :  { %6327 = vmatprep.subr.bf16.mxu1 %v8978_v1  ;;  %v9042_v63 = vld [vmem:[%s13507_s1 + $0xf40] ss:$16 sps:$4 sm:$0xff]  }
  0xca   :  { %v11047_v1 = vld [vmem:[%s13506_s0 + $0x10] sm:$0xff] }
  0xcb   :  { %6287 = vmatpush1.bf16.msra.mxu0 %v8973_v2  ;;  %v9047_v2 = vld [vmem:[%s13507_s1 + $0xd24] ss:$16 sps:$4 sm:$0xff]  }
  0xcc   :  { %6328 = vmatpush1.bf16.msra.mxu1 %v8976_v3  ;;  %6288 = vmatprep.subr.bf16.mxu0 %v8981_v4  ;;  %v9050_v3 = vld [vmem:[%s13507_s1 + $0xf24] ss:$16 sps:$4 sm:$0xff]   ;;  %v11057_v4 = vrot.slane %v11047_v1, %v10338_v49 }
  0xcd   :  { %6329 = vmatprep.subr.bf16.mxu1 %v8984_v5  ;;  %v9045_v5 = vld [vmem:[%s13507_s1 + $0xd20] ss:$16 sps:$4 sm:$0xff]  }
  0xcf   :  { %6289 = vmatpush1.bf16.msra.mxu0 %v8979_v7  ;;  %v9048_v7 = vld [vmem:[%s13507_s1 + $0xf20] ss:$16 sps:$4 sm:$0xff]  }
  0xd0   :  { %6330 = vmatpush1.bf16.msra.mxu1 %v8982_v8  ;;  %6290 = vmatprep.subr.bf16.mxu0 %v8987_v9  ;;  %v9053_v8 = vld [vmem:[%s13507_s1 + $0xd04] ss:$16 sps:$4 sm:$0xff]  }
  0xd1   :  { %6331 = vmatprep.subr.bf16.mxu1 %v8990_v10  ;;  %v9056_v9 = vld [vmem:[%s13507_s1 + $0xf04] ss:$16 sps:$4 sm:$0xff]   ;;  %v9051_v10 = vld [vmem:[%s13507_s1 + $0xd00] ss:$16 sps:$4 sm:$0xff]  }
  0xd3   :  { %6291 = vmatpush1.bf16.msra.mxu0 %v8985_v11  ;;  %v1125_v11 = vcombine.high %v11057_v4, %v11057_v4 }
  0xd4   :  { %6332 = vmatpush1.bf16.msra.mxu1 %v8988_v12  ;;  %6292 = vmatprep.subr.bf16.mxu0 %v8993_v14  ;;  %v9054_v12 = vld [vmem:[%s13507_s1 + $0xf00] ss:$16 sps:$4 sm:$0xff]  }
  0xd5   :  { %6333 = vmatprep.subr.bf16.mxu1 %v8996_v15  ;;  %v986_v14 = vld [vmem:[%s13508_s2] sm:$0xf]  ;;  %v11084_v15 = vrot.slane %v10835_v39, %v10338_v49 }
  0xd7   :  { %6293 = vmatpush1.bf16.msra.mxu0 %v8991_v16  ;;  %v990_v16 = vsub.s32 0, %v10320_v42  ;;  %v11099_v39 = vcombine.high %v11084_v15, %v11084_v15 }
  0xd8   :  { %6334 = vmatpush1.bf16.msra.mxu1 %v8994_v19  ;;  %6294 = vmatprep.subr.bf16.mxu0 %v8999_v20  ;;  %v9060_v19 = vld [vmem:[%s13507_s1 + $0x10e4] ss:$16 sps:$4 sm:$0xff]  }
  0xd9   :  { %6335 = vmatprep.subr.bf16.mxu1 %v9002_v21  ;;  %v9063_v20 = vld [vmem:[%s13507_s1 + $0x12e4] ss:$16 sps:$4 sm:$0xff]   ;;  %v994_v21 = vsub.s32 1, %v10320_v42 }
  0xdb   :  { %6295 = vmatpush1.bf16.msra.mxu0 %v8997_v22  ;;  %v11095_v22 = vrot.slane %v1125_v11, %v10338_v49  ;;  %v9091_v11 = vld [vmem:[%s13507_s1 + $0x1240] ss:$16 sps:$4 sm:$0xff]  }
  0xdc   :  { %6336 = vmatpush1.bf16.msra.mxu1 %v9000_v24  ;;  %6296 = vmatprep.subr.bf16.mxu0 %v9005_v25  ;;  %v9058_v24 = vld [vmem:[%s13507_s1 + $0x10e0] ss:$16 sps:$4 sm:$0xff]  }
  0xdd   :  { %6337 = vmatprep.subr.bf16.mxu1 %v9008_v27  ;;  %v9061_v25 = vld [vmem:[%s13507_s1 + $0x12e0] ss:$16 sps:$4 sm:$0xff]   ;;  %v991_v27 = vrot.slane %v986_v14, %v990_v16 }
  0xde   :  { %v9094_v16 = vld [vmem:[%s13507_s1 + $0x1020] ss:$16 sps:$4 sm:$0xff]  }
  0xdf   :  { %6297 = vmatpush1.bf16.msra.mxu0 %v9003_v28  ;;  %v9066_v28 = vld [vmem:[%s13507_s1 + $0x10c4] ss:$16 sps:$4 sm:$0xff]  }
  0xe0   :  { %6338 = vmatpush1.bf16.msra.mxu1 %v9006_v29  ;;  %6298 = vmatprep.subr.bf16.mxu0 %v9011_v30  ;;  %v9069_v29 = vld [vmem:[%s13507_s1 + $0x12c4] ss:$16 sps:$4 sm:$0xff]   ;;  %v995_v30 = vrot.slane %v986_v14, %v994_v21 }
  0xe1   :  { %6339 = vmatprep.subr.bf16.mxu1 %v9014_v31  ;;  %v11115_v31 = vcombine.high %v11095_v22, %v11095_v22  ;;  %v9099_v14 = vld [vmem:[%s13507_s1 + $0x1224] ss:$16 sps:$4 sm:$0xff]  }
  0xe2   :  { %v9105_v21 = vld [vmem:[%s13507_s1 + $0x1204] ss:$16 sps:$4 sm:$0xff]  }
  0xe3   :  { %6299 = vmatpush2.bf16.msra.mxu0 %v9009_v33 }
  0xe4   :  { %6340 = vmatpush2.bf16.msra.mxu1 %v9012_v34  ;;  %6300 = vmatprep.subr.bf16.mxu0 %v9017_v36  ;;  %v9064_v36 = vld [vmem:[%s13507_s1 + $0x10c0] ss:$16 sps:$4 sm:$0xff]  }
  0xe5   :  { %6341 = vmatprep.subr.bf16.mxu1 %v9020_v37  ;;  %v9067_v37 = vld [vmem:[%s13507_s1 + $0x12c0] ss:$16 sps:$4 sm:$0xff]  }
  0xe7   :  { %6301 = vmatpush2.bf16.msra.mxu0 %v9015_v38 }
  0xe8   :  { %6342 = vmatpush2.bf16.msra.mxu1 %v9018_v32  ;;  %6302 = vmatprep.subr.bf16.mxu0 %v9023_v40 }
  0xe9   :  { %6343 = vmatprep.subr.bf16.mxu1 %v9026_v44  ;;  %v9072_v44 = vld [vmem:[%s13507_s1 + $0x10a4] ss:$16 sps:$4 sm:$0xff]  }
  0xeb   :  { %6303 = vmatpush2.bf16.msra.mxu0 %v9021_v45  ;;  %v9075_v45 = vld [vmem:[%s13507_s1 + $0x12a4] ss:$16 sps:$4 sm:$0xff]  }
  0xec   :  { %6344 = vmatpush2.bf16.msra.mxu1 %v9024_v46  ;;  %6304 = vmatprep.subr.bf16.mxu0 %v9029_v47 }
  0xed   :  { %6345 = vmatprep.subr.bf16.mxu1 %v9032_v48  ;;  %v9070_v48 = vld [vmem:[%s13507_s1 + $0x10a0] ss:$16 sps:$4 sm:$0xff]  }
  0xef   :  { %6305 = vmatpush2.bf16.msra.mxu0 %v9027_v51  ;;  %v9073_v51 = vld [vmem:[%s13507_s1 + $0x12a0] ss:$16 sps:$4 sm:$0xff]  }
  0xf0   :  { %6346 = vmatpush2.bf16.msra.mxu1 %v9030_v52  ;;  %6306 = vmatprep.subr.bf16.mxu0 %v9035_v53 }
  0xf1   :  { %6347 = vmatprep.subr.bf16.mxu1 %v9038_v55 }
  0xf3   :  { %6307 = vmatpush2.bf16.msra.mxu0 %v9033_v56 }
  0xf4   :  { %6348 = vmatpush2.bf16.msra.mxu1 %v9036_v57  ;;  %6308 = vmatprep.subr.bf16.mxu0 %v9041_v58  ;;  %v9078_v58 = vld [vmem:[%s13507_s1 + $0x1084] ss:$16 sps:$4 sm:$0xff]  }
  0xf5   :  { %6349 = vmatprep.subr.bf16.mxu1 %v9044_v61  ;;  %v9081_v61 = vld [vmem:[%s13507_s1 + $0x1284] ss:$16 sps:$4 sm:$0xff]  }
  0xf7   :  { %6309 = vmatpush2.bf16.msra.mxu0 %v9039_v62  ;;  %v9076_v62 = vld [vmem:[%s13507_s1 + $0x1080] ss:$16 sps:$4 sm:$0xff]  }
  0xf8   :  { %6350 = vmatpush2.bf16.msra.mxu1 %v9042_v63  ;;  %6310 = vmatprep.subr.bf16.mxu0 %v9047_v2  ;;  %v9079_v63 = vld [vmem:[%s13507_s1 + $0x1280] ss:$16 sps:$4 sm:$0xff]   ;;  %v9084_v2 = vld [vmem:[%s13507_s1 + $0x1064] ss:$16 sps:$4 sm:$0xff]  }
  0xf9   :  { %6351 = vmatprep.subr.bf16.mxu1 %v9050_v3  ;;  %v9087_v3 = vld [vmem:[%s13507_s1 + $0x1264] ss:$16 sps:$4 sm:$0xff]  }
  0xfb   :  { %6311 = vmatpush2.bf16.msra.mxu0 %v9045_v5  ;;  %v9082_v5 = vld [vmem:[%s13507_s1 + $0x1060] ss:$16 sps:$4 sm:$0xff]  }
  0xfc   :  { %6352 = vmatpush2.bf16.msra.mxu1 %v9048_v7  ;;  %6312 = vmatprep.subr.bf16.mxu0 %v9053_v8  ;;  %v9085_v7 = vld [vmem:[%s13507_s1 + $0x1260] ss:$16 sps:$4 sm:$0xff]   ;;  %v9090_v8 = vld [vmem:[%s13507_s1 + $0x1044] ss:$16 sps:$4 sm:$0xff]  }
  0xfd   :  { %6353 = vmatprep.subr.bf16.mxu1 %v9056_v9  ;;  %v9093_v9 = vld [vmem:[%s13507_s1 + $0x1244] ss:$16 sps:$4 sm:$0xff]  }
  0xff   :  { %6313 = vmatpush2.bf16.msra.mxu0 %v9051_v10  ;;  %v9088_v10 = vld [vmem:[%s13507_s1 + $0x1040] ss:$16 sps:$4 sm:$0xff]  }
 0x100   :  { %6354 = vmatpush2.bf16.msra.mxu1 %v9054_v12  ;;  %6364 = vmatprep.subr.bf16.mxu0 %v9060_v19  ;;  %v9096_v12 = vld [vmem:[%s13507_s1 + $0x1024] ss:$16 sps:$4 sm:$0xff]   ;;  %v9097_v19 = vld [vmem:[%s13507_s1 + $0x1220] ss:$16 sps:$4 sm:$0xff]  }
 0x101   :  { %6405 = vmatprep.subr.bf16.mxu1 %v9063_v20  ;;  %v9102_v20 = vld [vmem:[%s13507_s1 + $0x1004] ss:$16 sps:$4 sm:$0xff]  }
 0x102   :  { %v6070_v33 = vpop.f32.mrf.mxu0  ;;  %6315 = vmatmul.mubr.bf16.vlgmr.msra.gmra.mxu0 %v11084_v15 }
 0x103   :  { %v6111_v34 = vpop.f32.mrf.mxu1  ;;  %6356 = vmatmul.mubr.bf16.vlgmr.msra.gmra.mxu1 %v11099_v39  ;;  %v6071_v38 = vadd.f32 %v6070_v33, %v991_v27  ;;  %6365 = vmatpush1.bf16.msra.mxu0 %v9058_v24  ;;  %v9100_v24 = vld [vmem:[%s13507_s1 + $0x1000] ss:$16 sps:$4 sm:$0xff]   ;;  %v9108_v27 = vld [vmem:[%s13507_s1 + $0x11e4] ss:$16 sps:$4 sm:$0xff]  }
 0x104   :  { %6406 = vmatpush1.bf16.msra.mxu1 %v9061_v25  ;;  %v6072_v32 = vpop.f32.mrf.mxu0  ;;  %6366 = vmatprep.subr.bf16.mxu0 %v9066_v28  ;;  %v9103_v25 = vld [vmem:[%s13507_s1 + $0x1200] ss:$16 sps:$4 sm:$0xff]   ;;  %v9111_v28 = vld [vmem:[%s13507_s1 + $0x13e4] ss:$16 sps:$4 sm:$0xff]  }
 0x105   :  { %v6113_v40 = vpop.f32.mrf.mxu1  ;;  %6407 = vmatprep.subr.bf16.mxu1 %v9069_v29  ;;  %v11131_v46 = vadd.f32 %v6111_v34, %v6071_v38  ;;  %v6073_v47 = vadd.f32 %v6072_v32, %v995_v30  ;;  %6396 = vmatprep.mubr.bf16.mxu0 %v11095_v22  ;;  %v9106_v29 = vld [vmem:[%s13507_s1 + $0x11e0] ss:$16 sps:$4 sm:$0xff]   ;;  %v9114_v33 = vld [vmem:[%s13507_s1 + $0x11c4] ss:$16 sps:$4 sm:$0xff]  }
 0x106   :  { %6437 = vmatprep.mubr.bf16.mxu1 %v11115_v31  ;;  %v6074_v52 = vpop.f32.mrf.mxu0  ;;  %v9109_v30 = vld [vmem:[%s13507_s1 + $0x13e0] ss:$16 sps:$4 sm:$0xff]   ;;  %v9117_v34 = vld [vmem:[%s13507_s1 + $0x13c4] ss:$16 sps:$4 sm:$0xff]  }
 0x107   :  { %v6115_v53 = vpop.f32.mrf.mxu1  ;;  %v11141_v55 = vadd.f32 %v6113_v40, %v6073_v47  ;;  %6367 = vmatpush1.bf16.msra.mxu0 %v9064_v36  ;;  %v9112_v36 = vld [vmem:[%s13507_s1 + $0x11c0] ss:$16 sps:$4 sm:$0xff]   ;;  %v9120_v38 = vld [vmem:[%s13507_s1 + $0x11a4] ss:$16 sps:$4 sm:$0xff]  }
 0x108   :  { %6408 = vmatpush1.bf16.msra.mxu1 %v9067_v37  ;;  %v6075_v56 = vpop.f32.mrf.mxu0  ;;  %6368 = vmatprep.subr.bf16.mxu0 %v9072_v44  ;;  %v9115_v37 = vld [vmem:[%s13507_s1 + $0x13c0] ss:$16 sps:$4 sm:$0xff]   ;;  %v9123_v32 = vld [vmem:[%s13507_s1 + $0x13a4] ss:$16 sps:$4 sm:$0xff]  }
 0x109   :  { %v6116_v57 = vpop.f32.mrf.mxu1  ;;  %6409 = vmatprep.subr.bf16.mxu1 %v9075_v45  ;;  %v9118_v40 = vld [vmem:[%s13507_s1 + $0x11a0] ss:$16 sps:$4 sm:$0xff]   ;;  %v9126_v45 = vld [vmem:[%s13507_s1 + $0x1184] ss:$16 sps:$4 sm:$0xff]  }
 0x10a   :  { %v9121_v44 = vld [vmem:[%s13507_s1 + $0x13a0] ss:$16 sps:$4 sm:$0xff]   ;;  %v9129_v47 = vld [vmem:[%s13507_s1 + $0x1384] ss:$16 sps:$4 sm:$0xff]  }
 0x10b   :  { %6369 = vmatpush1.bf16.msra.mxu0 %v9070_v48  ;;  %v9124_v48 = vld [vmem:[%s13507_s1 + $0x1180] ss:$16 sps:$4 sm:$0xff]   ;;  %v9132_v52 = vld [vmem:[%s13507_s1 + $0x1164] ss:$16 sps:$4 sm:$0xff]  }
 0x10c   :  { %6410 = vmatpush1.bf16.msra.mxu1 %v9073_v51  ;;  %6370 = vmatprep.subr.bf16.mxu0 %v9078_v58  ;;  %v9127_v51 = vld [vmem:[%s13507_s1 + $0x1380] ss:$16 sps:$4 sm:$0xff]   ;;  %v9135_v53 = vld [vmem:[%s13507_s1 + $0x1364] ss:$16 sps:$4 sm:$0xff]  }
 0x10d   :  { %6411 = vmatprep.subr.bf16.mxu1 %v9081_v61  ;;  %v9130_v56 = vld [vmem:[%s13507_s1 + $0x1160] ss:$16 sps:$4 sm:$0xff]   ;;  %v9138_v58 = vld [vmem:[%s13507_s1 + $0x1144] ss:$16 sps:$4 sm:$0xff]  }
 0x10e   :  { %v9133_v57 = vld [vmem:[%s13507_s1 + $0x1360] ss:$16 sps:$4 sm:$0xff]   ;;  %v9141_v61 = vld [vmem:[%s13507_s1 + $0x1344] ss:$16 sps:$4 sm:$0xff]  }
 0x10f   :  { %6371 = vmatpush1.bf16.msra.mxu0 %v9076_v62  ;;  %v1110_v62 = vcombine.high %v11047_v1, %v11047_v1  ;;  %v9147_v1 = vld [vmem:[%s13507_s1 + $0x1324] ss:$16 sps:$4 sm:$0xff]  }
 0x110   :  { %6412 = vmatpush1.bf16.msra.mxu1 %v9079_v63  ;;  %6372 = vmatprep.subr.bf16.mxu0 %v9084_v2  ;;  %v9136_v63 = vld [vmem:[%s13507_s1 + $0x1140] ss:$16 sps:$4 sm:$0xff]  }
 0x111   :  { %6413 = vmatprep.subr.bf16.mxu1 %v9087_v3  ;;  %v9139_v2 = vld [vmem:[%s13507_s1 + $0x1340] ss:$16 sps:$4 sm:$0xff]   ;;  %v9144_v3 = vld [vmem:[%s13507_s1 + $0x1124] ss:$16 sps:$4 sm:$0xff]  }
 0x113   :  { %6373 = vmatpush1.bf16.msra.mxu0 %v9082_v5  ;;  %v11284_v5 = vrot.slane %v1110_v62, %v10338_v49  ;;  %v9175_v62 = vld [vmem:[%s13507_s1 + $0x1680] ss:$16 sps:$4 sm:$0xff]  }
 0x114   :  { %6414 = vmatpush1.bf16.msra.mxu1 %v9085_v7  ;;  %6374 = vmatprep.subr.bf16.mxu0 %v9090_v8  ;;  %v9142_v7 = vld [vmem:[%s13507_s1 + $0x1120] ss:$16 sps:$4 sm:$0xff]  }
 0x115   :  { %6415 = vmatprep.subr.bf16.mxu1 %v9093_v9  ;;  %v9145_v8 = vld [vmem:[%s13507_s1 + $0x1320] ss:$16 sps:$4 sm:$0xff]   ;;  %v9150_v9 = vld [vmem:[%s13507_s1 + $0x1104] ss:$16 sps:$4 sm:$0xff]  }
 0x117   :  { %6375 = vmatpush1.bf16.msra.mxu0 %v9088_v10  ;;  %v9153_v10 = vld [vmem:[%s13507_s1 + $0x1304] ss:$16 sps:$4 sm:$0xff]  }
 0x118   :  { %6416 = vmatpush1.bf16.msra.mxu1 %v9091_v11  ;;  %6376 = vmatprep.subr.bf16.mxu0 %v9096_v12  ;;  %v1126_v11 = vcombine.high %v11284_v5, %v11284_v5  ;;  %v11302_v12 = vrot.slane %v11057_v4, %v10338_v49  ;;  %v9159_v4 = vld [vmem:[%s13507_s1 + $0x16e4] ss:$16 sps:$4 sm:$0xff]  }
 0x119   :  { %6417 = vmatprep.subr.bf16.mxu1 %v9099_v14  ;;  %v9148_v14 = vld [vmem:[%s13507_s1 + $0x1100] ss:$16 sps:$4 sm:$0xff]  }
 0x11b   :  { %6377 = vmatpush1.bf16.msra.mxu0 %v9094_v16  ;;  %v9151_v16 = vld [vmem:[%s13507_s1 + $0x1300] ss:$16 sps:$4 sm:$0xff]  }
 0x11c   :  { %6418 = vmatpush1.bf16.msra.mxu1 %v9097_v19  ;;  %6378 = vmatprep.subr.bf16.mxu0 %v9102_v20  ;;  %v9156_v19 = vld [vmem:[%s13507_s1 + $0x14e4] ss:$16 sps:$4 sm:$0xff]   ;;  %v9154_v20 = vld [vmem:[%s13507_s1 + $0x14e0] ss:$16 sps:$4 sm:$0xff]  }
 0x11d   :  { %6419 = vmatprep.subr.bf16.mxu1 %v9105_v21  ;;  %v9157_v21 = vld [vmem:[%s13507_s1 + $0x16e0] ss:$16 sps:$4 sm:$0xff]  }
 0x11f   :  { %6379 = vmatpush1.bf16.msra.mxu0 %v9100_v24  ;;  %v11323_v24 = vrot.slane %v1126_v11, %v10338_v49  ;;  %v9192_v11 = vld [vmem:[%s13507_s1 + $0x1424] ss:$16 sps:$4 sm:$0xff]  }
 0x120   :  { %6420 = vmatpush1.bf16.msra.mxu1 %v9103_v25  ;;  %6380 = vmatprep.subr.bf16.mxu0 %v9108_v27  ;;  %v11327_v25 = vcombine.high %v11302_v12, %v11302_v12  ;;  %v9162_v27 = vld [vmem:[%s13507_s1 + $0x14c4] ss:$16 sps:$4 sm:$0xff]  }
 0x121   :  { %6421 = vmatprep.subr.bf16.mxu1 %v9111_v28  ;;  %v9165_v28 = vld [vmem:[%s13507_s1 + $0x16c4] ss:$16 sps:$4 sm:$0xff]  }
 0x123   :  { %6381 = vmatpush2.bf16.msra.mxu0 %v9106_v29  ;;  %v9160_v29 = vld [vmem:[%s13507_s1 + $0x14c0] ss:$16 sps:$4 sm:$0xff]  }
 0x124   :  { %6422 = vmatpush2.bf16.msra.mxu1 %v9109_v30  ;;  %6382 = vmatprep.subr.bf16.mxu0 %v9114_v33  ;;  %v9163_v30 = vld [vmem:[%s13507_s1 + $0x16c0] ss:$16 sps:$4 sm:$0xff]   ;;  %v11343_v33 = vcombine.high %v11323_v24, %v11323_v24 }
 0x125   :  { %6423 = vmatprep.subr.bf16.mxu1 %v9117_v34 }
 0x127   :  { %6383 = vmatpush2.bf16.msra.mxu0 %v9112_v36 }
 0x128   :  { %6424 = vmatpush2.bf16.msra.mxu1 %v9115_v37  ;;  %6384 = vmatprep.subr.bf16.mxu0 %v9120_v38 }
 0x129   :  { %6425 = vmatprep.subr.bf16.mxu1 %v9123_v32 }
 0x12b   :  { %6385 = vmatpush2.bf16.msra.mxu0 %v9118_v40  ;;  %v9168_v40 = vld [vmem:[%s13507_s1 + $0x14a4] ss:$16 sps:$4 sm:$0xff]  }
 0x12c   :  { %6426 = vmatpush2.bf16.msra.mxu1 %v9121_v44  ;;  %6386 = vmatprep.subr.bf16.mxu0 %v9126_v45  ;;  %v9171_v44 = vld [vmem:[%s13507_s1 + $0x16a4] ss:$16 sps:$4 sm:$0xff]  }
 0x12d   :  { %6427 = vmatprep.subr.bf16.mxu1 %v9129_v47 }
 0x12f   :  { %6387 = vmatpush2.bf16.msra.mxu0 %v9124_v48  ;;  %v9169_v48 = vld [vmem:[%s13507_s1 + $0x16a0] ss:$16 sps:$4 sm:$0xff]  }
 0x130   :  { %6428 = vmatpush2.bf16.msra.mxu1 %v9127_v51  ;;  %6388 = vmatprep.subr.bf16.mxu0 %v9132_v52 }
 0x131   :  { %6429 = vmatprep.subr.bf16.mxu1 %v9135_v53 }
 0x133   :  { %6389 = vmatpush2.bf16.msra.mxu0 %v9130_v56 }
 0x134   :  { %6430 = vmatpush2.bf16.msra.mxu1 %v9133_v57  ;;  %6390 = vmatprep.subr.bf16.mxu0 %v9138_v58  ;;  %v9174_v57 = vld [vmem:[%s13507_s1 + $0x1484] ss:$16 sps:$4 sm:$0xff]  }
 0x135   :  { %6431 = vmatprep.subr.bf16.mxu1 %v9141_v61  ;;  %v9177_v58 = vld [vmem:[%s13507_s1 + $0x1684] ss:$16 sps:$4 sm:$0xff]   ;;  %v9172_v61 = vld [vmem:[%s13507_s1 + $0x1480] ss:$16 sps:$4 sm:$0xff]  }
 0x137   :  { %6391 = vmatpush2.bf16.msra.mxu0 %v9136_v63  ;;  %v9180_v63 = vld [vmem:[%s13507_s1 + $0x1464] ss:$16 sps:$4 sm:$0xff]  }
 0x138   :  { %6432 = vmatpush2.bf16.msra.mxu1 %v9139_v2  ;;  %6392 = vmatprep.subr.bf16.mxu0 %v9144_v3  ;;  %v9183_v2 = vld [vmem:[%s13507_s1 + $0x1664] ss:$16 sps:$4 sm:$0xff]   ;;  %v9178_v3 = vld [vmem:[%s13507_s1 + $0x1460] ss:$16 sps:$4 sm:$0xff]  }
 0x139   :  { %6433 = vmatprep.subr.bf16.mxu1 %v9147_v1  ;;  %v9181_v1 = vld [vmem:[%s13507_s1 + $0x1660] ss:$16 sps:$4 sm:$0xff]  }
 0x13b   :  { %6393 = vmatpush2.bf16.msra.mxu0 %v9142_v7  ;;  %v9186_v7 = vld [vmem:[%s13507_s1 + $0x1444] ss:$16 sps:$4 sm:$0xff]  }
 0x13c   :  { %6434 = vmatpush2.bf16.msra.mxu1 %v9145_v8  ;;  %6394 = vmatprep.subr.bf16.mxu0 %v9150_v9  ;;  %v9189_v8 = vld [vmem:[%s13507_s1 + $0x1644] ss:$16 sps:$4 sm:$0xff]   ;;  %v9184_v9 = vld [vmem:[%s13507_s1 + $0x1440] ss:$16 sps:$4 sm:$0xff]  }
 0x13d   :  { %6435 = vmatprep.subr.bf16.mxu1 %v9153_v10  ;;  %v9187_v10 = vld [vmem:[%s13507_s1 + $0x1640] ss:$16 sps:$4 sm:$0xff]  }
 0x13f   :  { %6395 = vmatpush2.bf16.msra.mxu0 %v9148_v14  ;;  %v9195_v14 = vld [vmem:[%s13507_s1 + $0x1624] ss:$16 sps:$4 sm:$0xff]  }
 0x140   :  { %6436 = vmatpush2.bf16.msra.mxu1 %v9151_v16  ;;  %6446 = vmatprep.subr.bf16.mxu0 %v9156_v19  ;;  %v9190_v16 = vld [vmem:[%s13507_s1 + $0x1420] ss:$16 sps:$4 sm:$0xff]  }
 0x141   :  { %6487 = vmatprep.subr.bf16.mxu1 %v9159_v4  ;;  %v9193_v19 = vld [vmem:[%s13507_s1 + $0x1620] ss:$16 sps:$4 sm:$0xff]   ;;  %v9198_v4 = vld [vmem:[%s13507_s1 + $0x1404] ss:$16 sps:$4 sm:$0xff]  }
 0x142   :  { %v6152_v34 = vpop.f32.mrf.mxu0  ;;  %6397 = vmatmul.mubr.bf16.vlgmr.msra.gmra.mxu0 %v11302_v12 }
 0x143   :  { %v6193_v36 = vpop.f32.mrf.mxu1  ;;  %6438 = vmatmul.mubr.bf16.vlgmr.msra.gmra.mxu1 %v11327_v25  ;;  %v6153_v37 = vadd.f32 %v6152_v34, %v11131_v46  ;;  %6447 = vmatpush1.bf16.msra.mxu0 %v9154_v20  ;;  %v9166_v46 = vld [vmem:[%s13507_s1 + $0x14a0] ss:$16 sps:$4 sm:$0xff]   ;;  %v9201_v20 = vld [vmem:[%s13507_s1 + $0x1604] ss:$16 sps:$4 sm:$0xff]  }
 0x144   :  { %6488 = vmatpush1.bf16.msra.mxu1 %v9157_v21  ;;  %v6154_v38 = vpop.f32.mrf.mxu0  ;;  %6448 = vmatprep.subr.bf16.mxu0 %v9162_v27  ;;  %v9196_v21 = vld [vmem:[%s13507_s1 + $0x1400] ss:$16 sps:$4 sm:$0xff]  }
 0x145   :  { %v6195_v32 = vpop.f32.mrf.mxu1  ;;  %6489 = vmatprep.subr.bf16.mxu1 %v9165_v28  ;;  %v11354_v45 = vadd.f32 %v6193_v36, %v6153_v37  ;;  %v6155_v47 = vadd.f32 %v6154_v38, %v11141_v55  ;;  %6478 = vmatprep.mubr.bf16.mxu0 %v11323_v24  ;;  %v9199_v27 = vld [vmem:[%s13507_s1 + $0x1600] ss:$16 sps:$4 sm:$0xff]   ;;  %v9204_v28 = vld [vmem:[%s13507_s1 + $0x15e4] ss:$16 sps:$4 sm:$0xff]  }
 0x146   :  { %6519 = vmatprep.mubr.bf16.mxu1 %v11343_v33  ;;  %v6156_v51 = vpop.f32.mrf.mxu0  ;;  %v9205_v34 = vld [vmem:[%s13507_s1 + $0x17e0] ss:$16 sps:$4 sm:$0xff]   ;;  %v9210_v36 = vld [vmem:[%s13507_s1 + $0x15c4] ss:$16 sps:$4 sm:$0xff]  }
 0x147   :  { %v6197_v52 = vpop.f32.mrf.mxu1  ;;  %v11365_v53 = vadd.f32 %v6195_v32, %v6155_v47  ;;  %6449 = vmatpush1.bf16.msra.mxu0 %v9160_v29  ;;  %v9207_v29 = vld [vmem:[%s13507_s1 + $0x17e4] ss:$16 sps:$4 sm:$0xff]   ;;  %v9208_v38 = vld [vmem:[%s13507_s1 + $0x15c0] ss:$16 sps:$4 sm:$0xff]  }
 0x148   :  { %6490 = vmatpush1.bf16.msra.mxu1 %v9163_v30  ;;  %v6157_v56 = vpop.f32.mrf.mxu0  ;;  %6450 = vmatprep.subr.bf16.mxu0 %v9168_v40  ;;  %v9202_v30 = vld [vmem:[%s13507_s1 + $0x15e0] ss:$16 sps:$4 sm:$0xff]   ;;  %v9213_v37 = vld [vmem:[%s13507_s1 + $0x17c4] ss:$16 sps:$4 sm:$0xff]  }
 0x149   :  { %v6198_v55 = vpop.f32.mrf.mxu1  ;;  %6491 = vmatprep.subr.bf16.mxu1 %v9171_v44  ;;  %v9211_v32 = vld [vmem:[%s13507_s1 + $0x17c0] ss:$16 sps:$4 sm:$0xff]   ;;  %v9216_v40 = vld [vmem:[%s13507_s1 + $0x15a4] ss:$16 sps:$4 sm:$0xff]  }
 0x14a   :  { %v9219_v44 = vld [vmem:[%s13507_s1 + $0x17a4] ss:$16 sps:$4 sm:$0xff]   ;;  %v9214_v47 = vld [vmem:[%s13507_s1 + $0x15a0] ss:$16 sps:$4 sm:$0xff]  }
 0x14b   :  { %6451 = vmatpush1.bf16.msra.mxu0 %v9166_v46  ;;  %v9217_v46 = vld [vmem:[%s13507_s1 + $0x17a0] ss:$16 sps:$4 sm:$0xff]   ;;  %v9225_v51 = vld [vmem:[%s13507_s1 + $0x1784] ss:$16 sps:$4 sm:$0xff]  }
 0x14c   :  { %6492 = vmatpush1.bf16.msra.mxu1 %v9169_v48  ;;  %6452 = vmatprep.subr.bf16.mxu0 %v9174_v57  ;;  %v9222_v48 = vld [vmem:[%s13507_s1 + $0x1584] ss:$16 sps:$4 sm:$0xff]   ;;  %v9220_v52 = vld [vmem:[%s13507_s1 + $0x1580] ss:$16 sps:$4 sm:$0xff]  }
 0x14d   :  { %6493 = vmatprep.subr.bf16.mxu1 %v9177_v58  ;;  %v9223_v56 = vld [vmem:[%s13507_s1 + $0x1780] ss:$16 sps:$4 sm:$0xff]   ;;  %v9228_v55 = vld [vmem:[%s13507_s1 + $0x1564] ss:$16 sps:$4 sm:$0xff]  }
 0x14e   :  { %v9231_v57 = vld [vmem:[%s13507_s1 + $0x1764] ss:$16 sps:$4 sm:$0xff]   ;;  %v9226_v58 = vld [vmem:[%s13507_s1 + $0x1560] ss:$16 sps:$4 sm:$0xff]  }
 0x14f   :  { %6453 = vmatpush1.bf16.msra.mxu0 %v9172_v61  ;;  %v9229_v61 = vld [vmem:[%s13507_s1 + $0x1760] ss:$16 sps:$4 sm:$0xff]  }
 0x150   :  { %6494 = vmatpush1.bf16.msra.mxu1 %v9175_v62  ;;  %6454 = vmatprep.subr.bf16.mxu0 %v9180_v63  ;;  %v9234_v62 = vld [vmem:[%s13507_s1 + $0x1544] ss:$16 sps:$4 sm:$0xff]  }
 0x151   :  { %6495 = vmatprep.subr.bf16.mxu1 %v9183_v2  ;;  %v9237_v63 = vld [vmem:[%s13507_s1 + $0x1744] ss:$16 sps:$4 sm:$0xff]   ;;  %v11496_v2 = vld [vmem:[%s13506_s0 + $0x18] sm:$0x3f] }
 0x153   :  { %6455 = vmatpush1.bf16.msra.mxu0 %v9178_v3  ;;  %v9232_v3 = vld [vmem:[%s13507_s1 + $0x1540] ss:$16 sps:$4 sm:$0xff]  }
 0x154   :  { %6496 = vmatpush1.bf16.msra.mxu1 %v9181_v1  ;;  %6456 = vmatprep.subr.bf16.mxu0 %v9186_v7  ;;  %v9235_v1 = vld [vmem:[%s13507_s1 + $0x1740] ss:$16 sps:$4 sm:$0xff]   ;;  %v9240_v7 = vld [vmem:[%s13507_s1 + $0x1524] ss:$16 sps:$4 sm:$0xff]  }
 0x155   :  { %6497 = vmatprep.subr.bf16.mxu1 %v9189_v8  ;;  %v9243_v8 = vld [vmem:[%s13507_s1 + $0x1724] ss:$16 sps:$4 sm:$0xff]  }
 0x157   :  { %6457 = vmatpush1.bf16.msra.mxu0 %v9184_v9  ;;  %v11512_v9 = vrot.slane %v11496_v2, %v10338_v49 }
 0x158   :  { %6498 = vmatpush1.bf16.msra.mxu1 %v9187_v10  ;;  %6458 = vmatprep.subr.bf16.mxu0 %v9192_v11  ;;  %v9238_v10 = vld [vmem:[%s13507_s1 + $0x1520] ss:$16 sps:$4 sm:$0xff]  }
 0x159   :  { %6499 = vmatprep.subr.bf16.mxu1 %v9195_v14  ;;  %v9241_v11 = vld [vmem:[%s13507_s1 + $0x1720] ss:$16 sps:$4 sm:$0xff]   ;;  %v9246_v14 = vld [vmem:[%s13507_s1 + $0x1504] ss:$16 sps:$4 sm:$0xff]  }
 0x15b   :  { %6459 = vmatpush1.bf16.msra.mxu0 %v9190_v16  ;;  %v9249_v16 = vld [vmem:[%s13507_s1 + $0x1704] ss:$16 sps:$4 sm:$0xff]  }
 0x15c   :  { %6500 = vmatpush1.bf16.msra.mxu1 %v9193_v19  ;;  %6460 = vmatprep.subr.bf16.mxu0 %v9198_v4  ;;  %v1174_v19 = vcombine.high %v11512_v9, %v11512_v9  ;;  %v11530_v4 = vrot.slane %v11284_v5, %v10338_v49  ;;  %v9256_v5 = vld [vmem:[%s13507_s1 + $0x1ae4] ss:$16 sps:$4 sm:$0xff]  }
 0x15d   :  { %6501 = vmatprep.subr.bf16.mxu1 %v9201_v20  ;;  %v9244_v20 = vld [vmem:[%s13507_s1 + $0x1500] ss:$16 sps:$4 sm:$0xff]  }
 0x15f   :  { %6461 = vmatpush1.bf16.msra.mxu0 %v9196_v21  ;;  %v9247_v21 = vld [vmem:[%s13507_s1 + $0x1700] ss:$16 sps:$4 sm:$0xff]  }
 0x160   :  { %6502 = vmatpush1.bf16.msra.mxu1 %v9199_v27  ;;  %6462 = vmatprep.subr.bf16.mxu0 %v9204_v28  ;;  %v9253_v27 = vld [vmem:[%s13507_s1 + $0x18e4] ss:$16 sps:$4 sm:$0xff]   ;;  %v9251_v28 = vld [vmem:[%s13507_s1 + $0x18e0] ss:$16 sps:$4 sm:$0xff]  }
 0x161   :  { %6503 = vmatprep.subr.bf16.mxu1 %v9207_v29  ;;  %v9254_v29 = vld [vmem:[%s13507_s1 + $0x1ae0] ss:$16 sps:$4 sm:$0xff]  }
 0x163   :  { %6463 = vmatpush2.bf16.msra.mxu0 %v9202_v30  ;;  %v11551_v30 = vrot.slane %v1174_v19, %v10338_v49  ;;  %v9278_v19 = vld [vmem:[%s13507_s1 + $0x1a60] ss:$16 sps:$4 sm:$0xff]  }
 0x164   :  { %6504 = vmatpush2.bf16.msra.mxu1 %v9205_v34  ;;  %6464 = vmatprep.subr.bf16.mxu0 %v9210_v36  ;;  %v11555_v34 = vcombine.high %v11530_v4, %v11530_v4  ;;  %v9259_v36 = vld [vmem:[%s13507_s1 + $0x18c4] ss:$16 sps:$4 sm:$0xff]  }
 0x165   :  { %6505 = vmatprep.subr.bf16.mxu1 %v9213_v37  ;;  %v9262_v37 = vld [vmem:[%s13507_s1 + $0x1ac4] ss:$16 sps:$4 sm:$0xff]  }
 0x167   :  { %6465 = vmatpush2.bf16.msra.mxu0 %v9208_v38  ;;  %v9257_v38 = vld [vmem:[%s13507_s1 + $0x18c0] ss:$16 sps:$4 sm:$0xff]  }
 0x168   :  { %6506 = vmatpush2.bf16.msra.mxu1 %v9211_v32  ;;  %6466 = vmatprep.subr.bf16.mxu0 %v9216_v40  ;;  %v9260_v32 = vld [vmem:[%s13507_s1 + $0x1ac0] ss:$16 sps:$4 sm:$0xff]   ;;  %v11571_v40 = vcombine.high %v11551_v30, %v11551_v30 }
 0x169   :  { %6507 = vmatprep.subr.bf16.mxu1 %v9219_v44 }
 0x16b   :  { %6467 = vmatpush2.bf16.msra.mxu0 %v9214_v47 }
 0x16c   :  { %6508 = vmatpush2.bf16.msra.mxu1 %v9217_v46  ;;  %6468 = vmatprep.subr.bf16.mxu0 %v9222_v48 }
 0x16d   :  { %6509 = vmatprep.subr.bf16.mxu1 %v9225_v51 }
 0x16f   :  { %6469 = vmatpush2.bf16.msra.mxu0 %v9220_v52  ;;  %v9265_v52 = vld [vmem:[%s13507_s1 + $0x18a4] ss:$16 sps:$4 sm:$0xff]  }
 0x170   :  { %6510 = vmatpush2.bf16.msra.mxu1 %v9223_v56  ;;  %6470 = vmatprep.subr.bf16.mxu0 %v9228_v55  ;;  %v9268_v56 = vld [vmem:[%s13507_s1 + $0x1aa4] ss:$16 sps:$4 sm:$0xff]  }
 0x171   :  { %6511 = vmatprep.subr.bf16.mxu1 %v9231_v57 }
 0x173   :  { %6471 = vmatpush2.bf16.msra.mxu0 %v9226_v58  ;;  %v9266_v58 = vld [vmem:[%s13507_s1 + $0x1aa0] ss:$16 sps:$4 sm:$0xff]  }
 0x174   :  { %6512 = vmatpush2.bf16.msra.mxu1 %v9229_v61  ;;  %6472 = vmatprep.subr.bf16.mxu0 %v9234_v62 }
 0x175   :  { %6513 = vmatprep.subr.bf16.mxu1 %v9237_v63 }
 0x177   :  { %6473 = vmatpush2.bf16.msra.mxu0 %v9232_v3 }
 0x178   :  { %6514 = vmatpush2.bf16.msra.mxu1 %v9235_v1  ;;  %6474 = vmatprep.subr.bf16.mxu0 %v9240_v7  ;;  %v9271_v1 = vld [vmem:[%s13507_s1 + $0x1884] ss:$16 sps:$4 sm:$0xff]  }
 0x179   :  { %6515 = vmatprep.subr.bf16.mxu1 %v9243_v8  ;;  %v9274_v7 = vld [vmem:[%s13507_s1 + $0x1a84] ss:$16 sps:$4 sm:$0xff]   ;;  %v9269_v8 = vld [vmem:[%s13507_s1 + $0x1880] ss:$16 sps:$4 sm:$0xff]  }
 0x17b   :  { %6475 = vmatpush2.bf16.msra.mxu0 %v9238_v10  ;;  %v9272_v10 = vld [vmem:[%s13507_s1 + $0x1a80] ss:$16 sps:$4 sm:$0xff]  }
 0x17c   :  { %6516 = vmatpush2.bf16.msra.mxu1 %v9241_v11  ;;  %6476 = vmatprep.subr.bf16.mxu0 %v9246_v14  ;;  %v9277_v11 = vld [vmem:[%s13507_s1 + $0x1864] ss:$16 sps:$4 sm:$0xff]  }
 0x17d   :  { %6517 = vmatprep.subr.bf16.mxu1 %v9249_v16  ;;  %v9280_v14 = vld [vmem:[%s13507_s1 + $0x1a64] ss:$16 sps:$4 sm:$0xff]   ;;  %v9275_v16 = vld [vmem:[%s13507_s1 + $0x1860] ss:$16 sps:$4 sm:$0xff]  }
 0x17f   :  { %6477 = vmatpush2.bf16.msra.mxu0 %v9244_v20  ;;  %v9283_v20 = vld [vmem:[%s13507_s1 + $0x1844] ss:$16 sps:$4 sm:$0xff]  }
 0x180   :  { %6518 = vmatpush2.bf16.msra.mxu1 %v9247_v21  ;;  %6528 = vmatprep.subr.bf16.mxu0 %v9253_v27  ;;  %v9286_v21 = vld [vmem:[%s13507_s1 + $0x1a44] ss:$16 sps:$4 sm:$0xff]   ;;  %v9281_v27 = vld [vmem:[%s13507_s1 + $0x1840] ss:$16 sps:$4 sm:$0xff]  }
 0x181   :  { %6569 = vmatprep.subr.bf16.mxu1 %v9256_v5  ;;  %v9284_v5 = vld [vmem:[%s13507_s1 + $0x1a40] ss:$16 sps:$4 sm:$0xff]  }
 0x182   :  { %v6234_v44 = vpop.f32.mrf.mxu0  ;;  %6479 = vmatmul.mubr.bf16.vlgmr.msra.gmra.mxu0 %v11530_v4 }
 0x183   :  { %v6275_v47 = vpop.f32.mrf.mxu1  ;;  %6520 = vmatmul.mubr.bf16.vlgmr.msra.gmra.mxu1 %v11555_v34  ;;  %v6235_v46 = vadd.f32 %v6234_v44, %v11354_v45  ;;  %6529 = vmatpush1.bf16.msra.mxu0 %v9251_v28  ;;  %v9263_v45 = vld [vmem:[%s13507_s1 + $0x18a0] ss:$16 sps:$4 sm:$0xff]   ;;  %v9289_v28 = vld [vmem:[%s13507_s1 + $0x1824] ss:$16 sps:$4 sm:$0xff]  }
 0x184   :  { %6570 = vmatpush1.bf16.msra.mxu1 %v9254_v29  ;;  %v6236_v48 = vpop.f32.mrf.mxu0  ;;  %6530 = vmatprep.subr.bf16.mxu0 %v9259_v36  ;;  %v9292_v29 = vld [vmem:[%s13507_s1 + $0x1a24] ss:$16 sps:$4 sm:$0xff]   ;;  %v9287_v36 = vld [vmem:[%s13507_s1 + $0x1820] ss:$16 sps:$4 sm:$0xff]  }
 0x185   :  { %v6277_v51 = vpop.f32.mrf.mxu1  ;;  %6571 = vmatprep.subr.bf16.mxu1 %v9262_v37  ;;  %v11582_v55 = vadd.f32 %v6275_v47, %v6235_v46  ;;  %v6237_v57 = vadd.f32 %v6236_v48, %v11365_v53  ;;  %6560 = vmatprep.mubr.bf16.mxu0 %v11551_v30  ;;  %v9290_v37 = vld [vmem:[%s13507_s1 + $0x1a20] ss:$16 sps:$4 sm:$0xff]   ;;  %v9301_v46 = vld [vmem:[%s13507_s1 + $0x19e4] ss:$16 sps:$4 sm:$0xff]  }
 0x186   :  { %6601 = vmatprep.mubr.bf16.mxu1 %v11571_v40  ;;  %v6238_v61 = vpop.f32.mrf.mxu0  ;;  %v9293_v44 = vld [vmem:[%s13507_s1 + $0x1800] ss:$16 sps:$4 sm:$0xff]   ;;  %v9304_v48 = vld [vmem:[%s13507_s1 + $0x1be4] ss:$16 sps:$4 sm:$0xff]  }
 0x187   :  { %v6279_v62 = vpop.f32.mrf.mxu1  ;;  %v11593_v63 = vadd.f32 %v6277_v51, %v6237_v57  ;;  %6531 = vmatpush1.bf16.msra.mxu0 %v9257_v38  ;;  %v9295_v38 = vld [vmem:[%s13507_s1 + $0x1804] ss:$16 sps:$4 sm:$0xff]   ;;  %v9296_v47 = vld [vmem:[%s13507_s1 + $0x1a00] ss:$16 sps:$4 sm:$0xff]  }
 0x188   :  { %6572 = vmatpush1.bf16.msra.mxu1 %v9260_v32  ;;  %v6239_v3 = vpop.f32.mrf.mxu0  ;;  %6532 = vmatprep.subr.bf16.mxu0 %v9265_v52  ;;  %v9298_v32 = vld [vmem:[%s13507_s1 + $0x1a04] ss:$16 sps:$4 sm:$0xff]   ;;  %v9299_v51 = vld [vmem:[%s13507_s1 + $0x19e0] ss:$16 sps:$4 sm:$0xff]  }
 0x189   :  { %v6280_v53 = vpop.f32.mrf.mxu1  ;;  %6573 = vmatprep.subr.bf16.mxu1 %v9268_v56  ;;  %v9302_v52 = vld [vmem:[%s13507_s1 + $0x1be0] ss:$16 sps:$4 sm:$0xff]   ;;  %v9307_v56 = vld [vmem:[%s13507_s1 + $0x19c4] ss:$16 sps:$4 sm:$0xff]  }
 0x18a   :  { %v9310_v57 = vld [vmem:[%s13507_s1 + $0x1bc4] ss:$16 sps:$4 sm:$0xff]   ;;  %v9311_v3 = vld [vmem:[%s13507_s1 + $0x19a0] ss:$16 sps:$4 sm:$0xff]  }
 0x18b   :  { %6533 = vmatpush1.bf16.msra.mxu0 %v9263_v45  ;;  %v9305_v45 = vld [vmem:[%s13507_s1 + $0x19c0] ss:$16 sps:$4 sm:$0xff]   ;;  %v9313_v61 = vld [vmem:[%s13507_s1 + $0x19a4] ss:$16 sps:$4 sm:$0xff]  }
 0x18c   :  { %6574 = vmatpush1.bf16.msra.mxu1 %v9266_v58  ;;  %6534 = vmatprep.subr.bf16.mxu0 %v9271_v1  ;;  %v9308_v58 = vld [vmem:[%s13507_s1 + $0x1bc0] ss:$16 sps:$4 sm:$0xff]   ;;  %v9316_v62 = vld [vmem:[%s13507_s1 + $0x1ba4] ss:$16 sps:$4 sm:$0xff]  }
 0x18d   :  { %6575 = vmatprep.subr.bf16.mxu1 %v9274_v7  ;;  %v9314_v53 = vld [vmem:[%s13507_s1 + $0x1ba0] ss:$16 sps:$4 sm:$0xff]   ;;  %v9319_v1 = vld [vmem:[%s13507_s1 + $0x1984] ss:$16 sps:$4 sm:$0xff]  }
 0x18e   :  { %v9322_v7 = vld [vmem:[%s13507_s1 + $0x1b84] ss:$16 sps:$4 sm:$0xff]  }
 0x18f   :  { %6535 = vmatpush1.bf16.msra.mxu0 %v9269_v8  ;;  %v9317_v8 = vld [vmem:[%s13507_s1 + $0x1980] ss:$16 sps:$4 sm:$0xff]  }
 0x190   :  { %6576 = vmatpush1.bf16.msra.mxu1 %v9272_v10  ;;  %6536 = vmatprep.subr.bf16.mxu0 %v9277_v11  ;;  %v9320_v10 = vld [vmem:[%s13507_s1 + $0x1b80] ss:$16 sps:$4 sm:$0xff]   ;;  %v9325_v11 = vld [vmem:[%s13507_s1 + $0x1964] ss:$16 sps:$4 sm:$0xff]  }
 0x191   :  { %6577 = vmatprep.subr.bf16.mxu1 %v9280_v14  ;;  %v9328_v14 = vld [vmem:[%s13507_s1 + $0x1b64] ss:$16 sps:$4 sm:$0xff]  }
 0x193   :  { %6537 = vmatpush1.bf16.msra.mxu0 %v9275_v16  ;;  %v9323_v16 = vld [vmem:[%s13507_s1 + $0x1960] ss:$16 sps:$4 sm:$0xff]  }
 0x194   :  { %6578 = vmatpush1.bf16.msra.mxu1 %v9278_v19  ;;  %6538 = vmatprep.subr.bf16.mxu0 %v9283_v20  ;;  %v9326_v19 = vld [vmem:[%s13507_s1 + $0x1b60] ss:$16 sps:$4 sm:$0xff]   ;;  %v9331_v20 = vld [vmem:[%s13507_s1 + $0x1944] ss:$16 sps:$4 sm:$0xff]  }
 0x195   :  { %6579 = vmatprep.subr.bf16.mxu1 %v9286_v21  ;;  %v9334_v21 = vld [vmem:[%s13507_s1 + $0x1b44] ss:$16 sps:$4 sm:$0xff]  }
 0x197   :  { %6539 = vmatpush1.bf16.msra.mxu0 %v9281_v27  ;;  %v9329_v27 = vld [vmem:[%s13507_s1 + $0x1940] ss:$16 sps:$4 sm:$0xff]  }
 0x198   :  { %6580 = vmatpush1.bf16.msra.mxu1 %v9284_v5  ;;  %6540 = vmatprep.subr.bf16.mxu0 %v9289_v28  ;;  %v9332_v5 = vld [vmem:[%s13507_s1 + $0x1b40] ss:$16 sps:$4 sm:$0xff]   ;;  %v9337_v28 = vld [vmem:[%s13507_s1 + $0x1924] ss:$16 sps:$4 sm:$0xff]  }
 0x199   :  { %6581 = vmatprep.subr.bf16.mxu1 %v9292_v29  ;;  %v9340_v29 = vld [vmem:[%s13507_s1 + $0x1b24] ss:$16 sps:$4 sm:$0xff]  }
 0x19b   :  { %6541 = vmatpush1.bf16.msra.mxu0 %v9287_v36  ;;  %v1159_v36 = vcombine.high %v11496_v2, %v11496_v2  ;;  %v9346_v2 = vld [vmem:[%s13507_s1 + $0x1b04] ss:$16 sps:$4 sm:$0xff]  }
 0x19c   :  { %6582 = vmatpush1.bf16.msra.mxu1 %v9290_v37  ;;  %6542 = vmatprep.subr.bf16.mxu0 %v9295_v38  ;;  %v9335_v37 = vld [vmem:[%s13507_s1 + $0x1920] ss:$16 sps:$4 sm:$0xff]  }
 0x19d   :  { %6583 = vmatprep.subr.bf16.mxu1 %v9298_v32  ;;  %v9338_v38 = vld [vmem:[%s13507_s1 + $0x1b20] ss:$16 sps:$4 sm:$0xff]   ;;  %v9343_v32 = vld [vmem:[%s13507_s1 + $0x1904] ss:$16 sps:$4 sm:$0xff]  }
 0x19f   :  { %6543 = vmatpush1.bf16.msra.mxu0 %v9293_v44  ;;  %v11748_v44 = vrot.slane %v1159_v36, %v10338_v49  ;;  %v9367_v36 = vld [vmem:[%s13507_s1 + $0x1c84] ss:$16 sps:$4 sm:$0xff]  }
 0x1a0   :  { %6584 = vmatpush1.bf16.msra.mxu1 %v9296_v47  ;;  %6544 = vmatprep.subr.bf16.mxu0 %v9301_v46  ;;  %v11752_v47 = vrot.slane %v11512_v9, %v10338_v49  ;;  %v9341_v46 = vld [vmem:[%s13507_s1 + $0x1900] ss:$16 sps:$4 sm:$0xff]   ;;  %v9352_v9 = vld [vmem:[%s13507_s1 + $0xec] ss:$16 sps:$4 sm:$0xff]  }
 0x1a1   :  { %6585 = vmatprep.subr.bf16.mxu1 %v9304_v48  ;;  %v9344_v48 = vld [vmem:[%s13507_s1 + $0x1b00] ss:$16 sps:$4 sm:$0xff]  }
 0x1a3   :  { %6545 = vmatpush2.bf16.msra.mxu0 %v9299_v51  ;;  %v9349_v51 = vld [vmem:[%s13507_s1 + $0x1ce4] ss:$16 sps:$4 sm:$0xff]  }
 0x1a4   :  { %6586 = vmatpush2.bf16.msra.mxu1 %v9302_v52  ;;  %6546 = vmatprep.subr.bf16.mxu0 %v9307_v56  ;;  %v9347_v52 = vld [vmem:[%s13507_s1 + $0x1ce0] ss:$16 sps:$4 sm:$0xff]   ;;  %v9350_v56 = vld [vmem:[%s13507_s1 + $0xe8] ss:$16 sps:$4 sm:$0xff]  }
 0x1a5   :  { %6587 = vmatprep.subr.bf16.mxu1 %v9310_v57  ;;  %v1175_v57 = vcombine.high %v11748_v44, %v11748_v44 }
 0x1a7   :  { %6547 = vmatpush2.bf16.msra.mxu0 %v9305_v45  ;;  %v11776_v45 = vcombine.high %v11752_v47, %v11752_v47 }
 0x1a8   :  { %6588 = vmatpush2.bf16.msra.mxu1 %v9308_v58  ;;  %6548 = vmatprep.subr.bf16.mxu0 %v9313_v61  ;;  %v9355_v58 = vld [vmem:[%s13507_s1 + $0x1cc4] ss:$16 sps:$4 sm:$0xff]   ;;  %v9358_v61 = vld [vmem:[%s13507_s1 + $0xcc] ss:$16 sps:$4 sm:$0xff]  }
 0x1a9   :  { %6589 = vmatprep.subr.bf16.mxu1 %v9316_v62  ;;  %v9353_v62 = vld [vmem:[%s13507_s1 + $0x1cc0] ss:$16 sps:$4 sm:$0xff]  }
 0x1ab   :  { %6549 = vmatpush2.bf16.msra.mxu0 %v9311_v3  ;;  %v9356_v3 = vld [vmem:[%s13507_s1 + $0xc8] ss:$16 sps:$4 sm:$0xff]  }
 0x1ac   :  { %6590 = vmatpush2.bf16.msra.mxu1 %v9314_v53  ;;  %6550 = vmatprep.subr.bf16.mxu0 %v9319_v1  ;;  %v11791_v53 = vrot.slane %v1175_v57, %v10338_v49  ;;  %v9385_v57 = vld [vmem:[%s13507_s1 + $0x1c24] ss:$16 sps:$4 sm:$0xff]  }
 0x1ad   :  { %6591 = vmatprep.subr.bf16.mxu1 %v9322_v7 }
 0x1af   :  { %6551 = vmatpush2.bf16.msra.mxu0 %v9317_v8 }
 0x1b0   :  { %6592 = vmatpush2.bf16.msra.mxu1 %v9320_v10  ;;  %6552 = vmatprep.subr.bf16.mxu0 %v9325_v11 }
 0x1b1   :  { %6593 = vmatprep.subr.bf16.mxu1 %v9328_v14  ;;  %v9361_v14 = vld [vmem:[%s13507_s1 + $0x1ca4] ss:$16 sps:$4 sm:$0xff]  }
 0x1b3   :  { %6553 = vmatpush2.bf16.msra.mxu0 %v9323_v16  ;;  %v9364_v16 = vld [vmem:[%s13507_s1 + $0xac] ss:$16 sps:$4 sm:$0xff]  }
 0x1b4   :  { %6594 = vmatpush2.bf16.msra.mxu1 %v9326_v19  ;;  %6554 = vmatprep.subr.bf16.mxu0 %v9331_v20 }
 0x1b5   :  { %6595 = vmatprep.subr.bf16.mxu1 %v9334_v21  ;;  %v9362_v21 = vld [vmem:[%s13507_s1 + $0xa8] ss:$16 sps:$4 sm:$0xff]  }
 0x1b7   :  { %6555 = vmatpush2.bf16.msra.mxu0 %v9329_v27 }
 0x1b8   :  { %6596 = vmatpush2.bf16.msra.mxu1 %v9332_v5  ;;  %6556 = vmatprep.subr.bf16.mxu0 %v9337_v28 }
 0x1b9   :  { %6597 = vmatprep.subr.bf16.mxu1 %v9340_v29 }
 0x1bb   :  { %6557 = vmatpush2.bf16.msra.mxu0 %v9335_v37  ;;  %v9370_v37 = vld [vmem:[%s13507_s1 + $0x8c] ss:$16 sps:$4 sm:$0xff]  }
 0x1bc   :  { %6598 = vmatpush2.bf16.msra.mxu1 %v9338_v38  ;;  %6558 = vmatprep.subr.bf16.mxu0 %v9343_v32  ;;  %v9368_v38 = vld [vmem:[%s13507_s1 + $0x88] ss:$16 sps:$4 sm:$0xff]   ;;  %v9373_v32 = vld [vmem:[%s13507_s1 + $0x1c64] ss:$16 sps:$4 sm:$0xff]  }
 0x1bd   :  { %6599 = vmatprep.subr.bf16.mxu1 %v9346_v2  ;;  %v9376_v2 = vld [vmem:[%s13507_s1 + $0x6c] ss:$16 sps:$4 sm:$0xff]  }
 0x1bf   :  { %6559 = vmatpush2.bf16.msra.mxu0 %v9341_v46  ;;  %v9371_v46 = vld [vmem:[%s13507_s1 + $0x1c60] ss:$16 sps:$4 sm:$0xff]  }
 0x1c0   :  { %6600 = vmatpush2.bf16.msra.mxu1 %v9344_v48  ;;  %6610 = vmatprep.subr.bf16.mxu0 %v9349_v51  ;;  %v9374_v48 = vld [vmem:[%s13507_s1 + $0x68] ss:$16 sps:$4 sm:$0xff]   ;;  %v9379_v51 = vld [vmem:[%s13507_s1 + $0x1c44] ss:$16 sps:$4 sm:$0xff]  }
 0x1c1   :  { %6651 = vmatprep.subr.bf16.mxu1 %v9352_v9  ;;  %v9382_v9 = vld [vmem:[%s13507_s1 + $0x4c] ss:$16 sps:$4 sm:$0xff]  }
 0x1c2   :  { %v6316_v1 = vpop.f32.mrf.mxu0  ;;  %6561 = vmatmul.mubr.bf16.vlgmr.msra.gmra.mxu0 %v11752_v47 }
 0x1c3   :  { %v6357_v7 = vpop.f32.mrf.mxu1  ;;  %6602 = vmatmul.mubr.bf16.vlgmr.msra.gmra.mxu1 %v11776_v45  ;;  %v6317_v8 = vadd.f32 %v6316_v1, %v11582_v55  ;;  %6611 = vmatpush1.bf16.msra.mxu0 %v9347_v52  ;;  %v9359_v55 = vld [vmem:[%s13507_s1 + $0x1ca0] ss:$16 sps:$4 sm:$0xff]   ;;  %v9394_v1 = vld [vmem:[%s13507_s1 + $0xc] ss:$16 sps:$4 sm:$0xff]  }
 0x1c4   :  { %6652 = vmatpush1.bf16.msra.mxu1 %v9350_v56  ;;  %v6318_v10 = vpop.f32.mrf.mxu0  ;;  %6612 = vmatprep.subr.bf16.mxu0 %v9355_v58  ;;  %v9377_v52 = vld [vmem:[%s13507_s1 + $0x1c40] ss:$16 sps:$4 sm:$0xff]   ;;  %v9380_v56 = vld [vmem:[%s13507_s1 + $0x48] ss:$16 sps:$4 sm:$0xff]   ;;  %v9388_v58 = vld [vmem:[%s13507_s1 + $0x2c] ss:$16 sps:$4 sm:$0xff]  }
 0x1c5   :  { %v6359_v11 = vpop.f32.mrf.mxu1  ;;  %6653 = vmatprep.subr.bf16.mxu1 %v9358_v61  ;;  %v11802_v19 = vadd.f32 %v6357_v7, %v6317_v8  ;;  %v6319_v20 = vadd.f32 %v6318_v10, %v11593_v63  ;;  %6642 = vmatprep.mubr.bf16.mxu0 %v11791_v53  ;;  %v9383_v61 = vld [vmem:[%s13507_s1 + $0x1c20] ss:$16 sps:$4 sm:$0xff]   ;;  %v9392_v8 = vld [vmem:[%s13507_s1 + $0x8] ss:$16 sps:$4 sm:$0xff]   ;;  %v9397_v10 = vld [vmem:[%s13507_s1 + $0x1de4] ss:$16 sps:$4 sm:$0xff]  }
 0x1c6   :  { %6683 = vmatprep.mubr.bf16.mxu1 %v10366_v60  ;;  %v6320_v27 = vpop.f32.mrf.mxu0  ;;  %v9365_v60 = vld [vmem:[%s13507_s1 + $0x1c80] ss:$16 sps:$4 sm:$0xff]  }
 0x1c7   :  { %v6361_v5 = vpop.f32.mrf.mxu1  ;;  %v11813_v28 = vadd.f32 %v6359_v11, %v6319_v20  ;;  %6613 = vmatpush1.bf16.msra.mxu0 %v9353_v62  ;;  %v9386_v62 = vld [vmem:[%s13507_s1 + $0x28] ss:$16 sps:$4 sm:$0xff]   ;;  %v9389_v7 = vld [vmem:[%s13507_s1 + $0x1c00] ss:$16 sps:$4 sm:$0xff]   ;;  %v9400_v11 = vld [vmem:[%s13507_s1 + $0x1ec] ss:$16 sps:$4 sm:$0xff]  }
 0x1c8   :  { %6654 = vmatpush1.bf16.msra.mxu1 %v9356_v3  ;;  %v6321_v29 = vpop.f32.mrf.mxu0  ;;  %6614 = vmatprep.subr.bf16.mxu0 %v9361_v14  ;;  %v9391_v3 = vld [vmem:[%s13507_s1 + $0x1c04] ss:$16 sps:$4 sm:$0xff]   ;;  %v9395_v14 = vld [vmem:[%s13507_s1 + $0x1de0] ss:$16 sps:$4 sm:$0xff]   ;;  %v9404_v27 = vld [vmem:[%s13507_s1 + $0x1c8] ss:$16 sps:$4 sm:$0xff]  }
 0x1c9   :  { %v6362_v63 = vpop.f32.mrf.mxu1  ;;  %6655 = vmatprep.subr.bf16.mxu1 %v9364_v16  ;;  %v9398_v16 = vld [vmem:[%s13507_s1 + $0x1e8] ss:$16 sps:$4 sm:$0xff]   ;;  %v9403_v20 = vld [vmem:[%s13507_s1 + $0x1dc4] ss:$16 sps:$4 sm:$0xff]   ;;  %v9412_v29 = vld [vmem:[%s13507_s1 + $0x1ac] ss:$16 sps:$4 sm:$0xff]  }
 0x1ca   :  { %v9409_v5 = vld [vmem:[%s13507_s1 + $0x1da4] ss:$16 sps:$4 sm:$0xff]   ;;  %v9407_v63 = vld [vmem:[%s13507_s1 + $0x1da0] ss:$16 sps:$4 sm:$0xff]  }
 0x1cb   :  { %6615 = vmatpush1.bf16.msra.mxu0 %v9359_v55  ;;  %v9406_v55 = vld [vmem:[%s13507_s1 + $0x1cc] ss:$16 sps:$4 sm:$0xff]  }
 0x1cc   :  { %6656 = vmatpush1.bf16.msra.mxu1 %v9362_v21  ;;  %6616 = vmatprep.subr.bf16.mxu0 %v9367_v36  ;;  %v9401_v21 = vld [vmem:[%s13507_s1 + $0x1dc0] ss:$16 sps:$4 sm:$0xff]   ;;  %v9410_v36 = vld [vmem:[%s13507_s1 + $0x1a8] ss:$16 sps:$4 sm:$0xff]  }
 0x1cd   :  { %6657 = vmatprep.subr.bf16.mxu1 %v9370_v37  ;;  %v9415_v37 = vld [vmem:[%s13507_s1 + $0x1d84] ss:$16 sps:$4 sm:$0xff]  }
 0x1cf   :  { %6617 = vmatpush1.bf16.msra.mxu0 %v9365_v60  ;;  %v9418_v60 = vld [vmem:[%s13507_s1 + $0x18c] ss:$16 sps:$4 sm:$0xff]  }
 0x1d0   :  { %6658 = vmatpush1.bf16.msra.mxu1 %v9368_v38  ;;  %6618 = vmatprep.subr.bf16.mxu0 %v9373_v32  ;;  %v9413_v38 = vld [vmem:[%s13507_s1 + $0x1d80] ss:$16 sps:$4 sm:$0xff]   ;;  %v9416_v32 = vld [vmem:[%s13507_s1 + $0x188] ss:$16 sps:$4 sm:$0xff]  }
 0x1d1   :  { %6659 = vmatprep.subr.bf16.mxu1 %v9376_v2  ;;  %v9421_v2 = vld [vmem:[%s13507_s1 + $0x1d64] ss:$16 sps:$4 sm:$0xff]  }
 0x1d3   :  { %6619 = vmatpush1.bf16.msra.mxu0 %v9371_v46  ;;  %v9424_v46 = vld [vmem:[%s13507_s1 + $0x16c] ss:$16 sps:$4 sm:$0xff]  }
 0x1d4   :  { %6660 = vmatpush1.bf16.msra.mxu1 %v9374_v48  ;;  %6620 = vmatprep.subr.bf16.mxu0 %v9379_v51  ;;  %v9419_v48 = vld [vmem:[%s13507_s1 + $0x1d60] ss:$16 sps:$4 sm:$0xff]   ;;  %v9422_v51 = vld [vmem:[%s13507_s1 + $0x168] ss:$16 sps:$4 sm:$0xff]  }
 0x1d5   :  { %6661 = vmatprep.subr.bf16.mxu1 %v9382_v9  ;;  %v9427_v9 = vld [vmem:[%s13507_s1 + $0x1d44] ss:$16 sps:$4 sm:$0xff]  }
 0x1d7   :  { %6621 = vmatpush1.bf16.msra.mxu0 %v9377_v52  ;;  %v9430_v52 = vld [vmem:[%s13507_s1 + $0x14c] ss:$16 sps:$4 sm:$0xff]  }
 0x1d8   :  { %6662 = vmatpush1.bf16.msra.mxu1 %v9380_v56  ;;  %6622 = vmatprep.subr.bf16.mxu0 %v9385_v57  ;;  %v9425_v56 = vld [vmem:[%s13507_s1 + $0x1d40] ss:$16 sps:$4 sm:$0xff]   ;;  %v9428_v57 = vld [vmem:[%s13507_s1 + $0x148] ss:$16 sps:$4 sm:$0xff]  }
 0x1d9   :  { %6663 = vmatprep.subr.bf16.mxu1 %v9388_v58  ;;  %v9433_v58 = vld [vmem:[%s13507_s1 + $0x1d24] ss:$16 sps:$4 sm:$0xff]  }
 0x1db   :  { %6623 = vmatpush1.bf16.msra.mxu0 %v9383_v61  ;;  %v9436_v61 = vld [vmem:[%s13507_s1 + $0x12c] ss:$16 sps:$4 sm:$0xff]  }
 0x1dc   :  { %6664 = vmatpush1.bf16.msra.mxu1 %v9386_v62  ;;  %6624 = vmatprep.subr.bf16.mxu0 %v9391_v3  ;;  %v9431_v62 = vld [vmem:[%s13507_s1 + $0x1d20] ss:$16 sps:$4 sm:$0xff]   ;;  %v9434_v3 = vld [vmem:[%s13507_s1 + $0x128] ss:$16 sps:$4 sm:$0xff]  }
 0x1dd   :  { %6665 = vmatprep.subr.bf16.mxu1 %v9394_v1  ;;  %v9439_v1 = vld [vmem:[%s13507_s1 + $0x1d04] ss:$16 sps:$4 sm:$0xff]  }
 0x1df   :  { %6625 = vmatpush1.bf16.msra.mxu0 %v9389_v7  ;;  %v9442_v7 = vld [vmem:[%s13507_s1 + $0x10c] ss:$16 sps:$4 sm:$0xff]  }
 0x1e0   :  { %6666 = vmatpush1.bf16.msra.mxu1 %v9392_v8  ;;  %6626 = vmatprep.subr.bf16.mxu0 %v9397_v10  ;;  %v9437_v8 = vld [vmem:[%s13507_s1 + $0x1d00] ss:$16 sps:$4 sm:$0xff]   ;;  %v9440_v10 = vld [vmem:[%s13507_s1 + $0x108] ss:$16 sps:$4 sm:$0xff]  }
 0x1e1   :  { %6667 = vmatprep.subr.bf16.mxu1 %v9400_v11  ;;  %v9446_v11 = vld [vmem:[%s13507_s1 + $0x2ec] ss:$16 sps:$4 sm:$0xff]  }
 0x1e3   :  { %6627 = vmatpush2.bf16.msra.mxu0 %v9395_v14  ;;  %v9449_v14 = vld [vmem:[%s13507_s1 + $0x4ec] ss:$16 sps:$4 sm:$0xff]  }
 0x1e4   :  { %6668 = vmatpush2.bf16.msra.mxu1 %v9398_v16  ;;  %6628 = vmatprep.subr.bf16.mxu0 %v9403_v20  ;;  %v9444_v16 = vld [vmem:[%s13507_s1 + $0x2e8] ss:$16 sps:$4 sm:$0xff]  }
 0x1e5   :  { %6669 = vmatprep.subr.bf16.mxu1 %v9406_v55  ;;  %v9447_v20 = vld [vmem:[%s13507_s1 + $0x4e8] ss:$16 sps:$4 sm:$0xff]   ;;  %v11985_v55 = vrot.slane %v11748_v44, %v10338_v49 }
 0x1e6   :  { %v9453_v49 = vld [vmem:[%s13507_s1 + $0x4c8] ss:$16 sps:$4 sm:$0xff]  }
 0x1e7   :  { %6629 = vmatpush2.bf16.msra.mxu0 %v9401_v21  ;;  %v9452_v21 = vld [vmem:[%s13507_s1 + $0x2cc] ss:$16 sps:$4 sm:$0xff]  }
 0x1e8   :  { %6670 = vmatpush2.bf16.msra.mxu1 %v9404_v27  ;;  %6630 = vmatprep.subr.bf16.mxu0 %v9409_v5  ;;  %v9455_v27 = vld [vmem:[%s13507_s1 + $0x4cc] ss:$16 sps:$4 sm:$0xff]   ;;  %v9450_v5 = vld [vmem:[%s13507_s1 + $0x2c8] ss:$16 sps:$4 sm:$0xff]  }
 0x1e9   :  { %6671 = vmatprep.subr.bf16.mxu1 %v9412_v29 }
 0x1eb   :  { %6631 = vmatpush2.bf16.msra.mxu0 %v9407_v63 }
 0x1ec   :  { %6672 = vmatpush2.bf16.msra.mxu1 %v9410_v36  ;;  %6632 = vmatprep.subr.bf16.mxu0 %v9415_v37 }
 0x1ed   :  { %6673 = vmatprep.subr.bf16.mxu1 %v9418_v60  ;;  %v9458_v60 = vld [vmem:[%s13507_s1 + $0x2ac] ss:$16 sps:$4 sm:$0xff]  }
 0x1ef   :  { %6633 = vmatpush2.bf16.msra.mxu0 %v9413_v38  ;;  %v9461_v38 = vld [vmem:[%s13507_s1 + $0x4ac] ss:$16 sps:$4 sm:$0xff]  }
 0x1f0   :  { %6674 = vmatpush2.bf16.msra.mxu1 %v9416_v32  ;;  %6634 = vmatprep.subr.bf16.mxu0 %v9421_v2  ;;  %v9459_v2 = vld [vmem:[%s13507_s1 + $0x4a8] ss:$16 sps:$4 sm:$0xff]  }
 0x1f1   :  { %6675 = vmatprep.subr.bf16.mxu1 %v9424_v46 }
 0x1f3   :  { %6635 = vmatpush2.bf16.msra.mxu0 %v9419_v48 }
 0x1f4   :  { %6676 = vmatpush2.bf16.msra.mxu1 %v9422_v51  ;;  %6636 = vmatprep.subr.bf16.mxu0 %v9427_v9 }
 0x1f5   :  { %6677 = vmatprep.subr.bf16.mxu1 %v9430_v52  ;;  %v9464_v52 = vld [vmem:[%s13507_s1 + $0x28c] ss:$16 sps:$4 sm:$0xff]  }
 0x1f7   :  { %6637 = vmatpush2.bf16.msra.mxu0 %v9425_v56  ;;  %v9465_v56 = vld [vmem:[%s13507_s1 + $0x488] ss:$16 sps:$4 sm:$0xff]  }
 0x1f8   :  { %6678 = vmatpush2.bf16.msra.mxu1 %v9428_v57  ;;  %6638 = vmatprep.subr.bf16.mxu0 %v9433_v58  ;;  %v9470_v57 = vld [vmem:[%s13507_s1 + $0x26c] ss:$16 sps:$4 sm:$0xff]  }
 0x1f9   :  { %6679 = vmatprep.subr.bf16.mxu1 %v9436_v61  ;;  %v9473_v58 = vld [vmem:[%s13507_s1 + $0x46c] ss:$16 sps:$4 sm:$0xff]   ;;  %v9468_v61 = vld [vmem:[%s13507_s1 + $0x268] ss:$16 sps:$4 sm:$0xff]  }
 0x1fb   :  { %6639 = vmatpush2.bf16.msra.mxu0 %v9431_v62  ;;  %v9471_v62 = vld [vmem:[%s13507_s1 + $0x468] ss:$16 sps:$4 sm:$0xff]  }
 0x1fc   :  { %6680 = vmatpush2.bf16.msra.mxu1 %v9434_v3  ;;  %6640 = vmatprep.subr.bf16.mxu0 %v9439_v1  ;;  %v9476_v3 = vld [vmem:[%s13507_s1 + $0x24c] ss:$16 sps:$4 sm:$0xff]  }
 0x1fd   :  { %6681 = vmatprep.subr.bf16.mxu1 %v9442_v7  ;;  %v9479_v1 = vld [vmem:[%s13507_s1 + $0x44c] ss:$16 sps:$4 sm:$0xff]   ;;  %v9474_v7 = vld [vmem:[%s13507_s1 + $0x248] ss:$16 sps:$4 sm:$0xff]  }
 0x1ff   :  { %6641 = vmatpush2.bf16.msra.mxu0 %v9437_v8  ;;  %v9477_v8 = vld [vmem:[%s13507_s1 + $0x448] ss:$16 sps:$4 sm:$0xff]  }
 0x200   :  { %6682 = vmatpush2.bf16.msra.mxu1 %v9440_v10  ;;  %6692 = vmatprep.subr.bf16.mxu0 %v9446_v11  ;;  %v9482_v10 = vld [vmem:[%s13507_s1 + $0x22c] ss:$16 sps:$4 sm:$0xff]  }
 0x201   :  { %6733 = vmatprep.subr.bf16.mxu1 %v9449_v14  ;;  %v9485_v11 = vld [vmem:[%s13507_s1 + $0x42c] ss:$16 sps:$4 sm:$0xff]   ;;  %v9480_v14 = vld [vmem:[%s13507_s1 + $0x228] ss:$16 sps:$4 sm:$0xff]  }
 0x202   :  { %v6398_v44 = vpop.f32.mrf.mxu0  ;;  %6643 = vmatmul.mubr.bf16.vlgmr.msra.gmra.mxu0 %v11985_v55 }
 0x203   :  { %v6439_v29 = vpop.f32.mrf.mxu1  ;;  %6684 = vmatmul.mubr.bf16.vlgmr.msra.gmra.mxu1 %v10416_v13  ;;  %v6399_v63 = vadd.f32 %v6398_v44, %v11802_v19  ;;  %6693 = vmatpush1.bf16.msra.mxu0 %v9444_v16  ;;  %v9456_v19 = vld [vmem:[%s13507_s1 + $0x2a8] ss:$16 sps:$4 sm:$0xff]   ;;  %v9497_v44 = vld [vmem:[%s13507_s1 + $0x5ec] ss:$16 sps:$4 sm:$0xff]  }
 0x204   :  { %6734 = vmatpush1.bf16.msra.mxu1 %v9447_v20  ;;  %v6400_v36 = vpop.f32.mrf.mxu0  ;;  %6694 = vmatprep.subr.bf16.mxu0 %v9452_v21  ;;  %v9483_v16 = vld [vmem:[%s13507_s1 + $0x428] ss:$16 sps:$4 sm:$0xff]   ;;  %v9488_v20 = vld [vmem:[%s13507_s1 + $0x20c] ss:$16 sps:$4 sm:$0xff]  }
 0x205   :  { %v6441_v37 = vpop.f32.mrf.mxu1  ;;  %6735 = vmatprep.subr.bf16.mxu1 %v9455_v27  ;;  %v12008_v32 = vadd.f32 %v6439_v29, %v6399_v63  ;;  %v6401_v13 = vadd.f32 %v6400_v36, %v11813_v28  ;;  %6724 = vmatprep.mubr.bf16.mxu0 %v10379_v0  ;;  %v9467_v0 = vld [vmem:[%s13507_s1 + $0x48c] ss:$16 sps:$4 sm:$0xff]   ;;  %v9486_v27 = vld [vmem:[%s13507_s1 + $0x208] ss:$16 sps:$4 sm:$0xff]  }
 0x206   :  { %6765 = vmatprep.mubr.bf16.mxu1 %v10428_v17  ;;  %v6402_v46 = vpop.f32.mrf.mxu0  ;;  %v9462_v17 = vld [vmem:[%s13507_s1 + $0x288] ss:$16 sps:$4 sm:$0xff]   ;;  %v9491_v21 = vld [vmem:[%s13507_s1 + $0x40c] ss:$16 sps:$4 sm:$0xff]  }
 0x207   :  { %v6443_v48 = vpop.f32.mrf.mxu1  ;;  %v12019_v51 = vadd.f32 %v6441_v37, %v6401_v13  ;;  %6695 = vmatpush1.bf16.msra.mxu0 %v9450_v5  ;;  %v9489_v5 = vld [vmem:[%s13507_s1 + $0x408] ss:$16 sps:$4 sm:$0xff]   ;;  %v9500_v36 = vld [vmem:[%s13507_s1 + $0x3cc] ss:$16 sps:$4 sm:$0xff]  }
 0x208   :  { %6736 = vmatpush1.bf16.msra.mxu1 %v9453_v49  ;;  %v6403_v9 = vpop.f32.mrf.mxu0  ;;  %6696 = vmatprep.subr.bf16.mxu0 %v9458_v60  ;;  %v9494_v49 = vld [vmem:[%s13507_s1 + $0x3ec] ss:$16 sps:$4 sm:$0xff]   ;;  %v9492_v29 = vld [vmem:[%s13507_s1 + $0x3e8] ss:$16 sps:$4 sm:$0xff]  }
 0x209   :  { %v6444_v28 = vpop.f32.mrf.mxu1  ;;  %6737 = vmatprep.subr.bf16.mxu1 %v9461_v38  ;;  %v9495_v63 = vld [vmem:[%s13507_s1 + $0x5e8] ss:$16 sps:$4 sm:$0xff]   ;;  %v9503_v37 = vld [vmem:[%s13507_s1 + $0x5cc] ss:$16 sps:$4 sm:$0xff]  }
 0x20a   :  { %v9498_v60 = vld [vmem:[%s13507_s1 + $0x3c8] ss:$16 sps:$4 sm:$0xff]   ;;  %v9506_v13 = vld [vmem:[%s13507_s1 + $0x3ac] ss:$16 sps:$4 sm:$0xff]  }
 0x20b   :  { %6697 = vmatpush1.bf16.msra.mxu0 %v9456_v19  ;;  %v9501_v38 = vld [vmem:[%s13507_s1 + $0x5c8] ss:$16 sps:$4 sm:$0xff]   ;;  %v9509_v19 = vld [vmem:[%s13507_s1 + $0x5ac] ss:$16 sps:$4 sm:$0xff]  }
 0x20c   :  { %6738 = vmatpush1.bf16.msra.mxu1 %v9459_v2  ;;  %6698 = vmatprep.subr.bf16.mxu0 %v9464_v52  ;;  %v9504_v2 = vld [vmem:[%s13507_s1 + $0x3a8] ss:$16 sps:$4 sm:$0xff]   ;;  %v9512_v48 = vld [vmem:[%s13507_s1 + $0x38c] ss:$16 sps:$4 sm:$0xff]  }
 0x20d   :  { %6739 = vmatprep.subr.bf16.mxu1 %v9467_v0  ;;  %v9507_v46 = vld [vmem:[%s13507_s1 + $0x5a8] ss:$16 sps:$4 sm:$0xff]   ;;  %v9515_v9 = vld [vmem:[%s13507_s1 + $0x58c] ss:$16 sps:$4 sm:$0xff]  }
 0x20e   :  { %v9510_v28 = vld [vmem:[%s13507_s1 + $0x388] ss:$16 sps:$4 sm:$0xff]   ;;  %v9518_v0 = vld [vmem:[%s13507_s1 + $0x36c] ss:$16 sps:$4 sm:$0xff]  }
 0x20f   :  { %6699 = vmatpush1.bf16.msra.mxu0 %v9462_v17  ;;  %v9513_v52 = vld [vmem:[%s13507_s1 + $0x588] ss:$16 sps:$4 sm:$0xff]   ;;  %v9521_v17 = vld [vmem:[%s13507_s1 + $0x56c] ss:$16 sps:$4 sm:$0xff]  }
 0x210   :  { %6740 = vmatpush1.bf16.msra.mxu1 %v9465_v56  ;;  %6700 = vmatprep.subr.bf16.mxu0 %v9470_v57  ;;  %v9516_v56 = vld [vmem:[%s13507_s1 + $0x368] ss:$16 sps:$4 sm:$0xff]  }
 0x211   :  { %6741 = vmatprep.subr.bf16.mxu1 %v9473_v58  ;;  %v9519_v57 = vld [vmem:[%s13507_s1 + $0x568] ss:$16 sps:$4 sm:$0xff]   ;;  %v9524_v58 = vld [vmem:[%s13507_s1 + $0x34c] ss:$16 sps:$4 sm:$0xff]  }
 0x213   :  { %6701 = vmatpush1.bf16.msra.mxu0 %v9468_v61  ;;  %v9527_v61 = vld [vmem:[%s13507_s1 + $0x54c] ss:$16 sps:$4 sm:$0xff]  }
 0x214   :  { %6742 = vmatpush1.bf16.msra.mxu1 %v9471_v62  ;;  %6702 = vmatprep.subr.bf16.mxu0 %v9476_v3  ;;  %v9522_v62 = vld [vmem:[%s13507_s1 + $0x348] ss:$16 sps:$4 sm:$0xff]  }
 0x215   :  { %6743 = vmatprep.subr.bf16.mxu1 %v9479_v1  ;;  %v9525_v3 = vld [vmem:[%s13507_s1 + $0x548] ss:$16 sps:$4 sm:$0xff]   ;;  %v9530_v1 = vld [vmem:[%s13507_s1 + $0x32c] ss:$16 sps:$4 sm:$0xff]  }
 0x217   :  { %6703 = vmatpush1.bf16.msra.mxu0 %v9474_v7  ;;  %v9533_v7 = vld [vmem:[%s13507_s1 + $0x52c] ss:$16 sps:$4 sm:$0xff]  }
 0x218   :  { %6744 = vmatpush1.bf16.msra.mxu1 %v9477_v8  ;;  %6704 = vmatprep.subr.bf16.mxu0 %v9482_v10  ;;  %v9528_v8 = vld [vmem:[%s13507_s1 + $0x328] ss:$16 sps:$4 sm:$0xff]  }
 0x219   :  { %6745 = vmatprep.subr.bf16.mxu1 %v9485_v11  ;;  %v9531_v10 = vld [vmem:[%s13507_s1 + $0x528] ss:$16 sps:$4 sm:$0xff]   ;;  %v9536_v11 = vld [vmem:[%s13507_s1 + $0x30c] ss:$16 sps:$4 sm:$0xff]  }
 0x21b   :  { %6705 = vmatpush1.bf16.msra.mxu0 %v9480_v14  ;;  %v9539_v14 = vld [vmem:[%s13507_s1 + $0x50c] ss:$16 sps:$4 sm:$0xff]  }
 0x21c   :  { %6746 = vmatpush1.bf16.msra.mxu1 %v9483_v16  ;;  %6706 = vmatprep.subr.bf16.mxu0 %v9488_v20  ;;  %v9534_v16 = vld [vmem:[%s13507_s1 + $0x308] ss:$16 sps:$4 sm:$0xff]  }
 0x21d   :  { %6747 = vmatprep.subr.bf16.mxu1 %v9491_v21  ;;  %v9537_v20 = vld [vmem:[%s13507_s1 + $0x508] ss:$16 sps:$4 sm:$0xff]   ;;  %v9542_v21 = vld [vmem:[%s13507_s1 + $0x6ec] ss:$16 sps:$4 sm:$0xff]  }
 0x21f   :  { %6707 = vmatpush1.bf16.msra.mxu0 %v9486_v27  ;;  %v9545_v27 = vld [vmem:[%s13507_s1 + $0x8ec] ss:$16 sps:$4 sm:$0xff]  }
 0x220   :  { %6748 = vmatpush1.bf16.msra.mxu1 %v9489_v5  ;;  %6708 = vmatprep.subr.bf16.mxu0 %v9494_v49  ;;  %v9540_v5 = vld [vmem:[%s13507_s1 + $0x6e8] ss:$16 sps:$4 sm:$0xff]  }
 0x221   :  { %6749 = vmatprep.subr.bf16.mxu1 %v9497_v44  ;;  %v9543_v49 = vld [vmem:[%s13507_s1 + $0x8e8] ss:$16 sps:$4 sm:$0xff]   ;;  %v9548_v44 = vld [vmem:[%s13507_s1 + $0x6cc] ss:$16 sps:$4 sm:$0xff]  }
 0x223   :  { %6709 = vmatpush2.bf16.msra.mxu0 %v9492_v29  ;;  %v9551_v29 = vld [vmem:[%s13507_s1 + $0x8cc] ss:$16 sps:$4 sm:$0xff]  }
 0x224   :  { %6750 = vmatpush2.bf16.msra.mxu1 %v9495_v63  ;;  %6710 = vmatprep.subr.bf16.mxu0 %v9500_v36 }
 0x225   :  { %6751 = vmatprep.subr.bf16.mxu1 %v9503_v37 }
 0x227   :  { %6711 = vmatpush2.bf16.msra.mxu0 %v9498_v60 }
 0x228   :  { %6752 = vmatpush2.bf16.msra.mxu1 %v9501_v38  ;;  %6712 = vmatprep.subr.bf16.mxu0 %v9506_v13 }
 0x229   :  { %6753 = vmatprep.subr.bf16.mxu1 %v9509_v19 }
 0x22b   :  { %6713 = vmatpush2.bf16.msra.mxu0 %v9504_v2 }
 0x22c   :  { %6754 = vmatpush2.bf16.msra.mxu1 %v9507_v46  ;;  %6714 = vmatprep.subr.bf16.mxu0 %v9512_v48 }
 0x22d   :  { %6755 = vmatprep.subr.bf16.mxu1 %v9515_v9 }
 0x22f   :  { %6715 = vmatpush2.bf16.msra.mxu0 %v9510_v28 }
 0x230   :  { %6756 = vmatpush2.bf16.msra.mxu1 %v9513_v52  ;;  %6716 = vmatprep.subr.bf16.mxu0 %v9518_v0 }
 0x231   :  { %6757 = vmatprep.subr.bf16.mxu1 %v9521_v17 }
 0x233   :  { %6717 = vmatpush2.bf16.msra.mxu0 %v9516_v56 }
 0x234   :  { %6758 = vmatpush2.bf16.msra.mxu1 %v9519_v57  ;;  %6718 = vmatprep.subr.bf16.mxu0 %v9524_v58 }
 0x235   :  { %6759 = vmatprep.subr.bf16.mxu1 %v9527_v61 }
 0x237   :  { %6719 = vmatpush2.bf16.msra.mxu0 %v9522_v62 }
 0x238   :  { %6760 = vmatpush2.bf16.msra.mxu1 %v9525_v3  ;;  %6720 = vmatprep.subr.bf16.mxu0 %v9530_v1 }
 0x239   :  { %6761 = vmatprep.subr.bf16.mxu1 %v9533_v7 }
 0x23b   :  { %6721 = vmatpush2.bf16.msra.mxu0 %v9528_v8 }
 0x23c   :  { %6762 = vmatpush2.bf16.msra.mxu1 %v9531_v10  ;;  %6722 = vmatprep.subr.bf16.mxu0 %v9536_v11 }
 0x23d   :  { %6763 = vmatprep.subr.bf16.mxu1 %v9539_v14 }
 0x23f   :  { %6723 = vmatpush2.bf16.msra.mxu0 %v9534_v16 }
 0x240   :  { %6764 = vmatpush2.bf16.msra.mxu1 %v9537_v20  ;;  %6774 = vmatprep.subr.bf16.mxu0 %v9542_v21 }
 0x241   :  { %6815 = vmatprep.subr.bf16.mxu1 %v9545_v27 }
 0x242   :  { %v6480_v63 = vpop.f32.mrf.mxu0  ;;  %6725 = vmatmul.mubr.bf16.vlgmr.msra.gmra.mxu0 %v10432_v18 }
 0x243   :  { %v6521_v36 = vpop.f32.mrf.mxu1  ;;  %6766 = vmatmul.mubr.bf16.vlgmr.msra.gmra.mxu1 %v10627_v26 }
 0x244   :  { %10 = vsyncpa [#allocation3], 0  ;;  %v6481_v37 = vadd.f32 %v6480_v63, %v12008_v32  ;;  %6775 = vmatpush1.bf16.msra.mxu0 %v9540_v5  ;;  %6816 = vmatpush1.bf16.msra.mxu1 %v9543_v49  ;;  %v9546_v60 = vld [vmem:[%s13507_s1 + $0x6c8] ss:$16 sps:$4 sm:$0xff]   ;;  %v6482_v13 = vpop.f32.mrf.mxu0  ;;  %v9554_v18 = vld [vmem:[%s13507_s1 + $0x6ac] ss:$16 sps:$4 sm:$0xff]  }
 0x245   :  { %v9549_v38 = vld [vmem:[%s13507_s1 + $0x8c8] ss:$16 sps:$4 sm:$0xff]   ;;  %v6523_v19 = vpop.f32.mrf.mxu1  ;;  %6776 = vmatprep.subr.bf16.mxu0 %v9548_v44  ;;  %6817 = vmatprep.subr.bf16.mxu1 %v9551_v29  ;;  %v9557_v26 = vld [vmem:[%s13507_s1 + $0x8ac] ss:$16 sps:$4 sm:$0xff]   ;;  %v6483_v2 = vadd.f32 %v6482_v13, %v12019_v51  ;;  %s10172_s23 = smov [#allocation2]   ;;  %vm7617_vm0 = vcmask 9216  }
 0x246   :  { %v12210_v32 = vadd.f32 %v6521_v36, %v6481_v37  ;;  %6806 = vmatprep.mubr.bf16.mxu0 %v10448_v23  ;;  %6847 = vmatprep.mubr.bf16.mxu1 %v10680_v41  ;;  %v6484_v46 = vpop.f32.mrf.mxu0  ;;  %v9552_v28 = vld [vmem:[%s13507_s1 + $0x6a8] ss:$16 sps:$4 sm:$0xff]   ;;  %v9560_v23 = vld [vmem:[%s13507_s1 + $0x68c] ss:$16 sps:$4 sm:$0xff]   ;;  %s7625_s24 = sshll.u32 %s10172_s23, 4  ;;  %s7626_s24 = int_to_ptr.vmem [resolvable:$true] %s7625_s24 }
 0x247   :  { %v6525_v48 = vpop.f32.mrf.mxu1  ;;  %v12215_v9 = vadd.f32 %v6523_v19, %v6483_v2  ;;  %v9555_v52 = vld [vmem:[%s13507_s1 + $0x8a8] ss:$16 sps:$4 sm:$0xff]   ;;  %v9563_v41 = vld [vmem:[%s13507_s1 + $0x88c] ss:$16 sps:$4 sm:$0xff]   ;;  %s10149_s25 = scalar_lea.vmem %s7626_s24, 32  ;;  %p10154_p1 = scmp.lt.s32.totalorder %s7626_s24, %s7626_s24 }
 0x248   :  { %6777 = vmatpush1.bf16.msra.mxu0 %v9546_v60  ;;  %6818 = vmatpush1.bf16.msra.mxu1 %v9549_v38  ;;  %v6485_v0 = vpop.f32.mrf.mxu0  ;;  %v9558_v17 = vld [vmem:[%s13507_s1 + $0x688] ss:$16 sps:$4 sm:$0xff]   ;;  %v9566_v57 = vld [vmem:[%s13507_s1 + $0x66c] ss:$16 sps:$4 sm:$0xff]   ;;  %p10150_p0 = scmp.ne.s32.totalorder %s7626_s24, %s10149_s25  ;;  %p10155_p2 = scmp.lt.s32.totalorder %s10149_s25, %s10149_s25 }
 0x249   :  { %v6526_v51 = vpop.f32.mrf.mxu1  ;;  %6778 = vmatprep.subr.bf16.mxu0 %v9554_v18  ;;  %6819 = vmatprep.subr.bf16.mxu1 %v9557_v26  ;;  %v9561_v56 = vld [vmem:[%s13507_s1 + $0x888] ss:$16 sps:$4 sm:$0xff]   ;;  %v9569_v58 = vld [vmem:[%s13507_s1 + $0x86c] ss:$16 sps:$4 sm:$0xff]  }
 0x24a   :  { %v9564_v61 = vld [vmem:[%s13507_s1 + $0x668] ss:$16 sps:$4 sm:$0xff]   ;;  %v9572_v3 = vld [vmem:[%s13507_s1 + $0x64c] ss:$16 sps:$4 sm:$0xff]   ;;  %p10156_p3 = por %p10155_p2, %p10154_p1 }
 0x24b   :  { %v9567_v62 = vld [vmem:[%s13507_s1 + $0x868] ss:$16 sps:$4 sm:$0xff]   ;;  %v9575_v1 = vld [vmem:[%s13507_s1 + $0x84c] ss:$16 sps:$4 sm:$0xff]  }
 0x24c   :  { %6779 = vmatpush1.bf16.msra.mxu0 %v9552_v28  ;;  %6820 = vmatpush1.bf16.msra.mxu1 %v9555_v52  ;;  %v9570_v7 = vld [vmem:[%s13507_s1 + $0x648] ss:$16 sps:$4 sm:$0xff]   ;;  %v9578_v10 = vld [vmem:[%s13507_s1 + $0x62c] ss:$16 sps:$4 sm:$0xff]   ;;  %p10157_p4 = pnand %p10156_p3, %p10150_p0 }
 0x24d   :  { %6780 = vmatprep.subr.bf16.mxu0 %v9560_v23  ;;  %6821 = vmatprep.subr.bf16.mxu1 %v9563_v41  ;;  %v9573_v8 = vld [vmem:[%s13507_s1 + $0x848] ss:$16 sps:$4 sm:$0xff]   ;;  %v9581_v11 = vld [vmem:[%s13507_s1 + $0x82c] ss:$16 sps:$4 sm:$0xff]  }
 0x24e   :  { %v9576_v14 = vld [vmem:[%s13507_s1 + $0x628] ss:$16 sps:$4 sm:$0xff]   ;;  %v9584_v20 = vld [vmem:[%s13507_s1 + $0x60c] ss:$16 sps:$4 sm:$0xff]  }
 0x24f   :  { %v9579_v16 = vld [vmem:[%s13507_s1 + $0x828] ss:$16 sps:$4 sm:$0xff]   ;;  %v9587_v21 = vld [vmem:[%s13507_s1 + $0x80c] ss:$16 sps:$4 sm:$0xff]  }
 0x250   :  { %6781 = vmatpush1.bf16.msra.mxu0 %v9558_v17  ;;  %6822 = vmatpush1.bf16.msra.mxu1 %v9561_v56  ;;  %v9582_v27 = vld [vmem:[%s13507_s1 + $0x608] ss:$16 sps:$4 sm:$0xff]   ;;  %v9590_v49 = vld [vmem:[%s13507_s1 + $0x7ec] ss:$16 sps:$4 sm:$0xff]  }
 0x251   :  { %6782 = vmatprep.subr.bf16.mxu0 %v9566_v57  ;;  %6823 = vmatprep.subr.bf16.mxu1 %v9569_v58  ;;  %v9585_v5 = vld [vmem:[%s13507_s1 + $0x808] ss:$16 sps:$4 sm:$0xff]   ;;  %v9593_v44 = vld [vmem:[%s13507_s1 + $0x9ec] ss:$16 sps:$4 sm:$0xff]  }
 0x252   :  { %v9588_v29 = vld [vmem:[%s13507_s1 + $0x7e8] ss:$16 sps:$4 sm:$0xff]   ;;  %v9596_v36 = vld [vmem:[%s13507_s1 + $0x7cc] ss:$16 sps:$4 sm:$0xff]  }
 0x253   :  { %v9591_v63 = vld [vmem:[%s13507_s1 + $0x9e8] ss:$16 sps:$4 sm:$0xff]   ;;  %v9599_v37 = vld [vmem:[%s13507_s1 + $0x9cc] ss:$16 sps:$4 sm:$0xff]  }
 0x254   :  { %6783 = vmatpush1.bf16.msra.mxu0 %v9564_v61  ;;  %6824 = vmatpush1.bf16.msra.mxu1 %v9567_v62  ;;  %v9594_v60 = vld [vmem:[%s13507_s1 + $0x7c8] ss:$16 sps:$4 sm:$0xff]   ;;  %v9602_v13 = vld [vmem:[%s13507_s1 + $0x7ac] ss:$16 sps:$4 sm:$0xff]  }
 0x255   :  { %6784 = vmatprep.subr.bf16.mxu0 %v9572_v3  ;;  %6825 = vmatprep.subr.bf16.mxu1 %v9575_v1  ;;  %v9597_v38 = vld [vmem:[%s13507_s1 + $0x9c8] ss:$16 sps:$4 sm:$0xff]   ;;  %v9605_v19 = vld [vmem:[%s13507_s1 + $0x9ac] ss:$16 sps:$4 sm:$0xff]  }
 0x256   :  { %v9600_v18 = vld [vmem:[%s13507_s1 + $0x7a8] ss:$16 sps:$4 sm:$0xff]   ;;  %v9608_v2 = vld [vmem:[%s13507_s1 + $0x78c] ss:$16 sps:$4 sm:$0xff]  }
 0x257   :  { %v9603_v26 = vld [vmem:[%s13507_s1 + $0x9a8] ss:$16 sps:$4 sm:$0xff]   ;;  %v9611_v46 = vld [vmem:[%s13507_s1 + $0x98c] ss:$16 sps:$4 sm:$0xff]  }
 0x258   :  { %6785 = vmatpush1.bf16.msra.mxu0 %v9570_v7  ;;  %6826 = vmatpush1.bf16.msra.mxu1 %v9573_v8  ;;  %v9606_v48 = vld [vmem:[%s13507_s1 + $0x788] ss:$16 sps:$4 sm:$0xff]   ;;  %v9614_v52 = vld [vmem:[%s13507_s1 + $0x76c] ss:$16 sps:$4 sm:$0xff]  }
 0x259   :  { %6786 = vmatprep.subr.bf16.mxu0 %v9578_v10  ;;  %6827 = vmatprep.subr.bf16.mxu1 %v9581_v11  ;;  %v9609_v28 = vld [vmem:[%s13507_s1 + $0x988] ss:$16 sps:$4 sm:$0xff]   ;;  %v9617_v0 = vld [vmem:[%s13507_s1 + $0x96c] ss:$16 sps:$4 sm:$0xff]  }
 0x25a   :  { %v9612_v51 = vld [vmem:[%s13507_s1 + $0x768] ss:$16 sps:$4 sm:$0xff]   ;;  %v9620_v41 = vld [vmem:[%s13507_s1 + $0x74c] ss:$16 sps:$4 sm:$0xff]  }
 0x25b   :  { %v9615_v23 = vld [vmem:[%s13507_s1 + $0x968] ss:$16 sps:$4 sm:$0xff]   ;;  %v9623_v17 = vld [vmem:[%s13507_s1 + $0x94c] ss:$16 sps:$4 sm:$0xff]  }
 0x25c   :  { %6787 = vmatpush1.bf16.msra.mxu0 %v9576_v14  ;;  %6828 = vmatpush1.bf16.msra.mxu1 %v9579_v16  ;;  %v9618_v56 = vld [vmem:[%s13507_s1 + $0x748] ss:$16 sps:$4 sm:$0xff]   ;;  %v9626_v58 = vld [vmem:[%s13507_s1 + $0x72c] ss:$16 sps:$4 sm:$0xff]  }
 0x25d   :  { %6788 = vmatprep.subr.bf16.mxu0 %v9584_v20  ;;  %6829 = vmatprep.subr.bf16.mxu1 %v9587_v21  ;;  %v9621_v57 = vld [vmem:[%s13507_s1 + $0x948] ss:$16 sps:$4 sm:$0xff]   ;;  %v9629_v61 = vld [vmem:[%s13507_s1 + $0x92c] ss:$16 sps:$4 sm:$0xff]  }
 0x25e   :  { %v9624_v62 = vld [vmem:[%s13507_s1 + $0x728] ss:$16 sps:$4 sm:$0xff]   ;;  %v9632_v1 = vld [vmem:[%s13507_s1 + $0x70c] ss:$16 sps:$4 sm:$0xff]  }
 0x25f   :  { %v9627_v3 = vld [vmem:[%s13507_s1 + $0x928] ss:$16 sps:$4 sm:$0xff]   ;;  %v9635_v7 = vld [vmem:[%s13507_s1 + $0x90c] ss:$16 sps:$4 sm:$0xff]  }
 0x260   :  { %6789 = vmatpush1.bf16.msra.mxu0 %v9582_v27  ;;  %6830 = vmatpush1.bf16.msra.mxu1 %v9585_v5  ;;  %v9630_v8 = vld [vmem:[%s13507_s1 + $0x708] ss:$16 sps:$4 sm:$0xff]   ;;  %v9638_v11 = vld [vmem:[%s13507_s1 + $0xaec] ss:$16 sps:$4 sm:$0xff]  }
 0x261   :  { %6790 = vmatprep.subr.bf16.mxu0 %v9590_v49  ;;  %6831 = vmatprep.subr.bf16.mxu1 %v9593_v44  ;;  %v9633_v10 = vld [vmem:[%s13507_s1 + $0x908] ss:$16 sps:$4 sm:$0xff]   ;;  %v9641_v14 = vld [vmem:[%s13507_s1 + $0xcec] ss:$16 sps:$4 sm:$0xff]  }
 0x262   :  { %v9636_v16 = vld [vmem:[%s13507_s1 + $0xae8] ss:$16 sps:$4 sm:$0xff]   ;;  %v9644_v21 = vld [vmem:[%s13507_s1 + $0xacc] ss:$16 sps:$4 sm:$0xff]  }
 0x263   :  { %v9639_v20 = vld [vmem:[%s13507_s1 + $0xce8] ss:$16 sps:$4 sm:$0xff]   ;;  %v9647_v27 = vld [vmem:[%s13507_s1 + $0xccc] ss:$16 sps:$4 sm:$0xff]  }
 0x264   :  { %6791 = vmatpush2.bf16.msra.mxu0 %v9588_v29  ;;  %6832 = vmatpush2.bf16.msra.mxu1 %v9591_v63  ;;  %v9642_v29 = vld [vmem:[%s13507_s1 + $0xac8] ss:$16 sps:$4 sm:$0xff]  }
 0x265   :  { %6792 = vmatprep.subr.bf16.mxu0 %v9596_v36  ;;  %6833 = vmatprep.subr.bf16.mxu1 %v9599_v37  ;;  %v9645_v63 = vld [vmem:[%s13507_s1 + $0xcc8] ss:$16 sps:$4 sm:$0xff]  }
 0x268   :  { %6793 = vmatpush2.bf16.msra.mxu0 %v9594_v60  ;;  %6834 = vmatpush2.bf16.msra.mxu1 %v9597_v38 }
 0x269   :  { %6794 = vmatprep.subr.bf16.mxu0 %v9602_v13  ;;  %6835 = vmatprep.subr.bf16.mxu1 %v9605_v19 }
 0x26c   :  { %6795 = vmatpush2.bf16.msra.mxu0 %v9600_v18  ;;  %6836 = vmatpush2.bf16.msra.mxu1 %v9603_v26  ;;  %v9648_v18 = vld [vmem:[%s13507_s1 + $0xaa8] ss:$16 sps:$4 sm:$0xff]  }
 0x26d   :  { %6796 = vmatprep.subr.bf16.mxu0 %v9608_v2  ;;  %6837 = vmatprep.subr.bf16.mxu1 %v9611_v46  ;;  %v9651_v26 = vld [vmem:[%s13507_s1 + $0xca8] ss:$16 sps:$4 sm:$0xff]  }
 0x26e   :  { %v9654_v46 = vld [vmem:[%s13507_s1 + $0xa88] ss:$16 sps:$4 sm:$0xff]  }
 0x270   :  { %6797 = vmatpush2.bf16.msra.mxu0 %v9606_v48  ;;  %6838 = vmatpush2.bf16.msra.mxu1 %v9609_v28  ;;  %v9657_v48 = vld [vmem:[%s13507_s1 + $0xc88] ss:$16 sps:$4 sm:$0xff]   ;;  %v9662_v28 = vld [vmem:[%s13507_s1 + $0xa6c] ss:$16 sps:$4 sm:$0xff]  }
 0x271   :  { %6798 = vmatprep.subr.bf16.mxu0 %v9614_v52  ;;  %6839 = vmatprep.subr.bf16.mxu1 %v9617_v0  ;;  %v9665_v52 = vld [vmem:[%s13507_s1 + $0xc6c] ss:$16 sps:$4 sm:$0xff]   ;;  %v9660_v0 = vld [vmem:[%s13507_s1 + $0xa68] ss:$16 sps:$4 sm:$0xff]  }
 0x274   :  { %6799 = vmatpush2.bf16.msra.mxu0 %v9612_v51  ;;  %6840 = vmatpush2.bf16.msra.mxu1 %v9615_v23  ;;  %v9663_v51 = vld [vmem:[%s13507_s1 + $0xc68] ss:$16 sps:$4 sm:$0xff]   ;;  %v9668_v23 = vld [vmem:[%s13507_s1 + $0xa4c] ss:$16 sps:$4 sm:$0xff]  }
 0x275   :  { %6800 = vmatprep.subr.bf16.mxu0 %v9620_v41  ;;  %6841 = vmatprep.subr.bf16.mxu1 %v9623_v17  ;;  %v9671_v41 = vld [vmem:[%s13507_s1 + $0xc4c] ss:$16 sps:$4 sm:$0xff]   ;;  %v9666_v17 = vld [vmem:[%s13507_s1 + $0xa48] ss:$16 sps:$4 sm:$0xff]  }
 0x278   :  { %6801 = vmatpush2.bf16.msra.mxu0 %v9618_v56  ;;  %6842 = vmatpush2.bf16.msra.mxu1 %v9621_v57  ;;  %v9669_v56 = vld [vmem:[%s13507_s1 + $0xc48] ss:$16 sps:$4 sm:$0xff]   ;;  %v9674_v57 = vld [vmem:[%s13507_s1 + $0xa2c] ss:$16 sps:$4 sm:$0xff]  }
 0x279   :  { %6802 = vmatprep.subr.bf16.mxu0 %v9626_v58  ;;  %6843 = vmatprep.subr.bf16.mxu1 %v9629_v61  ;;  %v9677_v58 = vld [vmem:[%s13507_s1 + $0xc2c] ss:$16 sps:$4 sm:$0xff]   ;;  %v9672_v61 = vld [vmem:[%s13507_s1 + $0xa28] ss:$16 sps:$4 sm:$0xff]  }
 0x27c   :  { %6803 = vmatpush2.bf16.msra.mxu0 %v9624_v62  ;;  %6844 = vmatpush2.bf16.msra.mxu1 %v9627_v3  ;;  %v9675_v62 = vld [vmem:[%s13507_s1 + $0xc28] ss:$16 sps:$4 sm:$0xff]   ;;  %v9680_v3 = vld [vmem:[%s13507_s1 + $0xa0c] ss:$16 sps:$4 sm:$0xff]  }
 0x27d   :  { %6804 = vmatprep.subr.bf16.mxu0 %v9632_v1  ;;  %6845 = vmatprep.subr.bf16.mxu1 %v9635_v7  ;;  %v9683_v1 = vld [vmem:[%s13507_s1 + $0xc0c] ss:$16 sps:$4 sm:$0xff]   ;;  %v9678_v7 = vld [vmem:[%s13507_s1 + $0xa08] ss:$16 sps:$4 sm:$0xff]  }
 0x280   :  { %6805 = vmatpush2.bf16.msra.mxu0 %v9630_v8  ;;  %6846 = vmatpush2.bf16.msra.mxu1 %v9633_v10  ;;  %v9681_v8 = vld [vmem:[%s13507_s1 + $0xc08] ss:$16 sps:$4 sm:$0xff]   ;;  %v9686_v10 = vld [vmem:[%s13507_s1 + $0xbec] ss:$16 sps:$4 sm:$0xff]  }
 0x281   :  { %6856 = vmatprep.subr.bf16.mxu0 %v9638_v11  ;;  %6897 = vmatprep.subr.bf16.mxu1 %v9641_v14  ;;  %v9689_v11 = vld [vmem:[%s13507_s1 + $0xdec] ss:$16 sps:$4 sm:$0xff]   ;;  %v9684_v14 = vld [vmem:[%s13507_s1 + $0xbe8] ss:$16 sps:$4 sm:$0xff]  }
 0x282   :  { %v6562_v5 = vpop.f32.mrf.mxu0 }
 0x283   :  { %v6603_v49 = vpop.f32.mrf.mxu1  ;;  %6807 = vmatmul.mubr.bf16.vlgmr.msra.gmra.mxu0 %v10640_v6  ;;  %6848 = vmatmul.mubr.bf16.vlgmr.msra.gmra.mxu1 %v10856_v50  ;;  %v6563_v44 = vadd.f32 %v6562_v5, %v12210_v32  ;;  %v9650_v6 = vld [vmem:[%s13507_s1 + $0xaac] ss:$16 sps:$4 sm:$0xff]   ;;  %v9693_v5 = vld [vmem:[%s13507_s1 + $0xdc8] ss:$16 sps:$4 sm:$0xff]  }
 0x284   :  { %6857 = vmatpush1.bf16.msra.mxu0 %v9636_v16  ;;  %6898 = vmatpush1.bf16.msra.mxu1 %v9639_v20  ;;  %v6564_v36 = vpop.f32.mrf.mxu0  ;;  %v9653_v50 = vld [vmem:[%s13507_s1 + $0xcac] ss:$16 sps:$4 sm:$0xff]   ;;  %v9687_v16 = vld [vmem:[%s13507_s1 + $0xde8] ss:$16 sps:$4 sm:$0xff]  }
 0x285   :  { %v6605_v37 = vpop.f32.mrf.mxu1  ;;  %6858 = vmatprep.subr.bf16.mxu0 %v9644_v21  ;;  %6899 = vmatprep.subr.bf16.mxu1 %v9647_v27  ;;  %v12412_v32 = vadd.f32 %v6603_v49, %v6563_v44  ;;  %v6565_v60 = vadd.f32 %v6564_v36, %v12215_v9  ;;  %v9692_v20 = vld [vmem:[%s13507_s1 + $0xbcc] ss:$16 sps:$4 sm:$0xff]   ;;  %v9690_v27 = vld [vmem:[%s13507_s1 + $0xbc8] ss:$16 sps:$4 sm:$0xff]  }
 0x286   :  { %6888 = vmatprep.mubr.bf16.mxu0 %v10685_v43  ;;  %6929 = vmatprep.mubr.bf16.mxu1 %v10868_v54  ;;  %v6566_v38 = vpop.f32.mrf.mxu0  ;;  %v9656_v43 = vld [vmem:[%s13507_s1 + $0xa8c] ss:$16 sps:$4 sm:$0xff]  }
 0x287   :  { %v6607_v13 = vpop.f32.mrf.mxu1  ;;  %v12417_v19 = vadd.f32 %v6605_v37, %v6565_v60  ;;  %v9659_v54 = vld [vmem:[%s13507_s1 + $0xc8c] ss:$16 sps:$4 sm:$0xff]  }
 0x288   :  { %6859 = vmatpush1.bf16.msra.mxu0 %v9642_v29  ;;  %6900 = vmatpush1.bf16.msra.mxu1 %v9645_v63  ;;  %v6567_v2 = vpop.f32.mrf.mxu0  ;;  %v9695_v21 = vld [vmem:[%s13507_s1 + $0xdcc] ss:$16 sps:$4 sm:$0xff]   ;;  %v9696_v29 = vld [vmem:[%s13507_s1 + $0xba8] ss:$16 sps:$4 sm:$0xff]  }
 0x289   :  { %v6608_v9 = vpop.f32.mrf.mxu1  ;;  %6860 = vmatprep.subr.bf16.mxu0 %v9650_v6  ;;  %6901 = vmatprep.subr.bf16.mxu1 %v9653_v50  ;;  %v9698_v49 = vld [vmem:[%s13507_s1 + $0xbac] ss:$16 sps:$4 sm:$0xff]   ;;  %v9699_v63 = vld [vmem:[%s13507_s1 + $0xda8] ss:$16 sps:$4 sm:$0xff]  }
 0x28a   :  { %v9701_v44 = vld [vmem:[%s13507_s1 + $0xdac] ss:$16 sps:$4 sm:$0xff]   ;;  %v9702_v6 = vld [vmem:[%s13507_s1 + $0xb88] ss:$16 sps:$4 sm:$0xff]  }
 0x28b   :  { %v9704_v36 = vld [vmem:[%s13507_s1 + $0xb8c] ss:$16 sps:$4 sm:$0xff]   ;;  %v9705_v50 = vld [vmem:[%s13507_s1 + $0xd88] ss:$16 sps:$4 sm:$0xff]  }
 0x28c   :  { %6861 = vmatpush1.bf16.msra.mxu0 %v9648_v18  ;;  %6902 = vmatpush1.bf16.msra.mxu1 %v9651_v26  ;;  %v9707_v37 = vld [vmem:[%s13507_s1 + $0xd8c] ss:$16 sps:$4 sm:$0xff]   ;;  %v9708_v13 = vld [vmem:[%s13507_s1 + $0xb68] ss:$16 sps:$4 sm:$0xff]  }
 0x28d   :  { %6862 = vmatprep.subr.bf16.mxu0 %v9656_v43  ;;  %6903 = vmatprep.subr.bf16.mxu1 %v9659_v54  ;;  %v9710_v60 = vld [vmem:[%s13507_s1 + $0xb6c] ss:$16 sps:$4 sm:$0xff]   ;;  %v9711_v18 = vld [vmem:[%s13507_s1 + $0xd68] ss:$16 sps:$4 sm:$0xff]  }
 0x28e   :  { %v9713_v38 = vld [vmem:[%s13507_s1 + $0xd6c] ss:$16 sps:$4 sm:$0xff]   ;;  %v9714_v9 = vld [vmem:[%s13507_s1 + $0xb48] ss:$16 sps:$4 sm:$0xff]  }
 0x28f   :  { %v9716_v26 = vld [vmem:[%s13507_s1 + $0xb4c] ss:$16 sps:$4 sm:$0xff]   ;;  %v9717_v43 = vld [vmem:[%s13507_s1 + $0xd48] ss:$16 sps:$4 sm:$0xff]  }
 0x290   :  { %6863 = vmatpush1.bf16.msra.mxu0 %v9654_v46  ;;  %6904 = vmatpush1.bf16.msra.mxu1 %v9657_v48  ;;  %v9719_v2 = vld [vmem:[%s13507_s1 + $0xd4c] ss:$16 sps:$4 sm:$0xff]   ;;  %v9720_v48 = vld [vmem:[%s13507_s1 + $0xb28] ss:$16 sps:$4 sm:$0xff]  }
 0x291   :  { %6864 = vmatprep.subr.bf16.mxu0 %v9662_v28  ;;  %6905 = vmatprep.subr.bf16.mxu1 %v9665_v52  ;;  %v9722_v54 = vld [vmem:[%s13507_s1 + $0xb2c] ss:$16 sps:$4 sm:$0xff]   ;;  %v9723_v28 = vld [vmem:[%s13507_s1 + $0xd28] ss:$16 sps:$4 sm:$0xff]  }
 0x292   :  { %v9725_v46 = vld [vmem:[%s13507_s1 + $0xd2c] ss:$16 sps:$4 sm:$0xff]  }
 0x293   :  { %v9728_v52 = vld [vmem:[%s13507_s1 + $0xb0c] ss:$16 sps:$4 sm:$0xff]  }
 0x294   :  { %6865 = vmatpush1.bf16.msra.mxu0 %v9660_v0  ;;  %6906 = vmatpush1.bf16.msra.mxu1 %v9663_v51  ;;  %v9731_v0 = vld [vmem:[%s13507_s1 + $0xd0c] ss:$16 sps:$4 sm:$0xff]   ;;  %v9726_v51 = vld [vmem:[%s13507_s1 + $0xb08] ss:$16 sps:$4 sm:$0xff]  }
 0x295   :  { %6866 = vmatprep.subr.bf16.mxu0 %v9668_v23  ;;  %6907 = vmatprep.subr.bf16.mxu1 %v9671_v41  ;;  %v9729_v23 = vld [vmem:[%s13507_s1 + $0xd08] ss:$16 sps:$4 sm:$0xff]   ;;  %v9734_v41 = vld [vmem:[%s13507_s1 + $0xeec] ss:$16 sps:$4 sm:$0xff]  }
 0x298   :  { %6867 = vmatpush1.bf16.msra.mxu0 %v9666_v17  ;;  %6908 = vmatpush1.bf16.msra.mxu1 %v9669_v56  ;;  %v9737_v17 = vld [vmem:[%s13507_s1 + $0x10ec] ss:$16 sps:$4 sm:$0xff]   ;;  %v9732_v56 = vld [vmem:[%s13507_s1 + $0xee8] ss:$16 sps:$4 sm:$0xff]  }
 0x299   :  { %6868 = vmatprep.subr.bf16.mxu0 %v9674_v57  ;;  %6909 = vmatprep.subr.bf16.mxu1 %v9677_v58  ;;  %v9735_v57 = vld [vmem:[%s13507_s1 + $0x10e8] ss:$16 sps:$4 sm:$0xff]   ;;  %v9740_v58 = vld [vmem:[%s13507_s1 + $0xecc] ss:$16 sps:$4 sm:$0xff]  }
 0x29c   :  { %6869 = vmatpush1.bf16.msra.mxu0 %v9672_v61  ;;  %6910 = vmatpush1.bf16.msra.mxu1 %v9675_v62  ;;  %v9743_v61 = vld [vmem:[%s13507_s1 + $0x10cc] ss:$16 sps:$4 sm:$0xff]  }
 0x29d   :  { %6870 = vmatprep.subr.bf16.mxu0 %v9680_v3  ;;  %6911 = vmatprep.subr.bf16.mxu1 %v9683_v1 }
 0x2a0   :  { %6871 = vmatpush1.bf16.msra.mxu0 %v9678_v7  ;;  %6912 = vmatpush1.bf16.msra.mxu1 %v9681_v8  ;;  %v9738_v7 = vld [vmem:[%s13507_s1 + $0xec8] ss:$16 sps:$4 sm:$0xff]  }
 0x2a1   :  { %6872 = vmatprep.subr.bf16.mxu0 %v9686_v10  ;;  %6913 = vmatprep.subr.bf16.mxu1 %v9689_v11  ;;  %v9741_v8 = vld [vmem:[%s13507_s1 + $0x10c8] ss:$16 sps:$4 sm:$0xff]  }
 0x2a4   :  { %6873 = vmatpush2.bf16.msra.mxu0 %v9684_v14  ;;  %6914 = vmatpush2.bf16.msra.mxu1 %v9687_v16 }
 0x2a5   :  { %6874 = vmatprep.subr.bf16.mxu0 %v9692_v20  ;;  %6915 = vmatprep.subr.bf16.mxu1 %v9695_v21  ;;  %v9744_v20 = vld [vmem:[%s13507_s1 + $0xea8] ss:$16 sps:$4 sm:$0xff]  }
 0x2a6   :  { %v9747_v21 = vld [vmem:[%s13507_s1 + $0x10a8] ss:$16 sps:$4 sm:$0xff]  }
 0x2a8   :  { %6875 = vmatpush2.bf16.msra.mxu0 %v9690_v27  ;;  %6916 = vmatpush2.bf16.msra.mxu1 %v9693_v5 }
 0x2a9   :  { %6876 = vmatprep.subr.bf16.mxu0 %v9698_v49  ;;  %6917 = vmatprep.subr.bf16.mxu1 %v9701_v44  ;;  %v9753_v49 = vld [vmem:[%s13507_s1 + $0x1088] ss:$16 sps:$4 sm:$0xff]   ;;  %v9758_v44 = vld [vmem:[%s13507_s1 + $0xe6c] ss:$16 sps:$4 sm:$0xff]  }
 0x2ac   :  { %6877 = vmatpush2.bf16.msra.mxu0 %v9696_v29  ;;  %6918 = vmatpush2.bf16.msra.mxu1 %v9699_v63  ;;  %v9761_v29 = vld [vmem:[%s13507_s1 + $0x106c] ss:$16 sps:$4 sm:$0xff]   ;;  %v9756_v63 = vld [vmem:[%s13507_s1 + $0xe68] ss:$16 sps:$4 sm:$0xff]  }
 0x2ad   :  { %6878 = vmatprep.subr.bf16.mxu0 %v9704_v36  ;;  %6919 = vmatprep.subr.bf16.mxu1 %v9707_v37  ;;  %v9759_v36 = vld [vmem:[%s13507_s1 + $0x1068] ss:$16 sps:$4 sm:$0xff]   ;;  %v9764_v37 = vld [vmem:[%s13507_s1 + $0xe4c] ss:$16 sps:$4 sm:$0xff]  }
 0x2b0   :  { %6879 = vmatpush2.bf16.msra.mxu0 %v9702_v6  ;;  %6920 = vmatpush2.bf16.msra.mxu1 %v9705_v50  ;;  %v9767_v6 = vld [vmem:[%s13507_s1 + $0x104c] ss:$16 sps:$4 sm:$0xff]   ;;  %v9762_v50 = vld [vmem:[%s13507_s1 + $0xe48] ss:$16 sps:$4 sm:$0xff]  }
 0x2b1   :  { %6880 = vmatprep.subr.bf16.mxu0 %v9710_v60  ;;  %6921 = vmatprep.subr.bf16.mxu1 %v9713_v38  ;;  %v9765_v60 = vld [vmem:[%s13507_s1 + $0x1048] ss:$16 sps:$4 sm:$0xff]   ;;  %v9770_v38 = vld [vmem:[%s13507_s1 + $0xe2c] ss:$16 sps:$4 sm:$0xff]  }
 0x2b4   :  { %6881 = vmatpush2.bf16.msra.mxu0 %v9708_v13  ;;  %6922 = vmatpush2.bf16.msra.mxu1 %v9711_v18  ;;  %v9773_v13 = vld [vmem:[%s13507_s1 + $0x102c] ss:$16 sps:$4 sm:$0xff]   ;;  %v9768_v18 = vld [vmem:[%s13507_s1 + $0xe28] ss:$16 sps:$4 sm:$0xff]  }
 0x2b5   :  { %6882 = vmatprep.subr.bf16.mxu0 %v9716_v26  ;;  %6923 = vmatprep.subr.bf16.mxu1 %v9719_v2  ;;  %v9771_v26 = vld [vmem:[%s13507_s1 + $0x1028] ss:$16 sps:$4 sm:$0xff]   ;;  %v9776_v2 = vld [vmem:[%s13507_s1 + $0xe0c] ss:$16 sps:$4 sm:$0xff]  }
 0x2b8   :  { %6883 = vmatpush2.bf16.msra.mxu0 %v9714_v9  ;;  %6924 = vmatpush2.bf16.msra.mxu1 %v9717_v43  ;;  %v9779_v9 = vld [vmem:[%s13507_s1 + $0x100c] ss:$16 sps:$4 sm:$0xff]   ;;  %v9774_v43 = vld [vmem:[%s13507_s1 + $0xe08] ss:$16 sps:$4 sm:$0xff]  }
 0x2b9   :  { %6884 = vmatprep.subr.bf16.mxu0 %v9722_v54  ;;  %6925 = vmatprep.subr.bf16.mxu1 %v9725_v46  ;;  %v9777_v54 = vld [vmem:[%s13507_s1 + $0x1008] ss:$16 sps:$4 sm:$0xff]   ;;  %v9782_v46 = vld [vmem:[%s13507_s1 + $0xfec] ss:$16 sps:$4 sm:$0xff]  }
 0x2bc   :  { %6885 = vmatpush2.bf16.msra.mxu0 %v9720_v48  ;;  %6926 = vmatpush2.bf16.msra.mxu1 %v9723_v28  ;;  %v9785_v48 = vld [vmem:[%s13507_s1 + $0x11ec] ss:$16 sps:$4 sm:$0xff]   ;;  %v9780_v28 = vld [vmem:[%s13507_s1 + $0xfe8] ss:$16 sps:$4 sm:$0xff]  }
 0x2bd   :  { %6886 = vmatprep.subr.bf16.mxu0 %v9728_v52  ;;  %6927 = vmatprep.subr.bf16.mxu1 %v9731_v0  ;;  %v9783_v52 = vld [vmem:[%s13507_s1 + $0x11e8] ss:$16 sps:$4 sm:$0xff]   ;;  %v9788_v0 = vld [vmem:[%s13507_s1 + $0xfcc] ss:$16 sps:$4 sm:$0xff]  }
 0x2c0   :  { %6887 = vmatpush2.bf16.msra.mxu0 %v9726_v51  ;;  %6928 = vmatpush2.bf16.msra.mxu1 %v9729_v23  ;;  %v9791_v51 = vld [vmem:[%s13507_s1 + $0x11cc] ss:$16 sps:$4 sm:$0xff]   ;;  %v9786_v23 = vld [vmem:[%s13507_s1 + $0xfc8] ss:$16 sps:$4 sm:$0xff]  }
 0x2c1   :  { %6938 = vmatprep.subr.bf16.mxu0 %v9734_v41  ;;  %6979 = vmatprep.subr.bf16.mxu1 %v9737_v17  ;;  %v9789_v41 = vld [vmem:[%s13507_s1 + $0x11c8] ss:$16 sps:$4 sm:$0xff]   ;;  %v9794_v17 = vld [vmem:[%s13507_s1 + $0xfac] ss:$16 sps:$4 sm:$0xff]  }
 0x2c2   :  { %v6644_v62 = vpop.f32.mrf.mxu0 }
 0x2c3   :  { %v12599_v3 = vpop.f32.mrf.mxu1  ;;  %6889 = vmatmul.mubr.bf16.vlgmr.msra.gmra.mxu0 %v10872_v35  ;;  %6930 = vmatmul.mubr.bf16.vlgmr.msra.gmra.mxu1 %v11084_v15  ;;  %v12604_v1 = vadd.f32 %v6644_v62, %v12412_v32  ;;  %v9746_v35 = vld [vmem:[%s13507_s1 + $0xeac] ss:$16 sps:$4 sm:$0xff]  }
 0x2c4   :  { %6939 = vmatpush1.bf16.msra.mxu0 %v9732_v56  ;;  %6980 = vmatpush1.bf16.msra.mxu1 %v9735_v57  ;;  %v6646_v10 = vpop.f32.mrf.mxu0  ;;  %v9749_v15 = vld [vmem:[%s13507_s1 + $0x10ac] ss:$16 sps:$4 sm:$0xff]   ;;  %v9792_v57 = vld [vmem:[%s13507_s1 + $0xfa8] ss:$16 sps:$4 sm:$0xff]  }
 0x2c5   :  { %v12612_v11 = vpop.f32.mrf.mxu1  ;;  %6940 = vmatprep.subr.bf16.mxu0 %v9740_v58  ;;  %6981 = vmatprep.subr.bf16.mxu1 %v9743_v61  ;;  %v12621_v32 = vadd.f32 %v6646_v10, %v12417_v19  ;;  %v9750_v19 = vld [vmem:[%s13507_s1 + $0xe88] ss:$16 sps:$4 sm:$0xff]   ;;  %v9797_v56 = vld [vmem:[%s13507_s1 + $0x11ac] ss:$16 sps:$4 sm:$0xff]  }
 0x2c6   :  { %6970 = vmatprep.mubr.bf16.mxu0 %v10888_v59  ;;  %7011 = vmatprep.mubr.bf16.mxu1 %v11095_v22  ;;  %v6648_v14 = vpop.f32.mrf.mxu0  ;;  %v9752_v59 = vld [vmem:[%s13507_s1 + $0xe8c] ss:$16 sps:$4 sm:$0xff]   ;;  %v9795_v58 = vld [vmem:[%s13507_s1 + $0x11a8] ss:$16 sps:$4 sm:$0xff]  }
 0x2c7   :  { %v6689_v16 = vpop.f32.mrf.mxu1  ;;  %v9755_v22 = vld [vmem:[%s13507_s1 + $0x108c] ss:$16 sps:$4 sm:$0xff]   ;;  %v9807_v14 = vld [vmem:[%s13507_s1 + $0x1168] ss:$16 sps:$4 sm:$0xff]  }
 0x2c8   :  { %6941 = vmatpush1.bf16.msra.mxu0 %v9738_v7  ;;  %6982 = vmatpush1.bf16.msra.mxu1 %v9741_v8  ;;  %v6649_v27 = vpop.f32.mrf.mxu0  ;;  %v9800_v61 = vld [vmem:[%s13507_s1 + $0xf8c] ss:$16 sps:$4 sm:$0xff]   ;;  %v9798_v7 = vld [vmem:[%s13507_s1 + $0xf88] ss:$16 sps:$4 sm:$0xff]  }
 0x2c9   :  { %v6690_v5 = vpop.f32.mrf.mxu1  ;;  %6942 = vmatprep.subr.bf16.mxu0 %v9746_v35  ;;  %6983 = vmatprep.subr.bf16.mxu1 %v9749_v15  ;;  %v9803_v62 = vld [vmem:[%s13507_s1 + $0x118c] ss:$16 sps:$4 sm:$0xff]   ;;  %v9801_v8 = vld [vmem:[%s13507_s1 + $0x1188] ss:$16 sps:$4 sm:$0xff]  }
 0x2ca   :  { %v9806_v10 = vld [vmem:[%s13507_s1 + $0xf6c] ss:$16 sps:$4 sm:$0xff]   ;;  %v9804_v15 = vld [vmem:[%s13507_s1 + $0xf68] ss:$16 sps:$4 sm:$0xff]  }
 0x2cb   :  { %v9809_v35 = vld [vmem:[%s13507_s1 + $0x116c] ss:$16 sps:$4 sm:$0xff]   ;;  %v9813_v27 = vld [vmem:[%s13507_s1 + $0x1148] ss:$16 sps:$4 sm:$0xff]  }
 0x2cc   :  { %6943 = vmatpush1.bf16.msra.mxu0 %v9744_v20  ;;  %6984 = vmatpush1.bf16.msra.mxu1 %v9747_v21  ;;  %v9812_v16 = vld [vmem:[%s13507_s1 + $0xf4c] ss:$16 sps:$4 sm:$0xff]   ;;  %v9810_v21 = vld [vmem:[%s13507_s1 + $0xf48] ss:$16 sps:$4 sm:$0xff]  }
 0x2cd   :  { %6944 = vmatprep.subr.bf16.mxu0 %v9752_v59  ;;  %6985 = vmatprep.subr.bf16.mxu1 %v9755_v22  ;;  %v9815_v20 = vld [vmem:[%s13507_s1 + $0x114c] ss:$16 sps:$4 sm:$0xff]   ;;  %v9816_v22 = vld [vmem:[%s13507_s1 + $0xf28] ss:$16 sps:$4 sm:$0xff]  }
 0x2ce   :  { %v9818_v5 = vld [vmem:[%s13507_s1 + $0xf2c] ss:$16 sps:$4 sm:$0xff]  }
 0x2cf   :  { %v9821_v59 = vld [vmem:[%s13507_s1 + $0x112c] ss:$16 sps:$4 sm:$0xff]  }
 0x2d0   :  { %6945 = vmatpush1.bf16.msra.mxu0 %v9750_v19  ;;  %6986 = vmatpush1.bf16.msra.mxu1 %v9753_v49  ;;  %v9819_v19 = vld [vmem:[%s13507_s1 + $0x1128] ss:$16 sps:$4 sm:$0xff]   ;;  %v9824_v49 = vld [vmem:[%s13507_s1 + $0xf0c] ss:$16 sps:$4 sm:$0xff]  }
 0x2d1   :  { %6946 = vmatprep.subr.bf16.mxu0 %v9758_v44  ;;  %6987 = vmatprep.subr.bf16.mxu1 %v9761_v29  ;;  %v9827_v44 = vld [vmem:[%s13507_s1 + $0x110c] ss:$16 sps:$4 sm:$0xff]   ;;  %v998_v29 = vsub.s32 2, %v10320_v42 }
 0x2d4   :  { %6947 = vmatpush1.bf16.msra.mxu0 %v9756_v63  ;;  %6988 = vmatpush1.bf16.msra.mxu1 %v9759_v36  ;;  %v1002_v63 = vsub.s32 3, %v10320_v42  ;;  %v9822_v36 = vld [vmem:[%s13507_s1 + $0xf08] ss:$16 sps:$4 sm:$0xff]   ;;  %v9833_v42 = vld [vmem:[%s13507_s1 + $0x14ec] ss:$16 sps:$4 sm:$0xff]  }
 0x2d5   :  { %6948 = vmatprep.subr.bf16.mxu0 %v9764_v37  ;;  %6989 = vmatprep.subr.bf16.mxu1 %v9767_v6  ;;  %v9825_v37 = vld [vmem:[%s13507_s1 + $0x1108] ss:$16 sps:$4 sm:$0xff]   ;;  %v9830_v6 = vld [vmem:[%s13507_s1 + $0x12ec] ss:$16 sps:$4 sm:$0xff]  }
 0x2d8   :  { %6949 = vmatpush1.bf16.msra.mxu0 %v9762_v50  ;;  %6990 = vmatpush1.bf16.msra.mxu1 %v9765_v60  ;;  %v10148_v50 = vld [vmem:[%s13508_s2] sm:$0xf] }
 0x2d9   :  { %6950 = vmatprep.subr.bf16.mxu0 %v9770_v38  ;;  %6991 = vmatprep.subr.bf16.mxu1 %v9773_v13  ;;  %v999_v60 = vrot.slane %v10148_v50, %v998_v29  ;;  %v1003_v38 = vrot.slane %v10148_v50, %v1002_v63  ;;  %v9828_v13 = vld [vmem:[%s13507_s1 + $0x12e8] ss:$16 sps:$4 sm:$0xff]   ;;  %v9878_v63 = vld [vmem:[%s13507_s1 + $0x13ec] ss:$16 sps:$4 sm:$0xff]  }
 0x2da   :  { %v9873_v29 = vld [vmem:[%s13507_s1 + $0x1408] ss:$16 sps:$4 sm:$0xff]   ;;  %v9887_v50 = vld [vmem:[%s13507_s1 + $0x15cc] ss:$16 sps:$4 sm:$0xff]  }
 0x2dc   :  { %6951 = vmatpush1.bf16.msra.mxu0 %v9768_v18  ;;  %6992 = vmatpush1.bf16.msra.mxu1 %v9771_v26  ;;  %v9831_v18 = vld [vmem:[%s13507_s1 + $0x14e8] ss:$16 sps:$4 sm:$0xff]   ;;  %v9836_v26 = vld [vmem:[%s13507_s1 + $0x12cc] ss:$16 sps:$4 sm:$0xff]  }
 0x2dd   :  { %6952 = vmatprep.subr.bf16.mxu0 %v9776_v2  ;;  %6993 = vmatprep.subr.bf16.mxu1 %v9779_v9  ;;  %v9839_v2 = vld [vmem:[%s13507_s1 + $0x14cc] ss:$16 sps:$4 sm:$0xff]   ;;  %v6686_v9 = vadd.f32 %v12599_v3, %v999_v60  ;;  %v9882_v60 = vld [vmem:[%s13507_s1 + $0x13c8] ss:$16 sps:$4 sm:$0xff]  }
 0x2e0   :  { %6953 = vmatpush1.bf16.msra.mxu0 %v9774_v43  ;;  %6994 = vmatpush1.bf16.msra.mxu1 %v9777_v54 }
 0x2e1   :  { %6954 = vmatprep.subr.bf16.mxu0 %v9782_v46  ;;  %6995 = vmatprep.subr.bf16.mxu1 %v9785_v48  ;;  %v6688_v46 = vadd.f32 %v12612_v11, %v1003_v38  ;;  %v9885_v38 = vld [vmem:[%s13507_s1 + $0x15c8] ss:$16 sps:$4 sm:$0xff]  }
 0x2e4   :  { %6955 = vmatpush2.bf16.msra.mxu0 %v9780_v28  ;;  %6996 = vmatpush2.bf16.msra.mxu1 %v9783_v52  ;;  %v9834_v28 = vld [vmem:[%s13507_s1 + $0x12c8] ss:$16 sps:$4 sm:$0xff]  }
 0x2e5   :  { %6956 = vmatprep.subr.bf16.mxu0 %v9788_v0  ;;  %6997 = vmatprep.subr.bf16.mxu1 %v9791_v51  ;;  %v9837_v52 = vld [vmem:[%s13507_s1 + $0x14c8] ss:$16 sps:$4 sm:$0xff]  }
 0x2e8   :  { %6957 = vmatpush2.bf16.msra.mxu0 %v9786_v23  ;;  %6998 = vmatpush2.bf16.msra.mxu1 %v9789_v41 }
 0x2e9   :  { %6958 = vmatprep.subr.bf16.mxu0 %v9794_v17  ;;  %6999 = vmatprep.subr.bf16.mxu1 %v9797_v56  ;;  %v9840_v56 = vld [vmem:[%s13507_s1 + $0x12a8] ss:$16 sps:$4 sm:$0xff]  }
 0x2ec   :  { %6959 = vmatpush2.bf16.msra.mxu0 %v9792_v57  ;;  %7000 = vmatpush2.bf16.msra.mxu1 %v9795_v58  ;;  %v9843_v57 = vld [vmem:[%s13507_s1 + $0x14a8] ss:$16 sps:$4 sm:$0xff]  }
 0x2ed   :  { %6960 = vmatprep.subr.bf16.mxu0 %v9800_v61  ;;  %7001 = vmatprep.subr.bf16.mxu1 %v9803_v62  ;;  %v9846_v62 = vld [vmem:[%s13507_s1 + $0x1288] ss:$16 sps:$4 sm:$0xff]  }
 0x2f0   :  { %6961 = vmatpush2.bf16.msra.mxu0 %v9798_v7  ;;  %7002 = vmatpush2.bf16.msra.mxu1 %v9801_v8  ;;  %v9849_v7 = vld [vmem:[%s13507_s1 + $0x1488] ss:$16 sps:$4 sm:$0xff]   ;;  %v9854_v8 = vld [vmem:[%s13507_s1 + $0x126c] ss:$16 sps:$4 sm:$0xff]  }
 0x2f1   :  { %6962 = vmatprep.subr.bf16.mxu0 %v9806_v10  ;;  %7003 = vmatprep.subr.bf16.mxu1 %v9809_v35  ;;  %v9857_v10 = vld [vmem:[%s13507_s1 + $0x146c] ss:$16 sps:$4 sm:$0xff]   ;;  %v9852_v35 = vld [vmem:[%s13507_s1 + $0x1268] ss:$16 sps:$4 sm:$0xff]  }
 0x2f4   :  { %6963 = vmatpush2.bf16.msra.mxu0 %v9804_v15  ;;  %7004 = vmatpush2.bf16.msra.mxu1 %v9807_v14  ;;  %v9855_v15 = vld [vmem:[%s13507_s1 + $0x1468] ss:$16 sps:$4 sm:$0xff]   ;;  %v9860_v14 = vld [vmem:[%s13507_s1 + $0x124c] ss:$16 sps:$4 sm:$0xff]  }
 0x2f5   :  { %6964 = vmatprep.subr.bf16.mxu0 %v9812_v16  ;;  %7005 = vmatprep.subr.bf16.mxu1 %v9815_v20  ;;  %v9863_v16 = vld [vmem:[%s13507_s1 + $0x144c] ss:$16 sps:$4 sm:$0xff]   ;;  %v9858_v20 = vld [vmem:[%s13507_s1 + $0x1248] ss:$16 sps:$4 sm:$0xff]  }
 0x2f8   :  { %6965 = vmatpush2.bf16.msra.mxu0 %v9810_v21  ;;  %7006 = vmatpush2.bf16.msra.mxu1 %v9813_v27  ;;  %v9861_v21 = vld [vmem:[%s13507_s1 + $0x1448] ss:$16 sps:$4 sm:$0xff]   ;;  %v9866_v27 = vld [vmem:[%s13507_s1 + $0x122c] ss:$16 sps:$4 sm:$0xff]  }
 0x2f9   :  { %6966 = vmatprep.subr.bf16.mxu0 %v9818_v5  ;;  %7007 = vmatprep.subr.bf16.mxu1 %v9821_v59  ;;  %v9869_v5 = vld [vmem:[%s13507_s1 + $0x142c] ss:$16 sps:$4 sm:$0xff]   ;;  %v9864_v59 = vld [vmem:[%s13507_s1 + $0x1228] ss:$16 sps:$4 sm:$0xff]  }
 0x2fc   :  { %6967 = vmatpush2.bf16.msra.mxu0 %v9816_v22  ;;  %7008 = vmatpush2.bf16.msra.mxu1 %v9819_v19  ;;  %v9867_v22 = vld [vmem:[%s13507_s1 + $0x1428] ss:$16 sps:$4 sm:$0xff]   ;;  %v9872_v19 = vld [vmem:[%s13507_s1 + $0x120c] ss:$16 sps:$4 sm:$0xff]  }
 0x2fd   :  { %6968 = vmatprep.subr.bf16.mxu0 %v9824_v49  ;;  %7009 = vmatprep.subr.bf16.mxu1 %v9827_v44  ;;  %v9875_v49 = vld [vmem:[%s13507_s1 + $0x140c] ss:$16 sps:$4 sm:$0xff]   ;;  %v9870_v44 = vld [vmem:[%s13507_s1 + $0x1208] ss:$16 sps:$4 sm:$0xff]  }
 0x300   :  { %6969 = vmatpush2.bf16.msra.mxu0 %v9822_v36  ;;  %7010 = vmatpush2.bf16.msra.mxu1 %v9825_v37  ;;  %v9881_v36 = vld [vmem:[%s13507_s1 + $0x15ec] ss:$16 sps:$4 sm:$0xff]   ;;  %v9876_v37 = vld [vmem:[%s13507_s1 + $0x13e8] ss:$16 sps:$4 sm:$0xff]  }
 0x301   :  { %7020 = vmatprep.subr.bf16.mxu0 %v9830_v6  ;;  %7061 = vmatprep.subr.bf16.mxu1 %v9833_v42  ;;  %v9879_v6 = vld [vmem:[%s13507_s1 + $0x15e8] ss:$16 sps:$4 sm:$0xff]   ;;  %v9884_v42 = vld [vmem:[%s13507_s1 + $0x13cc] ss:$16 sps:$4 sm:$0xff]  }
 0x302   :  { %v6726_v43 = vpop.f32.mrf.mxu0 }
 0x303   :  { %v6767_v54 = vpop.f32.mrf.mxu1  ;;  %6971 = vmatmul.mubr.bf16.vlgmr.msra.gmra.mxu0 %v11099_v39  ;;  %7012 = vmatmul.mubr.bf16.vlgmr.msra.gmra.mxu1 %v11302_v12  ;;  %v6727_v48 = vadd.f32 %v6726_v43, %v6686_v9  ;;  %v9842_v39 = vld [vmem:[%s13507_s1 + $0x12ac] ss:$16 sps:$4 sm:$0xff]  }
 0x304   :  { %7021 = vmatpush1.bf16.msra.mxu0 %v9828_v13  ;;  %7062 = vmatpush1.bf16.msra.mxu1 %v9831_v18  ;;  %v6728_v3 = vpop.f32.mrf.mxu0  ;;  %v9845_v12 = vld [vmem:[%s13507_s1 + $0x14ac] ss:$16 sps:$4 sm:$0xff]  }
 0x305   :  { %v6769_v0 = vpop.f32.mrf.mxu1  ;;  %7022 = vmatprep.subr.bf16.mxu0 %v9836_v26  ;;  %7063 = vmatprep.subr.bf16.mxu1 %v9839_v2  ;;  %v12826_v11 = vadd.f32 %v6767_v54, %v6727_v48  ;;  %v6729_v51 = vadd.f32 %v6728_v3, %v6688_v46  ;;  %v9890_v13 = vld [vmem:[%s13507_s1 + $0x13ac] ss:$16 sps:$4 sm:$0xff]   ;;  %v9888_v26 = vld [vmem:[%s13507_s1 + $0x13a8] ss:$16 sps:$4 sm:$0xff]  }
 0x306   :  { %7052 = vmatprep.mubr.bf16.mxu0 %v11115_v31  ;;  %7093 = vmatprep.mubr.bf16.mxu1 %v11323_v24  ;;  %v6730_v23 = vpop.f32.mrf.mxu0  ;;  %v9848_v31 = vld [vmem:[%s13507_s1 + $0x128c] ss:$16 sps:$4 sm:$0xff]   ;;  %v9891_v2 = vld [vmem:[%s13507_s1 + $0x15a8] ss:$16 sps:$4 sm:$0xff]  }
 0x307   :  { %v6771_v41 = vpop.f32.mrf.mxu1  ;;  %v12830_v17 = vadd.f32 %v6769_v0, %v6729_v51  ;;  %v9851_v24 = vld [vmem:[%s13507_s1 + $0x148c] ss:$16 sps:$4 sm:$0xff]   ;;  %v9894_v54 = vld [vmem:[%s13507_s1 + $0x1388] ss:$16 sps:$4 sm:$0xff]  }
 0x308   :  { %7023 = vmatpush1.bf16.msra.mxu0 %v9834_v28  ;;  %7064 = vmatpush1.bf16.msra.mxu1 %v9837_v52  ;;  %v6731_v58 = vpop.f32.mrf.mxu0  ;;  %v9893_v18 = vld [vmem:[%s13507_s1 + $0x15ac] ss:$16 sps:$4 sm:$0xff]   ;;  %v9897_v46 = vld [vmem:[%s13507_s1 + $0x1588] ss:$16 sps:$4 sm:$0xff]  }
 0x309   :  { %v6772_v61 = vpop.f32.mrf.mxu1  ;;  %7024 = vmatprep.subr.bf16.mxu0 %v9842_v39  ;;  %7065 = vmatprep.subr.bf16.mxu1 %v9845_v12  ;;  %v9896_v9 = vld [vmem:[%s13507_s1 + $0x138c] ss:$16 sps:$4 sm:$0xff]   ;;  %v9900_v52 = vld [vmem:[%s13507_s1 + $0x1368] ss:$16 sps:$4 sm:$0xff]  }
 0x30a   :  { %v9899_v43 = vld [vmem:[%s13507_s1 + $0x158c] ss:$16 sps:$4 sm:$0xff]   ;;  %v9903_v3 = vld [vmem:[%s13507_s1 + $0x1568] ss:$16 sps:$4 sm:$0xff]  }
 0x30b   :  { %v9902_v48 = vld [vmem:[%s13507_s1 + $0x136c] ss:$16 sps:$4 sm:$0xff]   ;;  %v9906_v12 = vld [vmem:[%s13507_s1 + $0x1348] ss:$16 sps:$4 sm:$0xff]  }
 0x30c   :  { %7025 = vmatpush1.bf16.msra.mxu0 %v9840_v56  ;;  %7066 = vmatpush1.bf16.msra.mxu1 %v9843_v57  ;;  %v9905_v28 = vld [vmem:[%s13507_s1 + $0x156c] ss:$16 sps:$4 sm:$0xff]   ;;  %v9909_v51 = vld [vmem:[%s13507_s1 + $0x1548] ss:$16 sps:$4 sm:$0xff]  }
 0x30d   :  { %7026 = vmatprep.subr.bf16.mxu0 %v9848_v31  ;;  %7067 = vmatprep.subr.bf16.mxu1 %v9851_v24  ;;  %v9908_v0 = vld [vmem:[%s13507_s1 + $0x134c] ss:$16 sps:$4 sm:$0xff]   ;;  %v9912_v56 = vld [vmem:[%s13507_s1 + $0x1328] ss:$16 sps:$4 sm:$0xff]  }
 0x30e   :  { %v9911_v39 = vld [vmem:[%s13507_s1 + $0x154c] ss:$16 sps:$4 sm:$0xff]   ;;  %v9915_v57 = vld [vmem:[%s13507_s1 + $0x1528] ss:$16 sps:$4 sm:$0xff]  }
 0x30f   :  { %v9914_v23 = vld [vmem:[%s13507_s1 + $0x132c] ss:$16 sps:$4 sm:$0xff]   ;;  %v9918_v31 = vld [vmem:[%s13507_s1 + $0x1308] ss:$16 sps:$4 sm:$0xff]  }
 0x310   :  { %7027 = vmatpush1.bf16.msra.mxu0 %v9846_v62  ;;  %7068 = vmatpush1.bf16.msra.mxu1 %v9849_v7  ;;  %v9917_v41 = vld [vmem:[%s13507_s1 + $0x152c] ss:$16 sps:$4 sm:$0xff]   ;;  %v9921_v24 = vld [vmem:[%s13507_s1 + $0x1508] ss:$16 sps:$4 sm:$0xff]  }
 0x311   :  { %7028 = vmatprep.subr.bf16.mxu0 %v9854_v8  ;;  %7069 = vmatprep.subr.bf16.mxu1 %v9857_v10  ;;  %v9920_v58 = vld [vmem:[%s13507_s1 + $0x130c] ss:$16 sps:$4 sm:$0xff]   ;;  %v9924_v8 = vld [vmem:[%s13507_s1 + $0x16e8] ss:$16 sps:$4 sm:$0xff]  }
 0x312   :  { %v9923_v61 = vld [vmem:[%s13507_s1 + $0x150c] ss:$16 sps:$4 sm:$0xff]   ;;  %v9927_v10 = vld [vmem:[%s13507_s1 + $0x18e8] ss:$16 sps:$4 sm:$0xff]  }
 0x313   :  { %v9926_v62 = vld [vmem:[%s13507_s1 + $0x16ec] ss:$16 sps:$4 sm:$0xff]  }
 0x314   :  { %7029 = vmatpush1.bf16.msra.mxu0 %v9852_v35  ;;  %7070 = vmatpush1.bf16.msra.mxu1 %v9855_v15  ;;  %v9929_v7 = vld [vmem:[%s13507_s1 + $0x18ec] ss:$16 sps:$4 sm:$0xff]  }
 0x315   :  { %7030 = vmatprep.subr.bf16.mxu0 %v9860_v14  ;;  %7071 = vmatprep.subr.bf16.mxu1 %v9863_v16  ;;  %v9932_v35 = vld [vmem:[%s13507_s1 + $0x16cc] ss:$16 sps:$4 sm:$0xff]  }
 0x316   :  { %v9935_v15 = vld [vmem:[%s13507_s1 + $0x18cc] ss:$16 sps:$4 sm:$0xff]  }
 0x318   :  { %7031 = vmatpush1.bf16.msra.mxu0 %v9858_v20  ;;  %7072 = vmatpush1.bf16.msra.mxu1 %v9861_v21  ;;  %v9930_v21 = vld [vmem:[%s13507_s1 + $0x16c8] ss:$16 sps:$4 sm:$0xff]  }
 0x319   :  { %7032 = vmatprep.subr.bf16.mxu0 %v9866_v27  ;;  %7073 = vmatprep.subr.bf16.mxu1 %v9869_v5  ;;  %v9933_v27 = vld [vmem:[%s13507_s1 + $0x18c8] ss:$16 sps:$4 sm:$0xff]  }
 0x31c   :  { %7033 = vmatpush1.bf16.msra.mxu0 %v9864_v59  ;;  %7074 = vmatpush1.bf16.msra.mxu1 %v9867_v22 }
 0x31d   :  { %7034 = vmatprep.subr.bf16.mxu0 %v9872_v19  ;;  %7075 = vmatprep.subr.bf16.mxu1 %v9875_v49 }
 0x320   :  { %7035 = vmatpush1.bf16.msra.mxu0 %v9870_v44  ;;  %7076 = vmatpush1.bf16.msra.mxu1 %v9873_v29  ;;  %v9936_v29 = vld [vmem:[%s13507_s1 + $0x16a8] ss:$16 sps:$4 sm:$0xff]  }
 0x321   :  { %7036 = vmatprep.subr.bf16.mxu0 %v9878_v63  ;;  %7077 = vmatprep.subr.bf16.mxu1 %v9881_v36  ;;  %v9939_v63 = vld [vmem:[%s13507_s1 + $0x18a8] ss:$16 sps:$4 sm:$0xff]  }
 0x324   :  { %7037 = vmatpush2.bf16.msra.mxu0 %v9876_v37  ;;  %7078 = vmatpush2.bf16.msra.mxu1 %v9879_v6  ;;  %v9942_v37 = vld [vmem:[%s13507_s1 + $0x1688] ss:$16 sps:$4 sm:$0xff]  }
 0x325   :  { %7038 = vmatprep.subr.bf16.mxu0 %v9884_v42  ;;  %7079 = vmatprep.subr.bf16.mxu1 %v9887_v50  ;;  %v9945_v6 = vld [vmem:[%s13507_s1 + $0x1888] ss:$16 sps:$4 sm:$0xff]   ;;  %v9950_v42 = vld [vmem:[%s13507_s1 + $0x166c] ss:$16 sps:$4 sm:$0xff]  }
 0x326   :  { %v9953_v50 = vld [vmem:[%s13507_s1 + $0x186c] ss:$16 sps:$4 sm:$0xff]  }
 0x328   :  { %7039 = vmatpush2.bf16.msra.mxu0 %v9882_v60  ;;  %7080 = vmatpush2.bf16.msra.mxu1 %v9885_v38  ;;  %v9948_v60 = vld [vmem:[%s13507_s1 + $0x1668] ss:$16 sps:$4 sm:$0xff]  }
 0x329   :  { %7040 = vmatprep.subr.bf16.mxu0 %v9890_v13  ;;  %7081 = vmatprep.subr.bf16.mxu1 %v9893_v18  ;;  %v9951_v38 = vld [vmem:[%s13507_s1 + $0x1868] ss:$16 sps:$4 sm:$0xff]   ;;  %v9956_v13 = vld [vmem:[%s13507_s1 + $0x164c] ss:$16 sps:$4 sm:$0xff]  }
 0x32a   :  { %v9959_v18 = vld [vmem:[%s13507_s1 + $0x184c] ss:$16 sps:$4 sm:$0xff]  }
 0x32c   :  { %7041 = vmatpush2.bf16.msra.mxu0 %v9888_v26  ;;  %7082 = vmatpush2.bf16.msra.mxu1 %v9891_v2  ;;  %v9954_v26 = vld [vmem:[%s13507_s1 + $0x1648] ss:$16 sps:$4 sm:$0xff]  }
 0x32d   :  { %7042 = vmatprep.subr.bf16.mxu0 %v9896_v9  ;;  %7083 = vmatprep.subr.bf16.mxu1 %v9899_v43  ;;  %v9957_v2 = vld [vmem:[%s13507_s1 + $0x1848] ss:$16 sps:$4 sm:$0xff]   ;;  %v9962_v9 = vld [vmem:[%s13507_s1 + $0x162c] ss:$16 sps:$4 sm:$0xff]  }
 0x32e   :  { %v9965_v43 = vld [vmem:[%s13507_s1 + $0x182c] ss:$16 sps:$4 sm:$0xff]  }
 0x330   :  { %7043 = vmatpush2.bf16.msra.mxu0 %v9894_v54  ;;  %7084 = vmatpush2.bf16.msra.mxu1 %v9897_v46  ;;  %v9960_v54 = vld [vmem:[%s13507_s1 + $0x1628] ss:$16 sps:$4 sm:$0xff]  }
 0x331   :  { %7044 = vmatprep.subr.bf16.mxu0 %v9902_v48  ;;  %7085 = vmatprep.subr.bf16.mxu1 %v9905_v28  ;;  %v9963_v46 = vld [vmem:[%s13507_s1 + $0x1828] ss:$16 sps:$4 sm:$0xff]   ;;  %v9968_v48 = vld [vmem:[%s13507_s1 + $0x160c] ss:$16 sps:$4 sm:$0xff]  }
 0x332   :  { %v9971_v28 = vld [vmem:[%s13507_s1 + $0x180c] ss:$16 sps:$4 sm:$0xff]  }
 0x334   :  { %7045 = vmatpush2.bf16.msra.mxu0 %v9900_v52  ;;  %7086 = vmatpush2.bf16.msra.mxu1 %v9903_v3  ;;  %v9966_v52 = vld [vmem:[%s13507_s1 + $0x1608] ss:$16 sps:$4 sm:$0xff]  }
 0x335   :  { %7046 = vmatprep.subr.bf16.mxu0 %v9908_v0  ;;  %7087 = vmatprep.subr.bf16.mxu1 %v9911_v39  ;;  %v9969_v3 = vld [vmem:[%s13507_s1 + $0x1808] ss:$16 sps:$4 sm:$0xff]   ;;  %v9974_v0 = vld [vmem:[%s13507_s1 + $0x17ec] ss:$16 sps:$4 sm:$0xff]  }
 0x336   :  { %v9977_v39 = vld [vmem:[%s13507_s1 + $0x19ec] ss:$16 sps:$4 sm:$0xff]  }
 0x338   :  { %7047 = vmatpush2.bf16.msra.mxu0 %v9906_v12  ;;  %7088 = vmatpush2.bf16.msra.mxu1 %v9909_v51  ;;  %v9972_v12 = vld [vmem:[%s13507_s1 + $0x17e8] ss:$16 sps:$4 sm:$0xff]  }
 0x339   :  { %7048 = vmatprep.subr.bf16.mxu0 %v9914_v23  ;;  %7089 = vmatprep.subr.bf16.mxu1 %v9917_v41  ;;  %v9975_v51 = vld [vmem:[%s13507_s1 + $0x19e8] ss:$16 sps:$4 sm:$0xff]   ;;  %v9980_v23 = vld [vmem:[%s13507_s1 + $0x17cc] ss:$16 sps:$4 sm:$0xff]  }
 0x33a   :  { %v9983_v41 = vld [vmem:[%s13507_s1 + $0x19cc] ss:$16 sps:$4 sm:$0xff]  }
 0x33c   :  { %7049 = vmatpush2.bf16.msra.mxu0 %v9912_v56  ;;  %7090 = vmatpush2.bf16.msra.mxu1 %v9915_v57  ;;  %v9978_v56 = vld [vmem:[%s13507_s1 + $0x17c8] ss:$16 sps:$4 sm:$0xff]  }
 0x33d   :  { %7050 = vmatprep.subr.bf16.mxu0 %v9920_v58  ;;  %7091 = vmatprep.subr.bf16.mxu1 %v9923_v61  ;;  %v9981_v57 = vld [vmem:[%s13507_s1 + $0x19c8] ss:$16 sps:$4 sm:$0xff]   ;;  %v9986_v58 = vld [vmem:[%s13507_s1 + $0x17ac] ss:$16 sps:$4 sm:$0xff]  }
 0x33e   :  { %v9989_v61 = vld [vmem:[%s13507_s1 + $0x19ac] ss:$16 sps:$4 sm:$0xff]  }
 0x340   :  { %7051 = vmatpush2.bf16.msra.mxu0 %v9918_v31  ;;  %7092 = vmatpush2.bf16.msra.mxu1 %v9921_v24  ;;  %v9984_v31 = vld [vmem:[%s13507_s1 + $0x17a8] ss:$16 sps:$4 sm:$0xff]  }
 0x341   :  { %7102 = vmatprep.subr.bf16.mxu0 %v9926_v62  ;;  %7143 = vmatprep.subr.bf16.mxu1 %v9929_v7  ;;  %v9987_v24 = vld [vmem:[%s13507_s1 + $0x19a8] ss:$16 sps:$4 sm:$0xff]   ;;  %v9992_v62 = vld [vmem:[%s13507_s1 + $0x178c] ss:$16 sps:$4 sm:$0xff]  }
 0x342   :  { %v9995_v7 = vld [vmem:[%s13507_s1 + $0x198c] ss:$16 sps:$4 sm:$0xff]  }
 0x343   :  { %v6808_v14 = vpop.f32.mrf.mxu0  ;;  %v6849_v16 = vpop.f32.mrf.mxu1  ;;  %7053 = vmatmul.mubr.bf16.vlgmr.msra.gmra.mxu0 %v11327_v25  ;;  %7094 = vmatmul.mubr.bf16.vlgmr.msra.gmra.mxu1 %v11530_v4  ;;  %v9938_v25 = vld [vmem:[%s13507_s1 + $0x16ac] ss:$16 sps:$4 sm:$0xff]  }
 0x344   :  { %v6809_v20 = vadd.f32 %v6808_v14, %v12826_v11  ;;  %7103 = vmatpush1.bf16.msra.mxu0 %v9924_v8  ;;  %7144 = vmatpush1.bf16.msra.mxu1 %v9927_v10  ;;  %v9941_v4 = vld [vmem:[%s13507_s1 + $0x18ac] ss:$16 sps:$4 sm:$0xff]   ;;  %v9990_v8 = vld [vmem:[%s13507_s1 + $0x1788] ss:$16 sps:$4 sm:$0xff]  }
 0x345   :  { %v6810_v5 = vpop.f32.mrf.mxu0  ;;  %v6851_v59 = vpop.f32.mrf.mxu1  ;;  %7104 = vmatprep.subr.bf16.mxu0 %v9932_v35  ;;  %7145 = vmatprep.subr.bf16.mxu1 %v9935_v15  ;;  %v9993_v10 = vld [vmem:[%s13507_s1 + $0x1988] ss:$16 sps:$4 sm:$0xff]   ;;  %v9998_v35 = vld [vmem:[%s13507_s1 + $0x176c] ss:$16 sps:$4 sm:$0xff]  }
 0x346   :  { %v13027_v11 = vadd.f32 %v6849_v16, %v6809_v20  ;;  %v6811_v22 = vadd.f32 %v6810_v5, %v12830_v17  ;;  %7134 = vmatprep.mubr.bf16.mxu0 %v11343_v33  ;;  %7175 = vmatprep.mubr.bf16.mxu1 %v11551_v30  ;;  %v9944_v33 = vld [vmem:[%s13507_s1 + $0x168c] ss:$16 sps:$4 sm:$0xff]   ;;  %v9996_v14 = vld [vmem:[%s13507_s1 + $0x1768] ss:$16 sps:$4 sm:$0xff]  }
 0x347   :  { %v6812_v19 = vpop.f32.mrf.mxu0  ;;  %v6853_v49 = vpop.f32.mrf.mxu1  ;;  %v9947_v30 = vld [vmem:[%s13507_s1 + $0x188c] ss:$16 sps:$4 sm:$0xff]   ;;  %v9999_v16 = vld [vmem:[%s13507_s1 + $0x1968] ss:$16 sps:$4 sm:$0xff]  }
 0x348   :  { %v13032_v44 = vadd.f32 %v6851_v59, %v6811_v22  ;;  %7105 = vmatpush1.bf16.msra.mxu0 %v9930_v21  ;;  %7146 = vmatpush1.bf16.msra.mxu1 %v9933_v27  ;;  %v10001_v15 = vld [vmem:[%s13507_s1 + $0x196c] ss:$16 sps:$4 sm:$0xff]   ;;  %v10002_v27 = vld [vmem:[%s13507_s1 + $0x1748] ss:$16 sps:$4 sm:$0xff]  }
 0x349   :  { %v6813_v36 = vpop.f32.mrf.mxu0  ;;  %v6854_v17 = vpop.f32.mrf.mxu1  ;;  %7106 = vmatprep.subr.bf16.mxu0 %v9938_v25  ;;  %7147 = vmatprep.subr.bf16.mxu1 %v9941_v4  ;;  %v10004_v20 = vld [vmem:[%s13507_s1 + $0x174c] ss:$16 sps:$4 sm:$0xff]   ;;  %v10005_v5 = vld [vmem:[%s13507_s1 + $0x1948] ss:$16 sps:$4 sm:$0xff]  }
 0x34a   :  { %v10007_v21 = vld [vmem:[%s13507_s1 + $0x194c] ss:$16 sps:$4 sm:$0xff]   ;;  %v10008_v4 = vld [vmem:[%s13507_s1 + $0x1728] ss:$16 sps:$4 sm:$0xff]  }
 0x34b   :  { %v10010_v59 = vld [vmem:[%s13507_s1 + $0x172c] ss:$16 sps:$4 sm:$0xff]   ;;  %v10011_v22 = vld [vmem:[%s13507_s1 + $0x1928] ss:$16 sps:$4 sm:$0xff]  }
 0x34c   :  { %7107 = vmatpush1.bf16.msra.mxu0 %v9936_v29  ;;  %7148 = vmatpush1.bf16.msra.mxu1 %v9939_v63  ;;  %v10013_v25 = vld [vmem:[%s13507_s1 + $0x192c] ss:$16 sps:$4 sm:$0xff]   ;;  %v10014_v29 = vld [vmem:[%s13507_s1 + $0x1708] ss:$16 sps:$4 sm:$0xff]  }
 0x34d   :  { %7108 = vmatprep.subr.bf16.mxu0 %v9944_v33  ;;  %7149 = vmatprep.subr.bf16.mxu1 %v9947_v30  ;;  %v10016_v19 = vld [vmem:[%s13507_s1 + $0x170c] ss:$16 sps:$4 sm:$0xff]   ;;  %v10017_v63 = vld [vmem:[%s13507_s1 + $0x1908] ss:$16 sps:$4 sm:$0xff]  }
 0x34e   :  { %v10019_v49 = vld [vmem:[%s13507_s1 + $0x190c] ss:$16 sps:$4 sm:$0xff]   ;;  %v10020_v33 = vld [vmem:[%s13507_s1 + $0x1ae8] ss:$16 sps:$4 sm:$0xff]  }
 0x34f   :  { %v10022_v36 = vld [vmem:[%s13507_s1 + $0x1aec] ss:$16 sps:$4 sm:$0xff]   ;;  %v10023_v30 = vld [vmem:[%s13507_s1 + $0x1ce8] ss:$16 sps:$4 sm:$0xff]  }
 0x350   :  { %7109 = vmatpush1.bf16.msra.mxu0 %v9942_v37  ;;  %7150 = vmatpush1.bf16.msra.mxu1 %v9945_v6  ;;  %v10025_v17 = vld [vmem:[%s13507_s1 + $0x1cec] ss:$16 sps:$4 sm:$0xff]  }
 0x351   :  { %7110 = vmatprep.subr.bf16.mxu0 %v9950_v42  ;;  %7151 = vmatprep.subr.bf16.mxu1 %v9953_v50  ;;  %v10028_v37 = vld [vmem:[%s13507_s1 + $0x1acc] ss:$16 sps:$4 sm:$0xff]  }
 0x352   :  { %v10031_v6 = vld [vmem:[%s13507_s1 + $0x1ccc] ss:$16 sps:$4 sm:$0xff]  }
 0x354   :  { %7111 = vmatpush1.bf16.msra.mxu0 %v9948_v60  ;;  %7152 = vmatpush1.bf16.msra.mxu1 %v9951_v38  ;;  %v10026_v38 = vld [vmem:[%s13507_s1 + $0x1ac8] ss:$16 sps:$4 sm:$0xff]  }
 0x355   :  { %7112 = vmatprep.subr.bf16.mxu0 %v9956_v13  ;;  %7153 = vmatprep.subr.bf16.mxu1 %v9959_v18  ;;  %v10029_v13 = vld [vmem:[%s13507_s1 + $0x1cc8] ss:$16 sps:$4 sm:$0xff]  }
 0x358   :  { %7113 = vmatpush1.bf16.msra.mxu0 %v9954_v26  ;;  %7154 = vmatpush1.bf16.msra.mxu1 %v9957_v2 }
 0x359   :  { %7114 = vmatprep.subr.bf16.mxu0 %v9962_v9  ;;  %7155 = vmatprep.subr.bf16.mxu1 %v9965_v43 }
 0x35c   :  { %7115 = vmatpush1.bf16.msra.mxu0 %v9960_v54  ;;  %7156 = vmatpush1.bf16.msra.mxu1 %v9963_v46  ;;  %v10032_v46 = vld [vmem:[%s13507_s1 + $0x1aa8] ss:$16 sps:$4 sm:$0xff]  }
 0x35d   :  { %7116 = vmatprep.subr.bf16.mxu0 %v9968_v48  ;;  %7157 = vmatprep.subr.bf16.mxu1 %v9971_v28  ;;  %v10035_v48 = vld [vmem:[%s13507_s1 + $0x1ca8] ss:$16 sps:$4 sm:$0xff]  }
 0x360   :  { %7117 = vmatpush1.bf16.msra.mxu0 %v9966_v52  ;;  %7158 = vmatpush1.bf16.msra.mxu1 %v9969_v3  ;;  %v10038_v52 = vld [vmem:[%s13507_s1 + $0x1a88] ss:$16 sps:$4 sm:$0xff]  }
 0x361   :  { %7118 = vmatprep.subr.bf16.mxu0 %v9974_v0  ;;  %7159 = vmatprep.subr.bf16.mxu1 %v9977_v39  ;;  %v10041_v3 = vld [vmem:[%s13507_s1 + $0x1c88] ss:$16 sps:$4 sm:$0xff]   ;;  %v10046_v0 = vld [vmem:[%s13507_s1 + $0x1a6c] ss:$16 sps:$4 sm:$0xff]  }
 0x362   :  { %v10049_v39 = vld [vmem:[%s13507_s1 + $0x1c6c] ss:$16 sps:$4 sm:$0xff]  }
 0x364   :  { %7119 = vmatpush2.bf16.msra.mxu0 %v9972_v12  ;;  %7160 = vmatpush2.bf16.msra.mxu1 %v9975_v51  ;;  %v10044_v12 = vld [vmem:[%s13507_s1 + $0x1a68] ss:$16 sps:$4 sm:$0xff]  }
 0x365   :  { %7120 = vmatprep.subr.bf16.mxu0 %v9980_v23  ;;  %7161 = vmatprep.subr.bf16.mxu1 %v9983_v41  ;;  %v10047_v51 = vld [vmem:[%s13507_s1 + $0x1c68] ss:$16 sps:$4 sm:$0xff]   ;;  %v10052_v23 = vld [vmem:[%s13507_s1 + $0x1a4c] ss:$16 sps:$4 sm:$0xff]  }
 0x366   :  { %v10055_v41 = vld [vmem:[%s13507_s1 + $0x1c4c] ss:$16 sps:$4 sm:$0xff]  }
 0x368   :  { %7121 = vmatpush2.bf16.msra.mxu0 %v9978_v56  ;;  %7162 = vmatpush2.bf16.msra.mxu1 %v9981_v57  ;;  %v10050_v56 = vld [vmem:[%s13507_s1 + $0x1a48] ss:$16 sps:$4 sm:$0xff]  }
 0x369   :  { %7122 = vmatprep.subr.bf16.mxu0 %v9986_v58  ;;  %7163 = vmatprep.subr.bf16.mxu1 %v9989_v61  ;;  %v10053_v57 = vld [vmem:[%s13507_s1 + $0x1c48] ss:$16 sps:$4 sm:$0xff]   ;;  %v10058_v58 = vld [vmem:[%s13507_s1 + $0x1a2c] ss:$16 sps:$4 sm:$0xff]  }
 0x36a   :  { %v10061_v61 = vld [vmem:[%s13507_s1 + $0x1c2c] ss:$16 sps:$4 sm:$0xff]  }
 0x36c   :  { %7123 = vmatpush2.bf16.msra.mxu0 %v9984_v31  ;;  %7164 = vmatpush2.bf16.msra.mxu1 %v9987_v24  ;;  %v10056_v31 = vld [vmem:[%s13507_s1 + $0x1a28] ss:$16 sps:$4 sm:$0xff]  }
 0x36d   :  { %7124 = vmatprep.subr.bf16.mxu0 %v9992_v62  ;;  %7165 = vmatprep.subr.bf16.mxu1 %v9995_v7  ;;  %v10059_v24 = vld [vmem:[%s13507_s1 + $0x1c28] ss:$16 sps:$4 sm:$0xff]   ;;  %v10064_v62 = vld [vmem:[%s13507_s1 + $0x1a0c] ss:$16 sps:$4 sm:$0xff]  }
 0x36e   :  { %v10067_v7 = vld [vmem:[%s13507_s1 + $0x1c0c] ss:$16 sps:$4 sm:$0xff]  }
 0x370   :  { %7125 = vmatpush2.bf16.msra.mxu0 %v9990_v8  ;;  %7166 = vmatpush2.bf16.msra.mxu1 %v9993_v10  ;;  %v10062_v8 = vld [vmem:[%s13507_s1 + $0x1a08] ss:$16 sps:$4 sm:$0xff]  }
 0x371   :  { %7126 = vmatprep.subr.bf16.mxu0 %v9998_v35  ;;  %7167 = vmatprep.subr.bf16.mxu1 %v10001_v15  ;;  %v10065_v10 = vld [vmem:[%s13507_s1 + $0x1c08] ss:$16 sps:$4 sm:$0xff]   ;;  %v10070_v35 = vld [vmem:[%s13507_s1 + $0x1bec] ss:$16 sps:$4 sm:$0xff]  }
 0x372   :  { %v10073_v15 = vld [vmem:[%s13507_s1 + $0x1dec] ss:$16 sps:$4 sm:$0xff]  }
 0x374   :  { %7127 = vmatpush2.bf16.msra.mxu0 %v9996_v14  ;;  %7168 = vmatpush2.bf16.msra.mxu1 %v9999_v16  ;;  %v10068_v14 = vld [vmem:[%s13507_s1 + $0x1be8] ss:$16 sps:$4 sm:$0xff]  }
 0x375   :  { %7128 = vmatprep.subr.bf16.mxu0 %v10004_v20  ;;  %7169 = vmatprep.subr.bf16.mxu1 %v10007_v21  ;;  %v10071_v16 = vld [vmem:[%s13507_s1 + $0x1de8] ss:$16 sps:$4 sm:$0xff]   ;;  %v10076_v20 = vld [vmem:[%s13507_s1 + $0x1bcc] ss:$16 sps:$4 sm:$0xff]  }
 0x376   :  { %v10079_v21 = vld [vmem:[%s13507_s1 + $0x1dcc] ss:$16 sps:$4 sm:$0xff]  }
 0x378   :  { %7129 = vmatpush2.bf16.msra.mxu0 %v10002_v27  ;;  %7170 = vmatpush2.bf16.msra.mxu1 %v10005_v5  ;;  %v10074_v27 = vld [vmem:[%s13507_s1 + $0x1bc8] ss:$16 sps:$4 sm:$0xff]  }
 0x379   :  { %7130 = vmatprep.subr.bf16.mxu0 %v10010_v59  ;;  %7171 = vmatprep.subr.bf16.mxu1 %v10013_v25  ;;  %v10077_v5 = vld [vmem:[%s13507_s1 + $0x1dc8] ss:$16 sps:$4 sm:$0xff]   ;;  %v10082_v59 = vld [vmem:[%s13507_s1 + $0x1bac] ss:$16 sps:$4 sm:$0xff]  }
 0x37a   :  { %v10085_v25 = vld [vmem:[%s13507_s1 + $0x1dac] ss:$16 sps:$4 sm:$0xff]  }
 0x37c   :  { %7131 = vmatpush2.bf16.msra.mxu0 %v10008_v4  ;;  %7172 = vmatpush2.bf16.msra.mxu1 %v10011_v22  ;;  %v10080_v4 = vld [vmem:[%s13507_s1 + $0x1ba8] ss:$16 sps:$4 sm:$0xff]  }
 0x37d   :  { %7132 = vmatprep.subr.bf16.mxu0 %v10016_v19  ;;  %7173 = vmatprep.subr.bf16.mxu1 %v10019_v49  ;;  %v10083_v22 = vld [vmem:[%s13507_s1 + $0x1da8] ss:$16 sps:$4 sm:$0xff]   ;;  %v10088_v19 = vld [vmem:[%s13507_s1 + $0x1b8c] ss:$16 sps:$4 sm:$0xff]  }
 0x37e   :  { %v10091_v49 = vld [vmem:[%s13507_s1 + $0x1d8c] ss:$16 sps:$4 sm:$0xff]  }
 0x380   :  { %7133 = vmatpush2.bf16.msra.mxu0 %v10014_v29  ;;  %7174 = vmatpush2.bf16.msra.mxu1 %v10017_v63  ;;  %v10086_v29 = vld [vmem:[%s13507_s1 + $0x1b88] ss:$16 sps:$4 sm:$0xff]  }
 0x381   :  { %7184 = vmatprep.subr.bf16.mxu0 %v10022_v36  ;;  %7225 = vmatprep.subr.bf16.mxu1 %v10025_v17  ;;  %v10089_v63 = vld [vmem:[%s13507_s1 + $0x1d88] ss:$16 sps:$4 sm:$0xff]   ;;  %v10094_v36 = vld [vmem:[%s13507_s1 + $0x1b6c] ss:$16 sps:$4 sm:$0xff]  }
 0x382   :  { %v10097_v17 = vld [vmem:[%s13507_s1 + $0x1d6c] ss:$16 sps:$4 sm:$0xff]  }
 0x383   :  { %v6890_v42 = vpop.f32.mrf.mxu0  ;;  %v6931_v50 = vpop.f32.mrf.mxu1  ;;  %7135 = vmatmul.mubr.bf16.vlgmr.msra.gmra.mxu0 %v11555_v34  ;;  %7176 = vmatmul.mubr.bf16.vlgmr.msra.gmra.mxu1 %v11752_v47  ;;  %v10034_v34 = vld [vmem:[%s13507_s1 + $0x1aac] ss:$16 sps:$4 sm:$0xff]  }
 0x384   :  { %v6891_v60 = vadd.f32 %v6890_v42, %v13027_v11  ;;  %7185 = vmatpush1.bf16.msra.mxu0 %v10020_v33  ;;  %7226 = vmatpush1.bf16.msra.mxu1 %v10023_v30  ;;  %v10037_v47 = vld [vmem:[%s13507_s1 + $0x1cac] ss:$16 sps:$4 sm:$0xff]   ;;  %v10092_v33 = vld [vmem:[%s13507_s1 + $0x1b68] ss:$16 sps:$4 sm:$0xff]  }
 0x385   :  { %v6892_v18 = vpop.f32.mrf.mxu0  ;;  %v6933_v26 = vpop.f32.mrf.mxu1  ;;  %7186 = vmatprep.subr.bf16.mxu0 %v10028_v37  ;;  %7227 = vmatprep.subr.bf16.mxu1 %v10031_v6  ;;  %v10095_v30 = vld [vmem:[%s13507_s1 + $0x1d68] ss:$16 sps:$4 sm:$0xff]   ;;  %v10100_v37 = vld [vmem:[%s13507_s1 + $0x1b4c] ss:$16 sps:$4 sm:$0xff]  }
 0x386   :  { %v13229_v11 = vadd.f32 %v6931_v50, %v6891_v60  ;;  %v6893_v2 = vadd.f32 %v6892_v18, %v13032_v44  ;;  %7216 = vmatprep.mubr.bf16.mxu0 %v11571_v40  ;;  %7257 = vmatprep.mubr.bf16.mxu1 %v11791_v53  ;;  %v10040_v40 = vld [vmem:[%s13507_s1 + $0x1a8c] ss:$16 sps:$4 sm:$0xff]   ;;  %v10098_v42 = vld [vmem:[%s13507_s1 + $0x1b48] ss:$16 sps:$4 sm:$0xff]  }
 0x387   :  { %v6894_v9 = vpop.f32.mrf.mxu0  ;;  %v6935_v43 = vpop.f32.mrf.mxu1  ;;  %v10043_v53 = vld [vmem:[%s13507_s1 + $0x1c8c] ss:$16 sps:$4 sm:$0xff]   ;;  %v10101_v50 = vld [vmem:[%s13507_s1 + $0x1d48] ss:$16 sps:$4 sm:$0xff]  }
 0x388   :  { %v13234_v54 = vadd.f32 %v6933_v26, %v6893_v2  ;;  %7187 = vmatpush1.bf16.msra.mxu0 %v10026_v38  ;;  %7228 = vmatpush1.bf16.msra.mxu1 %v10029_v13  ;;  %v10103_v6 = vld [vmem:[%s13507_s1 + $0x1d4c] ss:$16 sps:$4 sm:$0xff]   ;;  %v10104_v13 = vld [vmem:[%s13507_s1 + $0x1b28] ss:$16 sps:$4 sm:$0xff]   ;;  %v7267_v43 = vmax.f32 %v12621_v32, 0.0 }
 0x389   :  { %v6895_v28 = vpop.f32.mrf.mxu0  ;;  %v6936_v44 = vpop.f32.mrf.mxu1  ;;  %7188 = vmatprep.subr.bf16.mxu0 %v10034_v34  ;;  %7229 = vmatprep.subr.bf16.mxu1 %v10037_v47  ;;  %v10106_v60 = vld [vmem:[%s13507_s1 + $0x1b2c] ss:$16 sps:$4 sm:$0xff]   ;;  %v10107_v18 = vld [vmem:[%s13507_s1 + $0x1d28] ss:$16 sps:$4 sm:$0xff]  }
 0x38a   :  { %v10109_v38 = vld [vmem:[%s13507_s1 + $0x1d2c] ss:$16 sps:$4 sm:$0xff]   ;;  %v10110_v47 = vld [vmem:[%s13507_s1 + $0x1b08] ss:$16 sps:$4 sm:$0xff]   ;;  %v7271_v28 = vpack.c.bf16 %v7267_v43, %v7267_v43 }
 0x38b   :  { %v10112_v26 = vld [vmem:[%s13507_s1 + $0x1b0c] ss:$16 sps:$4 sm:$0xff]   ;;  %v10113_v2 = vld [vmem:[%s13507_s1 + $0x1d08] ss:$16 sps:$4 sm:$0xff]  }
 0x38c   :  { %7189 = vmatpush1.bf16.msra.mxu0 %v10032_v46  ;;  %7230 = vmatpush1.bf16.msra.mxu1 %v10035_v48  ;;  %v10115_v34 = vld [vmem:[%s13507_s1 + $0x1d0c] ss:$16 sps:$4 sm:$0xff]   ;;  %v10118_v48 = vld [vmem:[%s13509_s3 + $0x70] sm:$0xff]  }
 0x38d   :  { %7190 = vmatprep.subr.bf16.mxu0 %v10040_v40  ;;  %7231 = vmatprep.subr.bf16.mxu1 %v10043_v53  ;;  %v10116_v9 = vld [vmem:[%s13509_s3 + $0x78] sm:$0xff]   ;;  %v10119_v53 = vld [vmem:[%s13509_s3 + $0x30] sm:$0xff]  }
 0x38e   :  { %v10117_v46 = vld [vmem:[%s13509_s3 + $0x38] sm:$0xff]  }
 0x390   :  { %7191 = vmatpush1.bf16.msra.mxu0 %v10038_v52  ;;  %7232 = vmatpush1.bf16.msra.mxu1 %v10041_v3 }
 0x391   :  { %7192 = vmatprep.subr.bf16.mxu0 %v10046_v0  ;;  %7233 = vmatprep.subr.bf16.mxu1 %v10049_v39  ;;  %v10120_v0 = vld [vmem:[%s13509_s3 + $0x68] sm:$0xff]  }
 0x394   :  { %7193 = vmatpush1.bf16.msra.mxu0 %v10044_v12  ;;  %7234 = vmatpush1.bf16.msra.mxu1 %v10047_v51 }
 0x395   :  { %7194 = vmatprep.subr.bf16.mxu0 %v10052_v23  ;;  %7235 = vmatprep.subr.bf16.mxu1 %v10055_v41  ;;  %v10122_v23 = vld [vmem:[%s13509_s3 + $0x60] sm:$0xff]  }
 0x398   :  { %7195 = vmatpush1.bf16.msra.mxu0 %v10050_v56  ;;  %7236 = vmatpush1.bf16.msra.mxu1 %v10053_v57  ;;  %v10132_v57 = vld [vmem:[%s13509_s3 + $0xf8] sm:$0xff]  }
 0x399   :  { %7196 = vmatprep.subr.bf16.mxu0 %v10058_v58  ;;  %7237 = vmatprep.subr.bf16.mxu1 %v10061_v61  ;;  %v10134_v58 = vld [vmem:[%s13509_s3 + $0xf0] sm:$0xff]   ;;  %v10123_v61 = vld [vmem:[%s13509_s3 + $0x20] sm:$0xff]  }
 0x39c   :  { %7197 = vmatpush1.bf16.msra.mxu0 %v10056_v31  ;;  %7238 = vmatpush1.bf16.msra.mxu1 %v10059_v24  ;;  %v10135_v31 = vld [vmem:[%s13509_s3 + $0xb0] sm:$0xff]   ;;  %v10124_v24 = vld [vmem:[%s13509_s3 + $0x58] sm:$0xff]  }
 0x39d   :  { %7198 = vmatprep.subr.bf16.mxu0 %v10064_v62  ;;  %7239 = vmatprep.subr.bf16.mxu1 %v10067_v7  ;;  %v10136_v62 = vld [vmem:[%s13509_s3 + $0xe8] sm:$0xff]   ;;  %v10125_v7 = vld [vmem:[%s13509_s3 + $0x18] sm:$0xff]  }
 0x3a0   :  { %7199 = vmatpush1.bf16.msra.mxu0 %v10062_v8  ;;  %7240 = vmatpush1.bf16.msra.mxu1 %v10065_v10  ;;  %v10137_v8 = vld [vmem:[%s13509_s3 + $0xa8] sm:$0xff]   ;;  %v10126_v10 = vld [vmem:[%s13509_s3 + $0x50] sm:$0xff]  }
 0x3a1   :  { %7200 = vmatprep.subr.bf16.mxu0 %v10070_v35  ;;  %7241 = vmatprep.subr.bf16.mxu1 %v10073_v15  ;;  %v10138_v35 = vld [vmem:[%s13509_s3 + $0xe0] sm:$0xff]   ;;  %v10127_v15 = vld [vmem:[%s13509_s3 + $0x10] sm:$0xff]  }
 0x3a4   :  { %7201 = vmatpush2.bf16.msra.mxu0 %v10068_v14  ;;  %7242 = vmatpush2.bf16.msra.mxu1 %v10071_v16  ;;  %v10139_v14 = vld [vmem:[%s13509_s3 + $0xa0] sm:$0xff]   ;;  %v10128_v16 = vld [vmem:[%s13509_s3 + $0x48] sm:$0xff]  }
 0x3a5   :  { %7202 = vmatprep.subr.bf16.mxu0 %v10076_v20  ;;  %7243 = vmatprep.subr.bf16.mxu1 %v10079_v21  ;;  %v10140_v20 = vld [vmem:[%s13509_s3 + $0xd8] sm:$0xff]   ;;  %v10129_v21 = vld [vmem:[%s13509_s3 + $0x8] sm:$0xff]  }
 0x3a8   :  { %7203 = vmatpush2.bf16.msra.mxu0 %v10074_v27  ;;  %7244 = vmatpush2.bf16.msra.mxu1 %v10077_v5  ;;  %v10141_v27 = vld [vmem:[%s13509_s3 + $0x98] sm:$0xff]   ;;  %v10130_v5 = vld [vmem:[%s13509_s3 + $0x40] sm:$0xff]  }
 0x3a9   :  { %7204 = vmatprep.subr.bf16.mxu0 %v10082_v59  ;;  %7245 = vmatprep.subr.bf16.mxu1 %v10085_v25  ;;  %v10131_v59 = vld [vmem:[%s13509_s3] sm:$0xff]   ;;  %v7266_v25 = vmax.f32 %v12604_v1, 0.0  ;;  %v10144_v1 = vld [vmem:[%s13509_s3 + $0xc8] sm:$0xff]  }
 0x3ac   :  { %7205 = vmatpush2.bf16.msra.mxu0 %v10080_v4  ;;  %7246 = vmatpush2.bf16.msra.mxu1 %v10083_v22  ;;  %v7270_v4 = vpack.c.bf16 %v7266_v25, %v7266_v25  ;;  %v10142_v22 = vld [vmem:[%s13509_s3 + $0xd0] sm:$0xff]  }
 0x3ad   :  { %7206 = vmatprep.subr.bf16.mxu0 %v10088_v19  ;;  %7247 = vmatprep.subr.bf16.mxu1 %v10091_v49  ;;  %v10143_v19 = vld [vmem:[%s13509_s3 + $0x90] sm:$0xff]  }
 0x3b0   :  { %7207 = vmatpush2.bf16.msra.mxu0 %v10086_v29  ;;  %7248 = vmatpush2.bf16.msra.mxu1 %v10089_v63 }
 0x3b1   :  { %7208 = vmatprep.subr.bf16.mxu0 %v10094_v36  ;;  %7249 = vmatprep.subr.bf16.mxu1 %v10097_v17 }
 0x3b4   :  { %7209 = vmatpush2.bf16.msra.mxu0 %v10092_v33  ;;  %7250 = vmatpush2.bf16.msra.mxu1 %v10095_v30 }
 0x3b5   :  { %7210 = vmatprep.subr.bf16.mxu0 %v10100_v37  ;;  %7251 = vmatprep.subr.bf16.mxu1 %v10103_v6  ;;  %v10145_v37 = vld [vmem:[%s13509_s3 + $0x88] sm:$0xff]  }
 0x3b8   :  { %7211 = vmatpush2.bf16.msra.mxu0 %v10098_v42  ;;  %7252 = vmatpush2.bf16.msra.mxu1 %v10101_v50 }
 0x3b9   :  { %7212 = vmatprep.subr.bf16.mxu0 %v10106_v60  ;;  %7253 = vmatprep.subr.bf16.mxu1 %v10109_v38 }
 0x3bc   :  { %7213 = vmatpush2.bf16.msra.mxu0 %v10104_v13  ;;  %7254 = vmatpush2.bf16.msra.mxu1 %v10107_v18  ;;  %v10146_v13 = vld [vmem:[%s13509_s3 + $0xc0] sm:$0xff]  }
 0x3bd   :  { %7214 = vmatprep.subr.bf16.mxu0 %v10112_v26  ;;  %7255 = vmatprep.subr.bf16.mxu1 %v10115_v34  ;;  %v10147_v18 = vld [vmem:[%s13509_s3 + $0x80] sm:$0xff]  }
 0x3c0   :  { %7215 = vmatpush2.bf16.msra.mxu0 %v10110_v47  ;;  %7256 = vmatpush2.bf16.msra.mxu1 %v10113_v2 }
 0x3c1   :  { %8626 = vmatprep.subr.bf16.mxu0 %v10116_v9  ;;  %8648 = vmatprep.subr.bf16.mxu1 %v10132_v57 }
 0x3c3   :  { %v6972_v44 = vpop.f32.mrf.mxu0  ;;  %v7013_v40 = vpop.f32.mrf.mxu1  ;;  %7217 = vmatmul.mubr.bf16.vlgmr.msra.gmra.mxu0 %v11776_v45  ;;  %7258 = vmatmul.mubr.bf16.vlgmr.msra.gmra.mxu1 %v11985_v55 }
 0x3c4   :  { %v6973_v32 = vadd.f32 %v6972_v44, %v13229_v11  ;;  %8627 = vmatpush3.bf16.msra.mxu0 %v10117_v46  ;;  %7569 = vmatprep.mubr.bf16.mxu0 %v7271_v28  ;;  %v10121_v11 = vld [vmem:[%s13509_s3 + $0x28] sm:$0xff]  }
 0x3c5   :  { %v6974_v52 = vpop.f32.mrf.mxu0  ;;  %v7015_v3 = vpop.f32.mrf.mxu1  ;;  %8628 = vmatprep.subr.bf16.mxu0 %v10118_v48 }
 0x3c6   :  { %v7014_v39 = vadd.f32 %v7013_v40, %v6973_v32  ;;  %v6975_v45 = vadd.f32 %v6974_v52, %v13234_v54  ;;  %v10133_v54 = vld [vmem:[%s13509_s3 + $0xb8] sm:$0xff]  }
 0x3c7   :  { %v6976_v12 = vpop.f32.mrf.mxu0  ;;  %v7017_v55 = vpop.f32.mrf.mxu1  ;;  %8649 = vmatpush3.bf16.msra.mxu1 %v10133_v54 }
 0x3c8   :  { %v7016_v51 = vadd.f32 %v7015_v3, %v6975_v45  ;;  %8629 = vmatpush3.bf16.msra.mxu0 %v10119_v53  ;;  %8650 = vmatprep.subr.bf16.mxu1 %v10134_v58 }
 0x3c9   :  { %v6977_v41 = vpop.f32.mrf.mxu0  ;;  %v7018_v56 = vpop.f32.mrf.mxu1  ;;  %8630 = vmatprep.subr.bf16.mxu0 %v10120_v0 }
 0x3cb   :  { %8651 = vmatpush3.bf16.msra.mxu1 %v10135_v31 }
 0x3cc   :  { %8631 = vmatpush3.bf16.msra.mxu0 %v10121_v11  ;;  %8652 = vmatprep.subr.bf16.mxu1 %v10136_v62 }
 0x3cd   :  { %8632 = vmatprep.subr.bf16.mxu0 %v10122_v23 }
 0x3cf   :  { %8653 = vmatpush3.bf16.msra.mxu1 %v10137_v8  ;;  %v8593_v8 = vld [vmem:[%s13510_s4] ss:$0 sm:$0xff] }
 0x3d0   :  { %8633 = vmatpush3.bf16.msra.mxu0 %v10123_v61  ;;  %8654 = vmatprep.subr.bf16.mxu1 %v10138_v35 }
 0x3d1   :  { %8634 = vmatprep.subr.bf16.mxu0 %v10124_v24 }
 0x3d3   :  { %8655 = vmatpush3.bf16.msra.mxu1 %v10139_v14 }
 0x3d4   :  { %8635 = vmatpush3.bf16.msra.mxu0 %v10125_v7  ;;  %8656 = vmatprep.subr.bf16.mxu1 %v10140_v20 }
 0x3d5   :  { %8636 = vmatprep.subr.bf16.mxu0 %v10126_v10 }
 0x3d7   :  { %8657 = vmatpush3.bf16.msra.mxu1 %v10141_v27 }
 0x3d8   :  { %8637 = vmatpush3.bf16.msra.mxu0 %v10127_v15  ;;  %8658 = vmatprep.subr.bf16.mxu1 %v10142_v22 }
 0x3d9   :  { %8638 = vmatprep.subr.bf16.mxu0 %v10128_v16 }
 0x3db   :  { %8659 = vmatpush3.bf16.msra.mxu1 %v10143_v19 }
 0x3dc   :  { %8639 = vmatpush3.bf16.msra.mxu0 %v10129_v21  ;;  %8660 = vmatprep.subr.bf16.mxu1 %v10144_v1 }
 0x3dd   :  { %8640 = vmatprep.subr.bf16.mxu0 %v10130_v5 }
 0x3df   :  { %8661 = vmatpush3.bf16.msra.mxu1 %v10145_v37 }
 0x3e0   :  { %8641 = vmatpush3.bf16.msra.mxu0 %v10131_v59  ;;  %8662 = vmatprep.subr.bf16.mxu1 %v10146_v13 }
 0x3e3   :  { %7570 = vmatmul.mubr.bf16.vlgmr.msra.gmra.mxu0 %v7270_v4  ;;  %8663 = vmatpush3.bf16.msra.mxu1 %v10147_v18 }
 0x403   :  { %v7054_v49 = vpop.f32.mrf.mxu0  ;;  %v7095_v29 = vpop.f32.mrf.mxu1 }
 0x404   :  { %v7055_v63 = vadd.f32 %v7054_v49, %v7014_v39 }
 0x405   :  { %v7056_v36 = vpop.f32.mrf.mxu0  ;;  %v7097_v17 = vpop.f32.mrf.mxu1 }
 0x406   :  { %v7096_v33 = vadd.f32 %v7095_v29, %v7055_v63  ;;  %v7057_v30 = vadd.f32 %v7056_v36, %v7016_v51 }
 0x407   :  { %v7058_v6 = vpop.f32.mrf.mxu0  ;;  %v7099_v42 = vpop.f32.mrf.mxu1 }
 0x408   :  { %v7098_v50 = vadd.f32 %v7097_v17, %v7057_v30 }
 0x409   :  { %v7059_v60 = vpop.f32.mrf.mxu0  ;;  %v7100_v38 = vpop.f32.mrf.mxu1 }
 0x443   :  { %v7136_v26 = vpop.f32.mrf.mxu0  ;;  %v7177_v34 = vpop.f32.mrf.mxu1 }
 0x444   :  { %v7137_v47 = vadd.f32 %v7136_v26, %v7096_v33 }
 0x445   :  { %v7138_v2 = vpop.f32.mrf.mxu0  ;;  %v7179_v9 = vpop.f32.mrf.mxu1 }
 0x446   :  { %v7178_v43 = vadd.f32 %v7177_v34, %v7137_v47  ;;  %v7139_v40 = vadd.f32 %v7138_v2, %v7098_v50 }
 0x447   :  { %v7140_v46 = vpop.f32.mrf.mxu0  ;;  %v7181_v48 = vpop.f32.mrf.mxu1 }
 0x448   :  { %v7180_v52 = vadd.f32 %v7179_v9, %v7139_v40 }
 0x449   :  { %v7141_v28 = vpop.f32.mrf.mxu0  ;;  %v7182_v44 = vpop.f32.mrf.mxu1 }
 0x483   :  { %v7218_v32 = vpop.f32.mrf.mxu0  ;;  %v7259_v53 = vpop.f32.mrf.mxu1 }
 0x484   :  { %v7219_v3 = vadd.f32 %v7218_v32, %v7178_v43 }
 0x485   :  { %v7220_v0 = vpop.f32.mrf.mxu0  ;;  %v7261_v39 = vpop.f32.mrf.mxu1 }
 0x486   :  { %v7260_v45 = vadd.f32 %v7259_v53, %v7219_v3  ;;  %v7221_v12 = vadd.f32 %v7220_v0, %v7180_v52 }
 0x487   :  { %v7222_v55 = vpop.f32.mrf.mxu0  ;;  %v7263_v51 = vpop.f32.mrf.mxu1 }
 0x488   :  { %v7262_v11 = vadd.f32 %v7261_v39, %v7221_v12  ;;  %v7268_v23 = vmax.f32 %v7260_v45, 0.0 }
 0x489   :  { %v7223_v41 = vpop.f32.mrf.mxu0  ;;  %v7264_v56 = vpop.f32.mrf.mxu1 }
 0x48a   :  { %v7269_v57 = vmax.f32 %v7262_v11, 0.0  ;;  %v7272_v58 = vpack.c.bf16 %v7268_v23, %v7268_v23 }
 0x48c   :  { %v7273_v54 = vpack.c.bf16 %v7269_v57, %v7269_v57 }
 0x48e   :  { %7609 = vmatprep.mubr.bf16.mxu1 %v7273_v54 }
 0x48f   :  { %7610 = vmatmul.mubr.bf16.vlgmr.msra.gmra.mxu1 %v7272_v58 }
 0x4a3   :  { %v8642_v61 = vpop.f32.mrf.mxu0 }
 0x4a5   :  { %v8643_v31 = vpop.f32.mrf.mxu0 }
 0x4a6   :  { %v8644_v24 = vadd.f32 %v8643_v31, %v8642_v61 }
 0x4a7   :  { %v8645_v62 = vpop.f32.mrf.mxu0 }
 0x4a8   :  { %v7572_v15 = vadd.f32 %v8644_v24, %v8593_v8 }
 0x4a9   :  { %v8646_v7 = vpop.f32.mrf.mxu0 }
 0x54f   :  { %v8664_v10 = vpop.f32.mrf.mxu1 }
 0x551   :  { %v8665_v35 = vpop.f32.mrf.mxu1 }
 0x552   :  { %v8666_v14 = vadd.f32 %v8665_v35, %v8664_v10 }
 0x553   :  { %v8667_v16 = vpop.f32.mrf.mxu1 }
 0x554   :  { %v7612_v20 = vadd.f32 %v8666_v14, %v7572_v15 }
 0x555   :  { %v8668_v21 = vpop.f32.mrf.mxu1 }
 0x556   :  { %7618 = vst.msk [vmem:[#allocation2] sm:$0x3] %vm7617_vm0, %v7612_v20 }
 0x557   :  { %10160 = shalt.err (!%p10157_p4)
}
 0x558   :  { %7628 = dma.vmem_to_hbm [thread:$0]  %s7626_s24, 32, %s13511_s5, [#allocation3]  }
 0x559   :  { %10169 = dma.done.wait [#allocation3], 32  }
 0x55a   :  { %10170 = vsyncadd [#allocation3], 4294967264 }
 0x55b   :  { %7632 = vsyncpa [#allocation3], 1 }

</bundles_post_ra>
